<compile_context>
chip_gen: v7x
topology: tpu7x:2x2x1
jax: 0.10.0
libtpu: 0.0.40
codegen_flags: <defaults>
</compile_context>

<pallas_src>
import jax
import jax.numpy as jnp
from jax.experimental import pallas as pl
from jax.experimental.pallas import tpu as pltpu

# Reference module uses globals `decay` / SpikeFunc((mem > thresh)); standard values.
DECAY = 0.2
THRESH = 0.5

_COMPILER_PARAMS = pltpu.CompilerParams(
    dimension_semantics=("parallel", "parallel"),
    vmem_limit_bytes=32 * 1024 * 1024,
)


# ---------------------------------------------------------------------------
# Pallas kernel: conv (as matmul over pre-concatenated taps) + LIF [+ pool + LIF]
# ---------------------------------------------------------------------------
def _conv_lif_body(x_ref, w_ref, b_ref, cmem_ref, cspk_ref, cmem_o, cspk_o,
                   pmem_ref=None, pspk_ref=None, pmem_o=None, pspk_o=None,
                   pool=None):
    """Per grid point (b, i): compute TH output rows of the conv layer.

    x_ref   : (1, Hx, W, K)   bf16  -- kw-concatenated (or fully im2col'd) input,
                                        resident per batch element.
    w_ref   : (n_kh, K, Cout) bf16  -- weights with taps folded into K.
    b_ref   : (1, Cout)       f32
    c*_ref  : (1, TH, W, Cout)        conv-layer LIF state (in-place via aliasing)
    p*_ref  : (1, TH/p, W/p, Cout)    pool-layer LIF state (only when pool)
    """
    i = pl.program_id(1)
    n_kh, K, Cout = w_ref.shape
    _, TH, W, _ = cmem_o.shape
    row0 = pl.multiple_of(i * TH, TH)

    # Conv: row-contiguous kh slices, wide-K MXU matmuls, f32 accumulation.
    acc = jnp.zeros((TH * W, Cout), dtype=jnp.float32)
    for kh in range(n_kh):
        rows = x_ref[0, pl.ds(row0 + kh, TH), :, :]             # (TH, W, K) bf16
        acc = acc + jnp.dot(rows.reshape(TH * W, K), w_ref[kh],
                            preferred_element_type=jnp.float32)
    conv = (acc + b_ref[...]).reshape(TH, W, Cout)

    # LIF membrane update + threshold spike for the conv layer.
    cmem_new = cmem_ref[0] * DECAY * (1.0 - cspk_ref[0]) + conv
    cspk_new = (cmem_new > THRESH).astype(jnp.float32)
    cmem_o[0] = cmem_new
    cspk_o[0] = cspk_new

    if pool is not None:
        p = pool
        # avg_pool2d(kernel=stride=p): fold H (cheap leading split) then W.
        s = cspk_new.reshape(TH // p, p, W, Cout).sum(axis=1)        # (TH/p, W, C)
        s = s.reshape(TH // p, W // p, p, Cout).sum(axis=2)          # (TH/p, W/p, C)
        pooled = s * (1.0 / float(p * p))
        pmem_new = pmem_ref[0] * DECAY * (1.0 - pspk_ref[0]) + pooled
        pspk_new = (pmem_new > THRESH).astype(jnp.float32)
        pmem_o[0] = pmem_new
        pspk_o[0] = pspk_new


def _make_kernel(pool):
    if pool is None:
        def kernel(x_ref, w_ref, b_ref, cmem_ref, cspk_ref, cmem_o, cspk_o):
            _conv_lif_body(x_ref, w_ref, b_ref, cmem_ref, cspk_ref,
                           cmem_o, cspk_o, pool=None)
    else:
        def kernel(x_ref, w_ref, b_ref, cmem_ref, cspk_ref, pmem_ref, pspk_ref,
                   cmem_o, cspk_o, pmem_o, pspk_o):
            _conv_lif_body(x_ref, w_ref, b_ref, cmem_ref, cspk_ref,
                           cmem_o, cspk_o,
                           pmem_ref=pmem_ref, pspk_ref=pspk_ref,
                           pmem_o=pmem_o, pspk_o=pspk_o, pool=pool)
    return kernel


def _tile_h(Hc, pool):
    """Largest H-tile <= 16 that divides Hc and is a multiple of the pool size."""
    p = pool if pool is not None else 1
    th = min(Hc, 16)
    while Hc % th != 0 or th % p != 0:
        th -= 1
    return th


# ---------------------------------------------------------------------------
# pallas_call wrapper (fused conv + LIF [+ pool + LIF])
# ---------------------------------------------------------------------------
def conv_lif(x_im, w_r, b_r, cmem, cspk, pmem=None, pspk=None, pool=None):
    B, Hc, W, C = cmem.shape
    TH = _tile_h(Hc, pool)
    nH = Hc // TH
    grid = (B, nH)

    x_spec = pl.BlockSpec((1,) + tuple(x_im.shape[1:]), lambda b, i: (b, 0, 0, 0))
    w_spec = pl.BlockSpec(tuple(w_r.shape), lambda b, i: (0, 0, 0))
    bias_spec = pl.BlockSpec(tuple(b_r.shape), lambda b, i: (0, 0))
    c_spec = pl.BlockSpec((1, TH, W, C), lambda b, i: (b, i, 0, 0))

    kernel = _make_kernel(pool)
    c_shape = jax.ShapeDtypeStruct(cmem.shape, jnp.float32)

    if pool is None:
        return pl.pallas_call(
            kernel,
            grid=grid,
            in_specs=[x_spec, w_spec, bias_spec, c_spec, c_spec],
            out_specs=(c_spec, c_spec),
            out_shape=(c_shape, c_shape),
            input_output_aliases={3: 0, 4: 1},
            compiler_params=_COMPILER_PARAMS,
        )(x_im, w_r, b_r, cmem, cspk)

    p_spec = pl.BlockSpec((1, TH // pool, W // pool, C), lambda b, i: (b, i, 0, 0))
    p_shape = jax.ShapeDtypeStruct(pmem.shape, jnp.float32)
    return pl.pallas_call(
        kernel,
        grid=grid,
        in_specs=[x_spec, w_spec, bias_spec, c_spec, c_spec, p_spec, p_spec],
        out_specs=(c_spec, c_spec, p_spec, p_spec),
        out_shape=(c_shape, c_shape, p_shape, p_shape),
        input_output_aliases={3: 0, 4: 1, 5: 2, 6: 3},
        compiler_params=_COMPILER_PARAMS,
    )(x_im, w_r, b_r, cmem, cspk, pmem, pspk)


# ---------------------------------------------------------------------------
# Wrapper-side layout prep (XLA glue): pad + tap concat + bf16 cast
# ---------------------------------------------------------------------------
def _im2col_kw(x_nhwc):
    """(B,H,W,Cin) f32 -> (B, H+2, W, 3*Cin) bf16 : kw taps on the lane axis."""
    _, H, W, _ = x_nhwc.shape
    xp = jnp.pad(x_nhwc, ((0, 0), (1, 1), (1, 1), (0, 0)))
    x3 = jnp.concatenate([xp[:, :, kw:kw + W, :] for kw in range(3)], axis=-1)
    return x3.astype(jnp.bfloat16)


def _im2col_full(x_nhwc):
    """(B,H,W,Cin) f32 -> (B, H, W, 9*Cin) bf16 : all 9 taps (small-Cin layers)."""
    _, H, W, _ = x_nhwc.shape
    xp = jnp.pad(x_nhwc, ((0, 0), (1, 1), (1, 1), (0, 0)))
    taps = [xp[:, kh:kh + H, kw:kw + W, :] for kh in range(3) for kw in range(3)]
    return jnp.concatenate(taps, axis=-1).astype(jnp.bfloat16)


def _prep_w_kw(w, b):
    kh, kw, cin, cout = w.shape
    return (w.reshape(kh, kw * cin, cout).astype(jnp.bfloat16),
            b.reshape(1, cout).astype(jnp.float32))


def _prep_w_full(w, b):
    kh, kw, cin, cout = w.shape
    return (w.reshape(1, kh * kw * cin, cout).astype(jnp.bfloat16),
            b.reshape(1, cout).astype(jnp.float32))


# ---------------------------------------------------------------------------
# Full SResnet6 forward
# ---------------------------------------------------------------------------
def init_params(key):
    def conv_p(k, cin, cout, wscale=0.1, bscale=0.01):
        kw_, kb_ = jax.random.split(k)
        w = wscale * jax.random.normal(kw_, (3, 3, cin, cout), jnp.float32)
        b = bscale * jax.random.normal(kb_, (cout,), jnp.float32)
        return w, b

    ks = jax.random.split(key, 6)
    return {
        "conv0": conv_p(ks[0], 2, 64),
        "conv1": conv_p(ks[1], 64, 128),
        "b0_conv0": conv_p(ks[2], 128, 128),
        "b0_conv1": conv_p(ks[3], 128, 128),
        "conv2": conv_p(ks[4], 128, 128),
        # conv3 is defined by the PyTorch module but never used in forward
        # (forward reuses conv2 for the c3 layer); kept for parity.
        "conv3": conv_p(ks[5], 128, 128),
    }


def sresnet6_forward(x_bchwT, params):
    B, Cin, H, W, T = x_bchwT.shape
    f32 = jnp.float32

    w0, b0 = _prep_w_full(*params["conv0"])      # K = 18, one matmul (Cin=2)
    w1, b1 = _prep_w_kw(*params["conv1"])        # K = 192 per kh
    wb0, bb0 = _prep_w_kw(*params["b0_conv0"])   # K = 384 per kh
    wb1, bb1 = _prep_w_kw(*params["b0_conv1"])
    w2, b2 = _prep_w_kw(*params["conv2"])
    # NOTE: reference forward reuses conv2 for the c3 layer (conv3 unused).

    def zstate(h, w, c):
        m = jnp.zeros((B, h, w, c), f32)
        return m, m

    carry0 = (
        zstate(H, W, 64),                    # c0
        zstate(H // 2, W // 2, 64),          # p0
        zstate(H // 2, W // 2, 128),         # c1
        zstate(H // 4, W // 4, 128),         # p1
        zstate(H // 4, W // 4, 128),         # b0_c0
        zstate(H // 4, W // 4, 128),         # b0_c1
        zstate(H // 4, W // 4, 128),         # c2
        zstate(H // 8, W // 8, 128),         # p2
        zstate(H // 8, W // 8, 128),         # c3
        zstate(H // 32, W // 32, 128),       # p3
    )

    def step(carry, x_t):                    # x_t: (B, H, W, Cin) f32
        (c0, p0, c1, p1, bc0, bc1, c2, p2, c3, p3) = carry

        c0m, c0s, p0m, p0s = conv_lif(_im2col_full(x_t), w0, b0, *c0, *p0, pool=2)
        c1m, c1s, p1m, p1s = conv_lif(_im2col_kw(p0s), w1, b1, *c1, *p1, pool=2)
        bc0m, bc0s = conv_lif(_im2col_kw(p1s), wb0, bb0, *bc0)
        bc1m, bc1s = conv_lif(_im2col_kw(bc0s), wb1, bb1, *bc1)
        # Residual add feeds conv2's im2col prep (single XLA add).
        c2m, c2s, p2m, p2s = conv_lif(_im2col_kw(bc1s + p1s), w2, b2, *c2, *p2, pool=2)
        c3m, c3s, p3m, p3s = conv_lif(_im2col_kw(p2s), w2, b2, *c3, *p3, pool=4)

        # Match torch's NCHW .view(B, -1) flatten order.
        out_t = jnp.transpose(p3s, (0, 3, 1, 2)).reshape(B, -1)
        new_carry = ((c0m, c0s), (p0m, p0s), (c1m, c1s), (p1m, p1s),
                     (bc0m, bc0s), (bc1m, bc1s), (c2m, c2s), (p2m, p2s),
                     (c3m, c3s), (p3m, p3s))
        return new_carry, out_t

    x_tbhwc = jnp.transpose(x_bchwT, (4, 0, 2, 3, 1))    # (T, B, H, W, Cin)
    _, outs = jax.lax.scan(step, carry0, x_tbhwc)        # (T, B, F)
    return jnp.transpose(outs, (1, 2, 0))                # (B, F, T)


if __name__ == "__main__":
    key = jax.random.PRNGKey(0)
    k_x, k_p = jax.random.split(key)

    # Spatial size must be divisible by 32 (pool chain 2*2*2*4), so use 32x32.
    B, Cin, H, W, T = 2, 2, 32, 32, 3
    x = jax.random.normal(k_x, (B, Cin, H, W, T), jnp.float32)
    params = init_params(k_p)

    fwd = jax.jit(sresnet6_forward)
    out = fwd(x, params)
    jax.block_until_ready(out)

    assert out.shape == (B, 128 * (H // 32) * (W // 32), T), out.shape
    # Outputs are spikes -> must be exactly 0/1.
    assert bool(jnp.all((out == 0.0) | (out == 1.0)))
    print("KERNEL_OK")
</pallas_src>

<mosaic_0001>
module attributes {stable_mosaic.version = 11 : i64} {
  func.func @kernel(%arg0: i32, %arg1: i32, %arg2: memref<1x32x32x18xbf16, #tpu.memory_space<vmem>>, %arg3: memref<1x18x64xbf16, #tpu.memory_space<vmem>>, %arg4: memref<1x64xf32, #tpu.memory_space<vmem>>, %arg5: memref<1x16x32x64xf32, #tpu.memory_space<vmem>>, %arg6: memref<1x16x32x64xf32, #tpu.memory_space<vmem>>, %arg7: memref<1x8x16x64xf32, #tpu.memory_space<vmem>>, %arg8: memref<1x8x16x64xf32, #tpu.memory_space<vmem>>, %arg9: memref<1x16x32x64xf32, #tpu.memory_space<vmem>>, %arg10: memref<1x16x32x64xf32, #tpu.memory_space<vmem>>, %arg11: memref<1x8x16x64xf32, #tpu.memory_space<vmem>>, %arg12: memref<1x8x16x64xf32, #tpu.memory_space<vmem>>) attributes {dimension_semantics = [#tpu.dimension_semantics<parallel>, #tpu.dimension_semantics<parallel>], iteration_bounds = array<i64: 2, 2>, scalar_prefetch = 0 : i64, scratch_operands = 0 : i64, tpu.core_type = #tpu.core_type<tc>, window_params = [{transform_indices = @transform_0, window_bounds = array<i64: 1, 32, 32, 18>}, {pipeline_mode = #tpu.pipeline_mode<synchronous>, transform_indices = @transform_1, window_bounds = array<i64: 1, 18, 64>}, {pipeline_mode = #tpu.pipeline_mode<synchronous>, transform_indices = @transform_2, window_bounds = array<i64: 1, 64>}, {transform_indices = @transform_3, window_bounds = array<i64: 1, 16, 32, 64>}, {transform_indices = @transform_4, window_bounds = array<i64: 1, 16, 32, 64>}, {transform_indices = @transform_5, window_bounds = array<i64: 1, 8, 16, 64>}, {transform_indices = @transform_6, window_bounds = array<i64: 1, 8, 16, 64>}, {transform_indices = @transform_7, window_bounds = array<i64: 1, 16, 32, 64>}, {transform_indices = @transform_8, window_bounds = array<i64: 1, 16, 32, 64>}, {transform_indices = @transform_9, window_bounds = array<i64: 1, 8, 16, 64>}, {transform_indices = @transform_10, window_bounds = array<i64: 1, 8, 16, 64>}]} {
    %c16_i32 = arith.constant 16 : i32
    %0 = arith.muli %arg1, %c16_i32 : i32
    %1 = tpu.assume_multiple %0, 16 : i32
    %cst = arith.constant 0.000000e+00 : f32
    %2 = vector.broadcast %cst : f32 to vector<512x64xf32>
    %c0_i32 = arith.constant 0 : i32
    %3 = arith.addi %1, %c0_i32 : i32
    %c0 = arith.constant 0 : index
    %4 = arith.index_cast %3 : i32 to index
    %c0_0 = arith.constant 0 : index
    %c0_1 = arith.constant 0 : index
    %5 = vector.load %arg2[%c0, %4, %c0_0, %c0_1] : memref<1x32x32x18xbf16, #tpu.memory_space<vmem>>, vector<1x16x32x18xbf16>
    %6 = vector.shape_cast %5 : vector<1x16x32x18xbf16> to vector<16x32x18xbf16>
    %7 = vector.shape_cast %6 : vector<16x32x18xbf16> to vector<512x18xbf16>
    %c0_2 = arith.constant 0 : index
    %c0_3 = arith.constant 0 : index
    %c0_4 = arith.constant 0 : index
    %8 = vector.load %arg3[%c0_2, %c0_3, %c0_4] : memref<1x18x64xbf16, #tpu.memory_space<vmem>>, vector<1x18x64xbf16>
    %9 = vector.shape_cast %8 : vector<1x18x64xbf16> to vector<18x64xbf16>
    %cst_5 = arith.constant dense<0.000000e+00> : vector<512x64xf32>
    %10 = tpu.matmul %7, %9, %cst_5 {dimension_numbers = #tpu.dot_dimension_numbers<[1], [0], [0], [1], [0, 0, 1, 1], [], []>} : vector<512x18xbf16>, vector<18x64xbf16>, vector<512x64xf32> -> vector<512x64xf32>
    %11 = arith.addf %2, %10 : vector<512x64xf32>
    %c0_6 = arith.constant 0 : index
    %c0_7 = arith.constant 0 : index
    %12 = vector.load %arg4[%c0_6, %c0_7] : memref<1x64xf32, #tpu.memory_space<vmem>>, vector<1x64xf32>
    %13 = vector.broadcast %12 : vector<1x64xf32> to vector<512x64xf32>
    %14 = arith.addf %11, %13 : vector<512x64xf32>
    %15 = vector.shape_cast %14 : vector<512x64xf32> to vector<16x32x64xf32>
    %c0_8 = arith.constant 0 : index
    %c0_9 = arith.constant 0 : index
    %c0_10 = arith.constant 0 : index
    %c0_11 = arith.constant 0 : index
    %16 = vector.load %arg5[%c0_8, %c0_9, %c0_10, %c0_11] : memref<1x16x32x64xf32, #tpu.memory_space<vmem>>, vector<1x16x32x64xf32>
    %17 = vector.shape_cast %16 : vector<1x16x32x64xf32> to vector<16x32x64xf32>
    %cst_12 = arith.constant 2.000000e-01 : f32
    %18 = vector.broadcast %cst_12 : f32 to vector<16x32x64xf32>
    %19 = arith.mulf %17, %18 : vector<16x32x64xf32>
    %c0_13 = arith.constant 0 : index
    %c0_14 = arith.constant 0 : index
    %c0_15 = arith.constant 0 : index
    %c0_16 = arith.constant 0 : index
    %20 = vector.load %arg6[%c0_13, %c0_14, %c0_15, %c0_16] : memref<1x16x32x64xf32, #tpu.memory_space<vmem>>, vector<1x16x32x64xf32>
    %21 = vector.shape_cast %20 : vector<1x16x32x64xf32> to vector<16x32x64xf32>
    %cst_17 = arith.constant 1.000000e+00 : f32
    %22 = vector.broadcast %cst_17 : f32 to vector<16x32x64xf32>
    %23 = arith.subf %22, %21 : vector<16x32x64xf32>
    %24 = arith.mulf %19, %23 : vector<16x32x64xf32>
    %25 = arith.addf %24, %15 : vector<16x32x64xf32>
    %cst_18 = arith.constant 5.000000e-01 : f32
    %26 = vector.broadcast %cst_18 : f32 to vector<16x32x64xf32>
    %27 = arith.cmpf ogt, %25, %26 : vector<16x32x64xf32>
    %28 = arith.extui %27 : vector<16x32x64xi1> to vector<16x32x64xi32>
    %29 = arith.sitofp %28 : vector<16x32x64xi32> to vector<16x32x64xf32>
    %c0_19 = arith.constant 0 : index
    %c0_20 = arith.constant 0 : index
    %c0_21 = arith.constant 0 : index
    %c0_22 = arith.constant 0 : index
    %30 = vector.load %arg9[%c0_19, %c0_20, %c0_21, %c0_22] : memref<1x16x32x64xf32, #tpu.memory_space<vmem>>, vector<1x16x32x64xf32>
    %31 = vector.shape_cast %30 : vector<1x16x32x64xf32> to vector<16x32x64xf32>
    %32 = vector.shape_cast %25 : vector<16x32x64xf32> to vector<1x16x32x64xf32>
    tpu.vector_store %arg9[%c0_19, %c0_20, %c0_21, %c0_22], %32 {strides = array<i32>} : memref<1x16x32x64xf32, #tpu.memory_space<vmem>>, vector<1x16x32x64xf32>,
    %c0_23 = arith.constant 0 : index
    %c0_24 = arith.constant 0 : index
    %c0_25 = arith.constant 0 : index
    %c0_26 = arith.constant 0 : index
    %33 = vector.load %arg10[%c0_23, %c0_24, %c0_25, %c0_26] : memref<1x16x32x64xf32, #tpu.memory_space<vmem>>, vector<1x16x32x64xf32>
    %34 = vector.shape_cast %33 : vector<1x16x32x64xf32> to vector<16x32x64xf32>
    %35 = vector.shape_cast %29 : vector<16x32x64xf32> to vector<1x16x32x64xf32>
    tpu.vector_store %arg10[%c0_23, %c0_24, %c0_25, %c0_26], %35 {strides = array<i32>} : memref<1x16x32x64xf32, #tpu.memory_space<vmem>>, vector<1x16x32x64xf32>,
    %36 = vector.shape_cast %29 : vector<16x32x64xf32> to vector<8x2x32x64xf32>
    %cst_27 = arith.constant dense<0.000000e+00> : vector<8x32x64xf32>
    %37 = vector.multi_reduction <add>, %36, %cst_27 [1] : vector<8x2x32x64xf32> to vector<8x32x64xf32>
    %38 = vector.shape_cast %37 : vector<8x32x64xf32> to vector<8x16x2x64xf32>
    %cst_28 = arith.constant dense<0.000000e+00> : vector<8x16x64xf32>
    %39 = vector.multi_reduction <add>, %38, %cst_28 [2] : vector<8x16x2x64xf32> to vector<8x16x64xf32>
    %cst_29 = arith.constant 2.500000e-01 : f32
    %40 = vector.broadcast %cst_29 : f32 to vector<8x16x64xf32>
    %41 = arith.mulf %39, %40 : vector<8x16x64xf32>
    %c0_30 = arith.constant 0 : index
    %c0_31 = arith.constant 0 : index
    %c0_32 = arith.constant 0 : index
    %c0_33 = arith.constant 0 : index
    %42 = vector.load %arg7[%c0_30, %c0_31, %c0_32, %c0_33] : memref<1x8x16x64xf32, #tpu.memory_space<vmem>>, vector<1x8x16x64xf32>
    %43 = vector.shape_cast %42 : vector<1x8x16x64xf32> to vector<8x16x64xf32>
    %cst_34 = arith.constant 2.000000e-01 : f32
    %44 = vector.broadcast %cst_34 : f32 to vector<8x16x64xf32>
    %45 = arith.mulf %43, %44 : vector<8x16x64xf32>
    %c0_35 = arith.constant 0 : index
    %c0_36 = arith.constant 0 : index
    %c0_37 = arith.constant 0 : index
    %c0_38 = arith.constant 0 : index
    %46 = vector.load %arg8[%c0_35, %c0_36, %c0_37, %c0_38] : memref<1x8x16x64xf32, #tpu.memory_space<vmem>>, vector<1x8x16x64xf32>
    %47 = vector.shape_cast %46 : vector<1x8x16x64xf32> to vector<8x16x64xf32>
    %cst_39 = arith.constant 1.000000e+00 : f32
    %48 = vector.broadcast %cst_39 : f32 to vector<8x16x64xf32>
    %49 = arith.subf %48, %47 : vector<8x16x64xf32>
    %50 = arith.mulf %45, %49 : vector<8x16x64xf32>
    %51 = arith.addf %50, %41 : vector<8x16x64xf32>
    %cst_40 = arith.constant 5.000000e-01 : f32
    %52 = vector.broadcast %cst_40 : f32 to vector<8x16x64xf32>
    %53 = arith.cmpf ogt, %51, %52 : vector<8x16x64xf32>
    %54 = arith.extui %53 : vector<8x16x64xi1> to vector<8x16x64xi32>
    %55 = arith.sitofp %54 : vector<8x16x64xi32> to vector<8x16x64xf32>
    %c0_41 = arith.constant 0 : index
    %c0_42 = arith.constant 0 : index
    %c0_43 = arith.constant 0 : index
    %c0_44 = arith.constant 0 : index
    %56 = vector.load %arg11[%c0_41, %c0_42, %c0_43, %c0_44] : memref<1x8x16x64xf32, #tpu.memory_space<vmem>>, vector<1x8x16x64xf32>
    %57 = vector.shape_cast %56 : vector<1x8x16x64xf32> to vector<8x16x64xf32>
    %58 = vector.shape_cast %51 : vector<8x16x64xf32> to vector<1x8x16x64xf32>
    tpu.vector_store %arg11[%c0_41, %c0_42, %c0_43, %c0_44], %58 {strides = array<i32>} : memref<1x8x16x64xf32, #tpu.memory_space<vmem>>, vector<1x8x16x64xf32>,
    %c0_45 = arith.constant 0 : index
    %c0_46 = arith.constant 0 : index
    %c0_47 = arith.constant 0 : index
    %c0_48 = arith.constant 0 : index
    %59 = vector.load %arg12[%c0_45, %c0_46, %c0_47, %c0_48] : memref<1x8x16x64xf32, #tpu.memory_space<vmem>>, vector<1x8x16x64xf32>
    %60 = vector.shape_cast %59 : vector<1x8x16x64xf32> to vector<8x16x64xf32>
    %61 = vector.shape_cast %55 : vector<8x16x64xf32> to vector<1x8x16x64xf32>
    tpu.vector_store %arg12[%c0_45, %c0_46, %c0_47, %c0_48], %61 {strides = array<i32>} : memref<1x8x16x64xf32, #tpu.memory_space<vmem>>, vector<1x8x16x64xf32>,
    return
  }
  func.func @transform_0(%arg0: i32, %arg1: i32) -> (i32, i32, i32, i32) {
    %c0_i32 = arith.constant 0 : i32
    %c0_i32_0 = arith.constant 0 : i32
    %c0_i32_1 = arith.constant 0 : i32
    %c0_i32_2 = arith.constant 0 : i32
    return %arg0, %c0_i32, %c0_i32_0, %c0_i32_1 : i32, i32, i32, i32
  }
  func.func @transform_1(%arg0: i32, %arg1: i32) -> (i32, i32, i32) {
    %c0_i32 = arith.constant 0 : i32
    %c0_i32_0 = arith.constant 0 : i32
    %c0_i32_1 = arith.constant 0 : i32
    %c0_i32_2 = arith.constant 0 : i32
    return %c0_i32, %c0_i32_0, %c0_i32_1 : i32, i32, i32
  }
  func.func @transform_2(%arg0: i32, %arg1: i32) -> (i32, i32) {
    %c0_i32 = arith.constant 0 : i32
    %c0_i32_0 = arith.constant 0 : i32
    %c0_i32_1 = arith.constant 0 : i32
    return %c0_i32, %c0_i32_0 : i32, i32
  }
  func.func @transform_3(%arg0: i32, %arg1: i32) -> (i32, i32, i32, i32) {
    %c0_i32 = arith.constant 0 : i32
    %c0_i32_0 = arith.constant 0 : i32
    %c0_i32_1 = arith.constant 0 : i32
    return %arg0, %arg1, %c0_i32, %c0_i32_0 : i32, i32, i32, i32
  }
  func.func @transform_4(%arg0: i32, %arg1: i32) -> (i32, i32, i32, i32) {
    %c0_i32 = arith.constant 0 : i32
    %c0_i32_0 = arith.constant 0 : i32
    %c0_i32_1 = arith.constant 0 : i32
    return %arg0, %arg1, %c0_i32, %c0_i32_0 : i32, i32, i32, i32
  }
  func.func @transform_5(%arg0: i32, %arg1: i32) -> (i32, i32, i32, i32) {
    %c0_i32 = arith.constant 0 : i32
    %c0_i32_0 = arith.constant 0 : i32
    %c0_i32_1 = arith.constant 0 : i32
    return %arg0, %arg1, %c0_i32, %c0_i32_0 : i32, i32, i32, i32
  }
  func.func @transform_6(%arg0: i32, %arg1: i32) -> (i32, i32, i32, i32) {
    %c0_i32 = arith.constant 0 : i32
    %c0_i32_0 = arith.constant 0 : i32
    %c0_i32_1 = arith.constant 0 : i32
    return %arg0, %arg1, %c0_i32, %c0_i32_0 : i32, i32, i32, i32
  }
  func.func @transform_7(%arg0: i32, %arg1: i32) -> (i32, i32, i32, i32) {
    %c0_i32 = arith.constant 0 : i32
    %c0_i32_0 = arith.constant 0 : i32
    %c0_i32_1 = arith.constant 0 : i32
    return %arg0, %arg1, %c0_i32, %c0_i32_0 : i32, i32, i32, i32
  }
  func.func @transform_8(%arg0: i32, %arg1: i32) -> (i32, i32, i32, i32) {
    %c0_i32 = arith.constant 0 : i32
    %c0_i32_0 = arith.constant 0 : i32
    %c0_i32_1 = arith.constant 0 : i32
    return %arg0, %arg1, %c0_i32, %c0_i32_0 : i32, i32, i32, i32
  }
  func.func @transform_9(%arg0: i32, %arg1: i32) -> (i32, i32, i32, i32) {
    %c0_i32 = arith.constant 0 : i32
    %c0_i32_0 = arith.constant 0 : i32
    %c0_i32_1 = arith.constant 0 : i32
    return %arg0, %arg1, %c0_i32, %c0_i32_0 : i32, i32, i32, i32
  }
  func.func @transform_10(%arg0: i32, %arg1: i32) -> (i32, i32, i32, i32) {
    %c0_i32 = arith.constant 0 : i32
    %c0_i32_0 = arith.constant 0 : i32
    %c0_i32_1 = arith.constant 0 : i32
    return %arg0, %arg1, %c0_i32, %c0_i32_0 : i32, i32, i32, i32
  }
}

module attributes {stable_mosaic.version = 11 : i64} {
  func.func @kernel(%arg0: i32, %arg1: i32, %arg2: memref<1x18x16x192xbf16, #tpu.memory_space<vmem>>, %arg3: memref<3x192x128xbf16, #tpu.memory_space<vmem>>, %arg4: memref<1x128xf32, #tpu.memory_space<vmem>>, %arg5: memref<1x16x16x128xf32, #tpu.memory_space<vmem>>, %arg6: memref<1x16x16x128xf32, #tpu.memory_space<vmem>>, %arg7: memref<1x8x8x128xf32, #tpu.memory_space<vmem>>, %arg8: memref<1x8x8x128xf32, #tpu.memory_space<vmem>>, %arg9: memref<1x16x16x128xf32, #tpu.memory_space<vmem>>, %arg10: memref<1x16x16x128xf32, #tpu.memory_space<vmem>>, %arg11: memref<1x8x8x128xf32, #tpu.memory_space<vmem>>, %arg12: memref<1x8x8x128xf32, #tpu.memory_space<vmem>>) attributes {dimension_semantics = [#tpu.dimension_semantics<parallel>, #tpu.dimension_semantics<parallel>], iteration_bounds = array<i64: 2, 1>, scalar_prefetch = 0 : i64, scratch_operands = 0 : i64, tpu.core_type = #tpu.core_type<tc>, window_params = [{transform_indices = @transform_0, window_bounds = array<i64: 1, 18, 16, 192>}, {pipeline_mode = #tpu.pipeline_mode<synchronous>, transform_indices = @transform_1, window_bounds = array<i64: 3, 192, 128>}, {pipeline_mode = #tpu.pipeline_mode<synchronous>, transform_indices = @transform_2, window_bounds = array<i64: 1, 128>}, {transform_indices = @transform_3, window_bounds = array<i64: 1, 16, 16, 128>}, {transform_indices = @transform_4, window_bounds = array<i64: 1, 16, 16, 128>}, {transform_indices = @transform_5, window_bounds = array<i64: 1, 8, 8, 128>}, {transform_indices = @transform_6, window_bounds = array<i64: 1, 8, 8, 128>}, {transform_indices = @transform_7, window_bounds = array<i64: 1, 16, 16, 128>}, {transform_indices = @transform_8, window_bounds = array<i64: 1, 16, 16, 128>}, {transform_indices = @transform_9, window_bounds = array<i64: 1, 8, 8, 128>}, {transform_indices = @transform_10, window_bounds = array<i64: 1, 8, 8, 128>}]} {
    %c16_i32 = arith.constant 16 : i32
    %0 = arith.muli %arg1, %c16_i32 : i32
    %1 = tpu.assume_multiple %0, 16 : i32
    %cst = arith.constant 0.000000e+00 : f32
    %2 = vector.broadcast %cst : f32 to vector<256x128xf32>
    %c0_i32 = arith.constant 0 : i32
    %3 = arith.addi %1, %c0_i32 : i32
    %c0 = arith.constant 0 : index
    %4 = arith.index_cast %3 : i32 to index
    %c0_0 = arith.constant 0 : index
    %c0_1 = arith.constant 0 : index
    %5 = vector.load %arg2[%c0, %4, %c0_0, %c0_1] : memref<1x18x16x192xbf16, #tpu.memory_space<vmem>>, vector<1x16x16x192xbf16>
    %6 = vector.shape_cast %5 : vector<1x16x16x192xbf16> to vector<16x16x192xbf16>
    %7 = vector.shape_cast %6 : vector<16x16x192xbf16> to vector<256x192xbf16>
    %c0_2 = arith.constant 0 : index
    %c0_3 = arith.constant 0 : index
    %c0_4 = arith.constant 0 : index
    %8 = vector.load %arg3[%c0_2, %c0_3, %c0_4] : memref<3x192x128xbf16, #tpu.memory_space<vmem>>, vector<1x192x128xbf16>
    %9 = vector.shape_cast %8 : vector<1x192x128xbf16> to vector<192x128xbf16>
    %cst_5 = arith.constant dense<0.000000e+00> : vector<256x128xf32>
    %10 = tpu.matmul %7, %9, %cst_5 {dimension_numbers = #tpu.dot_dimension_numbers<[1], [0], [0], [1], [0, 0, 1, 1], [], []>} : vector<256x192xbf16>, vector<192x128xbf16>, vector<256x128xf32> -> vector<256x128xf32>
    %11 = arith.addf %2, %10 : vector<256x128xf32>
    %c1_i32 = arith.constant 1 : i32
    %12 = arith.addi %1, %c1_i32 : i32
    %c0_6 = arith.constant 0 : index
    %13 = arith.index_cast %12 : i32 to index
    %c0_7 = arith.constant 0 : index
    %c0_8 = arith.constant 0 : index
    %14 = vector.load %arg2[%c0_6, %13, %c0_7, %c0_8] : memref<1x18x16x192xbf16, #tpu.memory_space<vmem>>, vector<1x16x16x192xbf16>
    %15 = vector.shape_cast %14 : vector<1x16x16x192xbf16> to vector<16x16x192xbf16>
    %16 = vector.shape_cast %15 : vector<16x16x192xbf16> to vector<256x192xbf16>
    %c1 = arith.constant 1 : index
    %c0_9 = arith.constant 0 : index
    %c0_10 = arith.constant 0 : index
    %17 = vector.load %arg3[%c1, %c0_9, %c0_10] : memref<3x192x128xbf16, #tpu.memory_space<vmem>>, vector<1x192x128xbf16>
    %18 = vector.shape_cast %17 : vector<1x192x128xbf16> to vector<192x128xbf16>
    %cst_11 = arith.constant dense<0.000000e+00> : vector<256x128xf32>
    %19 = tpu.matmul %16, %18, %cst_11 {dimension_numbers = #tpu.dot_dimension_numbers<[1], [0], [0], [1], [0, 0, 1, 1], [], []>} : vector<256x192xbf16>, vector<192x128xbf16>, vector<256x128xf32> -> vector<256x128xf32>
    %20 = arith.addf %11, %19 : vector<256x128xf32>
    %c2_i32 = arith.constant 2 : i32
    %21 = arith.addi %1, %c2_i32 : i32
    %c0_12 = arith.constant 0 : index
    %22 = arith.index_cast %21 : i32 to index
    %c0_13 = arith.constant 0 : index
    %c0_14 = arith.constant 0 : index
    %23 = vector.load %arg2[%c0_12, %22, %c0_13, %c0_14] : memref<1x18x16x192xbf16, #tpu.memory_space<vmem>>, vector<1x16x16x192xbf16>
    %24 = vector.shape_cast %23 : vector<1x16x16x192xbf16> to vector<16x16x192xbf16>
    %25 = vector.shape_cast %24 : vector<16x16x192xbf16> to vector<256x192xbf16>
    %c2 = arith.constant 2 : index
    %c0_15 = arith.constant 0 : index
    %c0_16 = arith.constant 0 : index
    %26 = vector.load %arg3[%c2, %c0_15, %c0_16] : memref<3x192x128xbf16, #tpu.memory_space<vmem>>, vector<1x192x128xbf16>
    %27 = vector.shape_cast %26 : vector<1x192x128xbf16> to vector<192x128xbf16>
    %cst_17 = arith.constant dense<0.000000e+00> : vector<256x128xf32>
    %28 = tpu.matmul %25, %27, %cst_17 {dimension_numbers = #tpu.dot_dimension_numbers<[1], [0], [0], [1], [0, 0, 1, 1], [], []>} : vector<256x192xbf16>, vector<192x128xbf16>, vector<256x128xf32> -> vector<256x128xf32>
    %29 = arith.addf %20, %28 : vector<256x128xf32>
    %c0_18 = arith.constant 0 : index
    %c0_19 = arith.constant 0 : index
    %30 = vector.load %arg4[%c0_18, %c0_19] : memref<1x128xf32, #tpu.memory_space<vmem>>, vector<1x128xf32>
    %31 = vector.broadcast %30 : vector<1x128xf32> to vector<256x128xf32>
    %32 = arith.addf %29, %31 : vector<256x128xf32>
    %33 = vector.shape_cast %32 : vector<256x128xf32> to vector<16x16x128xf32>
    %c0_20 = arith.constant 0 : index
    %c0_21 = arith.constant 0 : index
    %c0_22 = arith.constant 0 : index
    %c0_23 = arith.constant 0 : index
    %34 = vector.load %arg5[%c0_20, %c0_21, %c0_22, %c0_23] : memref<1x16x16x128xf32, #tpu.memory_space<vmem>>, vector<1x16x16x128xf32>
    %35 = vector.shape_cast %34 : vector<1x16x16x128xf32> to vector<16x16x128xf32>
    %cst_24 = arith.constant 2.000000e-01 : f32
    %36 = vector.broadcast %cst_24 : f32 to vector<16x16x128xf32>
    %37 = arith.mulf %35, %36 : vector<16x16x128xf32>
    %c0_25 = arith.constant 0 : index
    %c0_26 = arith.constant 0 : index
    %c0_27 = arith.constant 0 : index
    %c0_28 = arith.constant 0 : index
    %38 = vector.load %arg6[%c0_25, %c0_26, %c0_27, %c0_28] : memref<1x16x16x128xf32, #tpu.memory_space<vmem>>, vector<1x16x16x128xf32>
    %39 = vector.shape_cast %38 : vector<1x16x16x128xf32> to vector<16x16x128xf32>
    %cst_29 = arith.constant 1.000000e+00 : f32
    %40 = vector.broadcast %cst_29 : f32 to vector<16x16x128xf32>
    %41 = arith.subf %40, %39 : vector<16x16x128xf32>
    %42 = arith.mulf %37, %41 : vector<16x16x128xf32>
    %43 = arith.addf %42, %33 : vector<16x16x128xf32>
    %cst_30 = arith.constant 5.000000e-01 : f32
    %44 = vector.broadcast %cst_30 : f32 to vector<16x16x128xf32>
    %45 = arith.cmpf ogt, %43, %44 : vector<16x16x128xf32>
    %46 = arith.extui %45 : vector<16x16x128xi1> to vector<16x16x128xi32>
    %47 = arith.sitofp %46 : vector<16x16x128xi32> to vector<16x16x128xf32>
    %c0_31 = arith.constant 0 : index
    %c0_32 = arith.constant 0 : index
    %c0_33 = arith.constant 0 : index
    %c0_34 = arith.constant 0 : index
    %48 = vector.load %arg9[%c0_31, %c0_32, %c0_33, %c0_34] : memref<1x16x16x128xf32, #tpu.memory_space<vmem>>, vector<1x16x16x128xf32>
    %49 = vector.shape_cast %48 : vector<1x16x16x128xf32> to vector<16x16x128xf32>
    %50 = vector.shape_cast %43 : vector<16x16x128xf32> to vector<1x16x16x128xf32>
    tpu.vector_store %arg9[%c0_31, %c0_32, %c0_33, %c0_34], %50 {strides = array<i32>} : memref<1x16x16x128xf32, #tpu.memory_space<vmem>>, vector<1x16x16x128xf32>,
    %c0_35 = arith.constant 0 : index
    %c0_36 = arith.constant 0 : index
    %c0_37 = arith.constant 0 : index
    %c0_38 = arith.constant 0 : index
    %51 = vector.load %arg10[%c0_35, %c0_36, %c0_37, %c0_38] : memref<1x16x16x128xf32, #tpu.memory_space<vmem>>, vector<1x16x16x128xf32>
    %52 = vector.shape_cast %51 : vector<1x16x16x128xf32> to vector<16x16x128xf32>
    %53 = vector.shape_cast %47 : vector<16x16x128xf32> to vector<1x16x16x128xf32>
    tpu.vector_store %arg10[%c0_35, %c0_36, %c0_37, %c0_38], %53 {strides = array<i32>} : memref<1x16x16x128xf32, #tpu.memory_space<vmem>>, vector<1x16x16x128xf32>,
    %54 = vector.shape_cast %47 : vector<16x16x128xf32> to vector<8x2x16x128xf32>
    %cst_39 = arith.constant dense<0.000000e+00> : vector<8x16x128xf32>
    %55 = vector.multi_reduction <add>, %54, %cst_39 [1] : vector<8x2x16x128xf32> to vector<8x16x128xf32>
    %56 = vector.shape_cast %55 : vector<8x16x128xf32> to vector<8x8x2x128xf32>
    %cst_40 = arith.constant dense<0.000000e+00> : vector<8x8x128xf32>
    %57 = vector.multi_reduction <add>, %56, %cst_40 [2] : vector<8x8x2x128xf32> to vector<8x8x128xf32>
    %cst_41 = arith.constant 2.500000e-01 : f32
    %58 = vector.broadcast %cst_41 : f32 to vector<8x8x128xf32>
    %59 = arith.mulf %57, %58 : vector<8x8x128xf32>
    %c0_42 = arith.constant 0 : index
    %c0_43 = arith.constant 0 : index
    %c0_44 = arith.constant 0 : index
    %c0_45 = arith.constant 0 : index
    %60 = vector.load %arg7[%c0_42, %c0_43, %c0_44, %c0_45] : memref<1x8x8x128xf32, #tpu.memory_space<vmem>>, vector<1x8x8x128xf32>
    %61 = vector.shape_cast %60 : vector<1x8x8x128xf32> to vector<8x8x128xf32>
    %cst_46 = arith.constant 2.000000e-01 : f32
    %62 = vector.broadcast %cst_46 : f32 to vector<8x8x128xf32>
    %63 = arith.mulf %61, %62 : vector<8x8x128xf32>
    %c0_47 = arith.constant 0 : index
    %c0_48 = arith.constant 0 : index
    %c0_49 = arith.constant 0 : index
    %c0_50 = arith.constant 0 : index
    %64 = vector.load %arg8[%c0_47, %c0_48, %c0_49, %c0_50] : memref<1x8x8x128xf32, #tpu.memory_space<vmem>>, vector<1x8x8x128xf32>
    %65 = vector.shape_cast %64 : vector<1x8x8x128xf32> to vector<8x8x128xf32>
    %cst_51 = arith.constant 1.000000e+00 : f32
    %66 = vector.broadcast %cst_51 : f32 to vector<8x8x128xf32>
    %67 = arith.subf %66, %65 : vector<8x8x128xf32>
    %68 = arith.mulf %63, %67 : vector<8x8x128xf32>
    %69 = arith.addf %68, %59 : vector<8x8x128xf32>
    %cst_52 = arith.constant 5.000000e-01 : f32
    %70 = vector.broadcast %cst_52 : f32 to vector<8x8x128xf32>
    %71 = arith.cmpf ogt, %69, %70 : vector<8x8x128xf32>
    %72 = arith.extui %71 : vector<8x8x128xi1> to vector<8x8x128xi32>
    %73 = arith.sitofp %72 : vector<8x8x128xi32> to vector<8x8x128xf32>
    %c0_53 = arith.constant 0 : index
    %c0_54 = arith.constant 0 : index
    %c0_55 = arith.constant 0 : index
    %c0_56 = arith.constant 0 : index
    %74 = vector.load %arg11[%c0_53, %c0_54, %c0_55, %c0_56] : memref<1x8x8x128xf32, #tpu.memory_space<vmem>>, vector<1x8x8x128xf32>
    %75 = vector.shape_cast %74 : vector<1x8x8x128xf32> to vector<8x8x128xf32>
    %76 = vector.shape_cast %69 : vector<8x8x128xf32> to vector<1x8x8x128xf32>
    tpu.vector_store %arg11[%c0_53, %c0_54, %c0_55, %c0_56], %76 {strides = array<i32>} : memref<1x8x8x128xf32, #tpu.memory_space<vmem>>, vector<1x8x8x128xf32>,
    %c0_57 = arith.constant 0 : index
    %c0_58 = arith.constant 0 : index
    %c0_59 = arith.constant 0 : index
    %c0_60 = arith.constant 0 : index
    %77 = vector.load %arg12[%c0_57, %c0_58, %c0_59, %c0_60] : memref<1x8x8x128xf32, #tpu.memory_space<vmem>>, vector<1x8x8x128xf32>
    %78 = vector.shape_cast %77 : vector<1x8x8x128xf32> to vector<8x8x128xf32>
    %79 = vector.shape_cast %73 : vector<8x8x128xf32> to vector<1x8x8x128xf32>
    tpu.vector_store %arg12[%c0_57, %c0_58, %c0_59, %c0_60], %79 {strides = array<i32>} : memref<1x8x8x128xf32, #tpu.memory_space<vmem>>, vector<1x8x8x128xf32>,
    return
  }
  func.func @transform_0(%arg0: i32, %arg1: i32) -> (i32, i32, i32, i32) {
    %c0_i32 = arith.constant 0 : i32
    %c0_i32_0 = arith.constant 0 : i32
    %c0_i32_1 = arith.constant 0 : i32
    %c0_i32_2 = arith.constant 0 : i32
    return %arg0, %c0_i32, %c0_i32_0, %c0_i32_1 : i32, i32, i32, i32
  }
  func.func @transform_1(%arg0: i32, %arg1: i32) -> (i32, i32, i32) {
    %c0_i32 = arith.constant 0 : i32
    %c0_i32_0 = arith.constant 0 : i32
    %c0_i32_1 = arith.constant 0 : i32
    %c0_i32_2 = arith.constant 0 : i32
    return %c0_i32, %c0_i32_0, %c0_i32_1 : i32, i32, i32
  }
  func.func @transform_2(%arg0: i32, %arg1: i32) -> (i32, i32) {
    %c0_i32 = arith.constant 0 : i32
    %c0_i32_0 = arith.constant 0 : i32
    %c0_i32_1 = arith.constant 0 : i32
    return %c0_i32, %c0_i32_0 : i32, i32
  }
  func.func @transform_3(%arg0: i32, %arg1: i32) -> (i32, i32, i32, i32) {
    %c0_i32 = arith.constant 0 : i32
    %c0_i32_0 = arith.constant 0 : i32
    %c0_i32_1 = arith.constant 0 : i32
    return %arg0, %arg1, %c0_i32, %c0_i32_0 : i32, i32, i32, i32
  }
  func.func @transform_4(%arg0: i32, %arg1: i32) -> (i32, i32, i32, i32) {
    %c0_i32 = arith.constant 0 : i32
    %c0_i32_0 = arith.constant 0 : i32
    %c0_i32_1 = arith.constant 0 : i32
    return %arg0, %arg1, %c0_i32, %c0_i32_0 : i32, i32, i32, i32
  }
  func.func @transform_5(%arg0: i32, %arg1: i32) -> (i32, i32, i32, i32) {
    %c0_i32 = arith.constant 0 : i32
    %c0_i32_0 = arith.constant 0 : i32
    %c0_i32_1 = arith.constant 0 : i32
    return %arg0, %arg1, %c0_i32, %c0_i32_0 : i32, i32, i32, i32
  }
  func.func @transform_6(%arg0: i32, %arg1: i32) -> (i32, i32, i32, i32) {
    %c0_i32 = arith.constant 0 : i32
    %c0_i32_0 = arith.constant 0 : i32
    %c0_i32_1 = arith.constant 0 : i32
    return %arg0, %arg1, %c0_i32, %c0_i32_0 : i32, i32, i32, i32
  }
  func.func @transform_7(%arg0: i32, %arg1: i32) -> (i32, i32, i32, i32) {
    %c0_i32 = arith.constant 0 : i32
    %c0_i32_0 = arith.constant 0 : i32
    %c0_i32_1 = arith.constant 0 : i32
    return %arg0, %arg1, %c0_i32, %c0_i32_0 : i32, i32, i32, i32
  }
  func.func @transform_8(%arg0: i32, %arg1: i32) -> (i32, i32, i32, i32) {
    %c0_i32 = arith.constant 0 : i32
    %c0_i32_0 = arith.constant 0 : i32
    %c0_i32_1 = arith.constant 0 : i32
    return %arg0, %arg1, %c0_i32, %c0_i32_0 : i32, i32, i32, i32
  }
  func.func @transform_9(%arg0: i32, %arg1: i32) -> (i32, i32, i32, i32) {
    %c0_i32 = arith.constant 0 : i32
    %c0_i32_0 = arith.constant 0 : i32
    %c0_i32_1 = arith.constant 0 : i32
    return %arg0, %arg1, %c0_i32, %c0_i32_0 : i32, i32, i32, i32
  }
  func.func @transform_10(%arg0: i32, %arg1: i32) -> (i32, i32, i32, i32) {
    %c0_i32 = arith.constant 0 : i32
    %c0_i32_0 = arith.constant 0 : i32
    %c0_i32_1 = arith.constant 0 : i32
    return %arg0, %arg1, %c0_i32, %c0_i32_0 : i32, i32, i32, i32
  }
}

module attributes {stable_mosaic.version = 11 : i64} {
  func.func @kernel(%arg0: i32, %arg1: i32, %arg2: memref<1x10x8x384xbf16, #tpu.memory_space<vmem>>, %arg3: memref<3x384x128xbf16, #tpu.memory_space<vmem>>, %arg4: memref<1x128xf32, #tpu.memory_space<vmem>>, %arg5: memref<1x8x8x128xf32, #tpu.memory_space<vmem>>, %arg6: memref<1x8x8x128xf32, #tpu.memory_space<vmem>>, %arg7: memref<1x8x8x128xf32, #tpu.memory_space<vmem>>, %arg8: memref<1x8x8x128xf32, #tpu.memory_space<vmem>>) attributes {dimension_semantics = [#tpu.dimension_semantics<parallel>, #tpu.dimension_semantics<parallel>], iteration_bounds = array<i64: 2, 1>, scalar_prefetch = 0 : i64, scratch_operands = 0 : i64, tpu.core_type = #tpu.core_type<tc>, window_params = [{transform_indices = @transform_0, window_bounds = array<i64: 1, 10, 8, 384>}, {pipeline_mode = #tpu.pipeline_mode<synchronous>, transform_indices = @transform_1, window_bounds = array<i64: 3, 384, 128>}, {pipeline_mode = #tpu.pipeline_mode<synchronous>, transform_indices = @transform_2, window_bounds = array<i64: 1, 128>}, {transform_indices = @transform_3, window_bounds = array<i64: 1, 8, 8, 128>}, {transform_indices = @transform_4, window_bounds = array<i64: 1, 8, 8, 128>}, {transform_indices = @transform_5, window_bounds = array<i64: 1, 8, 8, 128>}, {transform_indices = @transform_6, window_bounds = array<i64: 1, 8, 8, 128>}]} {
    %c8_i32 = arith.constant 8 : i32
    %0 = arith.muli %arg1, %c8_i32 : i32
    %1 = tpu.assume_multiple %0, 8 : i32
    %cst = arith.constant 0.000000e+00 : f32
    %2 = vector.broadcast %cst : f32 to vector<64x128xf32>
    %c0_i32 = arith.constant 0 : i32
    %3 = arith.addi %1, %c0_i32 : i32
    %c0 = arith.constant 0 : index
    %4 = arith.index_cast %3 : i32 to index
    %c0_0 = arith.constant 0 : index
    %c0_1 = arith.constant 0 : index
    %5 = vector.load %arg2[%c0, %4, %c0_0, %c0_1] : memref<1x10x8x384xbf16, #tpu.memory_space<vmem>>, vector<1x8x8x384xbf16>
    %6 = vector.shape_cast %5 : vector<1x8x8x384xbf16> to vector<8x8x384xbf16>
    %7 = vector.shape_cast %6 : vector<8x8x384xbf16> to vector<64x384xbf16>
    %c0_2 = arith.constant 0 : index
    %c0_3 = arith.constant 0 : index
    %c0_4 = arith.constant 0 : index
    %8 = vector.load %arg3[%c0_2, %c0_3, %c0_4] : memref<3x384x128xbf16, #tpu.memory_space<vmem>>, vector<1x384x128xbf16>
    %9 = vector.shape_cast %8 : vector<1x384x128xbf16> to vector<384x128xbf16>
    %cst_5 = arith.constant dense<0.000000e+00> : vector<64x128xf32>
    %10 = tpu.matmul %7, %9, %cst_5 {dimension_numbers = #tpu.dot_dimension_numbers<[1], [0], [0], [1], [0, 0, 1, 1], [], []>} : vector<64x384xbf16>, vector<384x128xbf16>, vector<64x128xf32> -> vector<64x128xf32>
    %11 = arith.addf %2, %10 : vector<64x128xf32>
    %c1_i32 = arith.constant 1 : i32
    %12 = arith.addi %1, %c1_i32 : i32
    %c0_6 = arith.constant 0 : index
    %13 = arith.index_cast %12 : i32 to index
    %c0_7 = arith.constant 0 : index
    %c0_8 = arith.constant 0 : index
    %14 = vector.load %arg2[%c0_6, %13, %c0_7, %c0_8] : memref<1x10x8x384xbf16, #tpu.memory_space<vmem>>, vector<1x8x8x384xbf16>
    %15 = vector.shape_cast %14 : vector<1x8x8x384xbf16> to vector<8x8x384xbf16>
    %16 = vector.shape_cast %15 : vector<8x8x384xbf16> to vector<64x384xbf16>
    %c1 = arith.constant 1 : index
    %c0_9 = arith.constant 0 : index
    %c0_10 = arith.constant 0 : index
    %17 = vector.load %arg3[%c1, %c0_9, %c0_10] : memref<3x384x128xbf16, #tpu.memory_space<vmem>>, vector<1x384x128xbf16>
    %18 = vector.shape_cast %17 : vector<1x384x128xbf16> to vector<384x128xbf16>
    %cst_11 = arith.constant dense<0.000000e+00> : vector<64x128xf32>
    %19 = tpu.matmul %16, %18, %cst_11 {dimension_numbers = #tpu.dot_dimension_numbers<[1], [0], [0], [1], [0, 0, 1, 1], [], []>} : vector<64x384xbf16>, vector<384x128xbf16>, vector<64x128xf32> -> vector<64x128xf32>
    %20 = arith.addf %11, %19 : vector<64x128xf32>
    %c2_i32 = arith.constant 2 : i32
    %21 = arith.addi %1, %c2_i32 : i32
    %c0_12 = arith.constant 0 : index
    %22 = arith.index_cast %21 : i32 to index
    %c0_13 = arith.constant 0 : index
    %c0_14 = arith.constant 0 : index
    %23 = vector.load %arg2[%c0_12, %22, %c0_13, %c0_14] : memref<1x10x8x384xbf16, #tpu.memory_space<vmem>>, vector<1x8x8x384xbf16>
    %24 = vector.shape_cast %23 : vector<1x8x8x384xbf16> to vector<8x8x384xbf16>
    %25 = vector.shape_cast %24 : vector<8x8x384xbf16> to vector<64x384xbf16>
    %c2 = arith.constant 2 : index
    %c0_15 = arith.constant 0 : index
    %c0_16 = arith.constant 0 : index
    %26 = vector.load %arg3[%c2, %c0_15, %c0_16] : memref<3x384x128xbf16, #tpu.memory_space<vmem>>, vector<1x384x128xbf16>
    %27 = vector.shape_cast %26 : vector<1x384x128xbf16> to vector<384x128xbf16>
    %cst_17 = arith.constant dense<0.000000e+00> : vector<64x128xf32>
    %28 = tpu.matmul %25, %27, %cst_17 {dimension_numbers = #tpu.dot_dimension_numbers<[1], [0], [0], [1], [0, 0, 1, 1], [], []>} : vector<64x384xbf16>, vector<384x128xbf16>, vector<64x128xf32> -> vector<64x128xf32>
    %29 = arith.addf %20, %28 : vector<64x128xf32>
    %c0_18 = arith.constant 0 : index
    %c0_19 = arith.constant 0 : index
    %30 = vector.load %arg4[%c0_18, %c0_19] : memref<1x128xf32, #tpu.memory_space<vmem>>, vector<1x128xf32>
    %31 = vector.broadcast %30 : vector<1x128xf32> to vector<64x128xf32>
    %32 = arith.addf %29, %31 : vector<64x128xf32>
    %33 = vector.shape_cast %32 : vector<64x128xf32> to vector<8x8x128xf32>
    %c0_20 = arith.constant 0 : index
    %c0_21 = arith.constant 0 : index
    %c0_22 = arith.constant 0 : index
    %c0_23 = arith.constant 0 : index
    %34 = vector.load %arg5[%c0_20, %c0_21, %c0_22, %c0_23] : memref<1x8x8x128xf32, #tpu.memory_space<vmem>>, vector<1x8x8x128xf32>
    %35 = vector.shape_cast %34 : vector<1x8x8x128xf32> to vector<8x8x128xf32>
    %cst_24 = arith.constant 2.000000e-01 : f32
    %36 = vector.broadcast %cst_24 : f32 to vector<8x8x128xf32>
    %37 = arith.mulf %35, %36 : vector<8x8x128xf32>
    %c0_25 = arith.constant 0 : index
    %c0_26 = arith.constant 0 : index
    %c0_27 = arith.constant 0 : index
    %c0_28 = arith.constant 0 : index
    %38 = vector.load %arg6[%c0_25, %c0_26, %c0_27, %c0_28] : memref<1x8x8x128xf32, #tpu.memory_space<vmem>>, vector<1x8x8x128xf32>
    %39 = vector.shape_cast %38 : vector<1x8x8x128xf32> to vector<8x8x128xf32>
    %cst_29 = arith.constant 1.000000e+00 : f32
    %40 = vector.broadcast %cst_29 : f32 to vector<8x8x128xf32>
    %41 = arith.subf %40, %39 : vector<8x8x128xf32>
    %42 = arith.mulf %37, %41 : vector<8x8x128xf32>
    %43 = arith.addf %42, %33 : vector<8x8x128xf32>
    %cst_30 = arith.constant 5.000000e-01 : f32
    %44 = vector.broadcast %cst_30 : f32 to vector<8x8x128xf32>
    %45 = arith.cmpf ogt, %43, %44 : vector<8x8x128xf32>
    %46 = arith.extui %45 : vector<8x8x128xi1> to vector<8x8x128xi32>
    %47 = arith.sitofp %46 : vector<8x8x128xi32> to vector<8x8x128xf32>
    %c0_31 = arith.constant 0 : index
    %c0_32 = arith.constant 0 : index
    %c0_33 = arith.constant 0 : index
    %c0_34 = arith.constant 0 : index
    %48 = vector.load %arg7[%c0_31, %c0_32, %c0_33, %c0_34] : memref<1x8x8x128xf32, #tpu.memory_space<vmem>>, vector<1x8x8x128xf32>
    %49 = vector.shape_cast %48 : vector<1x8x8x128xf32> to vector<8x8x128xf32>
    %50 = vector.shape_cast %43 : vector<8x8x128xf32> to vector<1x8x8x128xf32>
    tpu.vector_store %arg7[%c0_31, %c0_32, %c0_33, %c0_34], %50 {strides = array<i32>} : memref<1x8x8x128xf32, #tpu.memory_space<vmem>>, vector<1x8x8x128xf32>,
    %c0_35 = arith.constant 0 : index
    %c0_36 = arith.constant 0 : index
    %c0_37 = arith.constant 0 : index
    %c0_38 = arith.constant 0 : index
    %51 = vector.load %arg8[%c0_35, %c0_36, %c0_37, %c0_38] : memref<1x8x8x128xf32, #tpu.memory_space<vmem>>, vector<1x8x8x128xf32>
    %52 = vector.shape_cast %51 : vector<1x8x8x128xf32> to vector<8x8x128xf32>
    %53 = vector.shape_cast %47 : vector<8x8x128xf32> to vector<1x8x8x128xf32>
    tpu.vector_store %arg8[%c0_35, %c0_36, %c0_37, %c0_38], %53 {strides = array<i32>} : memref<1x8x8x128xf32, #tpu.memory_space<vmem>>, vector<1x8x8x128xf32>,
    return
  }
  func.func @transform_0(%arg0: i32, %arg1: i32) -> (i32, i32, i32, i32) {
    %c0_i32 = arith.constant 0 : i32
    %c0_i32_0 = arith.constant 0 : i32
    %c0_i32_1 = arith.constant 0 : i32
    %c0_i32_2 = arith.constant 0 : i32
    return %arg0, %c0_i32, %c0_i32_0, %c0_i32_1 : i32, i32, i32, i32
  }
  func.func @transform_1(%arg0: i32, %arg1: i32) -> (i32, i32, i32) {
    %c0_i32 = arith.constant 0 : i32
    %c0_i32_0 = arith.constant 0 : i32
    %c0_i32_1 = arith.constant 0 : i32
    %c0_i32_2 = arith.constant 0 : i32
    return %c0_i32, %c0_i32_0, %c0_i32_1 : i32, i32, i32
  }
  func.func @transform_2(%arg0: i32, %arg1: i32) -> (i32, i32) {
    %c0_i32 = arith.constant 0 : i32
    %c0_i32_0 = arith.constant 0 : i32
    %c0_i32_1 = arith.constant 0 : i32
    return %c0_i32, %c0_i32_0 : i32, i32
  }
  func.func @transform_3(%arg0: i32, %arg1: i32) -> (i32, i32, i32, i32) {
    %c0_i32 = arith.constant 0 : i32
    %c0_i32_0 = arith.constant 0 : i32
    %c0_i32_1 = arith.constant 0 : i32
    return %arg0, %arg1, %c0_i32, %c0_i32_0 : i32, i32, i32, i32
  }
  func.func @transform_4(%arg0: i32, %arg1: i32) -> (i32, i32, i32, i32) {
    %c0_i32 = arith.constant 0 : i32
    %c0_i32_0 = arith.constant 0 : i32
    %c0_i32_1 = arith.constant 0 : i32
    return %arg0, %arg1, %c0_i32, %c0_i32_0 : i32, i32, i32, i32
  }
  func.func @transform_5(%arg0: i32, %arg1: i32) -> (i32, i32, i32, i32) {
    %c0_i32 = arith.constant 0 : i32
    %c0_i32_0 = arith.constant 0 : i32
    %c0_i32_1 = arith.constant 0 : i32
    return %arg0, %arg1, %c0_i32, %c0_i32_0 : i32, i32, i32, i32
  }
  func.func @transform_6(%arg0: i32, %arg1: i32) -> (i32, i32, i32, i32) {
    %c0_i32 = arith.constant 0 : i32
    %c0_i32_0 = arith.constant 0 : i32
    %c0_i32_1 = arith.constant 0 : i32
    return %arg0, %arg1, %c0_i32, %c0_i32_0 : i32, i32, i32, i32
  }
}

module attributes {stable_mosaic.version = 11 : i64} {
  func.func @kernel(%arg0: i32, %arg1: i32, %arg2: memref<1x10x8x384xbf16, #tpu.memory_space<vmem>>, %arg3: memref<3x384x128xbf16, #tpu.memory_space<vmem>>, %arg4: memref<1x128xf32, #tpu.memory_space<vmem>>, %arg5: memref<1x8x8x128xf32, #tpu.memory_space<vmem>>, %arg6: memref<1x8x8x128xf32, #tpu.memory_space<vmem>>, %arg7: memref<1x4x4x128xf32, #tpu.memory_space<vmem>>, %arg8: memref<1x4x4x128xf32, #tpu.memory_space<vmem>>, %arg9: memref<1x8x8x128xf32, #tpu.memory_space<vmem>>, %arg10: memref<1x8x8x128xf32, #tpu.memory_space<vmem>>, %arg11: memref<1x4x4x128xf32, #tpu.memory_space<vmem>>, %arg12: memref<1x4x4x128xf32, #tpu.memory_space<vmem>>) attributes {dimension_semantics = [#tpu.dimension_semantics<parallel>, #tpu.dimension_semantics<parallel>], iteration_bounds = array<i64: 2, 1>, scalar_prefetch = 0 : i64, scratch_operands = 0 : i64, tpu.core_type = #tpu.core_type<tc>, window_params = [{transform_indices = @transform_0, window_bounds = array<i64: 1, 10, 8, 384>}, {pipeline_mode = #tpu.pipeline_mode<synchronous>, transform_indices = @transform_1, window_bounds = array<i64: 3, 384, 128>}, {pipeline_mode = #tpu.pipeline_mode<synchronous>, transform_indices = @transform_2, window_bounds = array<i64: 1, 128>}, {transform_indices = @transform_3, window_bounds = array<i64: 1, 8, 8, 128>}, {transform_indices = @transform_4, window_bounds = array<i64: 1, 8, 8, 128>}, {transform_indices = @transform_5, window_bounds = array<i64: 1, 4, 4, 128>}, {transform_indices = @transform_6, window_bounds = array<i64: 1, 4, 4, 128>}, {transform_indices = @transform_7, window_bounds = array<i64: 1, 8, 8, 128>}, {transform_indices = @transform_8, window_bounds = array<i64: 1, 8, 8, 128>}, {transform_indices = @transform_9, window_bounds = array<i64: 1, 4, 4, 128>}, {transform_indices = @transform_10, window_bounds = array<i64: 1, 4, 4, 128>}]} {
    %c8_i32 = arith.constant 8 : i32
    %0 = arith.muli %arg1, %c8_i32 : i32
    %1 = tpu.assume_multiple %0, 8 : i32
    %cst = arith.constant 0.000000e+00 : f32
    %2 = vector.broadcast %cst : f32 to vector<64x128xf32>
    %c0_i32 = arith.constant 0 : i32
    %3 = arith.addi %1, %c0_i32 : i32
    %c0 = arith.constant 0 : index
    %4 = arith.index_cast %3 : i32 to index
    %c0_0 = arith.constant 0 : index
    %c0_1 = arith.constant 0 : index
    %5 = vector.load %arg2[%c0, %4, %c0_0, %c0_1] : memref<1x10x8x384xbf16, #tpu.memory_space<vmem>>, vector<1x8x8x384xbf16>
    %6 = vector.shape_cast %5 : vector<1x8x8x384xbf16> to vector<8x8x384xbf16>
    %7 = vector.shape_cast %6 : vector<8x8x384xbf16> to vector<64x384xbf16>
    %c0_2 = arith.constant 0 : index
    %c0_3 = arith.constant 0 : index
    %c0_4 = arith.constant 0 : index
    %8 = vector.load %arg3[%c0_2, %c0_3, %c0_4] : memref<3x384x128xbf16, #tpu.memory_space<vmem>>, vector<1x384x128xbf16>
    %9 = vector.shape_cast %8 : vector<1x384x128xbf16> to vector<384x128xbf16>
    %cst_5 = arith.constant dense<0.000000e+00> : vector<64x128xf32>
    %10 = tpu.matmul %7, %9, %cst_5 {dimension_numbers = #tpu.dot_dimension_numbers<[1], [0], [0], [1], [0, 0, 1, 1], [], []>} : vector<64x384xbf16>, vector<384x128xbf16>, vector<64x128xf32> -> vector<64x128xf32>
    %11 = arith.addf %2, %10 : vector<64x128xf32>
    %c1_i32 = arith.constant 1 : i32
    %12 = arith.addi %1, %c1_i32 : i32
    %c0_6 = arith.constant 0 : index
    %13 = arith.index_cast %12 : i32 to index
    %c0_7 = arith.constant 0 : index
    %c0_8 = arith.constant 0 : index
    %14 = vector.load %arg2[%c0_6, %13, %c0_7, %c0_8] : memref<1x10x8x384xbf16, #tpu.memory_space<vmem>>, vector<1x8x8x384xbf16>
    %15 = vector.shape_cast %14 : vector<1x8x8x384xbf16> to vector<8x8x384xbf16>
    %16 = vector.shape_cast %15 : vector<8x8x384xbf16> to vector<64x384xbf16>
    %c1 = arith.constant 1 : index
    %c0_9 = arith.constant 0 : index
    %c0_10 = arith.constant 0 : index
    %17 = vector.load %arg3[%c1, %c0_9, %c0_10] : memref<3x384x128xbf16, #tpu.memory_space<vmem>>, vector<1x384x128xbf16>
    %18 = vector.shape_cast %17 : vector<1x384x128xbf16> to vector<384x128xbf16>
    %cst_11 = arith.constant dense<0.000000e+00> : vector<64x128xf32>
    %19 = tpu.matmul %16, %18, %cst_11 {dimension_numbers = #tpu.dot_dimension_numbers<[1], [0], [0], [1], [0, 0, 1, 1], [], []>} : vector<64x384xbf16>, vector<384x128xbf16>, vector<64x128xf32> -> vector<64x128xf32>
    %20 = arith.addf %11, %19 : vector<64x128xf32>
    %c2_i32 = arith.constant 2 : i32
    %21 = arith.addi %1, %c2_i32 : i32
    %c0_12 = arith.constant 0 : index
    %22 = arith.index_cast %21 : i32 to index
    %c0_13 = arith.constant 0 : index
    %c0_14 = arith.constant 0 : index
    %23 = vector.load %arg2[%c0_12, %22, %c0_13, %c0_14] : memref<1x10x8x384xbf16, #tpu.memory_space<vmem>>, vector<1x8x8x384xbf16>
    %24 = vector.shape_cast %23 : vector<1x8x8x384xbf16> to vector<8x8x384xbf16>
    %25 = vector.shape_cast %24 : vector<8x8x384xbf16> to vector<64x384xbf16>
    %c2 = arith.constant 2 : index
    %c0_15 = arith.constant 0 : index
    %c0_16 = arith.constant 0 : index
    %26 = vector.load %arg3[%c2, %c0_15, %c0_16] : memref<3x384x128xbf16, #tpu.memory_space<vmem>>, vector<1x384x128xbf16>
    %27 = vector.shape_cast %26 : vector<1x384x128xbf16> to vector<384x128xbf16>
    %cst_17 = arith.constant dense<0.000000e+00> : vector<64x128xf32>
    %28 = tpu.matmul %25, %27, %cst_17 {dimension_numbers = #tpu.dot_dimension_numbers<[1], [0], [0], [1], [0, 0, 1, 1], [], []>} : vector<64x384xbf16>, vector<384x128xbf16>, vector<64x128xf32> -> vector<64x128xf32>
    %29 = arith.addf %20, %28 : vector<64x128xf32>
    %c0_18 = arith.constant 0 : index
    %c0_19 = arith.constant 0 : index
    %30 = vector.load %arg4[%c0_18, %c0_19] : memref<1x128xf32, #tpu.memory_space<vmem>>, vector<1x128xf32>
    %31 = vector.broadcast %30 : vector<1x128xf32> to vector<64x128xf32>
    %32 = arith.addf %29, %31 : vector<64x128xf32>
    %33 = vector.shape_cast %32 : vector<64x128xf32> to vector<8x8x128xf32>
    %c0_20 = arith.constant 0 : index
    %c0_21 = arith.constant 0 : index
    %c0_22 = arith.constant 0 : index
    %c0_23 = arith.constant 0 : index
    %34 = vector.load %arg5[%c0_20, %c0_21, %c0_22, %c0_23] : memref<1x8x8x128xf32, #tpu.memory_space<vmem>>, vector<1x8x8x128xf32>
    %35 = vector.shape_cast %34 : vector<1x8x8x128xf32> to vector<8x8x128xf32>
    %cst_24 = arith.constant 2.000000e-01 : f32
    %36 = vector.broadcast %cst_24 : f32 to vector<8x8x128xf32>
    %37 = arith.mulf %35, %36 : vector<8x8x128xf32>
    %c0_25 = arith.constant 0 : index
    %c0_26 = arith.constant 0 : index
    %c0_27 = arith.constant 0 : index
    %c0_28 = arith.constant 0 : index
    %38 = vector.load %arg6[%c0_25, %c0_26, %c0_27, %c0_28] : memref<1x8x8x128xf32, #tpu.memory_space<vmem>>, vector<1x8x8x128xf32>
    %39 = vector.shape_cast %38 : vector<1x8x8x128xf32> to vector<8x8x128xf32>
    %cst_29 = arith.constant 1.000000e+00 : f32
    %40 = vector.broadcast %cst_29 : f32 to vector<8x8x128xf32>
    %41 = arith.subf %40, %39 : vector<8x8x128xf32>
    %42 = arith.mulf %37, %41 : vector<8x8x128xf32>
    %43 = arith.addf %42, %33 : vector<8x8x128xf32>
    %cst_30 = arith.constant 5.000000e-01 : f32
    %44 = vector.broadcast %cst_30 : f32 to vector<8x8x128xf32>
    %45 = arith.cmpf ogt, %43, %44 : vector<8x8x128xf32>
    %46 = arith.extui %45 : vector<8x8x128xi1> to vector<8x8x128xi32>
    %47 = arith.sitofp %46 : vector<8x8x128xi32> to vector<8x8x128xf32>
    %c0_31 = arith.constant 0 : index
    %c0_32 = arith.constant 0 : index
    %c0_33 = arith.constant 0 : index
    %c0_34 = arith.constant 0 : index
    %48 = vector.load %arg9[%c0_31, %c0_32, %c0_33, %c0_34] : memref<1x8x8x128xf32, #tpu.memory_space<vmem>>, vector<1x8x8x128xf32>
    %49 = vector.shape_cast %48 : vector<1x8x8x128xf32> to vector<8x8x128xf32>
    %50 = vector.shape_cast %43 : vector<8x8x128xf32> to vector<1x8x8x128xf32>
    tpu.vector_store %arg9[%c0_31, %c0_32, %c0_33, %c0_34], %50 {strides = array<i32>} : memref<1x8x8x128xf32, #tpu.memory_space<vmem>>, vector<1x8x8x128xf32>,
    %c0_35 = arith.constant 0 : index
    %c0_36 = arith.constant 0 : index
    %c0_37 = arith.constant 0 : index
    %c0_38 = arith.constant 0 : index
    %51 = vector.load %arg10[%c0_35, %c0_36, %c0_37, %c0_38] : memref<1x8x8x128xf32, #tpu.memory_space<vmem>>, vector<1x8x8x128xf32>
    %52 = vector.shape_cast %51 : vector<1x8x8x128xf32> to vector<8x8x128xf32>
    %53 = vector.shape_cast %47 : vector<8x8x128xf32> to vector<1x8x8x128xf32>
    tpu.vector_store %arg10[%c0_35, %c0_36, %c0_37, %c0_38], %53 {strides = array<i32>} : memref<1x8x8x128xf32, #tpu.memory_space<vmem>>, vector<1x8x8x128xf32>,
    %54 = vector.shape_cast %47 : vector<8x8x128xf32> to vector<4x2x8x128xf32>
    %cst_39 = arith.constant dense<0.000000e+00> : vector<4x8x128xf32>
    %55 = vector.multi_reduction <add>, %54, %cst_39 [1] : vector<4x2x8x128xf32> to vector<4x8x128xf32>
    %56 = vector.shape_cast %55 : vector<4x8x128xf32> to vector<4x4x2x128xf32>
    %cst_40 = arith.constant dense<0.000000e+00> : vector<4x4x128xf32>
    %57 = vector.multi_reduction <add>, %56, %cst_40 [2] : vector<4x4x2x128xf32> to vector<4x4x128xf32>
    %cst_41 = arith.constant 2.500000e-01 : f32
    %58 = vector.broadcast %cst_41 : f32 to vector<4x4x128xf32>
    %59 = arith.mulf %57, %58 : vector<4x4x128xf32>
    %c0_42 = arith.constant 0 : index
    %c0_43 = arith.constant 0 : index
    %c0_44 = arith.constant 0 : index
    %c0_45 = arith.constant 0 : index
    %60 = vector.load %arg7[%c0_42, %c0_43, %c0_44, %c0_45] : memref<1x4x4x128xf32, #tpu.memory_space<vmem>>, vector<1x4x4x128xf32>
    %61 = vector.shape_cast %60 : vector<1x4x4x128xf32> to vector<4x4x128xf32>
    %cst_46 = arith.constant 2.000000e-01 : f32
    %62 = vector.broadcast %cst_46 : f32 to vector<4x4x128xf32>
    %63 = arith.mulf %61, %62 : vector<4x4x128xf32>
    %c0_47 = arith.constant 0 : index
    %c0_48 = arith.constant 0 : index
    %c0_49 = arith.constant 0 : index
    %c0_50 = arith.constant 0 : index
    %64 = vector.load %arg8[%c0_47, %c0_48, %c0_49, %c0_50] : memref<1x4x4x128xf32, #tpu.memory_space<vmem>>, vector<1x4x4x128xf32>
    %65 = vector.shape_cast %64 : vector<1x4x4x128xf32> to vector<4x4x128xf32>
    %cst_51 = arith.constant 1.000000e+00 : f32
    %66 = vector.broadcast %cst_51 : f32 to vector<4x4x128xf32>
    %67 = arith.subf %66, %65 : vector<4x4x128xf32>
    %68 = arith.mulf %63, %67 : vector<4x4x128xf32>
    %69 = arith.addf %68, %59 : vector<4x4x128xf32>
    %cst_52 = arith.constant 5.000000e-01 : f32
    %70 = vector.broadcast %cst_52 : f32 to vector<4x4x128xf32>
    %71 = arith.cmpf ogt, %69, %70 : vector<4x4x128xf32>
    %72 = arith.extui %71 : vector<4x4x128xi1> to vector<4x4x128xi32>
    %73 = arith.sitofp %72 : vector<4x4x128xi32> to vector<4x4x128xf32>
    %c0_53 = arith.constant 0 : index
    %c0_54 = arith.constant 0 : index
    %c0_55 = arith.constant 0 : index
    %c0_56 = arith.constant 0 : index
    %74 = vector.load %arg11[%c0_53, %c0_54, %c0_55, %c0_56] : memref<1x4x4x128xf32, #tpu.memory_space<vmem>>, vector<1x4x4x128xf32>
    %75 = vector.shape_cast %74 : vector<1x4x4x128xf32> to vector<4x4x128xf32>
    %76 = vector.shape_cast %69 : vector<4x4x128xf32> to vector<1x4x4x128xf32>
    tpu.vector_store %arg11[%c0_53, %c0_54, %c0_55, %c0_56], %76 {strides = array<i32>} : memref<1x4x4x128xf32, #tpu.memory_space<vmem>>, vector<1x4x4x128xf32>,
    %c0_57 = arith.constant 0 : index
    %c0_58 = arith.constant 0 : index
    %c0_59 = arith.constant 0 : index
    %c0_60 = arith.constant 0 : index
    %77 = vector.load %arg12[%c0_57, %c0_58, %c0_59, %c0_60] : memref<1x4x4x128xf32, #tpu.memory_space<vmem>>, vector<1x4x4x128xf32>
    %78 = vector.shape_cast %77 : vector<1x4x4x128xf32> to vector<4x4x128xf32>
    %79 = vector.shape_cast %73 : vector<4x4x128xf32> to vector<1x4x4x128xf32>
    tpu.vector_store %arg12[%c0_57, %c0_58, %c0_59, %c0_60], %79 {strides = array<i32>} : memref<1x4x4x128xf32, #tpu.memory_space<vmem>>, vector<1x4x4x128xf32>,
    return
  }
  func.func @transform_0(%arg0: i32, %arg1: i32) -> (i32, i32, i32, i32) {
    %c0_i32 = arith.constant 0 : i32
    %c0_i32_0 = arith.constant 0 : i32
    %c0_i32_1 = arith.constant 0 : i32
    %c0_i32_2 = arith.constant 0 : i32
    return %arg0, %c0_i32, %c0_i32_0, %c0_i32_1 : i32, i32, i32, i32
  }
  func.func @transform_1(%arg0: i32, %arg1: i32) -> (i32, i32, i32) {
    %c0_i32 = arith.constant 0 : i32
    %c0_i32_0 = arith.constant 0 : i32
    %c0_i32_1 = arith.constant 0 : i32
    %c0_i32_2 = arith.constant 0 : i32
    return %c0_i32, %c0_i32_0, %c0_i32_1 : i32, i32, i32
  }
  func.func @transform_2(%arg0: i32, %arg1: i32) -> (i32, i32) {
    %c0_i32 = arith.constant 0 : i32
    %c0_i32_0 = arith.constant 0 : i32
    %c0_i32_1 = arith.constant 0 : i32
    return %c0_i32, %c0_i32_0 : i32, i32
  }
  func.func @transform_3(%arg0: i32, %arg1: i32) -> (i32, i32, i32, i32) {
    %c0_i32 = arith.constant 0 : i32
    %c0_i32_0 = arith.constant 0 : i32
    %c0_i32_1 = arith.constant 0 : i32
    return %arg0, %arg1, %c0_i32, %c0_i32_0 : i32, i32, i32, i32
  }
  func.func @transform_4(%arg0: i32, %arg1: i32) -> (i32, i32, i32, i32) {
    %c0_i32 = arith.constant 0 : i32
    %c0_i32_0 = arith.constant 0 : i32
    %c0_i32_1 = arith.constant 0 : i32
    return %arg0, %arg1, %c0_i32, %c0_i32_0 : i32, i32, i32, i32
  }
  func.func @transform_5(%arg0: i32, %arg1: i32) -> (i32, i32, i32, i32) {
    %c0_i32 = arith.constant 0 : i32
    %c0_i32_0 = arith.constant 0 : i32
    %c0_i32_1 = arith.constant 0 : i32
    return %arg0, %arg1, %c0_i32, %c0_i32_0 : i32, i32, i32, i32
  }
  func.func @transform_6(%arg0: i32, %arg1: i32) -> (i32, i32, i32, i32) {
    %c0_i32 = arith.constant 0 : i32
    %c0_i32_0 = arith.constant 0 : i32
    %c0_i32_1 = arith.constant 0 : i32
    return %arg0, %arg1, %c0_i32, %c0_i32_0 : i32, i32, i32, i32
  }
  func.func @transform_7(%arg0: i32, %arg1: i32) -> (i32, i32, i32, i32) {
    %c0_i32 = arith.constant 0 : i32
    %c0_i32_0 = arith.constant 0 : i32
    %c0_i32_1 = arith.constant 0 : i32
    return %arg0, %arg1, %c0_i32, %c0_i32_0 : i32, i32, i32, i32
  }
  func.func @transform_8(%arg0: i32, %arg1: i32) -> (i32, i32, i32, i32) {
    %c0_i32 = arith.constant 0 : i32
    %c0_i32_0 = arith.constant 0 : i32
    %c0_i32_1 = arith.constant 0 : i32
    return %arg0, %arg1, %c0_i32, %c0_i32_0 : i32, i32, i32, i32
  }
  func.func @transform_9(%arg0: i32, %arg1: i32) -> (i32, i32, i32, i32) {
    %c0_i32 = arith.constant 0 : i32
    %c0_i32_0 = arith.constant 0 : i32
    %c0_i32_1 = arith.constant 0 : i32
    return %arg0, %arg1, %c0_i32, %c0_i32_0 : i32, i32, i32, i32
  }
  func.func @transform_10(%arg0: i32, %arg1: i32) -> (i32, i32, i32, i32) {
    %c0_i32 = arith.constant 0 : i32
    %c0_i32_0 = arith.constant 0 : i32
    %c0_i32_1 = arith.constant 0 : i32
    return %arg0, %arg1, %c0_i32, %c0_i32_0 : i32, i32, i32, i32
  }
}

module attributes {stable_mosaic.version = 11 : i64} {
  func.func @kernel(%arg0: i32, %arg1: i32, %arg2: memref<1x6x4x384xbf16, #tpu.memory_space<vmem>>, %arg3: memref<3x384x128xbf16, #tpu.memory_space<vmem>>, %arg4: memref<1x128xf32, #tpu.memory_space<vmem>>, %arg5: memref<1x4x4x128xf32, #tpu.memory_space<vmem>>, %arg6: memref<1x4x4x128xf32, #tpu.memory_space<vmem>>, %arg7: memref<1x1x1x128xf32, #tpu.memory_space<vmem>>, %arg8: memref<1x1x1x128xf32, #tpu.memory_space<vmem>>, %arg9: memref<1x4x4x128xf32, #tpu.memory_space<vmem>>, %arg10: memref<1x4x4x128xf32, #tpu.memory_space<vmem>>, %arg11: memref<1x1x1x128xf32, #tpu.memory_space<vmem>>, %arg12: memref<1x1x1x128xf32, #tpu.memory_space<vmem>>) attributes {dimension_semantics = [#tpu.dimension_semantics<parallel>, #tpu.dimension_semantics<parallel>], iteration_bounds = array<i64: 2, 1>, scalar_prefetch = 0 : i64, scratch_operands = 0 : i64, tpu.core_type = #tpu.core_type<tc>, window_params = [{transform_indices = @transform_0, window_bounds = array<i64: 1, 6, 4, 384>}, {pipeline_mode = #tpu.pipeline_mode<synchronous>, transform_indices = @transform_1, window_bounds = array<i64: 3, 384, 128>}, {pipeline_mode = #tpu.pipeline_mode<synchronous>, transform_indices = @transform_2, window_bounds = array<i64: 1, 128>}, {transform_indices = @transform_3, window_bounds = array<i64: 1, 4, 4, 128>}, {transform_indices = @transform_4, window_bounds = array<i64: 1, 4, 4, 128>}, {transform_indices = @transform_5, window_bounds = array<i64: 1, 1, 1, 128>}, {transform_indices = @transform_6, window_bounds = array<i64: 1, 1, 1, 128>}, {transform_indices = @transform_7, window_bounds = array<i64: 1, 4, 4, 128>}, {transform_indices = @transform_8, window_bounds = array<i64: 1, 4, 4, 128>}, {transform_indices = @transform_9, window_bounds = array<i64: 1, 1, 1, 128>}, {transform_indices = @transform_10, window_bounds = array<i64: 1, 1, 1, 128>}]} {
    %c4_i32 = arith.constant 4 : i32
    %0 = arith.muli %arg1, %c4_i32 : i32
    %1 = tpu.assume_multiple %0, 4 : i32
    %cst = arith.constant 0.000000e+00 : f32
    %2 = vector.broadcast %cst : f32 to vector<16x128xf32>
    %c0_i32 = arith.constant 0 : i32
    %3 = arith.addi %1, %c0_i32 : i32
    %c0 = arith.constant 0 : index
    %4 = arith.index_cast %3 : i32 to index
    %c0_0 = arith.constant 0 : index
    %c0_1 = arith.constant 0 : index
    %5 = vector.load %arg2[%c0, %4, %c0_0, %c0_1] : memref<1x6x4x384xbf16, #tpu.memory_space<vmem>>, vector<1x4x4x384xbf16>
    %6 = vector.shape_cast %5 : vector<1x4x4x384xbf16> to vector<4x4x384xbf16>
    %7 = vector.shape_cast %6 : vector<4x4x384xbf16> to vector<16x384xbf16>
    %c0_2 = arith.constant 0 : index
    %c0_3 = arith.constant 0 : index
    %c0_4 = arith.constant 0 : index
    %8 = vector.load %arg3[%c0_2, %c0_3, %c0_4] : memref<3x384x128xbf16, #tpu.memory_space<vmem>>, vector<1x384x128xbf16>
    %9 = vector.shape_cast %8 : vector<1x384x128xbf16> to vector<384x128xbf16>
    %cst_5 = arith.constant dense<0.000000e+00> : vector<16x128xf32>
    %10 = tpu.matmul %7, %9, %cst_5 {dimension_numbers = #tpu.dot_dimension_numbers<[1], [0], [0], [1], [0, 0, 1, 1], [], []>} : vector<16x384xbf16>, vector<384x128xbf16>, vector<16x128xf32> -> vector<16x128xf32>
    %11 = arith.addf %2, %10 : vector<16x128xf32>
    %c1_i32 = arith.constant 1 : i32
    %12 = arith.addi %1, %c1_i32 : i32
    %c0_6 = arith.constant 0 : index
    %13 = arith.index_cast %12 : i32 to index
    %c0_7 = arith.constant 0 : index
    %c0_8 = arith.constant 0 : index
    %14 = vector.load %arg2[%c0_6, %13, %c0_7, %c0_8] : memref<1x6x4x384xbf16, #tpu.memory_space<vmem>>, vector<1x4x4x384xbf16>
    %15 = vector.shape_cast %14 : vector<1x4x4x384xbf16> to vector<4x4x384xbf16>
    %16 = vector.shape_cast %15 : vector<4x4x384xbf16> to vector<16x384xbf16>
    %c1 = arith.constant 1 : index
    %c0_9 = arith.constant 0 : index
    %c0_10 = arith.constant 0 : index
    %17 = vector.load %arg3[%c1, %c0_9, %c0_10] : memref<3x384x128xbf16, #tpu.memory_space<vmem>>, vector<1x384x128xbf16>
    %18 = vector.shape_cast %17 : vector<1x384x128xbf16> to vector<384x128xbf16>
    %cst_11 = arith.constant dense<0.000000e+00> : vector<16x128xf32>
    %19 = tpu.matmul %16, %18, %cst_11 {dimension_numbers = #tpu.dot_dimension_numbers<[1], [0], [0], [1], [0, 0, 1, 1], [], []>} : vector<16x384xbf16>, vector<384x128xbf16>, vector<16x128xf32> -> vector<16x128xf32>
    %20 = arith.addf %11, %19 : vector<16x128xf32>
    %c2_i32 = arith.constant 2 : i32
    %21 = arith.addi %1, %c2_i32 : i32
    %c0_12 = arith.constant 0 : index
    %22 = arith.index_cast %21 : i32 to index
    %c0_13 = arith.constant 0 : index
    %c0_14 = arith.constant 0 : index
    %23 = vector.load %arg2[%c0_12, %22, %c0_13, %c0_14] : memref<1x6x4x384xbf16, #tpu.memory_space<vmem>>, vector<1x4x4x384xbf16>
    %24 = vector.shape_cast %23 : vector<1x4x4x384xbf16> to vector<4x4x384xbf16>
    %25 = vector.shape_cast %24 : vector<4x4x384xbf16> to vector<16x384xbf16>
    %c2 = arith.constant 2 : index
    %c0_15 = arith.constant 0 : index
    %c0_16 = arith.constant 0 : index
    %26 = vector.load %arg3[%c2, %c0_15, %c0_16] : memref<3x384x128xbf16, #tpu.memory_space<vmem>>, vector<1x384x128xbf16>
    %27 = vector.shape_cast %26 : vector<1x384x128xbf16> to vector<384x128xbf16>
    %cst_17 = arith.constant dense<0.000000e+00> : vector<16x128xf32>
    %28 = tpu.matmul %25, %27, %cst_17 {dimension_numbers = #tpu.dot_dimension_numbers<[1], [0], [0], [1], [0, 0, 1, 1], [], []>} : vector<16x384xbf16>, vector<384x128xbf16>, vector<16x128xf32> -> vector<16x128xf32>
    %29 = arith.addf %20, %28 : vector<16x128xf32>
    %c0_18 = arith.constant 0 : index
    %c0_19 = arith.constant 0 : index
    %30 = vector.load %arg4[%c0_18, %c0_19] : memref<1x128xf32, #tpu.memory_space<vmem>>, vector<1x128xf32>
    %31 = vector.broadcast %30 : vector<1x128xf32> to vector<16x128xf32>
    %32 = arith.addf %29, %31 : vector<16x128xf32>
    %33 = vector.shape_cast %32 : vector<16x128xf32> to vector<4x4x128xf32>
    %c0_20 = arith.constant 0 : index
    %c0_21 = arith.constant 0 : index
    %c0_22 = arith.constant 0 : index
    %c0_23 = arith.constant 0 : index
    %34 = vector.load %arg5[%c0_20, %c0_21, %c0_22, %c0_23] : memref<1x4x4x128xf32, #tpu.memory_space<vmem>>, vector<1x4x4x128xf32>
    %35 = vector.shape_cast %34 : vector<1x4x4x128xf32> to vector<4x4x128xf32>
    %cst_24 = arith.constant 2.000000e-01 : f32
    %36 = vector.broadcast %cst_24 : f32 to vector<4x4x128xf32>
    %37 = arith.mulf %35, %36 : vector<4x4x128xf32>
    %c0_25 = arith.constant 0 : index
    %c0_26 = arith.constant 0 : index
    %c0_27 = arith.constant 0 : index
    %c0_28 = arith.constant 0 : index
    %38 = vector.load %arg6[%c0_25, %c0_26, %c0_27, %c0_28] : memref<1x4x4x128xf32, #tpu.memory_space<vmem>>, vector<1x4x4x128xf32>
    %39 = vector.shape_cast %38 : vector<1x4x4x128xf32> to vector<4x4x128xf32>
    %cst_29 = arith.constant 1.000000e+00 : f32
    %40 = vector.broadcast %cst_29 : f32 to vector<4x4x128xf32>
    %41 = arith.subf %40, %39 : vector<4x4x128xf32>
    %42 = arith.mulf %37, %41 : vector<4x4x128xf32>
    %43 = arith.addf %42, %33 : vector<4x4x128xf32>
    %cst_30 = arith.constant 5.000000e-01 : f32
    %44 = vector.broadcast %cst_30 : f32 to vector<4x4x128xf32>
    %45 = arith.cmpf ogt, %43, %44 : vector<4x4x128xf32>
    %46 = arith.extui %45 : vector<4x4x128xi1> to vector<4x4x128xi32>
    %47 = arith.sitofp %46 : vector<4x4x128xi32> to vector<4x4x128xf32>
    %c0_31 = arith.constant 0 : index
    %c0_32 = arith.constant 0 : index
    %c0_33 = arith.constant 0 : index
    %c0_34 = arith.constant 0 : index
    %48 = vector.load %arg9[%c0_31, %c0_32, %c0_33, %c0_34] : memref<1x4x4x128xf32, #tpu.memory_space<vmem>>, vector<1x4x4x128xf32>
    %49 = vector.shape_cast %48 : vector<1x4x4x128xf32> to vector<4x4x128xf32>
    %50 = vector.shape_cast %43 : vector<4x4x128xf32> to vector<1x4x4x128xf32>
    tpu.vector_store %arg9[%c0_31, %c0_32, %c0_33, %c0_34], %50 {strides = array<i32>} : memref<1x4x4x128xf32, #tpu.memory_space<vmem>>, vector<1x4x4x128xf32>,
    %c0_35 = arith.constant 0 : index
    %c0_36 = arith.constant 0 : index
    %c0_37 = arith.constant 0 : index
    %c0_38 = arith.constant 0 : index
    %51 = vector.load %arg10[%c0_35, %c0_36, %c0_37, %c0_38] : memref<1x4x4x128xf32, #tpu.memory_space<vmem>>, vector<1x4x4x128xf32>
    %52 = vector.shape_cast %51 : vector<1x4x4x128xf32> to vector<4x4x128xf32>
    %53 = vector.shape_cast %47 : vector<4x4x128xf32> to vector<1x4x4x128xf32>
    tpu.vector_store %arg10[%c0_35, %c0_36, %c0_37, %c0_38], %53 {strides = array<i32>} : memref<1x4x4x128xf32, #tpu.memory_space<vmem>>, vector<1x4x4x128xf32>,
    %54 = vector.shape_cast %47 : vector<4x4x128xf32> to vector<1x4x4x128xf32>
    %cst_39 = arith.constant dense<0.000000e+00> : vector<1x4x128xf32>
    %55 = vector.multi_reduction <add>, %54, %cst_39 [1] : vector<1x4x4x128xf32> to vector<1x4x128xf32>
    %56 = vector.shape_cast %55 : vector<1x4x128xf32> to vector<1x1x4x128xf32>
    %cst_40 = arith.constant dense<0.000000e+00> : vector<1x1x128xf32>
    %57 = vector.multi_reduction <add>, %56, %cst_40 [2] : vector<1x1x4x128xf32> to vector<1x1x128xf32>
    %cst_41 = arith.constant 6.250000e-02 : f32
    %58 = vector.broadcast %cst_41 : f32 to vector<1x1x128xf32>
    %59 = arith.mulf %57, %58 : vector<1x1x128xf32>
    %c0_42 = arith.constant 0 : index
    %c0_43 = arith.constant 0 : index
    %c0_44 = arith.constant 0 : index
    %c0_45 = arith.constant 0 : index
    %60 = vector.load %arg7[%c0_42, %c0_43, %c0_44, %c0_45] : memref<1x1x1x128xf32, #tpu.memory_space<vmem>>, vector<1x1x1x128xf32>
    %61 = vector.shape_cast %60 : vector<1x1x1x128xf32> to vector<1x1x128xf32>
    %cst_46 = arith.constant 2.000000e-01 : f32
    %62 = vector.broadcast %cst_46 : f32 to vector<1x1x128xf32>
    %63 = arith.mulf %61, %62 : vector<1x1x128xf32>
    %c0_47 = arith.constant 0 : index
    %c0_48 = arith.constant 0 : index
    %c0_49 = arith.constant 0 : index
    %c0_50 = arith.constant 0 : index
    %64 = vector.load %arg8[%c0_47, %c0_48, %c0_49, %c0_50] : memref<1x1x1x128xf32, #tpu.memory_space<vmem>>, vector<1x1x1x128xf32>
    %65 = vector.shape_cast %64 : vector<1x1x1x128xf32> to vector<1x1x128xf32>
    %cst_51 = arith.constant 1.000000e+00 : f32
    %66 = vector.broadcast %cst_51 : f32 to vector<1x1x128xf32>
    %67 = arith.subf %66, %65 : vector<1x1x128xf32>
    %68 = arith.mulf %63, %67 : vector<1x1x128xf32>
    %69 = arith.addf %68, %59 : vector<1x1x128xf32>
    %cst_52 = arith.constant 5.000000e-01 : f32
    %70 = vector.broadcast %cst_52 : f32 to vector<1x1x128xf32>
    %71 = arith.cmpf ogt, %69, %70 : vector<1x1x128xf32>
    %72 = arith.extui %71 : vector<1x1x128xi1> to vector<1x1x128xi32>
    %73 = arith.sitofp %72 : vector<1x1x128xi32> to vector<1x1x128xf32>
    %c0_53 = arith.constant 0 : index
    %c0_54 = arith.constant 0 : index
    %c0_55 = arith.constant 0 : index
    %c0_56 = arith.constant 0 : index
    %74 = vector.load %arg11[%c0_53, %c0_54, %c0_55, %c0_56] : memref<1x1x1x128xf32, #tpu.memory_space<vmem>>, vector<1x1x1x128xf32>
    %75 = vector.shape_cast %74 : vector<1x1x1x128xf32> to vector<1x1x128xf32>
    %76 = vector.shape_cast %69 : vector<1x1x128xf32> to vector<1x1x1x128xf32>
    tpu.vector_store %arg11[%c0_53, %c0_54, %c0_55, %c0_56], %76 {strides = array<i32>} : memref<1x1x1x128xf32, #tpu.memory_space<vmem>>, vector<1x1x1x128xf32>,
    %c0_57 = arith.constant 0 : index
    %c0_58 = arith.constant 0 : index
    %c0_59 = arith.constant 0 : index
    %c0_60 = arith.constant 0 : index
    %77 = vector.load %arg12[%c0_57, %c0_58, %c0_59, %c0_60] : memref<1x1x1x128xf32, #tpu.memory_space<vmem>>, vector<1x1x1x128xf32>
    %78 = vector.shape_cast %77 : vector<1x1x1x128xf32> to vector<1x1x128xf32>
    %79 = vector.shape_cast %73 : vector<1x1x128xf32> to vector<1x1x1x128xf32>
    tpu.vector_store %arg12[%c0_57, %c0_58, %c0_59, %c0_60], %79 {strides = array<i32>} : memref<1x1x1x128xf32, #tpu.memory_space<vmem>>, vector<1x1x1x128xf32>,
    return
  }
  func.func @transform_0(%arg0: i32, %arg1: i32) -> (i32, i32, i32, i32) {
    %c0_i32 = arith.constant 0 : i32
    %c0_i32_0 = arith.constant 0 : i32
    %c0_i32_1 = arith.constant 0 : i32
    %c0_i32_2 = arith.constant 0 : i32
    return %arg0, %c0_i32, %c0_i32_0, %c0_i32_1 : i32, i32, i32, i32
  }
  func.func @transform_1(%arg0: i32, %arg1: i32) -> (i32, i32, i32) {
    %c0_i32 = arith.constant 0 : i32
    %c0_i32_0 = arith.constant 0 : i32
    %c0_i32_1 = arith.constant 0 : i32
    %c0_i32_2 = arith.constant 0 : i32
    return %c0_i32, %c0_i32_0, %c0_i32_1 : i32, i32, i32
  }
  func.func @transform_2(%arg0: i32, %arg1: i32) -> (i32, i32) {
    %c0_i32 = arith.constant 0 : i32
    %c0_i32_0 = arith.constant 0 : i32
    %c0_i32_1 = arith.constant 0 : i32
    return %c0_i32, %c0_i32_0 : i32, i32
  }
  func.func @transform_3(%arg0: i32, %arg1: i32) -> (i32, i32, i32, i32) {
    %c0_i32 = arith.constant 0 : i32
    %c0_i32_0 = arith.constant 0 : i32
    %c0_i32_1 = arith.constant 0 : i32
    return %arg0, %arg1, %c0_i32, %c0_i32_0 : i32, i32, i32, i32
  }
  func.func @transform_4(%arg0: i32, %arg1: i32) -> (i32, i32, i32, i32) {
    %c0_i32 = arith.constant 0 : i32
    %c0_i32_0 = arith.constant 0 : i32
    %c0_i32_1 = arith.constant 0 : i32
    return %arg0, %arg1, %c0_i32, %c0_i32_0 : i32, i32, i32, i32
  }
  func.func @transform_5(%arg0: i32, %arg1: i32) -> (i32, i32, i32, i32) {
    %c0_i32 = arith.constant 0 : i32
    %c0_i32_0 = arith.constant 0 : i32
    %c0_i32_1 = arith.constant 0 : i32
    return %arg0, %arg1, %c0_i32, %c0_i32_0 : i32, i32, i32, i32
  }
  func.func @transform_6(%arg0: i32, %arg1: i32) -> (i32, i32, i32, i32) {
    %c0_i32 = arith.constant 0 : i32
    %c0_i32_0 = arith.constant 0 : i32
    %c0_i32_1 = arith.constant 0 : i32
    return %arg0, %arg1, %c0_i32, %c0_i32_0 : i32, i32, i32, i32
  }
  func.func @transform_7(%arg0: i32, %arg1: i32) -> (i32, i32, i32, i32) {
    %c0_i32 = arith.constant 0 : i32
    %c0_i32_0 = arith.constant 0 : i32
    %c0_i32_1 = arith.constant 0 : i32
    return %arg0, %arg1, %c0_i32, %c0_i32_0 : i32, i32, i32, i32
  }
  func.func @transform_8(%arg0: i32, %arg1: i32) -> (i32, i32, i32, i32) {
    %c0_i32 = arith.constant 0 : i32
    %c0_i32_0 = arith.constant 0 : i32
    %c0_i32_1 = arith.constant 0 : i32
    return %arg0, %arg1, %c0_i32, %c0_i32_0 : i32, i32, i32, i32
  }
  func.func @transform_9(%arg0: i32, %arg1: i32) -> (i32, i32, i32, i32) {
    %c0_i32 = arith.constant 0 : i32
    %c0_i32_0 = arith.constant 0 : i32
    %c0_i32_1 = arith.constant 0 : i32
    return %arg0, %arg1, %c0_i32, %c0_i32_0 : i32, i32, i32, i32
  }
  func.func @transform_10(%arg0: i32, %arg1: i32) -> (i32, i32, i32, i32) {
    %c0_i32 = arith.constant 0 : i32
    %c0_i32_0 = arith.constant 0 : i32
    %c0_i32_1 = arith.constant 0 : i32
    return %arg0, %arg1, %c0_i32, %c0_i32_0 : i32, i32, i32, i32
  }
}

</mosaic_0001>

<bundles_post_ra>
// kernel: custom-call
= control target key start
LH: loop header
LB: loop body
LE: loop exit
PB: predicated region body
PF: predicated region fallthrough
CT: control target
= control target key end

     0   :  { %s6_s0 = inlined_call_operand.hbm [shape: f32[3,2,128], index: 0, kind: output, shape index: {}]  }

// kernel: closed_call.78
= control target key start
LH: loop header
LB: loop body
LE: loop exit
PB: predicated region body
PF: predicated region fallthrough
CT: control target
= control target key end

     0   :  { %s5046_s13 = smov 0   ;;  %s5048_s14 = smov 0   ;;  %s7418_s0 = inlined_call_operand.vmem [shape: bf16[2,32,32,18], index: 0, kind: input, shape index: {}]   ;;  %s7419_s1 = inlined_call_operand.vmem [shape: bf16[1,18,64], index: 1, kind: input, shape index: {}]   ;;  %s7420_s2 = inlined_call_operand.vmem [shape: f32[1,64], index: 2, kind: input, shape index: {}]   ;;  %s7421_s3 = inlined_call_operand.vmem [shape: f32[2,32,32,64], index: 3, kind: input, shape index: {}, may-alias: {3,7}]   ;;  %s7422_s4 = inlined_call_operand.vmem [shape: f32[2,32,32,64], index: 4, kind: input, shape index: {}, may-alias: {4,8}]   ;;  %s7423_s5 = inlined_call_operand.vmem [shape: f32[2,16,16,64], index: 5, kind: input, shape index: {}, may-alias: {5,9}]   ;;  %s7424_s6 = inlined_call_operand.vmem [shape: f32[2,16,16,64], index: 6, kind: input, shape index: {}, may-alias: {6,10}]   ;;  %s7425_s7 = inlined_call_operand.vmem [shape: f32[2,32,32,64], index: 7, kind: output, shape index: {0}, may-alias: {3,7}]   ;;  %s7426_s8 = inlined_call_operand.vmem [shape: f32[2,32,32,64], index: 8, kind: output, shape index: {1}, may-alias: {4,8}]   ;;  %s7427_s9 = inlined_call_operand.vmem [shape: f32[2,16,16,64], index: 9, kind: output, shape index: {2}, may-alias: {5,9}]   ;;  %s7428_s10 = inlined_call_operand.vmem [shape: f32[2,16,16,64], index: 10, kind: output, shape index: {3}, may-alias: {6,10}]  }
   0x1   :  { %s5050_s15 = smov 0   ;;  %s5052_s16 = smov 0  }
   0x2   :  { %s5054_s17 = smov 0  }
   0x3 LB: > { %s30_s18 = sadd.s32 1, %s4979_s15  ;;  %s33_s19 = sadd.s32 1, %s4983_s16  ;;  %s4987_s17 = sphi %s5054_s17, %s21_s17   ;;  %s4983_s16 = sphi %s5052_s16, %s7751_s16   ;;  %s4979_s15 = sphi %s5050_s15, %s7750_s15   ;;  %s4975_s14 = sphi %s5048_s14, %s7749_s14   ;;  %s4971_s13 = sphi %s5046_s13, %s7748_s13  }
   0x4   : > { %p31_p0 = scmp.ge.s32.totalorder %s30_s18, 2  ;;  %p4572_p1 = scmp.ge.s32.totalorder %s4987_s17, 1 }
   0x5   : > { %p411_p2 = scmp.lt.s32.totalorder %s4987_s17, 5 }
   0x6   : > { %s7753_s18 = smov (%p31_p0, %s30_s18), 0  ;;  %s7755_s19 = smov (!%p31_p0, %s33_s19), %s4983_s16 }
   0x7   : > { %p412_p3 = pnand %p4572_p1, %p411_p2  ;;  %p35_p4 = scmp.ge.s32.totalorder %s7755_s19, 2 }
   0x9   : > { %s7757_s19 = smov (%p35_p4, %s7755_s19), 0  ;;  %415 = sbr.rel (%p412_p3) target bundleno = 759 (0x2f7), region = 48 }
  0x10   : > { %v4912_v0 = vld [vmem:[%s7419_s1] sm:$0xff]   ;;  %vm962_vm0 = vcmask 1040384   ;;  %v4913_v1 = vld [vmem:[%s7419_s1 + $0x8] ss:$0 sps:$4 sm:$0x11]   ;;  %p524_p5 = scmp.lt.s32.totalorder %s4975_s14, 1  ;;  %v2092_v63 = vlaneseq }
  0x11   : > { %4796 = vmatprep.subr.bf16.mxu0 %v4912_v0  ;;  %4864 = vmatprep.subr.bf16.mxu1 %v4912_v0  ;;  %v964_v2 = vsel %vm962_vm0, %v4913_v1, 0  ;;  %s4761_s25 = sshll.u32 %s4971_s13, 8  ;;  %vm865_vm1 = vcmask 146432   ;;  %s4575_s30 = sshll.u32 %s4971_s13, 4  ;;  %vm1831_vm2 = vcmask 523264   ;;  %vm2760_vm9 = vcmask 517120  }
  0x12   : > { %4797 = vmatpush3.bf16.msra.mxu0 %v4912_v0  ;;  %4866 = vmatpush3.bf16.msra.mxu1 %v4912_v0  ;;  %s7759_s14 = smov (!%p524_p5, %s4975_s14), 1  ;;  %p532_p6 = scmp.lt.s32.totalorder %s4575_s30, 31 }
  0x13   : > { %4868 = vmatprep.subr.msk.bf16.mxu0 %vm962_vm0, %v4913_v1  ;;  %4869 = vmatprep.subr.msk.bf16.mxu1 %vm962_vm0, %v4913_v1  ;;  %s4759_s24 = sshll.u32 %s7759_s14, 9  ;;  %s4577_s12 = sshll.u32 %s7759_s14, 7  ;;  %vm3993_vm0 = vcmask 1041409  }
  0x14   : > { %s528_s28 = scalar_lea.vmem %s7418_s0, %s4759_s24  ;;  %s7761_s30 = smov (!%p532_p6, %s4575_s30), 31 }
  0x15   : > { %s5091_s29 = scalar_lea.vmem %s528_s28, %s4761_s25  ;;  %s4576_s11 = sshll.u32 %s7761_s30, 2 }
  0x16   : > { %4799 = vmatpush3.bf16.msra.mxu0 %v964_v2  ;;  %4867 = vmatpush3.bf16.msra.mxu1 %v964_v2  ;;  %v4914_v3 = vld [vmem:[%s5091_s29] sm:$0xff]   ;;  %v4916_v5 = vld [vmem:[%s5091_s29 + $0x8] sm:$0xff]   ;;  %v4918_v7 = vld [vmem:[%s5091_s29 + $0x10] sm:$0xff]   ;;  %s536_s20 = sadd.s32 %s4577_s12, %s4576_s11  ;;  %s4583_s21 = sshll.u32 %s4971_s13, 3 }
  0x17   : > { %v4915_v4 = vld [vmem:[%s5091_s29 + $0x80] sm:$0xff]   ;;  %4800 = vmatprep.mubr.msk.bf16.mxu0 %vm865_vm1, %v4914_v3  ;;  %v4917_v6 = vld [vmem:[%s5091_s29 + $0x88] sm:$0xff]   ;;  %v4919_v8 = vld [vmem:[%s5091_s29 + $0x90] sm:$0xff]   ;;  %s5160_s22 = sshll.u32 %s536_s20, 3  ;;  %p554_p7 = scmp.lt.s32.totalorder %s4583_s21, 15 }
  0x18   : > { %4832 = vmatprep.mubr.msk.bf16.mxu1 %vm865_vm1, %v4915_v4  ;;  %v4920_v9 = vld [vmem:[%s5091_s29 + $0x18] sm:$0xff]   ;;  %v4922_v11 = vld [vmem:[%s5091_s29 + $0x20] sm:$0xff]   ;;  %v4924_v13 = vld [vmem:[%s5091_s29 + $0x28] sm:$0xff]   ;;  %s5166_s25 = scalar_lea.vmem %s7421_s3, %s5160_s22  ;;  %s5172_s13 = scalar_lea.vmem %s7422_s4, %s5160_s22 }
  0x19   : > { %4801 = vmatmul.mubr.msk.bf16.vlgmr.msra.gmra.mrb[0].mxu0 %vm865_vm1, %v4916_v5  ;;  %4833 = vmatmul.mubr.msk.bf16.vlgmr.msra.gmra.mrb[0].mxu1 %vm865_vm1, %v4917_v6  ;;  %v4921_v10 = vld [vmem:[%s5091_s29 + $0x98] sm:$0xff]   ;;  %v4923_v12 = vld [vmem:[%s5091_s29 + $0xa0] sm:$0xff]   ;;  %v4925_v14 = vld [vmem:[%s5091_s29 + $0xa8] sm:$0xff]   ;;  %s7763_s21 = smov (!%p554_p7, %s4583_s21), 15  ;;  %s6320_s23 = scalar_lea.vmem %s7425_s7, %s5160_s22 }
  0x1a   : > { %4804 = vmatprep.mubr.msk.bf16.mxu0 %vm865_vm1, %v4918_v7  ;;  %4836 = vmatprep.mubr.msk.bf16.mxu1 %vm865_vm1, %v4919_v8  ;;  %v4926_v15 = vld [vmem:[%s5091_s29 + $0x30] sm:$0xff]   ;;  %v4928_v17 = vld [vmem:[%s5091_s29 + $0x38] sm:$0xff]   ;;  %v4930_v19 = vld [vmem:[%s5091_s29 + $0x40] sm:$0xff]   ;;  %s4584_s28 = sshll.u32 %s7763_s21, 1 }
  0x1b   : > { %v4927_v16 = vld [vmem:[%s5091_s29 + $0xb0] sm:$0xff]   ;;  %v4929_v18 = vld [vmem:[%s5091_s29 + $0xb8] sm:$0xff]   ;;  %v4931_v20 = vld [vmem:[%s5091_s29 + $0xc0] sm:$0xff]  }
  0x1c   : > { %v4932_v21 = vld [vmem:[%s5091_s29 + $0x48] sm:$0xff]   ;;  %v4934_v23 = vld [vmem:[%s5091_s29 + $0x50] sm:$0xff]   ;;  %v4936_v25 = vld [vmem:[%s5091_s29 + $0x58] sm:$0xff]  }
  0x1d   : > { %v4933_v22 = vld [vmem:[%s5091_s29 + $0xc8] sm:$0xff]   ;;  %v4935_v24 = vld [vmem:[%s5091_s29 + $0xd0] sm:$0xff]   ;;  %v4937_v26 = vld [vmem:[%s5091_s29 + $0xd8] sm:$0xff]  }
  0x1e   : > { %v4938_v27 = vld [vmem:[%s5091_s29 + $0x60] sm:$0xff]   ;;  %v4940_v29 = vld [vmem:[%s5091_s29 + $0x68] sm:$0xff]   ;;  %v4942_v31 = vld [vmem:[%s5091_s29 + $0x70] sm:$0xff]  }
  0x1f   : > { %v4939_v28 = vld [vmem:[%s5091_s29 + $0xe0] sm:$0xff]   ;;  %v4941_v30 = vld [vmem:[%s5091_s29 + $0xe8] sm:$0xff]   ;;  %v4943_v32 = vld [vmem:[%s5091_s29 + $0xf0] sm:$0xff]  }
  0x20   : > { %v4944_v33 = vld [vmem:[%s5091_s29 + $0x78] sm:$0xff]   ;;  %v1257_v35 = vld [vmem:[%s5166_s25 + $0x10] sm:$0xff]  ;;  %v1255_v39 = vld [vmem:[%s5166_s25] sm:$0xff] }
  0x21   : > { %4805 = vmatmul.mubr.msk.bf16.gmra.mrb[4].mxu0 %vm865_vm1, %v4920_v9  ;;  %4837 = vmatmul.mubr.msk.bf16.gmra.mrb[4].mxu1 %vm865_vm1, %v4921_v10  ;;  %v4945_v34 = vld [vmem:[%s5091_s29 + $0xf8] sm:$0xff]   ;;  %v1385_v36 = vld [vmem:[%s5172_s13 + $0x10] sm:$0xff]  ;;  %v1383_v40 = vld [vmem:[%s5172_s13] sm:$0xff]  ;;  %s4585_s29 = sshll.u32 %s7759_s14, 5  ;;  %v1321_v43 = vmul.f32 0.2, %v1257_v35 }
  0x22   : > { %4808 = vmatprep.mubr.msk.bf16.mxu0 %vm865_vm1, %v4922_v11  ;;  %4840 = vmatprep.mubr.msk.bf16.mxu1 %vm865_vm1, %v4923_v12  ;;  %v1289_v37 = vld [vmem:[%s5166_s25 + $0x110] sm:$0xff]  ;;  %v1287_v41 = vld [vmem:[%s5166_s25 + $0x100] sm:$0xff]  ;;  %v1258_v45 = vld [vmem:[%s5166_s25 + $0x18] sm:$0xff]  ;;  %v1449_v47 = vsub.f32 1.0, %v1385_v36  ;;  %v1319_v49 = vmul.f32 0.2, %v1255_v39  ;;  %s558_s30 = sadd.s32 %s4585_s29, %s4584_s28  ;;  %s6408_s28 = scalar_lea.vmem %s7426_s8, %s5160_s22 }
  0x23   : > { %v1417_v38 = vld [vmem:[%s5172_s13 + $0x110] sm:$0xff]  ;;  %v1415_v42 = vld [vmem:[%s5172_s13 + $0x100] sm:$0xff]  ;;  %v1353_v44 = vmul.f32 0.2, %v1289_v37  ;;  %v1290_v46 = vld [vmem:[%s5166_s25 + $0x118] sm:$0xff]  ;;  %v1447_v50 = vsub.f32 1.0, %v1383_v40 }
  0x24   : > { %v1481_v48 = vsub.f32 1.0, %v1417_v38  ;;  %v1386_v51 = vld [vmem:[%s5172_s13 + $0x18] sm:$0xff]  ;;  %v1351_v52 = vmul.f32 0.2, %v1287_v41  ;;  %v1479_v53 = vsub.f32 1.0, %v1415_v42  ;;  %v1256_v55 = vld [vmem:[%s5166_s25 + $0x8] sm:$0xff]  ;;  %v5196_v5 = vmul.f32 %v1449_v47, %v1321_v43 }
  0x25   : > { %v1418_v54 = vld [vmem:[%s5172_s13 + $0x118] sm:$0xff]  ;;  %v1384_v56 = vld [vmem:[%s5172_s13 + $0x8] sm:$0xff]  ;;  %v1322_v57 = vmul.f32 0.2, %v1258_v45  ;;  %v1354_v58 = vmul.f32 0.2, %v1290_v46 }
  0x26   : > { %v1288_v59 = vld [vmem:[%s5166_s25 + $0x108] sm:$0xff]  ;;  %v1450_v61 = vsub.f32 1.0, %v1386_v51  ;;  %v1389_v62 = vld [vmem:[%s5172_s13 + $0x30] sm:$0xff]  ;;  %s5192_s14 = sshll.u32 %s558_s30, 3  ;;  %v1482_v0 = vsub.f32 1.0, %v1418_v54  ;;  %v1448_v2 = vsub.f32 1.0, %v1384_v56 }
  0x27   : > { %v1416_v60 = vld [vmem:[%s5172_s13 + $0x108] sm:$0xff]  ;;  %v1320_v1 = vmul.f32 0.2, %v1256_v55  ;;  %v1421_v3 = vld [vmem:[%s5172_s13 + $0x130] sm:$0xff]  ;;  %v1387_v4 = vld [vmem:[%s5172_s13 + $0x20] sm:$0xff]  ;;  %v1453_v12 = vsub.f32 1.0, %v1389_v62  ;;  %s5206_s20 = scalar_lea.vmem %s7423_s5, %s5192_s14  ;;  %s5212_s24 = scalar_lea.vmem %s7424_s6, %s5192_s14 }
  0x28   : > { %v1352_v6 = vmul.f32 0.2, %v1288_v59  ;;  %v1480_v7 = vsub.f32 1.0, %v1416_v60  ;;  %v1261_v8 = vld [vmem:[%s5166_s25 + $0x30] sm:$0xff]  ;;  %v1419_v10 = vld [vmem:[%s5172_s13 + $0x120] sm:$0xff]  ;;  %v1422_v35 = vld [vmem:[%s5172_s13 + $0x138] sm:$0xff]  ;;  %v5229_v36 = vmul.f32 %v1482_v0, %v1354_v58  ;;  %s6875_s11 = scalar_lea.vmem %s7428_s10, %s5192_s14 }
  0x29   : > { %4809 = vmatmul.mubr.msk.bf16.gmra.mrb[8].mxu0 %vm865_vm1, %v4924_v13  ;;  %4841 = vmatmul.mubr.msk.bf16.gmra.mrb[8].mxu1 %vm865_vm1, %v4925_v14  ;;  %v1293_v9 = vld [vmem:[%s5166_s25 + $0x130] sm:$0xff]  ;;  %v1325_v11 = vmul.f32 0.2, %v1261_v8  ;;  %v4989_v13 = vmov 1983009808   ;;  %v1486_v39 = vsub.f32 1.0, %v1422_v35  ;;  %v5234_v43 = vmul.f32 %v1448_v2, %v1320_v1 }
  0x2a   : > { %4812 = vmatprep.mubr.msk.bf16.mxu0 %vm865_vm1, %v4926_v15  ;;  %4844 = vmatprep.mubr.msk.bf16.mxu1 %vm865_vm1, %v4927_v16  ;;  %v2090_v14 = vunpack.c.l.s4 %v4989_v13  ;;  %v1357_v15 = vmul.f32 0.2, %v1293_v9  ;;  %v1259_v16 = vld [vmem:[%s5166_s25 + $0x20] sm:$0xff]  ;;  %v3794_v40 = vld [vmem:[%s5206_s20 + $0x48] sm:$0xff]  ;;  %v5249_v55 = vld [vmem:[%s5172_s13 + $0x50] sm:$0xff] }
  0x2b   : > { %v1260_v41 = vld [vmem:[%s5166_s25 + $0x28] sm:$0xff]  ;;  %v1297_v56 = vld [vmem:[%s5166_s25 + $0x150] sm:$0xff]  ;;  %v3810_v58 = vmul.f32 0.2, %v3794_v40  ;;  %v1263_v62 = vld [vmem:[%s5166_s25 + $0x40] sm:$0xff]  ;;  %v1457_v9 = vsub.f32 1.0, %v5249_v55 }
  0x2c   : > { %v2091_v37 = vunpack.c.0.s8 %v2090_v14  ;;  %v1388_v42 = vld [vmem:[%s5172_s13 + $0x28] sm:$0xff]  ;;  %v1324_v46 = vmul.f32 0.2, %v1260_v41  ;;  %v3785_v2 = vld [vmem:[%s5206_s20] sm:$0xff]  ;;  %v1266_v13 = vld [vmem:[%s5166_s25 + $0x58] sm:$0xff] }
  0x2d   : > { %v5239_v45 = vld [vmem:[%s5212_s24 + $0x48] sm:$0xff]  ;;  %v1452_v47 = vsub.f32 1.0, %v1388_v42  ;;  %v1394_v14 = vld [vmem:[%s5172_s13 + $0x58] sm:$0xff]  ;;  %v1269_v40 = vld [vmem:[%s5166_s25 + $0x70] sm:$0xff] }
  0x2e   : > { %v1420_v54 = vld [vmem:[%s5172_s13 + $0x128] sm:$0xff]  ;;  %v3842_v1 = vsub.f32 1.0, %v5239_v45  ;;  %v1397_v41 = vld [vmem:[%s5172_s13 + $0x70] sm:$0xff] }
  0x2f   : > { %v1484_v60 = vsub.f32 1.0, %v1420_v54  ;;  %v1301_v42 = vld [vmem:[%s5166_s25 + $0x170] sm:$0xff] }
  0x30   : > { %v1429_v45 = vld [vmem:[%s5172_s13 + $0x170] sm:$0xff] }
  0x31   : > { %4813 = vmatmul.mubr.msk.bf16.gmra.mrb[12].mxu0 %vm865_vm1, %v4928_v17  ;;  %4845 = vmatmul.mubr.msk.bf16.gmra.mrb[12].mxu1 %vm865_vm1, %v4929_v18  ;;  %v2093_v17 = vshrl.u32 %v2092_v63, 7  ;;  %v1485_v18 = vsub.f32 1.0, %v1421_v3  ;;  %v3817_v3 = vld [vmem:[%s5212_s24] sm:$0xff] }
  0x32   : > { %4816 = vmatprep.mubr.msk.bf16.mxu0 %vm865_vm1, %v4930_v19  ;;  %4848 = vmatprep.mubr.msk.bf16.mxu1 %vm865_vm1, %v4931_v20  ;;  %v1323_v19 = vmul.f32 0.2, %v1259_v16  ;;  %v1451_v20 = vsub.f32 1.0, %v1387_v4  ;;  %v5277_v16 = vmul.f32 %v1452_v47, %v1324_v46 }
  0x33   : > { %v5245_v51 = vmul.f32 %v1485_v18, %v1357_v15  ;;  %v5258_v63 = vsub.s32 %v2091_v37, %v2093_v17  ;;  %v1327_v18 = vmul.f32 0.2, %v1263_v62  ;;  %v1365_v62 = vmul.f32 0.2, %v1301_v42 }
  0x39   : > { %4817 = vmatmul.mubr.msk.bf16.gmra.mrb[16].mxu0 %vm865_vm1, %v4932_v21  ;;  %4849 = vmatmul.mubr.msk.bf16.gmra.mrb[16].mxu1 %vm865_vm1, %v4933_v22  ;;  %v1291_v21 = vld [vmem:[%s5166_s25 + $0x120] sm:$0xff]  ;;  %v5215_v22 = vmul.f32 %v1481_v48, %v1353_v44  ;;  %v5236_v44 = vmul.f32 %v1480_v7, %v1352_v6  ;;  %v1292_v48 = vld [vmem:[%s5166_s25 + $0x128] sm:$0xff] }
  0x3a   : > { %4820 = vmatprep.mubr.msk.bf16.mxu0 %vm865_vm1, %v4934_v23  ;;  %4852 = vmatprep.mubr.msk.bf16.mxu1 %vm865_vm1, %v4935_v24  ;;  %v5217_v23 = vmul.f32 %v1447_v50, %v1319_v49  ;;  %v1355_v24 = vmul.f32 0.2, %v1291_v21  ;;  %v1265_v49 = vld [vmem:[%s5166_s25 + $0x50] sm:$0xff]  ;;  %v5243_v50 = vmul.f32 %v1453_v12, %v1325_v11  ;;  %v1356_v59 = vmul.f32 0.2, %v1292_v48  ;;  %v1391_v6 = vld [vmem:[%s5172_s13 + $0x40] sm:$0xff] }
  0x3b   : > { %v1329_v4 = vmul.f32 0.2, %v1265_v49  ;;  %v1295_v11 = vld [vmem:[%s5166_s25 + $0x140] sm:$0xff]  ;;  %v1264_v21 = vld [vmem:[%s5166_s25 + $0x48] sm:$0xff] }
  0x3c   : > { %v1423_v12 = vld [vmem:[%s5172_s13 + $0x140] sm:$0xff]  ;;  %v1359_v35 = vmul.f32 0.2, %v1295_v11  ;;  %v1328_v48 = vmul.f32 0.2, %v1264_v21 }
  0x3d   : > { %v1487_v37 = vsub.f32 1.0, %v1423_v12  ;;  %v5303_v11 = vmul.f32 %v1457_v9, %v1329_v4 }
  0x3f   : > { %v5311_v21 = vmul.f32 %v1487_v37, %v1359_v35 }
  0x41   : > { %4821 = vmatmul.mubr.msk.bf16.gmra.mrb[20].mxu0 %vm865_vm1, %v4936_v25  ;;  %4853 = vmatmul.mubr.msk.bf16.gmra.mrb[20].mxu1 %vm865_vm1, %v4937_v26  ;;  %v1483_v25 = vsub.f32 1.0, %v1419_v10  ;;  %v1262_v26 = vld [vmem:[%s5166_s25 + $0x38] sm:$0xff]  ;;  %v1361_v10 = vmul.f32 0.2, %v1297_v56 }
  0x42   : > { %4824 = vmatprep.mubr.msk.bf16.mxu0 %vm865_vm1, %v4938_v27  ;;  %4856 = vmatprep.mubr.msk.bf16.mxu1 %vm865_vm1, %v4939_v28  ;;  %v1390_v27 = vld [vmem:[%s5172_s13 + $0x38] sm:$0xff] }
  0x43   : > { %v1294_v28 = vld [vmem:[%s5166_s25 + $0x138] sm:$0xff]  ;;  %v5260_v0 = vmul.f32 %v1483_v25, %v1355_v24  ;;  %v1392_v24 = vld [vmem:[%s5172_s13 + $0x48] sm:$0xff]  ;;  %v3801_v25 = vmul.f32 0.2, %v3785_v2  ;;  %v1493_v2 = vsub.f32 1.0, %v1429_v45 }
  0x44   : > { %v1358_v38 = vmul.f32 0.2, %v1294_v28  ;;  %v3793_v28 = vld [vmem:[%s5206_s20 + $0x40] sm:$0xff]  ;;  %v1456_v49 = vsub.f32 1.0, %v1392_v24 }
  0x45   : > { %v3809_v54 = vmul.f32 0.2, %v3793_v28 }
  0x46   : > { %v5268_v8 = vmul.f32 %v1486_v39, %v1358_v38  ;;  %v1330_v38 = vmul.f32 0.2, %v1266_v13  ;;  %v1458_v39 = vsub.f32 1.0, %v1394_v14 }
  0x48   : > { %v5313_v28 = vmul.f32 %v1458_v39, %v1330_v38  ;;  %v5336_v39 = vld [vmem:[%s5172_s13 + $0x160] sm:$0xff] }
  0x49   : > { %4825 = vmatmul.mubr.msk.bf16.gmra.mrb[24].mxu0 %vm865_vm1, %v4940_v29  ;;  %4857 = vmatmul.mubr.msk.bf16.gmra.mrb[24].mxu1 %vm865_vm1, %v4941_v30  ;;  %v5222_v29 = vmul.f32 %v1479_v53, %v1351_v52  ;;  %v5224_v30 = vmul.f32 %v1450_v61, %v1322_v57  ;;  %v5252_v57 = vmul.f32 %v1451_v20, %v1323_v19  ;;  %v5255_v61 = vld [vmem:[%s5172_s13 + $0x150] sm:$0xff]  ;;  %v1298_v19 = vld [vmem:[%s5166_s25 + $0x158] sm:$0xff] }
  0x4a   : > { %4828 = vmatprep.mubr.msk.bf16.mxu0 %vm865_vm1, %v4942_v31  ;;  %4860 = vmatprep.mubr.msk.bf16.mxu1 %vm865_vm1, %v4943_v32  ;;  %v1326_v31 = vmul.f32 0.2, %v1262_v26  ;;  %v1454_v32 = vsub.f32 1.0, %v1390_v27  ;;  %v1489_v17 = vsub.f32 1.0, %v5255_v61  ;;  %v1426_v20 = vld [vmem:[%s5172_s13 + $0x158] sm:$0xff]  ;;  %v3833_v26 = vsub.f32 1.0, %v3817_v3 }
  0x4b   : > { %v5284_v27 = vmul.f32 %v1484_v60, %v1356_v59  ;;  %v1362_v46 = vmul.f32 0.2, %v1298_v19  ;;  %v1490_v47 = vsub.f32 1.0, %v1426_v20  ;;  %v1333_v60 = vmul.f32 0.2, %v1269_v40  ;;  %7495 = vst [vmem:[#allocation9_spill] sm:$0xff] %v5336_v39 }
  0x4c   : > { %v5266_v7 = vmul.f32 %v1454_v32, %v1326_v31  ;;  %v3825_v31 = vld [vmem:[%s5212_s24 + $0x40] sm:$0xff]  ;;  %v1455_v32 = vsub.f32 1.0, %v1391_v6  ;;  %v1461_v61 = vsub.f32 1.0, %v1397_v41  ;;  %v5301_v6 = vmul.f32 %v3842_v1, %v3810_v58 }
  0x4d   : > { %v3841_v55 = vsub.f32 1.0, %v3825_v31  ;;  %v5299_v3 = vld [vmem:[%s7420_s2] ss:$0 sm:$0xff]  ;;  %v5305_v14 = vmul.f32 %v3833_v26, %v3801_v25  ;;  %v5307_v19 = vmul.f32 %v1489_v17, %v1361_v10  ;;  %v5315_v31 = vmul.f32 %v1490_v47, %v1362_v46 }
  0x4e   : > { %v5309_v20 = vmul.f32 %v1455_v32, %v1327_v18  ;;  %v5317_v58 = vmul.f32 %v1456_v49, %v1328_v48  ;;  %v5324_v17 = vmul.f32 %v1461_v61, %v1333_v60  ;;  %v5326_v18 = vmul.f32 %v1493_v2, %v1365_v62  ;;  %v1299_v26 = vld [vmem:[%s5166_s25 + $0x160] sm:$0xff] }
  0x4f   : > { %v5322_v10 = vmul.f32 %v3841_v55, %v3809_v54  ;;  %v5333_v38 = vmul.f32 0.2, %v1299_v26 }
  0x50   : > { %7488 = vst [vmem:[#allocation2_spill] sm:$0xff] %v5317_v58  ;;  %7491 = vst [vmem:[#allocation5_spill] sm:$0xff] %v5324_v17 }
  0x51   : > { %4829 = vmatmul.mubr.msk.bf16.gmra.mrb[28].mxu0 %vm865_vm1, %v4944_v33  ;;  %4861 = vmatmul.mubr.msk.bf16.gmra.mrb[28].mxu1 %vm865_vm1, %v4945_v34  ;;  %v3786_v33 = vld [vmem:[%s5206_s20 + $0x8] sm:$0xff]  ;;  %7490 = vst [vmem:[#allocation4_spill] sm:$0xff] %v5322_v10  ;;  %7492 = vst [vmem:[#allocation6_spill] sm:$0xff] %v5326_v18  ;;  %vm3995_vm1 = vcmask 1042434  }
  0x52   : > { %v3818_v34 = vld [vmem:[%s5212_s24 + $0x8] sm:$0xff]  ;;  %v3802_v52 = vmul.f32 0.2, %v3786_v33  ;;  %7494 = vst [vmem:[#allocation8_spill] sm:$0xff] %v5333_v38 }
  0x53   : > { %v3834_v53 = vsub.f32 1.0, %v3818_v34  ;;  %v1296_v33 = vld [vmem:[%s5166_s25 + $0x148] sm:$0xff] }
  0x54   : > { %v1424_v34 = vld [vmem:[%s5172_s13 + $0x148] sm:$0xff]  ;;  %v1360_v56 = vmul.f32 0.2, %v1296_v33 }
  0x55   : > { %v5275_v15 = vmul.f32 %v3834_v53, %v3802_v52  ;;  %v1267_v52 = vld [vmem:[%s5166_s25 + $0x60] sm:$0xff]  ;;  %v1488_v59 = vsub.f32 1.0, %v1424_v34 }
  0x56   : > { %v1395_v53 = vld [vmem:[%s5172_s13 + $0x60] sm:$0xff]  ;;  %v1331_v12 = vmul.f32 0.2, %v1267_v52 }
  0x57   : > { %v1459_v13 = vsub.f32 1.0, %v1395_v53  ;;  %v5319_v1 = vmul.f32 %v1488_v59, %v1360_v56 }
  0x59   : > { %7489 = vst [vmem:[#allocation3_spill] sm:$0xff] %v5319_v1  ;;  %v5331_v37 = vmul.f32 %v1459_v13, %v1331_v12 }
  0x5b   : > { %7493 = vst [vmem:[#allocation7_spill] sm:$0xff] %v5331_v37 }
  0xec   : > { %v4802_v24 = vpop.f32.mrb[0].mxu0  ;;  %v4834_v9 = vpop.f32.mrb[0].mxu1 }
  0xed   : > { %v1009_v4 = vadd.f32 %v4802_v24, %v5299_v3  ;;  %v1000_v25 = vpop.f32.mrb[1].mxu0  ;;  %v1137_v32 = vadd.f32 %v4834_v9, %v5299_v3  ;;  %v1128_v34 = vpop.f32.mrb[1].mxu1 }
  0xee   : > { %v1001_v33 = vadd.f32 %v5299_v3, %v1000_v25  ;;  %v4803_v35 = vpop.f32.mrb[2].mxu0  ;;  %v1129_v41 = vadd.f32 %v5299_v3, %v1128_v34  ;;  %v4835_v45 = vpop.f32.mrb[2].mxu1 }
  0xef   : > { %v5339_v40 = vadd.f32 %v5196_v5, %v1009_v4  ;;  %v1012_v42 = vadd.f32 %v4803_v35, %v5299_v3  ;;  %v1003_v46 = vpop.f32.mrb[3].mxu0  ;;  %v5345_v48 = vadd.f32 %v5215_v22, %v1137_v32  ;;  %v1140_v52 = vadd.f32 %v4835_v45, %v5299_v3  ;;  %v1131_v5 = vpop.f32.mrb[3].mxu1 }
  0xf0   : > { %v5348_v49 = vadd.f32 %v5217_v23, %v1001_v33  ;;  %v1004_v53 = vadd.f32 %v5299_v3, %v1003_v46  ;;  %v5354_v54 = vadd.f32 %v5222_v29, %v1129_v41  ;;  %v1132_v56 = vadd.f32 %v5299_v3, %v1131_v5 }
  0xf1   : > { %7496 = vst [vmem:[#allocation10_spill] sm:$0xff] %v5339_v40  ;;  %7497 = vst [vmem:[#allocation11_spill] sm:$0xff] %v5345_v48  ;;  %vm1641_vm3 = vcmp.gt.f32.partialorder %v5339_v40, 0.5  ;;  %v5357_v55 = vadd.f32 %v5224_v30, %v1012_v42  ;;  %v7437_v22 = vmov 0.0   ;;  %vm1673_vm4 = vcmp.gt.f32.partialorder %v5345_v48, 0.5 }
  0xf2   : > { %7498 = vst [vmem:[#allocation12_spill] sm:$0xff] %v5348_v49  ;;  %7499 = vst [vmem:[#allocation13_spill] sm:$0xff] %v5354_v54  ;;  %v5361_v59 = vsel %vm1641_vm3, 1.0, %v7437_v22  ;;  %vm1639_vm5 = vcmp.gt.f32.partialorder %v5348_v49, 0.5  ;;  %v5366_v23 = vadd.f32 %v5229_v36, %v1140_v52  ;;  %v5371_v60 = vsel %vm1673_vm4, 1.0, %v7437_v22 }
  0xf3   : > { %7500 = vst [vmem:[#allocation14_spill] sm:$0xff] %v5357_v55  ;;  %7501 = vst [vmem:[#allocation15_spill] sm:$0xff] %v5361_v59  ;;  %v1966_v29 = vsel %vm1831_vm2, %v5361_v59, 0.0  ;;  %v5374_v30 = vsel %vm1639_vm5, 1.0, %v7437_v22  ;;  %vm1671_vm6 = vcmp.gt.f32.partialorder %v5354_v54, 0.5  ;;  %v2014_v61 = vsel %vm1831_vm2, %v5371_v60, 0.0 }
  0xf4   : > { %7502 = vst [vmem:[#allocation16_spill] sm:$0xff] %v5366_v23  ;;  %7503 = vst [vmem:[#allocation17_spill] sm:$0xff] %v5371_v60  ;;  %v1960_v62 = vsel %vm1831_vm2, %v5374_v30, 0.0  ;;  %v5382_v36 = vsel %vm1671_vm6, 1.0, %v7437_v22  ;;  %vm1642_vm7 = vcmp.gt.f32.partialorder %v5357_v55, 0.5  ;;  %v4806_v2 = vpop.f32.mrb[4].mxu0  ;;  %v5392_v24 = vadd.f32 %v5234_v43, %v1004_v53 }
  0xf5   : > { %7504 = vst [vmem:[#allocation18_spill] sm:$0xff] %v5374_v30  ;;  %7505 = vst [vmem:[#allocation19_spill] sm:$0xff] %v5382_v36  ;;  %v2008_v12 = vsel %vm1831_vm2, %v5382_v36, 0.0  ;;  %v5388_v13 = vsel %vm1642_vm7, 1.0, %v7437_v22  ;;  %vm1674_vm8 = vcmp.gt.f32.partialorder %v5366_v23, 0.5  ;;  %v4838_v4 = vpop.f32.mrb[4].mxu1  ;;  %v5402_v32 = vadd.f32 %v5236_v44, %v1132_v56 }
  0xf6   : > { %7506 = vst [vmem:[#allocation20_spill] sm:$0xff] %v5388_v13  ;;  %7507 = vst [vmem:[#allocation21_spill] sm:$0xff] %v5392_v24  ;;  %v1016_v9 = vpop.f32.mrb[5].mxu0  ;;  %v5396_v25 = vsel %vm1831_vm2, %v5388_v13, 0.0  ;;  %v5399_v26 = vsel %vm1674_vm8, 1.0, %v7437_v22  ;;  %v1025_v33 = vadd.f32 %v4806_v2, %v5299_v3  ;;  %v1144_v34 = vpop.f32.mrb[5].mxu1  ;;  %v1153_v41 = vadd.f32 %v4838_v4, %v5299_v3 }
  0xf7   : > { %7508 = vst [vmem:[#allocation22_spill] sm:$0xff] %v5399_v26  ;;  %7509 = vst [vmem:[#allocation23_spill] sm:$0xff] %v5402_v32  ;;  %v4807_v35 = vpop.f32.mrb[6].mxu0  ;;  %v5407_v43 = vsel %vm1831_vm2, %v5399_v26, 0.0  ;;  %vm1640_vm10 = vcmp.gt.f32.partialorder %v5392_v24, 0.5  ;;  %v1017_v42 = vadd.f32 %v5299_v3, %v1016_v9  ;;  %v4839_v45 = vpop.f32.mrb[6].mxu1  ;;  %v1145_v53 = vadd.f32 %v5299_v3, %v1144_v34 }
  0xf8   : > { %v5412_v46 = vpop.f32.mrb[7].mxu0  ;;  %v5415_v44 = vsel %vm1640_vm10, 1.0, %v7437_v22  ;;  %vm1672_vm11 = vcmp.gt.f32.partialorder %v5402_v32, 0.5  ;;  %v5419_v52 = vadd.f32 %v5243_v50, %v1025_v33  ;;  %v5422_v5 = vpop.f32.mrb[7].mxu1  ;;  %v5432_v4 = vadd.f32 %v5245_v51, %v1153_v41 }
  0xf9   : > { %7510 = vst [vmem:[#allocation24_spill] sm:$0xff] %v5415_v44  ;;  %v5426_v56 = vsel %vm1831_vm2, %v5415_v44, 0.0  ;;  %v5429_v2 = vsel %vm1672_vm11, 1.0, %v7437_v22  ;;  %v5435_v9 = vadd.f32 %v5252_v57, %v1017_v42  ;;  %v5443_v33 = vadd.f32 %v5260_v0, %v1145_v53 }
  0xfa   : > { %7511 = vst [vmem:[#allocation25_spill] sm:$0xff] %v5419_v52  ;;  %7512 = vst [vmem:[#allocation26_spill] sm:$0xff] %v5429_v2  ;;  %v5439_v50 = vsel %vm1831_vm2, %v5429_v2, 0.0  ;;  %vm1645_vm12 = vcmp.gt.f32.partialorder %v5419_v52, 0.5  ;;  %v1028_v34 = vadd.f32 %v4807_v35, %v5299_v3  ;;  %vm1677_vm13 = vcmp.gt.f32.partialorder %v5432_v4, 0.5 }
  0xfb   : > { %7513 = vst [vmem:[#allocation27_spill] sm:$0xff] %v5432_v4  ;;  %7514 = vst [vmem:[#allocation28_spill] sm:$0xff] %v5435_v9  ;;  %v5447_v47 = vsel %vm1645_vm12, 1.0, %v7437_v22  ;;  %vm1643_vm14 = vcmp.gt.f32.partialorder %v5435_v9, 0.5  ;;  %v1156_v51 = vadd.f32 %v4839_v45, %v5299_v3  ;;  %v5455_v41 = vsel %vm1677_vm13, 1.0, %v7437_v22 }
  0xfc   : > { %7515 = vst [vmem:[#allocation29_spill] sm:$0xff] %v5443_v33  ;;  %7516 = vst [vmem:[#allocation30_spill] sm:$0xff] %v5447_v47  ;;  %v1967_v57 = vsel %vm1831_vm2, %v5447_v47, 0.0  ;;  %v5458_v0 = vsel %vm1643_vm14, 1.0, %v7437_v22  ;;  %vm1675_vm15 = vcmp.gt.f32.partialorder %v5443_v33, 0.5  ;;  %v5461_v35 = vpop.f32.mrb[8].mxu0 }
  0xfd   : > { %7517 = vst [vmem:[#allocation31_spill] sm:$0xff] %v5455_v41  ;;  %7518 = vst [vmem:[#allocation32_spill] sm:$0xff] %v5458_v0  ;;  %v1968_v42 = vadd.f32 %v1967_v57, %v1966_v29  ;;  %v2015_v53 = vsel %vm1831_vm2, %v5455_v41, 0.0  ;;  %v1961_v45 = vsel %vm1831_vm2, %v5458_v0, 0.0  ;;  %v5468_v26 = vsel %vm1675_vm15, 1.0, %v7437_v22  ;;  %v5470_v60 = vpop.f32.mrb[8].mxu1 }
  0xfe   : > { %7519 = vst [vmem:[#allocation33_spill] sm:$0xff] %v5468_v26  ;;  %v5472_v2 = vpop.f32.mrb[9].mxu0  ;;  %v2016_v36 = vadd.f32 %v2015_v53, %v2014_v61  ;;  %v5474_v47 = vadd.f32 %v1961_v45, %v1960_v62  ;;  %v2009_v13 = vsel %vm1831_vm2, %v5468_v26, 0.0  ;;  %v5479_v29 = vadd.f32 %v5266_v7, %v1028_v34  ;;  %v5481_v57 = vpop.f32.mrb[9].mxu1 }
  0xff   : > { %v5483_v41 = vpop.f32.mrb[10].mxu0  ;;  %v2122_v0 = vcombine.high %v1968_v42, %v1968_v42  ;;  %v2129_v22 = vrot.slane %v1968_v42, %v5258_v63  ;;  %v5486_v59 = vadd.f32 %v2009_v13, %v2008_v12  ;;  %v5489_v44 = vadd.f32 %v5268_v8, %v1156_v51  ;;  %v5491_v61 = vpop.f32.mrb[10].mxu1 }
 0x100   : > { %v5493_v62 = vpop.f32.mrb[11].mxu0  ;;  %v2394_v53 = vcombine.high %v2016_v36, %v2016_v36  ;;  %v2401_v7 = vrot.slane %v2016_v36, %v5258_v63  ;;  %v5500_v45 = vrot.slane %v5474_v47, %v5258_v63  ;;  %v5502_v42 = vpop.f32.mrb[11].mxu1  ;;  %vm1646_vm3 = vcmp.gt.f32.partialorder %v5479_v29, 0.5 }
 0x101   : > { %7520 = vst [vmem:[#allocation34_spill] sm:$0xff] %v5489_v44  ;;  %7521 = vst [vmem:[#allocation35_spill] sm:$0xff] %v5493_v62  ;;  %v2136_v12 = vrot.slane %v2122_v0, %v5258_v63  ;;  %v2137_v8 = vcombine.high %v2129_v22, %v2129_v22  ;;  %v2817_v13 = vsel %vm2760_vm9, %v2129_v22, 0.0  ;;  %vm3997_vm4 = vcmask 1043459  }
 0x102   : > { %7522 = vst [vmem:[#allocation36_spill] sm:$0xff] %v5502_v42  ;;  %v2818_v26 = vrot.slane %v2817_v13, 4  ;;  %v2408_v36 = vrot.slane %v2394_v53, %v5258_v63  ;;  %v2409_v30 = vcombine.high %v2401_v7, %v2401_v7  ;;  %v3265_v34 = vsel %vm2760_vm9, %v2401_v7, 0.0 }
 0x103   : > { %v2138_v4 = vcombine.high %v2136_v12, %v2136_v12  ;;  %v2824_v33 = vsel %vm2760_vm9, %v2137_v8, 0.0  ;;  %v2831_v23 = vsel %vm2760_vm9, %v2136_v12, 0.0  ;;  %v3266_v48 = vrot.slane %v3265_v34, 4 }
 0x104   : > { %v2819_v32 = vadd.f32 %v2818_v26, %v2817_v13  ;;  %v2825_v0 = vrot.slane %v2824_v33, 4  ;;  %v2832_v54 = vrot.slane %v2831_v23, 4  ;;  %v2410_v52 = vcombine.high %v2408_v36, %v2408_v36  ;;  %v5512_v22 = vpop.f32.mrb[12].mxu0  ;;  %v5517_v7 = vpop.f32.mrb[12].mxu1 }
 0x105   : > { %7523 = vst [vmem:[#allocation37_spill] sm:$0xff] %v5512_v22  ;;  %v2838_v51 = vsel %vm2760_vm9, %v2138_v4, 0.0  ;;  %v3267_v9 = vadd.f32 %v3266_v48, %v3265_v34  ;;  %v3272_v53 = vsel %vm2760_vm9, %v2409_v30, 0.0  ;;  %v3279_v55 = vsel %vm2760_vm9, %v2408_v36, 0.0  ;;  %7524 = vst [vmem:[#allocation38_spill] sm:$0xff] %v5517_v7  ;;  %v5519_v40 = vpop.f32.mrb[13].mxu0 }
 0x106   : > { %7525 = vst [vmem:[#allocation39_spill] sm:$0xff] %v5519_v40  ;;  %v2820_v8 = vrot.slane %v2819_v32, 2  ;;  %v2826_v12 = vadd.f32 %v2825_v0, %v2824_v33  ;;  %v2833_v24 = vadd.f32 %v2832_v54, %v2831_v23  ;;  %v2839_v26 = vrot.slane %v2838_v51, 4  ;;  %v5521_v13 = vpop.f32.mrb[13].mxu1  ;;  %v5523_v49 = vpop.f32.mrb[14].mxu0 }
 0x107   : > { %7526 = vst [vmem:[#allocation40_spill] sm:$0xff] %v5521_v13  ;;  %7527 = vst [vmem:[#allocation41_spill] sm:$0xff] %v5523_v49  ;;  %v3268_v39 = vrot.slane %v3267_v9, 2  ;;  %v3273_v4 = vrot.slane %v3272_v53, 4  ;;  %v3280_v48 = vrot.slane %v3279_v55, 4  ;;  %v3286_v30 = vsel %vm2760_vm9, %v2410_v52, 0.0 }
 0x108   : > { %v2821_v34 = vadd.f32 %v2820_v8, %v2819_v32  ;;  %v2827_v36 = vrot.slane %v2826_v12, 2  ;;  %v2834_v38 = vrot.slane %v2833_v24, 2  ;;  %v2840_v37 = vadd.f32 %v2839_v26, %v2838_v51  ;;  %v5526_v18 = vpop.f32.mrb[14].mxu1 }
 0x109   : > { %7528 = vst [vmem:[#allocation42_spill] sm:$0xff] %v5526_v18  ;;  %v3269_v33 = vadd.f32 %v3268_v39, %v3267_v9  ;;  %v3274_v54 = vadd.f32 %v3273_v4, %v3272_v53  ;;  %v3281_v23 = vadd.f32 %v3280_v48, %v3279_v55  ;;  %v3287_v0 = vrot.slane %v3286_v30, 4 }
 0x10a   : > { %v2822_v13 = vrot.slane %v2821_v34, 1  ;;  %v2828_v10 = vadd.f32 %v2827_v36, %v2826_v12  ;;  %v2835_v49 = vadd.f32 %v2834_v38, %v2833_v24  ;;  %v2841_v40 = vrot.slane %v2840_v37, 2 }
 0x10b   : > { %v3270_v7 = vrot.slane %v3269_v33, 1  ;;  %v3275_v17 = vrot.slane %v3274_v54, 2  ;;  %v3282_v1 = vrot.slane %v3281_v23, 2  ;;  %v3288_v58 = vadd.f32 %v3287_v0, %v3286_v30 }
 0x10c   : > { %v2823_v52 = vadd.f32 %v2822_v13, %v2821_v34  ;;  %v2829_v32 = vrot.slane %v2828_v10, 1  ;;  %v2836_v8 = vrot.slane %v2835_v49, 1  ;;  %v2842_v22 = vadd.f32 %v2841_v40, %v2840_v37 }
 0x10d   : > { %v3271_v51 = vadd.f32 %v3270_v7, %v3269_v33  ;;  %v3276_v26 = vadd.f32 %v3275_v17, %v3274_v54  ;;  %v3283_v42 = vadd.f32 %v3282_v1, %v3281_v23  ;;  %v3289_v18 = vrot.slane %v3288_v58, 2 }
 0x10e   : > { %v2830_v39 = vadd.f32 %v2829_v32, %v2828_v10  ;;  %v2837_v9 = vadd.f32 %v2836_v8, %v2835_v49  ;;  %v2843_v55 = vrot.slane %v2842_v22, 1  ;;  %v3665_v53 = vmul.f32 0.25, %v2823_v52 }
 0x10f   : > { %v3277_v4 = vrot.slane %v3276_v26, 1  ;;  %v3284_v12 = vrot.slane %v3283_v42, 1  ;;  %v3290_v38 = vadd.f32 %v3289_v18, %v3288_v58  ;;  %v3729_v24 = vmul.f32 0.25, %v3271_v51 }
 0x110   : > { %v2844_v48 = vadd.f32 %v2843_v55, %v2842_v22  ;;  %v3666_v36 = vmul.f32 0.25, %v2830_v39  ;;  %v3667_v62 = vmul.f32 0.25, %v2837_v9  ;;  %v7529_v13 = vcombine.high %v5474_v47, %v5474_v47 }
 0x111   : > { %v3278_v40 = vadd.f32 %v3277_v4, %v3276_v26  ;;  %v3285_v17 = vadd.f32 %v3284_v12, %v3283_v42  ;;  %v3291_v1 = vrot.slane %v3290_v38, 1  ;;  %v2103_v10 = vcombine.high %v5500_v45, %v5500_v45 }
 0x112   : > { %v2102_v37 = vrot.slane %v7529_v13, %v5258_v63  ;;  %v5534_v49 = vmul.f32 0.25, %v2844_v48  ;;  %v4007_v7 = vsel %vm3993_vm0, %v3666_v36, %v3665_v53  ;;  %v2761_v18 = vsel %vm2760_vm9, %v5500_v45, 0.0  ;;  %v5548_v45 = vpop.f32.mrb[15].mxu0 }
 0x113   : > { %v5540_v22 = vsel %vm3995_vm1, %v3667_v62, %v4007_v7  ;;  %v3292_v30 = vadd.f32 %v3291_v1, %v3290_v38  ;;  %v3730_v47 = vmul.f32 0.25, %v3278_v40  ;;  %v3731_v34 = vmul.f32 0.25, %v3285_v17  ;;  %7530 = vst [vmem:[#allocation43_spill] sm:$0xff] %v5548_v45 }
 0x114   : > { %v2104_v58 = vcombine.high %v2102_v37, %v2102_v37  ;;  %v2762_v33 = vrot.slane %v2761_v18, 4  ;;  %v2768_v42 = vsel %vm2760_vm9, %v2103_v10, 0.0  ;;  %v2775_v54 = vsel %vm2760_vm9, %v2102_v37, 0.0 }
 0x115   : > { %v5545_v0 = vmul.f32 0.25, %v3292_v30  ;;  %v4063_v52 = vsel %vm3993_vm0, %v3730_v47, %v3729_v24  ;;  %v2769_v32 = vrot.slane %v2768_v42, 4  ;;  %v2776_v8 = vrot.slane %v2775_v54, 4 }
 0x116   : > { %v2782_v23 = vsel %vm2760_vm9, %v2104_v58, 0.0  ;;  %v5551_v62 = vsel %vm3995_vm1, %v3731_v34, %v4063_v52  ;;  %v2763_v51 = vadd.f32 %v2762_v33, %v2761_v18  ;;  %v2367_v39 = vrot.slane %v5486_v59, %v5258_v63 }
 0x117   : > { %v2783_v26 = vrot.slane %v2782_v23, 4  ;;  %v2770_v9 = vadd.f32 %v2769_v32, %v2768_v42  ;;  %v2777_v55 = vadd.f32 %v2776_v8, %v2775_v54  ;;  %v7531_v53 = vcombine.high %v5486_v59, %v5486_v59 }
 0x118   : > { %v2764_v12 = vrot.slane %v2763_v51, 2  ;;  %v2375_v24 = vcombine.high %v2367_v39, %v2367_v39  ;;  %v3209_v48 = vsel %vm2760_vm9, %v2367_v39, 0.0  ;;  %vm1678_vm5 = vcmp.gt.f32.partialorder %v5489_v44, 0.5 }
 0x119   : > { %v2374_v4 = vrot.slane %v7531_v53, %v5258_v63  ;;  %v2784_v38 = vadd.f32 %v2783_v26, %v2782_v23  ;;  %v2771_v36 = vrot.slane %v2770_v9, 2  ;;  %v2778_v13 = vrot.slane %v2777_v55, 2 }
 0x11a   : > { %v3210_v40 = vrot.slane %v3209_v48, 4  ;;  %v2765_v17 = vadd.f32 %v2764_v12, %v2763_v51  ;;  %v3216_v10 = vsel %vm2760_vm9, %v2375_v24, 0.0  ;;  %vm3999_vm7 = vcmask 1044484  }
 0x11b   : > { %v2376_v37 = vcombine.high %v2374_v4, %v2374_v4  ;;  %v2785_v1 = vrot.slane %v2784_v38, 2  ;;  %v3223_v7 = vsel %vm2760_vm9, %v2374_v4, 0.0  ;;  %v2772_v59 = vadd.f32 %v2771_v36, %v2770_v9 }
 0x11c   : > { %v2779_v58 = vadd.f32 %v2778_v13, %v2777_v55  ;;  %v3211_v18 = vadd.f32 %v3210_v40, %v3209_v48  ;;  %v3217_v30 = vrot.slane %v3216_v10, 4  ;;  %v2766_v47 = vrot.slane %v2765_v17, 1 }
 0x11d   : > { %v2786_v34 = vadd.f32 %v2785_v1, %v2784_v38  ;;  %v3224_v33 = vrot.slane %v3223_v7, 4  ;;  %v3230_v42 = vsel %vm2760_vm9, %v2376_v37, 0.0  ;;  %v2773_v54 = vrot.slane %v2772_v59, 1 }
 0x11e   : > { %v2780_v23 = vrot.slane %v2779_v58, 1  ;;  %v3212_v52 = vrot.slane %v3211_v18, 2  ;;  %v3218_v32 = vadd.f32 %v3217_v30, %v3216_v10  ;;  %v2767_v8 = vadd.f32 %v2766_v47, %v2765_v17 }
 0x11f   : > { %v2787_v51 = vrot.slane %v2786_v34, 1  ;;  %v3225_v26 = vadd.f32 %v3224_v33, %v3223_v7  ;;  %v3231_v39 = vrot.slane %v3230_v42, 4  ;;  %v2774_v53 = vadd.f32 %v2773_v54, %v2772_v59  ;;  %v5578_v54 = vpop.f32.mrb[15].mxu1 }
 0x120   : > { %v2781_v4 = vadd.f32 %v2780_v23, %v2779_v58  ;;  %v3213_v12 = vadd.f32 %v3212_v52, %v3211_v18  ;;  %v3219_v9 = vrot.slane %v3218_v32, 2  ;;  %v3657_v24 = vmul.f32 0.25, %v2767_v8 }
 0x121   : > { %v2788_v55 = vadd.f32 %v2787_v51, %v2786_v34  ;;  %v3226_v48 = vrot.slane %v3225_v26, 2  ;;  %v3232_v36 = vadd.f32 %v3231_v39, %v3230_v42  ;;  %v3658_v38 = vmul.f32 0.25, %v2774_v53 }
 0x122   : > { %v3659_v13 = vmul.f32 0.25, %v2781_v4  ;;  %v3214_v40 = vrot.slane %v3213_v12, 1  ;;  %v3220_v37 = vadd.f32 %v3219_v9, %v3218_v32  ;;  %v7532_v17 = vmov 0.0  }
 0x123   : > { %v5564_v1 = vmul.f32 0.25, %v2788_v55  ;;  %v3227_v45 = vadd.f32 %v3226_v48, %v3225_v26  ;;  %v3233_v10 = vrot.slane %v3232_v36, 2  ;;  %v5569_v7 = vsel %vm1646_vm3, 1.0, %v7532_v17 }
 0x124   : > { %7533 = vst [vmem:[#allocation44_spill] sm:$0xff] %v5569_v7  ;;  %v3994_v59 = vsel %vm3993_vm0, %v3658_v38, %v3657_v24  ;;  %v3215_v58 = vadd.f32 %v3214_v40, %v3213_v12  ;;  %v3221_v18 = vrot.slane %v3220_v37, 1  ;;  %v1970_v30 = vsel %vm1831_vm2, %v5569_v7, 0.0 }
 0x125   : > { %v5575_v47 = vsel %vm3995_vm1, %v3659_v13, %v3994_v59  ;;  %v3228_v34 = vrot.slane %v3227_v45, 1  ;;  %v3234_v33 = vadd.f32 %v3233_v10, %v3232_v36  ;;  %v1971_v42 = vadd.f32 %v1970_v30, %v5396_v25 }
 0x126   : > { %v3222_v23 = vadd.f32 %v3221_v18, %v3220_v37  ;;  %v3721_v52 = vmul.f32 0.25, %v3215_v58  ;;  %v5583_v32 = vsel %vm3997_vm4, %v5534_v49, %v5540_v22  ;;  %v5588_v4 = vsel %vm1678_vm5, 1.0, %v7532_v17 }
 0x127   : > { %v3229_v8 = vadd.f32 %v3228_v34, %v3227_v45  ;;  %v3235_v51 = vrot.slane %v3234_v33, 1  ;;  %v2139_v26 = vcombine.high %v1971_v42, %v1971_v42  ;;  %v2146_v39 = vrot.slane %v1971_v42, %v5258_v63  ;;  %7534 = vst [vmem:[#allocation45_spill] sm:$0xff] %v5588_v4 }
 0x128   : > { %v3722_v53 = vmul.f32 0.25, %v3222_v23  ;;  %v5593_v25 = vsel %vm3997_vm4, %v5545_v0, %v5551_v62  ;;  %v1020_v49 = vadd.f32 %v5299_v3, %v5412_v46  ;;  %v2018_v48 = vsel %vm1831_vm2, %v5588_v4, 0.0 }
 0x129   : > { %v3236_v22 = vadd.f32 %v3235_v51, %v3234_v33  ;;  %v3723_v12 = vmul.f32 0.25, %v3229_v8  ;;  %v2153_v45 = vrot.slane %v2139_v26, %v5258_v63  ;;  %v2154_v9 = vcombine.high %v2146_v39, %v2146_v39 }
 0x12a   : > { %v4056_v55 = vsel %vm3993_vm0, %v3722_v53, %v3721_v52  ;;  %v2845_v24 = vsel %vm2760_vm9, %v2146_v39, 0.0  ;;  %v5603_v36 = vadd.f32 %v5277_v16, %v1020_v49  ;;  %v2019_v37 = vadd.f32 %v2018_v48, %v5407_v43 }
 0x12b   : > { %v5605_v0 = vmul.f32 0.25, %v3236_v22  ;;  %v5608_v62 = vsel %vm3995_vm1, %v3723_v12, %v4056_v55  ;;  %v2155_v46 = vcombine.high %v2153_v45, %v2153_v45  ;;  %v2846_v38 = vrot.slane %v2845_v24, 4 }
 0x12c   : > { %v2852_v13 = vsel %vm2760_vm9, %v2154_v9, 0.0  ;;  %v2859_v40 = vsel %vm2760_vm9, %v2153_v45, 0.0  ;;  %vm1644_vm6 = vcmp.gt.f32.partialorder %v5603_v36, 0.5  ;;  %v2411_v30 = vcombine.high %v2019_v37, %v2019_v37 }
 0x12d   : > { %v2847_v10 = vadd.f32 %v2846_v38, %v2845_v24  ;;  %v2853_v59 = vrot.slane %v2852_v13, 4  ;;  %v2860_v58 = vrot.slane %v2859_v40, 4  ;;  %v2866_v16 = vsel %vm2760_vm9, %v2155_v46, 0.0 }
 0x12e   : > { %v2867_v18 = vrot.slane %v2866_v16, 4  ;;  %v2418_v34 = vrot.slane %v2019_v37, %v5258_v63  ;;  %v5617_v33 = vsel %vm1644_vm6, 1.0, %v7532_v17  ;;  %vm4001_vm8 = vcmask 1045509  }
 0x12f   : > { %7535 = vst [vmem:[#allocation46_spill] sm:$0xff] %v5617_v33  ;;  %v2848_v42 = vrot.slane %v2847_v10, 2  ;;  %v2854_v23 = vadd.f32 %v2853_v59, %v2852_v13  ;;  %v2861_v52 = vadd.f32 %v2860_v58, %v2859_v40  ;;  %v1964_v43 = vsel %vm1831_vm2, %v5617_v33, 0.0 }
 0x130   : > { %v2868_v8 = vadd.f32 %v2867_v18, %v2866_v16  ;;  %v2425_v51 = vrot.slane %v2411_v30, %v5258_v63  ;;  %v2426_v26 = vcombine.high %v2418_v34, %v2418_v34  ;;  %v3293_v39 = vsel %vm2760_vm9, %v2418_v34, 0.0 }
 0x131   : > { %v2849_v53 = vadd.f32 %v2848_v42, %v2847_v10  ;;  %v2855_v49 = vrot.slane %v2854_v23, 2  ;;  %v2862_v22 = vrot.slane %v2861_v52, 2  ;;  %vm4003_vm10 = vcmask 1046534  }
 0x132   : > { %v3294_v12 = vrot.slane %v3293_v39, 4  ;;  %v2869_v45 = vrot.slane %v2868_v8, 2  ;;  %vm4005_vm11 = vcmask 1047559   ;;  %v2427_v9 = vcombine.high %v2425_v51, %v2425_v51 }
 0x133   : > { %v3300_v55 = vsel %vm2760_vm9, %v2426_v26, 0.0  ;;  %v3307_v24 = vsel %vm2760_vm9, %v2425_v51, 0.0  ;;  %v2850_v48 = vrot.slane %v2849_v53, 1  ;;  %v2856_v46 = vadd.f32 %v2855_v49, %v2854_v23  ;;  %v5626_v49 = vpop.f32.mrb[16].mxu0 }
 0x134   : > { %v2863_v38 = vadd.f32 %v2862_v22, %v2861_v52  ;;  %v3295_v13 = vadd.f32 %v3294_v12, %v3293_v39  ;;  %v2870_v40 = vadd.f32 %v2869_v45, %v2868_v8  ;;  %v3301_v37 = vrot.slane %v3300_v55, 4 }
 0x135   : > { %v3308_v59 = vrot.slane %v3307_v24, 4  ;;  %v3314_v10 = vsel %vm2760_vm9, %v2427_v9, 0.0  ;;  %v2851_v58 = vadd.f32 %v2850_v48, %v2849_v53  ;;  %v2857_v16 = vrot.slane %v2856_v46, 1 }
 0x136   : > { %v2864_v18 = vrot.slane %v2863_v38, 1  ;;  %v3296_v30 = vrot.slane %v3295_v13, 2  ;;  %v2871_v34 = vrot.slane %v2870_v40, 1  ;;  %v3302_v42 = vadd.f32 %v3301_v37, %v3300_v55 }
 0x137   : > { %v3309_v4 = vadd.f32 %v3308_v59, %v3307_v24  ;;  %v3315_v7 = vrot.slane %v3314_v10, 4  ;;  %v2858_v26 = vadd.f32 %v2857_v16, %v2856_v46  ;;  %v3669_v51 = vmul.f32 0.25, %v2851_v58 }
 0x138   : > { %v2865_v33 = vadd.f32 %v2864_v18, %v2863_v38  ;;  %v3297_v44 = vadd.f32 %v3296_v30, %v3295_v13  ;;  %v2872_v23 = vadd.f32 %v2871_v34, %v2870_v40  ;;  %v3303_v52 = vrot.slane %v3302_v42, 2  ;;  %v5643_v18 = vpop.f32.mrb[16].mxu1 }
 0x139   : > { %v3310_v39 = vrot.slane %v3309_v4, 2  ;;  %v3316_v8 = vadd.f32 %v3315_v7, %v3314_v10  ;;  %v3670_v22 = vmul.f32 0.25, %v2858_v26  ;;  %v4010_v53 = vsel %vm3999_vm7, %v3669_v51, %v5583_v32 }
 0x13a   : > { %v3671_v12 = vmul.f32 0.25, %v2865_v33  ;;  %v3298_v45 = vrot.slane %v3297_v44, 1  ;;  %v3672_v9 = vmul.f32 0.25, %v2872_v23  ;;  %v3304_v55 = vadd.f32 %v3303_v52, %v3302_v42 }
 0x13b   : > { %v3311_v24 = vadd.f32 %v3310_v39, %v3309_v4  ;;  %v3317_v48 = vrot.slane %v3316_v8, 2  ;;  %v4011_v46 = vsel %vm4001_vm8, %v3670_v22, %v4010_v53  ;;  %v1965_v13 = vadd.f32 %v1964_v43, %v5426_v56 }
 0x13c   : > { %v3299_v38 = vadd.f32 %v3298_v45, %v3297_v44  ;;  %v5635_v7 = vsel %vm3997_vm4, %v5564_v1, %v5575_v47  ;;  %v4012_v33 = vsel %vm4003_vm10, %v3671_v12, %v4011_v46  ;;  %v3305_v40 = vrot.slane %v3304_v55, 1 }
 0x13d   : > { %v3312_v37 = vrot.slane %v3311_v24, 1  ;;  %v3318_v32 = vadd.f32 %v3317_v48, %v3316_v8  ;;  %v4013_v59 = vsel %vm4005_vm11, %v3672_v9, %v4012_v33  ;;  %v2105_v4 = vcombine.high %v1965_v13, %v1965_v13 }
 0x13e   : > { %v3733_v10 = vmul.f32 0.25, %v3299_v38  ;;  %v2112_v58 = vrot.slane %v1965_v13, %v5258_v63  ;;  %v5641_v44 = vadd.f32 %v4013_v59, %v5275_v15  ;;  %v3306_v56 = vadd.f32 %v3305_v40, %v3304_v55 }
 0x13f   : > { %v3313_v43 = vadd.f32 %v3312_v37, %v3311_v24  ;;  %v3319_v16 = vrot.slane %v3318_v32, 1  ;;  %v2119_v47 = vrot.slane %v2105_v4, %v5258_v63  ;;  %v1148_v38 = vadd.f32 %v5299_v3, %v5422_v5 }
 0x140   : > { %7536 = vst [vmem:[#allocation47_spill] sm:$0xff] %v5641_v44  ;;  %v4066_v1 = vsel %vm3999_vm7, %v3733_v10, %v5593_v25  ;;  %v2120_v30 = vcombine.high %v2112_v58, %v2112_v58  ;;  %v2789_v34 = vsel %vm2760_vm9, %v2112_v58, 0.0  ;;  %vm4145_vm12 = vcmp.gt.f32.partialorder %v5641_v44, 0.5  ;;  %v5674_v58 = vpop.f32.mrb[17].mxu0 }
 0x141   : > { %v3320_v42 = vadd.f32 %v3319_v16, %v3318_v32  ;;  %v3734_v26 = vmul.f32 0.25, %v3306_v56  ;;  %v3735_v51 = vmul.f32 0.25, %v3313_v43  ;;  %v5651_v15 = vsel %vm4145_vm12, 1.0, %v7532_v17 }
 0x142   : > { %7537 = vst [vmem:[#allocation48_spill] sm:$0xff] %v5651_v15  ;;  %v2121_v23 = vcombine.high %v2119_v47, %v2119_v47  ;;  %v2790_v52 = vrot.slane %v2789_v34, 4  ;;  %v2796_v39 = vsel %vm2760_vm9, %v2120_v30, 0.0  ;;  %v2803_v12 = vsel %vm2760_vm9, %v2119_v47, 0.0 }
 0x143   : > { %v3736_v8 = vmul.f32 0.25, %v3320_v42  ;;  %v4067_v25 = vsel %vm4001_vm8, %v3734_v26, %v4066_v1  ;;  %v2797_v22 = vrot.slane %v2796_v39, 4  ;;  %v2804_v9 = vrot.slane %v2803_v12, 4  ;;  %v5694_v42 = vpop.f32.mrb[17].mxu1 }
 0x144   : > { %v4068_v53 = vsel %vm4003_vm10, %v3735_v51, %v4067_v25  ;;  %v2791_v45 = vadd.f32 %v2790_v52, %v2789_v34  ;;  %v2810_v55 = vsel %vm2760_vm9, %v2121_v23, 0.0  ;;  %v5667_v37 = vsel %vm3997_vm4, %v5605_v0, %v5608_v62 }
 0x145   : > { %v4069_v24 = vsel %vm4005_vm11, %v3736_v8, %v4068_v53  ;;  %v2798_v48 = vadd.f32 %v2797_v22, %v2796_v39  ;;  %v2811_v46 = vrot.slane %v2810_v55, 4  ;;  %v2805_v40 = vadd.f32 %v2804_v9, %v2803_v12  ;;  %v5710_v9 = vpop.f32.mrb[18].mxu0 }
 0x146   : > { %v5662_v13 = vadd.f32 %v4069_v24, %v5301_v6  ;;  %v2792_v33 = vrot.slane %v2791_v45, 2  ;;  %v5670_v10 = vadd.f32 %v5284_v27, %v1148_v38  ;;  %v1041_v4 = vadd.f32 %v5461_v35, %v5299_v3 }
 0x147   : > { %v2799_v32 = vrot.slane %v2798_v48, 2  ;;  %v2812_v59 = vadd.f32 %v2811_v46, %v2810_v55  ;;  %v2806_v5 = vrot.slane %v2805_v40, 2  ;;  %v1169_v56 = vadd.f32 %v5470_v60, %v5299_v3 }
 0x148   : > { %7538 = vst [vmem:[#allocation49_spill] sm:$0xff] %v5662_v13  ;;  %7539 = vst [vmem:[#allocation50_spill] sm:$0xff] %v5670_v10  ;;  %vm4153_vm13 = vcmp.gt.f32.partialorder %v5662_v13, 0.5  ;;  %v2793_v6 = vadd.f32 %v2792_v33, %v2791_v45  ;;  %vm1676_vm14 = vcmp.gt.f32.partialorder %v5670_v10, 0.5  ;;  %v5687_v1 = vadd.f32 %v5303_v11, %v1041_v4 }
 0x149   : > { %v5680_v0 = vsel %vm4153_vm13, 1.0, %v7532_v17  ;;  %v2800_v62 = vadd.f32 %v2799_v32, %v2798_v48  ;;  %v2813_v43 = vrot.slane %v2812_v59, 2  ;;  %v2807_v16 = vadd.f32 %v2806_v5, %v2805_v40 }
 0x14a   : > { %7540 = vst [vmem:[#allocation51_spill] sm:$0xff] %v5680_v0  ;;  %v2794_v27 = vrot.slane %v2793_v6, 1  ;;  %v5684_v35 = vsel %vm1676_vm14, 1.0, %v7532_v17  ;;  %v5692_v34 = vadd.f32 %v5307_v19, %v1169_v56  ;;  %vm1649_vm15 = vcmp.gt.f32.partialorder %v5687_v1, 0.5 }
 0x14b   : > { %7541 = vst [vmem:[#allocation52_spill] sm:$0xff] %v5684_v35  ;;  %v2801_v47 = vrot.slane %v2800_v62, 1  ;;  %v2814_v30 = vadd.f32 %v2813_v43, %v2812_v59  ;;  %v2012_v60 = vsel %vm1831_vm2, %v5684_v35, 0.0  ;;  %v2808_v51 = vrot.slane %v2807_v16, 1  ;;  %v5721_v59 = vpop.f32.mrb[18].mxu1 }
 0x14c   : > { %7542 = vst [vmem:[#allocation53_spill] sm:$0xff] %v5692_v34  ;;  %v2795_v26 = vadd.f32 %v2794_v27, %v2793_v6  ;;  %v2013_v23 = vadd.f32 %v2012_v60, %v5439_v50  ;;  %v5699_v11 = vsel %vm1649_vm15, 1.0, %v7532_v17  ;;  %vm1681_vm3 = vcmp.gt.f32.partialorder %v5692_v34, 0.5 }
 0x14d   : > { %v2802_v52 = vadd.f32 %v2801_v47, %v2800_v62  ;;  %v2815_v39 = vrot.slane %v2814_v30, 1  ;;  %7543 = vst [vmem:[#allocation54_spill] sm:$0xff] %v5699_v11  ;;  %v2809_v8 = vadd.f32 %v2808_v51, %v2807_v16  ;;  %v5705_v45 = vsel %vm1831_vm2, %v5699_v11, 0.0 }
 0x14e   : > { %v3661_v25 = vmul.f32 0.25, %v2795_v26  ;;  %v2377_v22 = vcombine.high %v2013_v23, %v2013_v23  ;;  %v2384_v19 = vrot.slane %v2013_v23, %v5258_v63  ;;  %v5708_v50 = vsel %vm1681_vm3, 1.0, %v7532_v17  ;;  %v5733_v26 = vpop.f32.mrb[19].mxu0 }
 0x14f   : > { %v2816_v12 = vadd.f32 %v2815_v39, %v2814_v30  ;;  %v3662_v53 = vmul.f32 0.25, %v2802_v52  ;;  %7544 = vst [vmem:[#allocation55_spill] sm:$0xff] %v5708_v50  ;;  %v3663_v55 = vmul.f32 0.25, %v2809_v8  ;;  %v5719_v32 = vsel %vm1831_vm2, %v5708_v50, 0.0  ;;  %v5740_v8 = vpop.f32.mrb[19].mxu1 }
 0x150   : > { %v4000_v24 = vsel %vm3999_vm7, %v3661_v25, %v5635_v7  ;;  %v2391_v48 = vrot.slane %v2377_v22, %v5258_v63  ;;  %v2392_v46 = vcombine.high %v2384_v19, %v2384_v19  ;;  %v3237_v40 = vsel %vm2760_vm9, %v2384_v19, 0.0 }
 0x151   : > { %v3664_v38 = vmul.f32 0.25, %v2816_v12  ;;  %v4002_v33 = vsel %vm4001_vm8, %v3662_v53, %v4000_v24  ;;  %v3238_v5 = vrot.slane %v3237_v40, 4  ;;  %v1033_v27 = vadd.f32 %v5299_v3, %v5472_v2 }
 0x152   : > { %v4004_v4 = vsel %vm4003_vm10, %v3663_v55, %v4002_v33  ;;  %v2393_v6 = vcombine.high %v2391_v48, %v2391_v48  ;;  %v3244_v7 = vsel %vm2760_vm9, %v2392_v46, 0.0  ;;  %v3251_v43 = vsel %vm2760_vm9, %v2391_v48, 0.0 }
 0x153   : > { %v4006_v56 = vsel %vm4005_vm11, %v3664_v38, %v4004_v4  ;;  %v3245_v62 = vrot.slane %v3244_v7, 4  ;;  %v3239_v47 = vadd.f32 %v3238_v5, %v3237_v40  ;;  %v3252_v30 = vrot.slane %v3251_v43, 4 }
 0x154   : > { %v5730_v16 = vadd.f32 %v4006_v56, %v5305_v14  ;;  %v3258_v60 = vsel %vm2760_vm9, %v2393_v6, 0.0  ;;  %v5736_v52 = vadd.f32 %v5309_v20, %v1033_v27  ;;  %v1161_v39 = vadd.f32 %v5299_v3, %v5481_v57  ;;  %v5783_v27 = vpop.f32.mrb[20].mxu0 }
 0x155   : > { %v3246_v51 = vadd.f32 %v3245_v62, %v3244_v7  ;;  %v3259_v23 = vrot.slane %v3258_v60, 4  ;;  %v3240_v14 = vrot.slane %v3239_v47, 2  ;;  %v3253_v2 = vadd.f32 %v3252_v30, %v3251_v43 }
 0x156   : > { %7545 = vst [vmem:[#allocation56_spill] sm:$0xff] %v5730_v16  ;;  %vm4144_vm5 = vcmp.gt.f32.partialorder %v5730_v16, 0.5  ;;  %v1044_v25 = vadd.f32 %v5483_v41, %v5299_v3  ;;  %vm1647_vm6 = vcmp.gt.f32.partialorder %v5736_v52, 0.5  ;;  %v5753_v55 = vadd.f32 %v5311_v21, %v1161_v39 }
 0x157   : > { %v5746_v22 = vsel %vm4144_vm5, 1.0, %v7532_v17  ;;  %v3247_v19 = vrot.slane %v3246_v51, 2  ;;  %v3260_v12 = vadd.f32 %v3259_v23, %v3258_v60  ;;  %v3241_v20 = vadd.f32 %v3240_v14, %v3239_v47  ;;  %v5785_v47 = vpop.f32.mrb[20].mxu1  ;;  %v7552_v23 = vld [vmem:[#allocation35_spill] sm:$0xff]  ;;  %v7553_v14 = vld [vmem:[#allocation36_spill] sm:$0xff] }
 0x158   : > { %7546 = vst [vmem:[#allocation57_spill] sm:$0xff] %v5746_v22  ;;  %v3254_v53 = vrot.slane %v3253_v2, 2  ;;  %v5750_v57 = vsel %vm1647_vm6, 1.0, %v7532_v17  ;;  %7548 = vst [vmem:[#allocation59_spill] sm:$0xff] %v5753_v55  ;;  %v5760_v46 = vadd.f32 %v5313_v28, %v1044_v25  ;;  %vm1679_vm12 = vcmp.gt.f32.partialorder %v5753_v55, 0.5 }
 0x159   : > { %7547 = vst [vmem:[#allocation58_spill] sm:$0xff] %v5750_v57  ;;  %v3248_v24 = vadd.f32 %v3247_v19, %v3246_v51  ;;  %v3261_v48 = vrot.slane %v3260_v12, 2  ;;  %v5757_v41 = vsel %vm1831_vm2, %v5750_v57, 0.0  ;;  %v3242_v38 = vrot.slane %v3241_v20, 1  ;;  %v5790_v51 = vld [vmem:[%s7420_s2] ss:$0 sm:$0xff] }
 0x15a   : > { %v3255_v33 = vadd.f32 %v3254_v53, %v3253_v2  ;;  %v1172_v40 = vadd.f32 %v5491_v61, %v5299_v3  ;;  %v5766_v21 = vsel %vm1679_vm12, 1.0, %v7532_v17  ;;  %vm1650_vm13 = vcmp.gt.f32.partialorder %v5760_v46, 0.5  ;;  %v7554_v19 = vld [vmem:[#allocation37_spill] sm:$0xff] }
 0x15b   : > { %v3249_v4 = vrot.slane %v3248_v24, 1  ;;  %v3262_v6 = vadd.f32 %v3261_v48, %v3260_v12  ;;  %7549 = vst [vmem:[#allocation60_spill] sm:$0xff] %v5766_v21  ;;  %v3243_v5 = vadd.f32 %v3242_v38, %v3241_v20  ;;  %v5771_v28 = vsel %vm1831_vm2, %v5766_v21, 0.0  ;;  %v5799_v20 = vpop.f32.mrb[21].mxu0  ;;  %v7556_v38 = vld [vmem:[#allocation2_spill] sm:$0xff] }
 0x15c   : > { %v3256_v7 = vrot.slane %v3255_v33, 1  ;;  %v5774_v56 = vsel %vm1650_vm13, 1.0, %v7532_v17  ;;  %v5781_v61 = vadd.f32 %v5315_v31, %v1172_v40  ;;  %v1036_v39 = vadd.f32 %v5790_v51, %v7552_v23 }
 0x15d   : > { %7550 = vst [vmem:[#allocation61_spill] sm:$0xff] %v5774_v56  ;;  %v3250_v62 = vadd.f32 %v3249_v4, %v3248_v24  ;;  %v3263_v43 = vrot.slane %v3262_v6, 1  ;;  %v5778_v3 = vsel %vm1831_vm2, %v5774_v56, 0.0  ;;  %v3725_v60 = vmul.f32 0.25, %v3243_v5  ;;  %v7557_v5 = vld [vmem:[#allocation3_spill] sm:$0xff] }
 0x15e   : > { %7551 = vst [vmem:[#allocation62_spill] sm:$0xff] %v5781_v61  ;;  %v3257_v30 = vadd.f32 %v3256_v7, %v3255_v33  ;;  %v1164_v2 = vadd.f32 %v5790_v51, %v7553_v14  ;;  %vm1682_vm14 = vcmp.gt.f32.partialorder %v5781_v61, 0.5  ;;  %v1057_v12 = vadd.f32 %v5790_v51, %v7554_v19  ;;  %v7563_v14 = vld [vmem:[#allocation39_spill] sm:$0xff] }
 0x15f   : > { %v3264_v25 = vadd.f32 %v3263_v43, %v3262_v6  ;;  %v3726_v31 = vmul.f32 0.25, %v3250_v62  ;;  %v4059_v24 = vsel %vm3999_vm7, %v3725_v60, %v5667_v37  ;;  %v5804_v48 = vsel %vm1682_vm14, 1.0, %v7532_v17  ;;  %v7559_v37 = vld [vmem:[#allocation5_spill] sm:$0xff] }
 0x160   : > { %v3727_v53 = vmul.f32 0.25, %v3257_v30  ;;  %7555 = vst [vmem:[#allocation35_spill] sm:$0xff] %v5804_v48  ;;  %v5807_v33 = vadd.f32 %v7556_v38, %v1036_v39  ;;  %v5812_v6 = vsel %vm1831_vm2, %v5804_v48, 0.0  ;;  %v5815_v7 = vadd.f32 %v7557_v5, %v1164_v2  ;;  %v7561_v30 = vld [vmem:[#allocation38_spill] sm:$0xff] }
 0x161   : > { %v3728_v40 = vmul.f32 0.25, %v3264_v25  ;;  %v4060_v4 = vsel %vm4001_vm8, %v3726_v31, %v4059_v24  ;;  %v5820_v43 = vadd.f32 %v7559_v37, %v1057_v12  ;;  %v1185_v60 = vadd.f32 %v5790_v51, %v7561_v30  ;;  %v7564_v25 = vld [vmem:[#allocation4_spill] sm:$0xff]  ;;  %v7568_v38 = vld [vmem:[#allocation6_spill] sm:$0xff] }
 0x162   : > { %7558 = vst [vmem:[#allocation36_spill] sm:$0xff] %v5815_v7  ;;  %v4061_v62 = vsel %vm4003_vm10, %v3727_v53, %v4060_v4  ;;  %vm1648_vm15 = vcmp.gt.f32.partialorder %v5807_v33, 0.5  ;;  %vm1680_vm3 = vcmp.gt.f32.partialorder %v5815_v7, 0.5  ;;  %v1049_v2 = vadd.f32 %v5790_v51, %v7563_v14  ;;  %v7570_v4 = vld [vmem:[#allocation7_spill] sm:$0xff]  ;;  %v7572_v37 = vld [vmem:[#allocation40_spill] sm:$0xff]  ;;  %v7574_v14 = vld [vmem:[#allocation9_spill] sm:$0xff] }
 0x163   : > { %7560 = vst [vmem:[#allocation37_spill] sm:$0xff] %v5820_v43  ;;  %v4062_v23 = vsel %vm4005_vm11, %v3728_v40, %v4061_v62  ;;  %v5826_v39 = vsel %vm1648_vm15, 1.0, %v7532_v17  ;;  %v5839_v12 = vsel %vm1680_vm3, 1.0, %v7532_v17  ;;  %vm1653_vm5 = vcmp.gt.f32.partialorder %v5820_v43, 0.5 }
 0x164   : > { %7562 = vst [vmem:[#allocation2_spill] sm:$0xff] %v5826_v39  ;;  %v5832_v31 = vadd.f32 %v4062_v23, %v7564_v25  ;;  %v5836_v19 = vsel %vm1831_vm2, %v5826_v39, 0.0  ;;  %7566 = vst [vmem:[#allocation5_spill] sm:$0xff] %v5839_v12  ;;  %v5844_v53 = vsel %vm1831_vm2, %v5839_v12, 0.0  ;;  %v5847_v24 = vsel %vm1653_vm5, 1.0, %v7532_v17  ;;  %v7573_v23 = vld [vmem:[#allocation8_spill] sm:$0xff] }
 0x165   : > { %7567 = vst [vmem:[#allocation38_spill] sm:$0xff] %v5847_v24  ;;  %v5850_v40 = vadd.f32 %v7568_v38, %v1185_v60  ;;  %v5853_v5 = vadd.f32 %v7570_v4, %v1049_v2  ;;  %v1979_v62 = vsel %vm1831_vm2, %v5847_v24, 0.0  ;;  %v1177_v30 = vadd.f32 %v5790_v51, %v7572_v37  ;;  %v7580_v37 = vld [vmem:[#allocation41_spill] sm:$0xff] }
 0x166   : > { %7565 = vst [vmem:[#allocation3_spill] sm:$0xff] %v5832_v31  ;;  %vm4152_vm6 = vcmp.gt.f32.partialorder %v5832_v31, 0.5  ;;  %v7575_v25 = vsub.f32 1.0, %v7574_v14  ;;  %v1980_v60 = vadd.f32 %v1979_v62, %v5705_v45 }
 0x167   : > { %7569 = vst [vmem:[#allocation39_spill] sm:$0xff] %v5850_v40  ;;  %7571 = vst [vmem:[#allocation4_spill] sm:$0xff] %v5853_v5  ;;  %v5864_v15 = vsel %vm4152_vm6, 1.0, %v7532_v17  ;;  %vm1685_vm12 = vcmp.gt.f32.partialorder %v5850_v40, 0.5  ;;  %vm1651_vm13 = vcmp.gt.f32.partialorder %v5853_v5, 0.5 }
 0x168   : > { %v1555_v0 = vmul.f32 %v7575_v25, %v7573_v23  ;;  %7576 = vst [vmem:[#allocation6_spill] sm:$0xff] %v5864_v15  ;;  %v5870_v2 = vsel %vm1685_vm12, 1.0, %v7532_v17  ;;  %v5873_v38 = vsel %vm1651_vm13, 1.0, %v7532_v17  ;;  %v5879_v23 = vadd.f32 %v5790_v51, %v7580_v37  ;;  %v1270_v15 = vld [vmem:[%s5166_s25 + $0x78] sm:$0xff] }
 0x169   : > { %7577 = vst [vmem:[#allocation7_spill] sm:$0xff] %v5870_v2  ;;  %7578 = vst [vmem:[#allocation40_spill] sm:$0xff] %v5873_v38  ;;  %v2190_v14 = vcombine.high %v1980_v60, %v1980_v60  ;;  %v2197_v25 = vrot.slane %v1980_v60, %v5258_v63  ;;  %v2027_v45 = vsel %vm1831_vm2, %v5870_v2, 0.0  ;;  %v1973_v62 = vsel %vm1831_vm2, %v5873_v38, 0.0 }
 0x16a   : > { %v5875_v4 = vadd.f32 %v1555_v0, %v1177_v30  ;;  %v2028_v22 = vadd.f32 %v2027_v45, %v5719_v32  ;;  %v1974_v13 = vadd.f32 %v1973_v62, %v5757_v41  ;;  %v5890_v0 = vmul.f32 0.2, %v1270_v15  ;;  %v5898_v32 = vpop.f32.mrb[21].mxu1 }
 0x16b   : > { %v2204_v30 = vrot.slane %v2190_v14, %v5258_v63  ;;  %v2205_v37 = vcombine.high %v2197_v25, %v2197_v25  ;;  %v2929_v60 = vsel %vm2760_vm9, %v2197_v25, 0.0 }
 0x16c   : > { %7579 = vst [vmem:[#allocation8_spill] sm:$0xff] %v5875_v4  ;;  %vm1683_vm14 = vcmp.gt.f32.partialorder %v5875_v4, 0.5  ;;  %v2930_v44 = vrot.slane %v2929_v60, 4  ;;  %v2462_v16 = vcombine.high %v2028_v22, %v2028_v22  ;;  %v2469_v2 = vrot.slane %v2028_v22, %v5258_v63 }
 0x16d   : > { %v5895_v31 = vsel %vm1683_vm14, 1.0, %v7532_v17  ;;  %v2156_v48 = vcombine.high %v1974_v13, %v1974_v13  ;;  %v2206_v41 = vcombine.high %v2204_v30, %v2204_v30  ;;  %v2936_v45 = vsel %vm2760_vm9, %v2205_v37, 0.0 }
 0x16e   : > { %7581 = vst [vmem:[#allocation9_spill] sm:$0xff] %v5895_v31  ;;  %v2943_v15 = vsel %vm2760_vm9, %v2204_v30, 0.0  ;;  %v5903_v14 = vrot.slane %v1974_v13, %v5258_v63  ;;  %v2931_v62 = vadd.f32 %v2930_v44, %v2929_v60  ;;  %v2937_v25 = vrot.slane %v2936_v45, 4 }
 0x16f   : > { %v2944_v50 = vrot.slane %v2943_v15, 4  ;;  %v2476_v12 = vrot.slane %v2462_v16, %v5258_v63  ;;  %v2950_v21 = vsel %vm2760_vm9, %v2206_v41, 0.0  ;;  %v2477_v35 = vcombine.high %v2469_v2, %v2469_v2 }
 0x170   : > { %v3377_v22 = vsel %vm2760_vm9, %v2469_v2, 0.0  ;;  %v5909_v24 = vrot.slane %v2156_v48, %v5258_v63  ;;  %v2932_v38 = vrot.slane %v2931_v62, 2  ;;  %v2938_v37 = vadd.f32 %v2937_v25, %v2936_v45 }
 0x171   : > { %v2945_v56 = vadd.f32 %v2944_v50, %v2943_v15  ;;  %v2951_v30 = vrot.slane %v2950_v21, 4  ;;  %v2478_v11 = vcombine.high %v2476_v12, %v2476_v12  ;;  %v3378_v13 = vrot.slane %v3377_v22, 4 }
 0x172   : > { %v3384_v44 = vsel %vm2760_vm9, %v2477_v35, 0.0  ;;  %v3391_v60 = vsel %vm2760_vm9, %v2476_v12, 0.0  ;;  %v2933_v39 = vadd.f32 %v2932_v38, %v2931_v62  ;;  %v2939_v16 = vrot.slane %v2938_v37, 2  ;;  %v5914_v62 = vpop.f32.mrb[22].mxu0 }
 0x173   : > { %v2946_v57 = vrot.slane %v2945_v56, 2  ;;  %v2952_v41 = vadd.f32 %v2951_v30, %v2950_v21  ;;  %v3379_v40 = vadd.f32 %v3378_v13, %v3377_v22  ;;  %v3385_v4 = vrot.slane %v3384_v44, 4 }
 0x174   : > { %v3392_v2 = vrot.slane %v3391_v60, 4  ;;  %v3398_v48 = vsel %vm2760_vm9, %v2478_v11, 0.0  ;;  %v2934_v61 = vrot.slane %v2933_v39, 1  ;;  %v2940_v34 = vadd.f32 %v2939_v16, %v2938_v37 }
 0x175   : > { %v2947_v45 = vadd.f32 %v2946_v57, %v2945_v56  ;;  %v2953_v50 = vrot.slane %v2952_v41, 2  ;;  %v3380_v15 = vrot.slane %v3379_v40, 2  ;;  %v3386_v25 = vadd.f32 %v3385_v4, %v3384_v44 }
 0x176   : > { %v3393_v7 = vadd.f32 %v3392_v2, %v3391_v60  ;;  %v3399_v55 = vrot.slane %v3398_v48, 4  ;;  %v2935_v35 = vadd.f32 %v2934_v61, %v2933_v39  ;;  %v2941_v10 = vrot.slane %v2940_v34, 1 }
 0x177   : > { %v2948_v12 = vrot.slane %v2947_v45, 1  ;;  %v2954_v38 = vadd.f32 %v2953_v50, %v2952_v41  ;;  %v3381_v21 = vadd.f32 %v3380_v15, %v3379_v40  ;;  %v3387_v22 = vrot.slane %v3386_v25, 2 }
 0x178   : > { %v3394_v30 = vrot.slane %v3393_v7, 2  ;;  %v3400_v13 = vadd.f32 %v3399_v55, %v3398_v48  ;;  %v2942_v43 = vadd.f32 %v2941_v10, %v2940_v34  ;;  %v3681_v37 = vmul.f32 0.25, %v2935_v35 }
 0x179   : > { %v2949_v11 = vadd.f32 %v2948_v12, %v2947_v45  ;;  %v2955_v5 = vrot.slane %v2954_v38, 1  ;;  %v3382_v57 = vrot.slane %v3381_v21, 1  ;;  %v3388_v56 = vadd.f32 %v3387_v22, %v3386_v25 }
 0x17a   : > { %v3395_v16 = vadd.f32 %v3394_v30, %v3393_v7  ;;  %v3401_v4 = vrot.slane %v3400_v13, 2  ;;  %v3682_v60 = vmul.f32 0.25, %v2942_v43  ;;  %v2171_v39 = vcombine.high %v5903_v14, %v5903_v14 }
 0x17b   : > { %v2956_v44 = vadd.f32 %v2955_v5, %v2954_v38  ;;  %v3683_v61 = vmul.f32 0.25, %v2949_v11  ;;  %v3383_v41 = vadd.f32 %v3382_v57, %v3381_v21  ;;  %v3389_v2 = vrot.slane %v3388_v56, 1 }
 0x17c   : > { %v3396_v40 = vrot.slane %v3395_v16, 1  ;;  %v3402_v50 = vadd.f32 %v3401_v4, %v3400_v13  ;;  %v4021_v10 = vsel %vm3993_vm0, %v3682_v60, %v3681_v37  ;;  %v2172_v34 = vcombine.high %v5909_v24, %v5909_v24 }
 0x17d   : > { %v5918_v15 = vmul.f32 0.25, %v2956_v44  ;;  %v2873_v55 = vsel %vm2760_vm9, %v5903_v14, 0.0  ;;  %v5926_v7 = vsel %vm3995_vm1, %v3683_v61, %v4021_v10  ;;  %v3390_v43 = vadd.f32 %v3389_v2, %v3388_v56  ;;  %v5943_v2 = vpop.f32.mrb[22].mxu1 }
 0x17e   : > { %v3397_v5 = vadd.f32 %v3396_v40, %v3395_v16  ;;  %v3403_v48 = vrot.slane %v3402_v50, 1  ;;  %v3745_v45 = vmul.f32 0.25, %v3383_v41  ;;  %v2874_v25 = vrot.slane %v2873_v55, 4  ;;  %v3788_v41 = vld [vmem:[%s5206_s20 + $0x18] sm:$0xff]  ;;  %7582 = vst [vmem:[#allocation41_spill] sm:$0xff] %v5943_v2  ;;  %v1396_v2 = vld [vmem:[%s5172_s13 + $0x68] sm:$0xff] }
 0x17f   : > { %v2880_v35 = vsel %vm2760_vm9, %v2171_v39, 0.0  ;;  %v2887_v12 = vsel %vm2760_vm9, %v5909_v24, 0.0  ;;  %v3746_v21 = vmul.f32 0.25, %v3390_v43  ;;  %v2894_v11 = vsel %vm2760_vm9, %v2172_v34, 0.0  ;;  %v1398_v39 = vld [vmem:[%s5172_s13 + $0x78] sm:$0xff] }
 0x180   : > { %v3404_v38 = vadd.f32 %v3403_v48, %v3402_v50  ;;  %v3747_v22 = vmul.f32 0.25, %v3397_v5  ;;  %v2881_v30 = vrot.slane %v2880_v35, 4  ;;  %v2875_v14 = vadd.f32 %v2874_v25, %v2873_v55 }
 0x181   : > { %v2888_v13 = vrot.slane %v2887_v12, 4  ;;  %v2021_v37 = vsel %vm1831_vm2, %v5895_v31, 0.0  ;;  %v4077_v56 = vsel %vm3993_vm0, %v3746_v21, %v3745_v45  ;;  %v2895_v4 = vrot.slane %v2894_v11, 4  ;;  %v3820_v45 = vld [vmem:[%s5212_s24 + $0x18] sm:$0xff] }
 0x182   : > { %v5934_v57 = vmul.f32 0.25, %v3404_v38  ;;  %v2882_v16 = vadd.f32 %v2881_v30, %v2880_v35  ;;  %v5938_v24 = vsel %vm3995_vm1, %v3747_v22, %v4077_v56  ;;  %v2876_v44 = vrot.slane %v2875_v14, 2 }
 0x183   : > { %v2889_v60 = vadd.f32 %v2888_v13, %v2887_v12  ;;  %v2022_v61 = vadd.f32 %v2021_v37, %v5771_v28  ;;  %v2896_v50 = vadd.f32 %v2895_v4, %v2894_v11  ;;  %v1462_v10 = vsub.f32 1.0, %v1398_v39 }
 0x184   : > { %v2883_v40 = vrot.slane %v2882_v16, 2  ;;  %v3804_v34 = vmul.f32 0.2, %v3788_v41  ;;  %v2877_v55 = vadd.f32 %v2876_v44, %v2875_v14  ;;  %v3836_v38 = vsub.f32 1.0, %v3820_v45 }
 0x185   : > { %v2890_v43 = vrot.slane %v2889_v60, 2  ;;  %v2428_v5 = vcombine.high %v2022_v61, %v2022_v61  ;;  %v2435_v48 = vrot.slane %v2022_v61, %v5258_v63  ;;  %v2897_v35 = vrot.slane %v2896_v50, 2 }
 0x186   : > { %v2884_v25 = vadd.f32 %v2883_v40, %v2882_v16  ;;  %v1526_v12 = vmul.f32 %v1462_v10, %v5890_v0  ;;  %v2878_v28 = vrot.slane %v2877_v55, 1 }
 0x187   : > { %v2891_v21 = vadd.f32 %v2890_v43, %v2889_v60  ;;  %v2442_v22 = vrot.slane %v2428_v5, %v5258_v63  ;;  %v2443_v30 = vcombine.high %v2435_v48, %v2435_v48  ;;  %v2898_v11 = vadd.f32 %v2897_v35, %v2896_v50 }
 0x188   : > { %v2885_v13 = vrot.slane %v2884_v25, 1  ;;  %v3321_v37 = vsel %vm2760_vm9, %v2435_v48, 0.0  ;;  %v5951_v14 = vadd.f32 %v1526_v12, %v5879_v23  ;;  %v2879_v56 = vadd.f32 %v2878_v28, %v2877_v55 }
 0x189   : > { %v2892_v4 = vrot.slane %v2891_v21, 1  ;;  %v2444_v44 = vcombine.high %v2442_v22, %v2442_v22  ;;  %v3322_v16 = vrot.slane %v3321_v37, 4  ;;  %v2899_v39 = vrot.slane %v2898_v11, 1 }
 0x18a   : > { %v2886_v61 = vadd.f32 %v2885_v13, %v2884_v25  ;;  %v3328_v0 = vsel %vm2760_vm9, %v2443_v30, 0.0  ;;  %v3335_v60 = vsel %vm2760_vm9, %v2442_v22, 0.0  ;;  %v3673_v40 = vmul.f32 0.25, %v2879_v56 }
 0x18b   : > { %v2893_v41 = vadd.f32 %v2892_v4, %v2891_v21  ;;  %v3323_v10 = vadd.f32 %v3322_v16, %v3321_v37  ;;  %v3329_v43 = vrot.slane %v3328_v0, 4  ;;  %v2900_v50 = vadd.f32 %v2899_v39, %v2898_v11 }
 0x18c   : > { %v3674_v5 = vmul.f32 0.25, %v2886_v61  ;;  %v3336_v48 = vrot.slane %v3335_v60, 4  ;;  %v3342_v23 = vsel %vm2760_vm9, %v2444_v44, 0.0  ;;  %vm1654_vm15 = vcmp.gt.f32.partialorder %v5951_v14, 0.5 }
 0x18d   : > { %v3675_v45 = vmul.f32 0.25, %v2893_v41  ;;  %v3324_v55 = vrot.slane %v3323_v10, 2  ;;  %v3330_v35 = vadd.f32 %v3329_v43, %v3328_v0  ;;  %v3343_v12 = vrot.slane %v3342_v23, 4  ;;  %v1430_v43 = vld [vmem:[%s5172_s13 + $0x178] sm:$0xff] }
 0x18e   : > { %v5956_v28 = vmul.f32 0.25, %v2900_v50  ;;  %v4014_v25 = vsel %vm3993_vm0, %v3674_v5, %v3673_v40  ;;  %v3337_v30 = vadd.f32 %v3336_v48, %v3335_v60  ;;  %v5964_v56 = vsel %vm1654_vm15, 1.0, %v7532_v17  ;;  %v1302_v60 = vld [vmem:[%s5166_s25 + $0x178] sm:$0xff]  ;;  %v5980_v50 = vpop.f32.mrb[23].mxu0 }
 0x18f   : > { %v5961_v21 = vsel %vm3995_vm1, %v3675_v45, %v4014_v25  ;;  %v3325_v22 = vadd.f32 %v3324_v55, %v3323_v10  ;;  %v3331_v13 = vrot.slane %v3330_v35, 2  ;;  %v3344_v11 = vadd.f32 %v3343_v12, %v3342_v23  ;;  %7583 = vst [vmem:[#allocation63_spill] sm:$0xff] %v5964_v56  ;;  %v7584_v10 = vld [vmem:[#allocation42_spill] sm:$0xff]  ;;  %v3796_v23 = vld [vmem:[%s5206_s20 + $0x58] sm:$0xff] }
 0x190   : > { %v3338_v37 = vrot.slane %v3337_v30, 2  ;;  %v5966_v4 = vmul.f32 %v3836_v38, %v3804_v34  ;;  %v5971_v44 = vsel %vm3997_vm4, %v5918_v15, %v5926_v7  ;;  %v1982_v0 = vsel %vm1831_vm2, %v5964_v56, 0.0  ;;  %7585 = vst [vmem:[#allocation42_spill] sm:$0xff] %v5980_v50 }
 0x191   : > { %v3326_v16 = vrot.slane %v3325_v22, 1  ;;  %v3332_v61 = vadd.f32 %v3331_v13, %v3330_v35  ;;  %v3345_v39 = vrot.slane %v3344_v11, 2  ;;  %v1983_v40 = vadd.f32 %v1982_v0, %v5778_v3 }
 0x192   : > { %v3339_v41 = vadd.f32 %v3338_v37, %v3337_v30  ;;  %v1188_v34 = vadd.f32 %v5790_v51, %v7584_v10  ;;  %v1366_v38 = vmul.f32 0.2, %v1302_v60  ;;  %v1494_v48 = vsub.f32 1.0, %v1430_v43 }
 0x193   : > { %v3327_v15 = vadd.f32 %v3326_v16, %v3325_v22  ;;  %v3333_v7 = vrot.slane %v3332_v61, 1  ;;  %v3346_v5 = vadd.f32 %v3345_v39, %v3344_v11  ;;  %v2207_v55 = vcombine.high %v1983_v40, %v1983_v40 }
 0x194   : > { %v3340_v45 = vrot.slane %v3339_v41, 1  ;;  %v2214_v35 = vrot.slane %v1983_v40, %v5258_v63  ;;  %v3812_v12 = vmul.f32 0.2, %v3796_v23  ;;  %v1558_v13 = vmul.f32 %v1494_v48, %v1366_v38 }
 0x195   : > { %v3334_v25 = vadd.f32 %v3333_v7, %v3332_v61  ;;  %v3347_v30 = vrot.slane %v3346_v5, 1  ;;  %v3737_v3 = vmul.f32 0.25, %v3327_v15  ;;  %v2221_v0 = vrot.slane %v2207_v55, %v5258_v63 }
 0x196   : > { %v3341_v37 = vadd.f32 %v3340_v45, %v3339_v41  ;;  %v2222_v60 = vcombine.high %v2214_v35, %v2214_v35  ;;  %v2957_v10 = vsel %vm2760_vm9, %v2214_v35, 0.0  ;;  %v5986_v39 = vadd.f32 %v1558_v13, %v1188_v34 }
 0x197   : > { %v3348_v22 = vadd.f32 %v3347_v30, %v3346_v5  ;;  %v3738_v16 = vmul.f32 0.25, %v3334_v25  ;;  %v2958_v11 = vrot.slane %v2957_v10, 4  ;;  %v2223_v50 = vcombine.high %v2221_v0, %v2221_v0  ;;  %v3828_v25 = vld [vmem:[%s5212_s24 + $0x58] sm:$0xff] }
 0x198   : > { %v3739_v43 = vmul.f32 0.25, %v3341_v37  ;;  %v2964_v40 = vsel %vm2760_vm9, %v2222_v60, 0.0  ;;  %v2971_v61 = vsel %vm2760_vm9, %v2221_v0, 0.0  ;;  %vm1686_vm3 = vcmp.gt.f32.partialorder %v5986_v39, 0.5 }
 0x199   : > { %v5990_v15 = vmul.f32 0.25, %v3348_v22  ;;  %v4070_v41 = vsel %vm3993_vm0, %v3738_v16, %v3737_v3  ;;  %v2959_v38 = vadd.f32 %v2958_v11, %v2957_v10  ;;  %v2965_v7 = vrot.slane %v2964_v40, 4  ;;  %v1268_v22 = vld [vmem:[%s5166_s25 + $0x68] sm:$0xff] }
 0x19a   : > { %v5994_v48 = vsel %vm3995_vm1, %v3739_v43, %v4070_v41  ;;  %v2972_v5 = vrot.slane %v2971_v61, 4  ;;  %v2978_v34 = vsel %vm2760_vm9, %v2223_v50, 0.0  ;;  %v5999_v35 = vsel %vm1686_vm3, 1.0, %v7532_v17  ;;  %v7587_v43 = vld [vmem:[#allocation43_spill] sm:$0xff] }
 0x19b   : > { %v2960_v23 = vrot.slane %v2959_v38, 2  ;;  %v2966_v45 = vadd.f32 %v2965_v7, %v2964_v40  ;;  %v2979_v55 = vrot.slane %v2978_v34, 4  ;;  %7586 = vst [vmem:[#allocation64_spill] sm:$0xff] %v5999_v35  ;;  %v2030_v3 = vsel %vm1831_vm2, %v5999_v35, 0.0 }
 0x19c   : > { %v2973_v30 = vadd.f32 %v2972_v5, %v2971_v61  ;;  %v3844_v13 = vsub.f32 1.0, %v3828_v25  ;;  %v6007_v50 = vsel %vm3997_vm4, %v5934_v57, %v5938_v24  ;;  %v2031_v10 = vadd.f32 %v2030_v3, %v5812_v6  ;;  %v3787_v57 = vld [vmem:[%s5206_s20 + $0x10] sm:$0xff]  ;;  %v6018_v6 = vpop.f32.mrb[23].mxu1 }
 0x19d   : > { %v2961_v37 = vadd.f32 %v2960_v23, %v2959_v38  ;;  %v2967_v0 = vrot.slane %v2966_v45, 2  ;;  %v2980_v60 = vadd.f32 %v2979_v55, %v2978_v34  ;;  %v1052_v40 = vadd.f32 %v5790_v51, %v7587_v43  ;;  %7588 = vst [vmem:[#allocation43_spill] sm:$0xff] %v6018_v6  ;;  %v1278_v6 = vld [vmem:[%s5166_s25 + $0xb8] sm:$0xff] }
 0x19e   : > { %v2974_v16 = vrot.slane %v2973_v30, 2  ;;  %v6011_v11 = vmul.f32 %v3844_v13, %v3812_v12  ;;  %v1332_v61 = vmul.f32 0.2, %v1268_v22  ;;  %v2479_v25 = vcombine.high %v2031_v10, %v2031_v10 }
 0x19f   : > { %v2962_v41 = vrot.slane %v2961_v37, 1  ;;  %v2968_v7 = vadd.f32 %v2967_v0, %v2966_v45  ;;  %v2981_v5 = vrot.slane %v2980_v60, 2  ;;  %v2486_v38 = vrot.slane %v2031_v10, %v5258_v63 }
 0x1a0   : > { %v2975_v24 = vadd.f32 %v2974_v16, %v2973_v30  ;;  %v1460_v34 = vsub.f32 1.0, %v1396_v2  ;;  %v3803_v23 = vmul.f32 0.2, %v3787_v57  ;;  %v2493_v13 = vrot.slane %v2479_v25, %v5258_v63 }
 0x1a1   : > { %v2963_v55 = vadd.f32 %v2962_v41, %v2961_v37  ;;  %v2969_v12 = vrot.slane %v2968_v7, 1  ;;  %v2982_v3 = vadd.f32 %v2981_v5, %v2980_v60  ;;  %v2494_v22 = vcombine.high %v2486_v38, %v2486_v38 }
 0x1a2   : > { %v2976_v43 = vrot.slane %v2975_v24, 1  ;;  %v3405_v45 = vsel %vm2760_vm9, %v2486_v38, 0.0  ;;  %v1524_v0 = vmul.f32 %v1460_v34, %v1332_v61  ;;  %v2495_v30 = vcombine.high %v2493_v13, %v2493_v13 }
 0x1a3   : > { %v2970_v35 = vadd.f32 %v2969_v12, %v2968_v7  ;;  %v2983_v31 = vrot.slane %v2982_v3, 1  ;;  %v3685_v56 = vmul.f32 0.25, %v2963_v55  ;;  %v3406_v10 = vrot.slane %v3405_v45, 4 }
 0x1a4   : > { %v2977_v16 = vadd.f32 %v2976_v43, %v2975_v24  ;;  %v3412_v2 = vsel %vm2760_vm9, %v2494_v22, 0.0  ;;  %v3419_v57 = vsel %vm2760_vm9, %v2493_v13, 0.0  ;;  %v3426_v7 = vsel %vm2760_vm9, %v2495_v30, 0.0 }
 0x1a5   : > { %v2984_v37 = vadd.f32 %v2983_v31, %v2982_v3  ;;  %v3686_v60 = vmul.f32 0.25, %v2970_v35  ;;  %v4024_v41 = vsel %vm3999_vm7, %v3685_v56, %v5971_v44  ;;  %v3413_v5 = vrot.slane %v3412_v2, 4  ;;  %v3819_v35 = vld [vmem:[%s5212_s24 + $0x10] sm:$0xff] }
 0x1a6   : > { %v3687_v25 = vmul.f32 0.25, %v2977_v16  ;;  %v3407_v38 = vadd.f32 %v3406_v10, %v3405_v45  ;;  %v3420_v61 = vrot.slane %v3419_v57, 4  ;;  %v3427_v12 = vrot.slane %v3426_v7, 4 }
 0x1a7   : > { %v3688_v34 = vmul.f32 0.25, %v2984_v37  ;;  %v4025_v24 = vsel %vm4001_vm8, %v3686_v60, %v4024_v41  ;;  %v3414_v55 = vadd.f32 %v3413_v5, %v3412_v2  ;;  %v6029_v3 = vadd.f32 %v1524_v0, %v1052_v40 }
 0x1a8   : > { %v4026_v43 = vsel %vm4003_vm10, %v3687_v25, %v4025_v24  ;;  %v3408_v13 = vrot.slane %v3407_v38, 2  ;;  %v3421_v31 = vadd.f32 %v3420_v61, %v3419_v57  ;;  %v3428_v22 = vadd.f32 %v3427_v12, %v3426_v7 }
 0x1a9   : > { %v4027_v56 = vsel %vm4005_vm11, %v3688_v34, %v4026_v43  ;;  %v3415_v44 = vrot.slane %v3414_v55, 2  ;;  %v3835_v45 = vsub.f32 1.0, %v3819_v35  ;;  %vm1652_vm5 = vcmp.gt.f32.partialorder %v6029_v3, 0.5 }
 0x1aa   : > { %v6034_v16 = vadd.f32 %v4027_v56, %v5966_v4  ;;  %v3409_v30 = vadd.f32 %v3408_v13, %v3407_v38  ;;  %v3422_v10 = vrot.slane %v3421_v31, 2  ;;  %v3429_v37 = vrot.slane %v3428_v22, 2  ;;  %v1300_v13 = vld [vmem:[%s5166_s25 + $0x168] sm:$0xff] }
 0x1ab   : > { %v3416_v2 = vadd.f32 %v3415_v44, %v3414_v55  ;;  %v6038_v60 = vsel %vm1652_vm5, 1.0, %v7532_v17  ;;  %v6040_v40 = vmul.f32 %v3835_v45, %v3803_v23  ;;  %v6052_v23 = vsel %vm3997_vm4, %v5956_v28, %v5961_v21  ;;  %v6060_v21 = vpop.f32.mrb[24].mxu0 }
 0x1ac   : > { %vm4147_vm6 = vcmp.gt.f32.partialorder %v6034_v16, 0.5  ;;  %v3410_v0 = vrot.slane %v3409_v30, 1  ;;  %v3423_v57 = vadd.f32 %v3422_v10, %v3421_v31  ;;  %v1976_v4 = vsel %vm1831_vm2, %v6038_v60, 0.0  ;;  %v1428_v31 = vld [vmem:[%s5172_s13 + $0x168] sm:$0xff]  ;;  %7590 = vst [vmem:[#allocation66_spill] sm:$0xff] %v6060_v21 }
 0x1ad   : > { %v6046_v41 = vsel %vm4147_vm6, 1.0, %v7532_v17  ;;  %v3417_v5 = vrot.slane %v3416_v2, 1  ;;  %v3430_v25 = vadd.f32 %v3429_v37, %v3428_v22  ;;  %v1977_v38 = vadd.f32 %v1976_v4, %v5836_v19 }
 0x1ae   : > { %7589 = vst [vmem:[#allocation65_spill] sm:$0xff] %v6046_v41  ;;  %v3411_v61 = vadd.f32 %v3410_v0, %v3409_v30  ;;  %v3424_v7 = vrot.slane %v3423_v57, 1  ;;  %v1180_v34 = vadd.f32 %v5790_v51, %v5578_v54  ;;  %v1364_v19 = vmul.f32 0.2, %v1300_v13  ;;  %v6347_v41 = vld [vmem:[%s5172_s13 + $0xc0] sm:$0xff] }
 0x1af   : > { %v3418_v24 = vadd.f32 %v3417_v5, %v3416_v2  ;;  %v3431_v55 = vrot.slane %v3430_v25, 1  ;;  %v2173_v12 = vcombine.high %v1977_v38, %v1977_v38  ;;  %v2180_v43 = vrot.slane %v1977_v38, %v5258_v63  ;;  %7620 = vst [vmem:[#allocation96_spill] sm:$0xff] %v6347_v41  ;;  %v6374_v41 = vld [vmem:[%s5166_s25 + $0xf8] sm:$0xff] }
 0x1b0   : > { %v3425_v35 = vadd.f32 %v3424_v7, %v3423_v57  ;;  %v3749_v56 = vmul.f32 0.25, %v3411_v61  ;;  %v1492_v44 = vsub.f32 1.0, %v1428_v31  ;;  %7629 = vst [vmem:[#allocation105_spill] sm:$0xff] %v6374_v41 }
 0x1b1   : > { %v3432_v22 = vadd.f32 %v3431_v55, %v3430_v25  ;;  %v3750_v45 = vmul.f32 0.25, %v3418_v24  ;;  %v2187_v30 = vrot.slane %v2173_v12, %v5258_v63  ;;  %v2188_v28 = vcombine.high %v2180_v43, %v2180_v43 }
 0x1b2   : > { %v3751_v10 = vmul.f32 0.25, %v3425_v35  ;;  %v4080_v54 = vsel %vm3999_vm7, %v3749_v56, %v6007_v50  ;;  %v2901_v2 = vsel %vm2760_vm9, %v2180_v43, 0.0  ;;  %v1556_v37 = vmul.f32 %v1492_v44, %v1364_v19  ;;  %v3795_v43 = vld [vmem:[%s5206_s20 + $0x50] sm:$0xff] }
 0x1b3   : > { %v3752_v0 = vmul.f32 0.25, %v3432_v22  ;;  %v4081_v57 = vsel %vm4001_vm8, %v3750_v45, %v4080_v54  ;;  %v2189_v4 = vcombine.high %v2187_v30, %v2187_v30  ;;  %v2902_v5 = vrot.slane %v2901_v2, 4 }
 0x1b4   : > { %v4082_v25 = vsel %vm4003_vm10, %v3751_v10, %v4081_v57  ;;  %v2908_v38 = vsel %vm2760_vm9, %v2188_v28, 0.0  ;;  %v2915_v61 = vsel %vm2760_vm9, %v2187_v30, 0.0  ;;  %v6069_v7 = vadd.f32 %v1556_v37, %v1180_v34  ;;  %v3827_v34 = vld [vmem:[%s5212_s24 + $0x50] sm:$0xff] }
 0x1b5   : > { %v4083_v24 = vsel %vm4005_vm11, %v3752_v0, %v4082_v25  ;;  %v2903_v50 = vadd.f32 %v2902_v5, %v2901_v2  ;;  %v2909_v55 = vrot.slane %v2908_v38, 4  ;;  %v2916_v12 = vrot.slane %v2915_v61, 4 }
 0x1b6   : > { %v6074_v13 = vadd.f32 %v4083_v24, %v6011_v11  ;;  %v2922_v31 = vsel %vm2760_vm9, %v2189_v4, 0.0  ;;  %vm1684_vm12 = vcmp.gt.f32.partialorder %v6069_v7, 0.5  ;;  %v3811_v35 = vmul.f32 0.2, %v3795_v43 }
 0x1b7   : > { %v2904_v56 = vrot.slane %v2903_v50, 2  ;;  %v2910_v19 = vadd.f32 %v2909_v55, %v2908_v38  ;;  %v2917_v44 = vadd.f32 %v2916_v12, %v2915_v61  ;;  %v2923_v22 = vrot.slane %v2922_v31, 4  ;;  %v1273_v38 = vld [vmem:[%s5166_s25 + $0x90] sm:$0xff] }
 0x1b8   : > { %vm4155_vm13 = vcmp.gt.f32.partialorder %v6074_v13, 0.5  ;;  %v6081_v45 = vsel %vm1684_vm12, 1.0, %v7532_v17  ;;  %v3843_v30 = vsub.f32 1.0, %v3827_v34  ;;  %v6086_v11 = vsel %vm3997_vm4, %v5990_v15, %v5994_v48  ;;  %v1401_v61 = vld [vmem:[%s5172_s13 + $0x90] sm:$0xff]  ;;  %v6103_v34 = vpop.f32.mrb[24].mxu1 }
 0x1b9   : > { %v6089_v28 = vsel %vm4155_vm13, 1.0, %v7532_v17  ;;  %v2905_v10 = vadd.f32 %v2904_v56, %v2903_v50  ;;  %v2911_v54 = vrot.slane %v2910_v19, 2  ;;  %v2918_v2 = vrot.slane %v2917_v44, 2  ;;  %7592 = vst [vmem:[#allocation68_spill] sm:$0xff] %v6103_v34 }
 0x1ba   : > { %7591 = vst [vmem:[#allocation67_spill] sm:$0xff] %v6089_v28  ;;  %v2924_v37 = vadd.f32 %v2923_v22, %v2922_v31  ;;  %v2024_v0 = vsel %vm1831_vm2, %v6081_v45, 0.0  ;;  %v6093_v57 = vmul.f32 %v3843_v30, %v3811_v35  ;;  %v1073_v4 = vadd.f32 %v5790_v51, %v5626_v49  ;;  %v1305_v22 = vld [vmem:[%s5166_s25 + $0x190] sm:$0xff]  ;;  %v6269_v28 = vld [vmem:[%s5166_s25 + $0x1b8] sm:$0xff] }
 0x1bb   : > { %v2906_v5 = vrot.slane %v2905_v10, 1  ;;  %v2912_v25 = vadd.f32 %v2911_v54, %v2910_v19  ;;  %v2919_v15 = vadd.f32 %v2918_v2, %v2917_v44  ;;  %v2025_v48 = vadd.f32 %v2024_v0, %v5844_v53 }
 0x1bc   : > { %v2925_v24 = vrot.slane %v2924_v37, 2  ;;  %v1337_v50 = vmul.f32 0.2, %v1273_v38  ;;  %v1465_v55 = vsub.f32 1.0, %v1401_v61  ;;  %v1201_v12 = vadd.f32 %v5790_v51, %v5643_v18 }
 0x1bd   : > { %v2907_v43 = vadd.f32 %v2906_v5, %v2905_v10  ;;  %v2913_v31 = vrot.slane %v2912_v25, 1  ;;  %v2920_v35 = vrot.slane %v2919_v15, 1  ;;  %v2445_v56 = vcombine.high %v2025_v48, %v2025_v48 }
 0x1be   : > { %v2926_v49 = vadd.f32 %v2925_v24, %v2924_v37  ;;  %v2452_v19 = vrot.slane %v2025_v48, %v5258_v63  ;;  %v1529_v44 = vmul.f32 %v1465_v55, %v1337_v50  ;;  %v1369_v53 = vmul.f32 0.2, %v1305_v22 }
 0x1bf   : > { %v2914_v30 = vadd.f32 %v2913_v31, %v2912_v25  ;;  %v2921_v54 = vadd.f32 %v2920_v35, %v2919_v15  ;;  %v3677_v2 = vmul.f32 0.25, %v2907_v43  ;;  %v2459_v0 = vrot.slane %v2445_v56, %v5258_v63  ;;  %v6116_v35 = vpop.f32.mrb[25].mxu0 }
 0x1c0   : > { %v2927_v38 = vrot.slane %v2926_v49, 1  ;;  %v2460_v61 = vcombine.high %v2452_v19, %v2452_v19  ;;  %v3349_v18 = vsel %vm2760_vm9, %v2452_v19, 0.0  ;;  %v6108_v10 = vadd.f32 %v1529_v44, %v1073_v4  ;;  %7593 = vst [vmem:[#allocation69_spill] sm:$0xff] %v6116_v35  ;;  %v1433_v44 = vld [vmem:[%s5172_s13 + $0x190] sm:$0xff] }
 0x1c1   : > { %v3678_v5 = vmul.f32 0.25, %v2914_v30  ;;  %v3679_v21 = vmul.f32 0.25, %v2921_v54  ;;  %v4017_v37 = vsel %vm3999_vm7, %v3677_v2, %v6052_v23  ;;  %v2461_v48 = vcombine.high %v2459_v0, %v2459_v0 }
 0x1c2   : > { %v2928_v24 = vadd.f32 %v2927_v38, %v2926_v49  ;;  %v3350_v50 = vrot.slane %v3349_v18, 4  ;;  %v3356_v25 = vsel %vm2760_vm9, %v2460_v61, 0.0  ;;  %v3363_v15 = vsel %vm2760_vm9, %v2459_v0, 0.0 }
 0x1c3   : > { %v4018_v55 = vsel %vm4001_vm8, %v3678_v5, %v4017_v37  ;;  %v3357_v43 = vrot.slane %v3356_v25, 4  ;;  %v3364_v31 = vrot.slane %v3363_v15, 4  ;;  %v3370_v4 = vsel %vm2760_vm9, %v2461_v48, 0.0  ;;  %v6125_v5 = vpop.f32.mrb[25].mxu1 }
 0x1c4   : > { %v3680_v56 = vmul.f32 0.25, %v2928_v24  ;;  %v4019_v22 = vsel %vm4003_vm10, %v3679_v21, %v4018_v55  ;;  %v3351_v19 = vadd.f32 %v3350_v50, %v3349_v18  ;;  %v3371_v23 = vrot.slane %v3370_v4, 4  ;;  %7594 = vst [vmem:[#allocation70_spill] sm:$0xff] %v6125_v5  ;;  %v1271_v55 = vld [vmem:[%s5166_s25 + $0x80] sm:$0xff] }
 0x1c5   : > { %v3358_v49 = vadd.f32 %v3357_v43, %v3356_v25  ;;  %v3365_v30 = vadd.f32 %v3364_v31, %v3363_v15  ;;  %vm1657_vm14 = vcmp.gt.f32.partialorder %v6108_v10, 0.5  ;;  %v1497_v54 = vsub.f32 1.0, %v1433_v44 }
 0x1c6   : > { %v4020_v2 = vsel %vm4005_vm11, %v3680_v56, %v4019_v22  ;;  %v3352_v0 = vrot.slane %v3351_v19, 2  ;;  %v3372_v38 = vadd.f32 %v3371_v23, %v3370_v4  ;;  %v6123_v61 = vsel %vm1657_vm14, 1.0, %v7532_v17 }
 0x1c7   : > { %v6128_v21 = vadd.f32 %v4020_v2, %v6040_v40  ;;  %v3359_v18 = vrot.slane %v3358_v49, 2  ;;  %v3366_v37 = vrot.slane %v3365_v30, 2  ;;  %v6132_v48 = vsel %vm1831_vm2, %v6123_v61, 0.0 }
 0x1c8   : > { %v3353_v24 = vadd.f32 %v3352_v0, %v3351_v19  ;;  %v3373_v50 = vrot.slane %v3372_v38, 2  ;;  %v1561_v25 = vmul.f32 %v1497_v54, %v1369_v53  ;;  %v1065_v15 = vadd.f32 %v5790_v51, %v5674_v58  ;;  %v1399_v19 = vld [vmem:[%s5172_s13 + $0x80] sm:$0xff]  ;;  %v6144_v53 = vpop.f32.mrb[26].mxu0 }
 0x1c9   : > { %vm4146_vm15 = vcmp.gt.f32.partialorder %v6128_v21, 0.5  ;;  %v3360_v43 = vadd.f32 %v3359_v18, %v3358_v49  ;;  %v3367_v40 = vadd.f32 %v3366_v37, %v3365_v30  ;;  %v1335_v31 = vmul.f32 0.2, %v1271_v55  ;;  %7596 = vst [vmem:[#allocation72_spill] sm:$0xff] %v6144_v53  ;;  %v1303_v49 = vld [vmem:[%s5166_s25 + $0x180] sm:$0xff]  ;;  %v6149_v30 = vpop.f32.mrb[26].mxu1 }
 0x1ca   : > { %v6139_v4 = vsel %vm4146_vm15, 1.0, %v7532_v17  ;;  %v3354_v56 = vrot.slane %v3353_v24, 1  ;;  %v3374_v22 = vadd.f32 %v3373_v50, %v3372_v38  ;;  %v6141_v23 = vadd.f32 %v1561_v25, %v1201_v12  ;;  %7597 = vst [vmem:[#allocation73_spill] sm:$0xff] %v6149_v30  ;;  %v1431_v55 = vld [vmem:[%s5172_s13 + $0x180] sm:$0xff] }
 0x1cb   : > { %7595 = vst [vmem:[#allocation71_spill] sm:$0xff] %v6139_v4  ;;  %v3361_v44 = vrot.slane %v3360_v43, 1  ;;  %v3368_v58 = vrot.slane %v3367_v40, 1  ;;  %v1463_v54 = vsub.f32 1.0, %v1399_v19  ;;  %v1193_v2 = vadd.f32 %v5790_v51, %v5694_v42  ;;  %v6362_v4 = vld [vmem:[%s5172_s13 + $0x1c8] sm:$0xff] }
 0x1cc   : > { %v3355_v0 = vadd.f32 %v3354_v56, %v3353_v24  ;;  %v3375_v18 = vrot.slane %v3374_v22, 1  ;;  %vm1689_vm3 = vcmp.gt.f32.partialorder %v6141_v23, 0.5  ;;  %v1367_v12 = vmul.f32 0.2, %v1303_v49  ;;  %v6160_v56 = vpop.f32.mrb[27].mxu0  ;;  %7625 = vst [vmem:[#allocation101_spill] sm:$0xff] %v6362_v4 }
 0x1cd   : > { %v3362_v38 = vadd.f32 %v3361_v44, %v3360_v43  ;;  %v3369_v37 = vadd.f32 %v3368_v58, %v3367_v40  ;;  %v6153_v50 = vsel %vm1689_vm3, 1.0, %v7532_v17  ;;  %v1527_v25 = vmul.f32 %v1463_v54, %v1335_v31  ;;  %7598 = vst [vmem:[#allocation74_spill] sm:$0xff] %v6160_v56  ;;  %v1274_v31 = vld [vmem:[%s5166_s25 + $0x98] sm:$0xff]  ;;  %v1403_v56 = vld [vmem:[%s5172_s13 + $0xa0] sm:$0xff] }
 0x1ce   : > { %v3376_v19 = vadd.f32 %v3375_v18, %v3374_v22  ;;  %v3741_v53 = vmul.f32 0.25, %v3355_v0  ;;  %v6158_v42 = vsel %vm1831_vm2, %v6153_v50, 0.0  ;;  %v1495_v24 = vsub.f32 1.0, %v1431_v55  ;;  %v1402_v0 = vld [vmem:[%s5172_s13 + $0x98] sm:$0xff]  ;;  %v6170_v18 = vpop.f32.mrb[27].mxu1 }
 0x1cf   : > { %v3742_v30 = vmul.f32 0.25, %v3362_v38  ;;  %v3743_v49 = vmul.f32 0.25, %v3369_v37  ;;  %v6162_v43 = vadd.f32 %v1527_v25, %v1065_v15  ;;  %v1076_v40 = vadd.f32 %v5790_v51, %v5710_v9  ;;  %7599 = vst [vmem:[#allocation75_spill] sm:$0xff] %v6170_v18  ;;  %v1306_v37 = vld [vmem:[%s5166_s25 + $0x198] sm:$0xff] }
 0x1d0   : > { %v3744_v44 = vmul.f32 0.25, %v3376_v19  ;;  %v4073_v22 = vsel %vm3999_vm7, %v3741_v53, %v6086_v11  ;;  %v1559_v58 = vmul.f32 %v1495_v24, %v1367_v12  ;;  %v1338_v54 = vmul.f32 0.2, %v1274_v31  ;;  %v1434_v55 = vld [vmem:[%s5172_s13 + $0x198] sm:$0xff]  ;;  %v1272_v31 = vld [vmem:[%s5166_s25 + $0x88] sm:$0xff] }
 0x1d1   : > { %v4074_v38 = vsel %vm4001_vm8, %v3742_v30, %v4073_v22  ;;  %vm1655_vm5 = vcmp.gt.f32.partialorder %v6162_v43, 0.5  ;;  %v1466_v15 = vsub.f32 1.0, %v1402_v0  ;;  %v1204_v9 = vadd.f32 %v5790_v51, %v5721_v59 }
 0x1d2   : > { %v4075_v25 = vsel %vm4003_vm10, %v3743_v49, %v4074_v38  ;;  %v6179_v11 = vsel %vm1655_vm5, 1.0, %v7532_v17  ;;  %v6181_v53 = vadd.f32 %v1559_v58, %v1193_v2  ;;  %v1370_v12 = vmul.f32 0.2, %v1306_v37  ;;  %v1400_v58 = vld [vmem:[%s5172_s13 + $0x88] sm:$0xff]  ;;  %v6210_v37 = vpop.f32.mrb[28].mxu1 }
 0x1d3   : > { %v4076_v30 = vsel %vm4005_vm11, %v3744_v44, %v4075_v25  ;;  %v6187_v19 = vsel %vm1831_vm2, %v6179_v11, 0.0  ;;  %v1530_v24 = vmul.f32 %v1466_v15, %v1338_v54  ;;  %v1498_v59 = vsub.f32 1.0, %v1434_v55  ;;  %v1304_v15 = vld [vmem:[%s5166_s25 + $0x188] sm:$0xff]  ;;  %7601 = vst [vmem:[#allocation77_spill] sm:$0xff] %v6210_v37 }
 0x1d4   : > { %v6191_v22 = vadd.f32 %v4076_v30, %v6093_v57  ;;  %vm1687_vm6 = vcmp.gt.f32.partialorder %v6181_v53, 0.5  ;;  %v1068_v2 = vadd.f32 %v5790_v51, %v5733_v26  ;;  %v1336_v49 = vmul.f32 0.2, %v1272_v31  ;;  %v6208_v51 = vpop.f32.mrb[28].mxu0  ;;  %v1432_v30 = vld [vmem:[%s5172_s13 + $0x188] sm:$0xff] }
 0x1d5   : > { %v6198_v44 = vsel %vm1687_vm6, 1.0, %v7532_v17  ;;  %v6200_v0 = vadd.f32 %v1530_v24, %v1076_v40  ;;  %v1562_v54 = vmul.f32 %v1498_v59, %v1370_v12  ;;  %v1464_v38 = vsub.f32 1.0, %v1400_v58  ;;  %7600 = vst [vmem:[#allocation76_spill] sm:$0xff] %v6208_v51  ;;  %v6218_v12 = vld [vmem:[%s7420_s2] ss:$0 sm:$0xff]  ;;  %v1277_v24 = vld [vmem:[%s5166_s25 + $0xb0] sm:$0xff] }
 0x1d6   : > { %vm4154_vm12 = vcmp.gt.f32.partialorder %v6191_v22, 0.5  ;;  %v6206_v57 = vsel %vm1831_vm2, %v6198_v44, 0.0  ;;  %v1368_v26 = vmul.f32 0.2, %v1304_v15  ;;  %v1196_v55 = vadd.f32 %v6218_v12, %v5740_v8  ;;  %v1309_v15 = vld [vmem:[%s5166_s25 + $0x1b0] sm:$0xff]  ;;  %v6237_v37 = vpop.f32.mrb[29].mxu0 }
 0x1d7   : > { %vm1658_vm13 = vcmp.gt.f32.partialorder %v6200_v0, 0.5  ;;  %v6213_v40 = vadd.f32 %v1562_v54, %v1204_v9  ;;  %v1528_v25 = vmul.f32 %v1464_v38, %v1336_v49  ;;  %v6225_v59 = vsel %vm4154_vm12, 1.0, %v7532_v17  ;;  %v1405_v49 = vld [vmem:[%s5172_s13 + $0xb0] sm:$0xff]  ;;  %7603 = vst [vmem:[#allocation79_spill] sm:$0xff] %v6237_v37  ;;  %v1275_v37 = vld [vmem:[%s5166_s25 + $0xa0] sm:$0xff] }
 0x1d8   : > { %7602 = vst [vmem:[#allocation78_spill] sm:$0xff] %v6225_v59  ;;  %v6228_v31 = vsel %vm1658_vm13, 1.0, %v7532_v17  ;;  %v1496_v9 = vsub.f32 1.0, %v1432_v30  ;;  %v1341_v58 = vmul.f32 0.2, %v1277_v24  ;;  %v1089_v8 = vadd.f32 %v6218_v12, %v5783_v27  ;;  %v6299_v59 = vld [vmem:[%s5166_s25 + $0x1c8] sm:$0xff] }
 0x1d9   : > { %vm1690_vm14 = vcmp.gt.f32.partialorder %v6213_v40, 0.5  ;;  %v6232_v54 = vadd.f32 %v1528_v25, %v1068_v2  ;;  %v1469_v38 = vsub.f32 1.0, %v1405_v49  ;;  %v6241_v51 = vsel %vm1831_vm2, %v6228_v31, 0.0  ;;  %v1437_v2 = vld [vmem:[%s5172_s13 + $0x1b0] sm:$0xff]  ;;  %7612 = vst [vmem:[#allocation88_spill] sm:$0xff] %v6299_v59  ;;  %v6314_v59 = vld [vmem:[%s5166_s25 + $0x1e0] sm:$0xff] }
 0x1da   : > { %v6244_v30 = vsel %vm1690_vm14, 1.0, %v7532_v17  ;;  %v1560_v24 = vmul.f32 %v1496_v9, %v1368_v26  ;;  %v1373_v18 = vmul.f32 0.2, %v1309_v15  ;;  %v1217_v25 = vadd.f32 %v6218_v12, %v5785_v47  ;;  %v1435_v15 = vld [vmem:[%s5172_s13 + $0x1a0] sm:$0xff]  ;;  %7616 = vst [vmem:[#allocation92_spill] sm:$0xff] %v6314_v59  ;;  %v6332_v59 = vld [vmem:[%s5172_s13 + $0x1b8] sm:$0xff] }
 0x1db   : > { %vm1656_vm15 = vcmp.gt.f32.partialorder %v6232_v54, 0.5  ;;  %v1533_v27 = vmul.f32 %v1469_v38, %v1341_v58  ;;  %v1501_v49 = vsub.f32 1.0, %v1437_v2  ;;  %v6254_v26 = vsel %vm1831_vm2, %v6244_v30, 0.0  ;;  %v1307_v38 = vld [vmem:[%s5166_s25 + $0x1a0] sm:$0xff] }
 0x1dc   : > { %v6257_v9 = vsel %vm1656_vm15, 1.0, %v7532_v17  ;;  %v6259_v58 = vadd.f32 %v1560_v24, %v1196_v55  ;;  %v1339_v47 = vmul.f32 0.2, %v1275_v37  ;;  %v1081_v35 = vadd.f32 %v6218_v12, %v5799_v20  ;;  %v6272_v55 = vld [vmem:[%s5166_s25 + $0xa8] sm:$0xff]  ;;  %v6278_v24 = vld [vmem:[%s5166_s25 + $0xd0] sm:$0xff]  ;;  %v6290_v20 = vld [vmem:[%s5166_s25 + $0xd8] sm:$0xff] }
 0x1dd   : > { %v6263_v2 = vadd.f32 %v1533_v27, %v1089_v8  ;;  %v1565_v5 = vmul.f32 %v1501_v49, %v1373_v18  ;;  %v1467_v34 = vsub.f32 1.0, %v1403_v56  ;;  %v6275_v37 = vld [vmem:[%s5166_s25 + $0x1a8] sm:$0xff]  ;;  %7605 = vst [vmem:[#allocation81_spill] sm:$0xff] %v6278_v24  ;;  %v6281_v8 = vld [vmem:[%s5166_s25 + $0x1d0] sm:$0xff]  ;;  %v6284_v18 = vld [vmem:[%s5166_s25 + $0xc0] sm:$0xff] }
 0x1de   : > { %7604 = vst [vmem:[#allocation80_spill] sm:$0xff] %v6275_v37  ;;  %7606 = vst [vmem:[#allocation82_spill] sm:$0xff] %v6281_v8  ;;  %v6287_v27 = vld [vmem:[%s5166_s25 + $0x1c0] sm:$0xff]  ;;  %v6293_v56 = vld [vmem:[%s5166_s25 + $0x1d8] sm:$0xff]  ;;  %vm1688_vm3 = vcmp.gt.f32.partialorder %v6259_v58, 0.5 }
 0x1df   : > { %7607 = vst [vmem:[#allocation83_spill] sm:$0xff] %v6284_v18  ;;  %7608 = vst [vmem:[#allocation84_spill] sm:$0xff] %v6287_v27  ;;  %v6296_v49 = vld [vmem:[%s5166_s25 + $0xc8] sm:$0xff]  ;;  %v6302_v37 = vld [vmem:[%s5166_s25 + $0xf0] sm:$0xff]  ;;  %vm1661_vm5 = vcmp.gt.f32.partialorder %v6263_v2, 0.5 }
 0x1e0   : > { %7609 = vst [vmem:[#allocation85_spill] sm:$0xff] %v6290_v20  ;;  %7610 = vst [vmem:[#allocation86_spill] sm:$0xff] %v6293_v56  ;;  %v6305_v24 = vld [vmem:[%s5166_s25 + $0x1f0] sm:$0xff]  ;;  %v1209_v20 = vadd.f32 %v6218_v12, %v5898_v32  ;;  %v1371_v56 = vmul.f32 0.2, %v1307_v38  ;;  %v6311_v27 = vld [vmem:[%s5166_s25 + $0xe0] sm:$0xff]  ;;  %v6326_v32 = vadd.f32 %v1565_v5, %v1217_v25  ;;  %v1531_v38 = vmul.f32 %v1467_v34, %v1339_v47 }
 0x1e1   : > { %7611 = vst [vmem:[#allocation87_spill] sm:$0xff] %v6296_v49  ;;  %7613 = vst [vmem:[#allocation89_spill] sm:$0xff] %v6302_v37  ;;  %v1499_v49 = vsub.f32 1.0, %v1435_v15  ;;  %v6329_v15 = vld [vmem:[%s5172_s13 + $0xb8] sm:$0xff]  ;;  %v6338_v37 = vld [vmem:[%s5172_s13 + $0x1a8] sm:$0xff] }
 0x1e2   : > { %7614 = vst [vmem:[#allocation90_spill] sm:$0xff] %v6305_v24  ;;  %7615 = vst [vmem:[#allocation91_spill] sm:$0xff] %v6311_v27  ;;  %v6323_v24 = vsel %vm1688_vm3, 1.0, %v7532_v17  ;;  %v6335_v27 = vld [vmem:[%s5172_s13 + $0xa8] sm:$0xff]  ;;  %v6341_v18 = vld [vmem:[%s5172_s13 + $0xd0] sm:$0xff]  ;;  %vm1693_vm6 = vcmp.gt.f32.partialorder %v6326_v32, 0.5 }
 0x1e3   : > { %7617 = vst [vmem:[#allocation93_spill] sm:$0xff] %v6338_v37  ;;  %7618 = vst [vmem:[#allocation94_spill] sm:$0xff] %v6341_v18  ;;  %v6344_v8 = vld [vmem:[%s5172_s13 + $0x1d0] sm:$0xff]  ;;  %v6350_v5 = vld [vmem:[%s5172_s13 + $0x1c0] sm:$0xff]  ;;  %v6388_v4 = vsel %vm1831_vm2, %v6323_v24, 0.0  ;;  %v1563_v41 = vmul.f32 %v1499_v49, %v1371_v56  ;;  %v1595_v56 = vadd.f32 %v1531_v38, %v1081_v35 }
 0x1e4   : > { %7619 = vst [vmem:[#allocation95_spill] sm:$0xff] %v6344_v8  ;;  %7621 = vst [vmem:[#allocation97_spill] sm:$0xff] %v6350_v5  ;;  %v6353_v34 = vld [vmem:[%s5172_s13 + $0xd8] sm:$0xff]  ;;  %v6359_v47 = vld [vmem:[%s5172_s13 + $0xc8] sm:$0xff]  ;;  %v6413_v49 = vmul.f32 0.2, %v1278_v6 }
 0x1e5   : > { %7622 = vst [vmem:[#allocation98_spill] sm:$0xff] %v6353_v34  ;;  %v6356_v25 = vld [vmem:[%s5172_s13 + $0x1d8] sm:$0xff]  ;;  %7624 = vst [vmem:[#allocation100_spill] sm:$0xff] %v6359_v47  ;;  %v6365_v37 = vld [vmem:[%s5172_s13 + $0xf0] sm:$0xff]  ;;  %v6425_v47 = vsel %vm1693_vm6, 1.0, %v7532_v17  ;;  %v1470_v6 = vsub.f32 1.0, %v6329_v15 }
 0x1e6   : > { %7623 = vst [vmem:[#allocation99_spill] sm:$0xff] %v6356_v25  ;;  %7626 = vst [vmem:[#allocation102_spill] sm:$0xff] %v6365_v37  ;;  %v6368_v18 = vld [vmem:[%s5172_s13 + $0x1f0] sm:$0xff]  ;;  %v6371_v8 = vld [vmem:[%s5172_s13 + $0xe0] sm:$0xff]  ;;  %v6384_v25 = vsel %vm1831_vm2, %v6257_v9, 0.0  ;;  %vm1659_vm12 = vcmp.gt.f32.partialorder %v1595_v56, 0.5 }
 0x1e7   : > { %7627 = vst [vmem:[#allocation103_spill] sm:$0xff] %v6368_v18  ;;  %7628 = vst [vmem:[#allocation104_spill] sm:$0xff] %v6371_v8  ;;  %v6377_v5 = vld [vmem:[%s5166_s25 + $0x1f8] sm:$0xff]  ;;  %v6380_v34 = vld [vmem:[%s5166_s25 + $0xe8] sm:$0xff]  ;;  %v6393_v8 = vsel %vm1661_vm5, 1.0, %v7532_v17 }
 0x1e8   : > { %7630 = vst [vmem:[#allocation106_spill] sm:$0xff] %v6377_v5  ;;  %7631 = vst [vmem:[#allocation107_spill] sm:$0xff] %v6380_v34  ;;  %v6396_v18 = vld [vmem:[%s5172_s13 + $0x1e0] sm:$0xff]  ;;  %v6399_v34 = vld [vmem:[%s5172_s13 + $0xf8] sm:$0xff]  ;;  %v1991_v37 = vsel %vm1831_vm2, %v6393_v8, 0.0 }
 0x1e9   : > { %7632 = vst [vmem:[#allocation108_spill] sm:$0xff] %v6388_v4  ;;  %7633 = vst [vmem:[#allocation109_spill] sm:$0xff] %v6396_v18  ;;  %v6402_v5 = vld [vmem:[%s5172_s13 + $0x1f8] sm:$0xff]  ;;  %v6422_v18 = vadd.f32 %v1991_v37, %v6132_v48  ;;  %v6427_v4 = vadd.f32 %v1563_v41, %v1209_v20  ;;  %v3790_v35 = vld [vmem:[%s5206_s20 + $0x28] sm:$0xff] }
 0x1ea   : > { %7634 = vst [vmem:[#allocation110_spill] sm:$0xff] %v6399_v34  ;;  %7635 = vst [vmem:[#allocation111_spill] sm:$0xff] %v6402_v5  ;;  %v6416_v5 = vld [vmem:[%s5172_s13 + $0xe8] sm:$0xff]  ;;  %v7637_v38 = vld [vmem:[#allocation12_spill] sm:$0xff] }
 0x1eb   : > { %v6419_v34 = vld [vmem:[%s5166_s25 + $0x1e8] sm:$0xff]  ;;  %v7639_v48 = vld [vmem:[#allocation10_spill] sm:$0xff]  ;;  %v7641_v41 = vld [vmem:[#allocation28_spill] sm:$0xff]  ;;  %vm1691_vm13 = vcmp.gt.f32.partialorder %v6427_v4, 0.5 }
 0x1ec   : > { %7636 = vst [vmem:[#allocation112_spill] sm:$0xff] %v6419_v34  ;;  %1832 = vst.msk [vmem:[%s6320_s23] sm:$0xff] %vm1831_vm2, %v7637_v38  ;;  %v7638_v34 = vld [vmem:[#allocation21_spill] sm:$0xff]  ;;  %v7640_v37 = vld [vmem:[#allocation14_spill] sm:$0xff] }
 0x1ed   : > { %1833 = vst.msk [vmem:[%s6320_s23 + $0x8] sm:$0xff] %vm1831_vm2, %v7638_v34  ;;  %1834 = vst.msk [vmem:[%s6320_s23 + $0x10] sm:$0xff] %vm1831_vm2, %v7639_v48  ;;  %v7642_v20 = vld [vmem:[#allocation25_spill] sm:$0xff]  ;;  %v7656_v34 = vld [vmem:[#allocation62_spill] sm:$0xff] }
 0x1ee   : > { %1835 = vst.msk [vmem:[%s6320_s23 + $0x18] sm:$0xff] %vm1831_vm2, %v7640_v37  ;;  %1836 = vst.msk [vmem:[%s6320_s23 + $0x20] sm:$0xff] %vm1831_vm2, %v7641_v41  ;;  %v7657_v38 = vld [vmem:[#allocation8_spill] sm:$0xff]  ;;  %v7658_v48 = vld [vmem:[#allocation39_spill] sm:$0xff] }
 0x1ef   : > { %1837 = vst.msk [vmem:[%s6320_s23 + $0x28] sm:$0xff] %vm1831_vm2, %v5603_v36  ;;  %1838 = vst.msk [vmem:[%s6320_s23 + $0x30] sm:$0xff] %vm1831_vm2, %v7642_v20  ;;  %v7643_v36 = vld [vmem:[#allocation4_spill] sm:$0xff]  ;;  %v7664_v20 = vld [vmem:[#allocation46_spill] sm:$0xff] }
 0x1f0   : > { %1839 = vst.msk [vmem:[%s6320_s23 + $0x38] sm:$0xff] %vm1831_vm2, %v5479_v29  ;;  %1840 = vst.msk [vmem:[%s6320_s23 + $0x40] sm:$0xff] %vm1831_vm2, %v5736_v52  ;;  %v7644_v29 = vld [vmem:[#allocation37_spill] sm:$0xff]  ;;  %v7646_v52 = vld [vmem:[#allocation23_spill] sm:$0xff] }
 0x1f1   : > { %1841 = vst.msk [vmem:[%s6320_s23 + $0x48] sm:$0xff] %vm1831_vm2, %v5807_v33  ;;  %1842 = vst.msk [vmem:[%s6320_s23 + $0x50] sm:$0xff] %vm1831_vm2, %v5687_v1  ;;  %v7645_v1 = vld [vmem:[#allocation13_spill] sm:$0xff]  ;;  %v7648_v33 = vld [vmem:[#allocation16_spill] sm:$0xff] }
 0x1f2   : > { %1843 = vst.msk [vmem:[%s6320_s23 + $0x58] sm:$0xff] %vm1831_vm2, %v5760_v46  ;;  %1844 = vst.msk [vmem:[%s6320_s23 + $0x60] sm:$0xff] %vm1831_vm2, %v7643_v36  ;;  %v7647_v46 = vld [vmem:[#allocation11_spill] sm:$0xff]  ;;  %v7662_v37 = vld [vmem:[#allocation20_spill] sm:$0xff] }
 0x1f3   : > { %1845 = vst.msk [vmem:[%s6320_s23 + $0x68] sm:$0xff] %vm1831_vm2, %v6029_v3  ;;  %1846 = vst.msk [vmem:[%s6320_s23 + $0x70] sm:$0xff] %vm1831_vm2, %v7644_v29  ;;  %v7650_v3 = vld [vmem:[#allocation50_spill] sm:$0xff]  ;;  %v7663_v41 = vld [vmem:[#allocation32_spill] sm:$0xff] }
 0x1f4   : > { %1847 = vst.msk [vmem:[%s6320_s23 + $0x78] sm:$0xff] %vm1831_vm2, %v5951_v14  ;;  %1848 = vst.msk [vmem:[%s6320_s23 + $0x80] sm:$0xff] %vm1831_vm2, %v6162_v43  ;;  %v7649_v14 = vld [vmem:[#allocation29_spill] sm:$0xff]  ;;  %v7652_v43 = vld [vmem:[#allocation34_spill] sm:$0xff] }
 0x1f5   : > { %1849 = vst.msk [vmem:[%s6320_s23 + $0x88] sm:$0xff] %vm1831_vm2, %v6232_v54  ;;  %1850 = vst.msk [vmem:[%s6320_s23 + $0x90] sm:$0xff] %vm1831_vm2, %v6108_v10  ;;  %v7651_v10 = vld [vmem:[#allocation27_spill] sm:$0xff]  ;;  %v7654_v54 = vld [vmem:[#allocation36_spill] sm:$0xff] }
 0x1f6   : > { %1851 = vst.msk [vmem:[%s6320_s23 + $0x98] sm:$0xff] %vm1831_vm2, %v6200_v0  ;;  %1854 = vst.msk [vmem:[%s6320_s23 + $0xb0] sm:$0xff] %vm1831_vm2, %v6263_v2  ;;  %v7653_v0 = vld [vmem:[#allocation59_spill] sm:$0xff]  ;;  %v7655_v2 = vld [vmem:[#allocation53_spill] sm:$0xff] }
 0x1f7   : > { %1864 = vst.msk [vmem:[%s6320_s23 + $0x100] sm:$0xff] %vm1831_vm2, %v7645_v1  ;;  %1865 = vst.msk [vmem:[%s6320_s23 + $0x108] sm:$0xff] %vm1831_vm2, %v7646_v52  ;;  %v7665_v36 = vld [vmem:[#allocation30_spill] sm:$0xff]  ;;  %v7666_v29 = vld [vmem:[#allocation44_spill] sm:$0xff] }
 0x1f8   : > { %1866 = vst.msk [vmem:[%s6320_s23 + $0x110] sm:$0xff] %vm1831_vm2, %v7647_v46  ;;  %1867 = vst.msk [vmem:[%s6320_s23 + $0x118] sm:$0xff] %vm1831_vm2, %v7648_v33  ;;  %v7667_v1 = vld [vmem:[#allocation58_spill] sm:$0xff]  ;;  %v7670_v33 = vld [vmem:[#allocation61_spill] sm:$0xff] }
 0x1f9   : > { %1868 = vst.msk [vmem:[%s6320_s23 + $0x120] sm:$0xff] %vm1831_vm2, %v7649_v14  ;;  %1869 = vst.msk [vmem:[%s6320_s23 + $0x128] sm:$0xff] %vm1831_vm2, %v7650_v3  ;;  %v7668_v52 = vld [vmem:[#allocation2_spill] sm:$0xff]  ;;  %v7671_v14 = vld [vmem:[#allocation40_spill] sm:$0xff] }
 0x1fa   : > { %1870 = vst.msk [vmem:[%s6320_s23 + $0x130] sm:$0xff] %vm1831_vm2, %v7651_v10  ;;  %1871 = vst.msk [vmem:[%s6320_s23 + $0x138] sm:$0xff] %vm1831_vm2, %v7652_v43  ;;  %v7669_v46 = vld [vmem:[#allocation54_spill] sm:$0xff]  ;;  %v7673_v10 = vld [vmem:[#allocation63_spill] sm:$0xff] }
 0x1fb   : > { %1872 = vst.msk [vmem:[%s6320_s23 + $0x140] sm:$0xff] %vm1831_vm2, %v7653_v0  ;;  %1873 = vst.msk [vmem:[%s6320_s23 + $0x148] sm:$0xff] %vm1831_vm2, %v7654_v54  ;;  %v7672_v3 = vld [vmem:[#allocation38_spill] sm:$0xff]  ;;  %v7680_v43 = vld [vmem:[#allocation31_spill] sm:$0xff] }
 0x1fc   : > { %1874 = vst.msk [vmem:[%s6320_s23 + $0x150] sm:$0xff] %vm1831_vm2, %v7655_v2  ;;  %1875 = vst.msk [vmem:[%s6320_s23 + $0x158] sm:$0xff] %vm1831_vm2, %v7656_v34  ;;  %v7681_v0 = vld [vmem:[#allocation45_spill] sm:$0xff]  ;;  %v7682_v54 = vld [vmem:[#allocation60_spill] sm:$0xff] }
 0x1fd   : > { %1876 = vst.msk [vmem:[%s6320_s23 + $0x160] sm:$0xff] %vm1831_vm2, %v7657_v38  ;;  %1877 = vst.msk [vmem:[%s6320_s23 + $0x168] sm:$0xff] %vm1831_vm2, %v6069_v7  ;;  %v6561_v7 = vadd.f32 %v6218_v12, %v5914_v62  ;;  %v7683_v2 = vld [vmem:[#allocation5_spill] sm:$0xff]  ;;  %v7684_v34 = vld [vmem:[#allocation55_spill] sm:$0xff] }
 0x1fe   : > { %1878 = vst.msk [vmem:[%s6320_s23 + $0x170] sm:$0xff] %vm1831_vm2, %v7658_v48  ;;  %1879 = vst.msk [vmem:[%s6320_s23 + $0x178] sm:$0xff] %vm1831_vm2, %v5986_v39  ;;  %v2039_v39 = vsel %vm1831_vm2, %v6425_v47, 0.0  ;;  %v7685_v38 = vld [vmem:[#allocation35_spill] sm:$0xff]  ;;  %v7686_v48 = vld [vmem:[#allocation9_spill] sm:$0xff] }
 0x1ff   : > { %1880 = vst.msk [vmem:[%s6320_s23 + $0x180] sm:$0xff] %vm1831_vm2, %v6181_v53  ;;  %1881 = vst.msk [vmem:[%s6320_s23 + $0x188] sm:$0xff] %vm1831_vm2, %v6259_v58  ;;  %v6566_v53 = vld [vmem:[%s5172_s13 + $0x1e8] sm:$0xff]  ;;  %v6574_v58 = vrot.slane %v6422_v18, %v5258_v63  ;;  %v6577_v62 = vadd.f32 %v2039_v39, %v6158_v42  ;;  %s6844_s13 = scalar_lea.vmem %s7427_s9, %s5192_s14 }
 0x200   : > { %1882 = vst.msk [vmem:[%s6320_s23 + $0x190] sm:$0xff] %vm1831_vm2, %v6141_v23  ;;  %1883 = vst.msk [vmem:[%s6320_s23 + $0x198] sm:$0xff] %vm1831_vm2, %v6213_v40  ;;  %v6563_v23 = vmul.f32 0.2, %v3790_v35  ;;  %v2258_v40 = vcombine.high %v6422_v18, %v6422_v18  ;;  %v6581_v35 = vld [vmem:[%s5212_s24 + $0x28] sm:$0xff]  ;;  %v7660_v18 = vld [vmem:[#allocation24_spill] sm:$0xff] }
 0x201   : > { %1886 = vst.msk [vmem:[%s6320_s23 + $0x1b0] sm:$0xff] %vm1831_vm2, %v6326_v32  ;;  %1852 = vst.msk [vmem:[%s6320_s23 + $0xa0] sm:$0xff] %vm1831_vm2, %v1595_v56  ;;  %v4697_v32 = vsel %vm1659_vm12, 1.0, %v7532_v17  ;;  %v7659_v56 = vld [vmem:[#allocation18_spill] sm:$0xff]  ;;  %v7661_v42 = vld [vmem:[#allocation15_spill] sm:$0xff] }
 0x202   : > { %1884 = vst.msk [vmem:[%s6320_s23 + $0x1a0] sm:$0xff] %vm1831_vm2, %v6427_v4  ;;  %1896 = vst.msk [vmem:[%s6408_s28] sm:$0xff] %vm1831_vm2, %v7659_v56  ;;  %v7687_v39 = vld [vmem:[#allocation7_spill] sm:$0xff]  ;;  %v7688_v56 = vld [vmem:[#allocation64_spill] sm:$0xff]  ;;  %v2530_v4 = vcombine.high %v6577_v62, %v6577_v62 }
 0x203   : > { %1897 = vst.msk [vmem:[%s6408_s28 + $0x8] sm:$0xff] %vm1831_vm2, %v7660_v18  ;;  %1898 = vst.msk [vmem:[%s6408_s28 + $0x10] sm:$0xff] %vm1831_vm2, %v7661_v42  ;;  %v6729_v18 = vpop.f32.mrb[29].mxu1 }
 0x204   : > { %1899 = vst.msk [vmem:[%s6408_s28 + $0x18] sm:$0xff] %vm1831_vm2, %v7662_v37  ;;  %1900 = vst.msk [vmem:[%s6408_s28 + $0x20] sm:$0xff] %vm1831_vm2, %v7663_v41  ;;  %v2544_v37 = vrot.slane %v2530_v4, %v5258_v63 }
 0x205   : > { %1901 = vst.msk [vmem:[%s6408_s28 + $0x28] sm:$0xff] %vm1831_vm2, %v7664_v20  ;;  %1902 = vst.msk [vmem:[%s6408_s28 + $0x30] sm:$0xff] %vm1831_vm2, %v7665_v36 }
 0x206   : > { %1903 = vst.msk [vmem:[%s6408_s28 + $0x38] sm:$0xff] %vm1831_vm2, %v7666_v29  ;;  %1904 = vst.msk [vmem:[%s6408_s28 + $0x40] sm:$0xff] %vm1831_vm2, %v7667_v1  ;;  %v2546_v29 = vcombine.high %v2544_v37, %v2544_v37 }
 0x207   : > { %1905 = vst.msk [vmem:[%s6408_s28 + $0x48] sm:$0xff] %vm1831_vm2, %v7668_v52  ;;  %1906 = vst.msk [vmem:[%s6408_s28 + $0x50] sm:$0xff] %vm1831_vm2, %v7669_v46  ;;  %v3503_v52 = vsel %vm2760_vm9, %v2544_v37, 0.0 }
 0x208   : > { %1907 = vst.msk [vmem:[%s6408_s28 + $0x58] sm:$0xff] %vm1831_vm2, %v7670_v33  ;;  %1908 = vst.msk [vmem:[%s6408_s28 + $0x60] sm:$0xff] %vm1831_vm2, %v7671_v14 }
 0x209   : > { %1909 = vst.msk [vmem:[%s6408_s28 + $0x68] sm:$0xff] %vm1831_vm2, %v6038_v60  ;;  %1910 = vst.msk [vmem:[%s6408_s28 + $0x70] sm:$0xff] %vm1831_vm2, %v7672_v3  ;;  %v7674_v60 = vld [vmem:[#allocation19_spill] sm:$0xff] }
 0x20a   : > { %1911 = vst.msk [vmem:[%s6408_s28 + $0x78] sm:$0xff] %vm1831_vm2, %v7673_v10  ;;  %1912 = vst.msk [vmem:[%s6408_s28 + $0x80] sm:$0xff] %vm1831_vm2, %v6179_v11  ;;  %v7675_v11 = vld [vmem:[#allocation26_spill] sm:$0xff] }
 0x20b   : > { %1913 = vst.msk [vmem:[%s6408_s28 + $0x88] sm:$0xff] %vm1831_vm2, %v6257_v9  ;;  %1914 = vst.msk [vmem:[%s6408_s28 + $0x90] sm:$0xff] %vm1831_vm2, %v6123_v61  ;;  %v7676_v9 = vld [vmem:[#allocation17_spill] sm:$0xff]  ;;  %v7677_v61 = vld [vmem:[#allocation22_spill] sm:$0xff] }
 0x20c   : > { %1915 = vst.msk [vmem:[%s6408_s28 + $0x98] sm:$0xff] %vm1831_vm2, %v6228_v31  ;;  %1918 = vst.msk [vmem:[%s6408_s28 + $0xb0] sm:$0xff] %vm1831_vm2, %v6393_v8  ;;  %v7678_v31 = vld [vmem:[#allocation33_spill] sm:$0xff]  ;;  %v7679_v8 = vld [vmem:[#allocation52_spill] sm:$0xff] }
 0x20d   : > { %1928 = vst.msk [vmem:[%s6408_s28 + $0x100] sm:$0xff] %vm1831_vm2, %v7674_v60  ;;  %1929 = vst.msk [vmem:[%s6408_s28 + $0x108] sm:$0xff] %vm1831_vm2, %v7675_v11  ;;  %v3504_v11 = vrot.slane %v3503_v52, 4 }
 0x20e   : > { %1930 = vst.msk [vmem:[%s6408_s28 + $0x110] sm:$0xff] %vm1831_vm2, %v7676_v9  ;;  %1931 = vst.msk [vmem:[%s6408_s28 + $0x118] sm:$0xff] %vm1831_vm2, %v7677_v61  ;;  %v3510_v9 = vsel %vm2760_vm9, %v2546_v29, 0.0 }
 0x20f   : > { %1932 = vst.msk [vmem:[%s6408_s28 + $0x120] sm:$0xff] %vm1831_vm2, %v7678_v31  ;;  %1933 = vst.msk [vmem:[%s6408_s28 + $0x128] sm:$0xff] %vm1831_vm2, %v7679_v8 }
 0x210   : > { %1934 = vst.msk [vmem:[%s6408_s28 + $0x130] sm:$0xff] %vm1831_vm2, %v7680_v43  ;;  %1935 = vst.msk [vmem:[%s6408_s28 + $0x138] sm:$0xff] %vm1831_vm2, %v7681_v0 }
 0x211   : > { %1936 = vst.msk [vmem:[%s6408_s28 + $0x140] sm:$0xff] %vm1831_vm2, %v7682_v54  ;;  %1937 = vst.msk [vmem:[%s6408_s28 + $0x148] sm:$0xff] %vm1831_vm2, %v7683_v2  ;;  %v3505_v2 = vadd.f32 %v3504_v11, %v3503_v52 }
 0x212   : > { %1938 = vst.msk [vmem:[%s6408_s28 + $0x150] sm:$0xff] %vm1831_vm2, %v7684_v34  ;;  %1939 = vst.msk [vmem:[%s6408_s28 + $0x158] sm:$0xff] %vm1831_vm2, %v7685_v38  ;;  %v3511_v34 = vrot.slane %v3510_v9, 4 }
 0x213   : > { %1940 = vst.msk [vmem:[%s6408_s28 + $0x160] sm:$0xff] %vm1831_vm2, %v7686_v48  ;;  %1941 = vst.msk [vmem:[%s6408_s28 + $0x168] sm:$0xff] %vm1831_vm2, %v6081_v45  ;;  %v1985_v45 = vsel %vm1831_vm2, %v4697_v32, 0.0 }
 0x214   : > { %1942 = vst.msk [vmem:[%s6408_s28 + $0x170] sm:$0xff] %vm1831_vm2, %v7687_v39  ;;  %1943 = vst.msk [vmem:[%s6408_s28 + $0x178] sm:$0xff] %vm1831_vm2, %v7688_v56 }
 0x215   : > { %1944 = vst.msk [vmem:[%s6408_s28 + $0x180] sm:$0xff] %vm1831_vm2, %v6198_v44  ;;  %1945 = vst.msk [vmem:[%s6408_s28 + $0x188] sm:$0xff] %vm1831_vm2, %v6323_v24  ;;  %v6717_v44 = vmul.f32 %v1470_v6, %v6413_v49  ;;  %v3838_v24 = vsub.f32 1.0, %v6581_v35  ;;  %v2537_v49 = vrot.slane %v6577_v62, %v5258_v63  ;;  %v6734_v6 = vadd.f32 %v1985_v45, %v6187_v19 }
 0x216   : > { %1946 = vst.msk [vmem:[%s6408_s28 + $0x190] sm:$0xff] %vm1831_vm2, %v6153_v50  ;;  %1947 = vst.msk [vmem:[%s6408_s28 + $0x198] sm:$0xff] %vm1831_vm2, %v6244_v30  ;;  %v2272_v50 = vrot.slane %v2258_v40, %v5258_v63  ;;  %v2273_v30 = vcombine.high %v6574_v58, %v6574_v58  ;;  %v6737_v40 = vsel %vm1691_vm13, 1.0, %v7532_v17 }
 0x217   : > { %1950 = vst.msk [vmem:[%s6408_s28 + $0x1b0] sm:$0xff] %vm1831_vm2, %v6425_v47  ;;  %1916 = vst.msk [vmem:[%s6408_s28 + $0xa0] sm:$0xff] %vm1831_vm2, %v4697_v32  ;;  %v3041_v47 = vsel %vm2760_vm9, %v6574_v58, 0.0  ;;  %v2545_v62 = vcombine.high %v2537_v49, %v2537_v49  ;;  %v3489_v1 = vsel %vm2760_vm9, %v2537_v49, 0.0 }
 0x218   : > { %v3042_v15 = vrot.slane %v3041_v47, 4  ;;  %v2274_v32 = vcombine.high %v2272_v50, %v2272_v50  ;;  %v3048_v42 = vsel %vm2760_vm9, %v2273_v30, 0.0  ;;  %v3055_v58 = vsel %vm2760_vm9, %v2272_v50, 0.0  ;;  %1948 = vst.msk [vmem:[%s6408_s28 + $0x1a0] sm:$0xff] %vm1831_vm2, %v6737_v40 }
 0x219   : > { %v3049_v20 = vrot.slane %v3048_v42, 4  ;;  %v3056_v36 = vrot.slane %v3055_v58, 4  ;;  %v3490_v10 = vrot.slane %v3489_v1, 4  ;;  %v3496_v60 = vsel %vm2760_vm9, %v2545_v62, 0.0 }
 0x21a   : > { %v3043_v41 = vadd.f32 %v3042_v15, %v3041_v47  ;;  %v3062_v19 = vsel %vm2760_vm9, %v2274_v32, 0.0  ;;  %v3497_v54 = vrot.slane %v3496_v60, 4  ;;  %v3506_v30 = vrot.slane %v3505_v2, 2 }
 0x21b   : > { %v3050_v33 = vadd.f32 %v3049_v20, %v3048_v42  ;;  %v3057_v14 = vadd.f32 %v3056_v36, %v3055_v58  ;;  %v3063_v3 = vrot.slane %v3062_v19, 4  ;;  %v3491_v0 = vadd.f32 %v3490_v10, %v3489_v1  ;;  %v6750_v20 = vpop.f32.mrb[30].mxu0 }
 0x21c   : > { %v3044_v46 = vrot.slane %v3043_v41, 2  ;;  %v3498_v50 = vadd.f32 %v3497_v54, %v3496_v60  ;;  %v3512_v47 = vadd.f32 %v3511_v34, %v3510_v9  ;;  %v3507_v37 = vadd.f32 %v3506_v30, %v3505_v2  ;;  %v6767_v30 = vpop.f32.mrb[30].mxu1 }
 0x21d   : > { %v3051_v31 = vrot.slane %v3050_v33, 2  ;;  %v3058_v8 = vrot.slane %v3057_v14, 2  ;;  %v3064_v43 = vadd.f32 %v3063_v3, %v3062_v19  ;;  %v3492_v45 = vrot.slane %v3491_v0, 2 }
 0x21e   : > { %v3045_v61 = vadd.f32 %v3044_v46, %v3043_v41  ;;  %v3499_v58 = vrot.slane %v3498_v50, 2  ;;  %v3513_v41 = vrot.slane %v3512_v47, 2  ;;  %v3508_v46 = vrot.slane %v3507_v37, 1 }
 0x21f   : > { %v3052_v48 = vadd.f32 %v3051_v31, %v3050_v33  ;;  %v3059_v39 = vadd.f32 %v3058_v8, %v3057_v14  ;;  %v3065_v56 = vrot.slane %v3064_v43, 2  ;;  %v3493_v42 = vadd.f32 %v3492_v45, %v3491_v0 }
 0x220   : > { %v3046_v38 = vrot.slane %v3045_v61, 1  ;;  %v3500_v52 = vadd.f32 %v3499_v58, %v3498_v50  ;;  %v3514_v33 = vadd.f32 %v3513_v41, %v3512_v47  ;;  %v2224_v60 = vcombine.high %v6734_v6, %v6734_v6 }
 0x221   : > { %v3053_v15 = vrot.slane %v3052_v48, 1  ;;  %v3060_v49 = vrot.slane %v3059_v39, 1  ;;  %v3066_v32 = vadd.f32 %v3065_v56, %v3064_v43  ;;  %v3494_v1 = vrot.slane %v3493_v42, 1 }
 0x222   : > { %v3047_v4 = vadd.f32 %v3046_v38, %v3045_v61  ;;  %v3501_v9 = vrot.slane %v3500_v52, 1  ;;  %v3509_v61 = vadd.f32 %v3508_v46, %v3507_v37  ;;  %v3515_v31 = vrot.slane %v3514_v33, 1 }
 0x223   : > { %v3054_v36 = vadd.f32 %v3053_v15, %v3052_v48  ;;  %v3061_v62 = vadd.f32 %v3060_v49, %v3059_v39  ;;  %v3067_v19 = vrot.slane %v3066_v32, 1  ;;  %v3495_v11 = vadd.f32 %v3494_v1, %v3493_v42 }
 0x224   : > { %v3697_v29 = vmul.f32 0.25, %v3047_v4  ;;  %v2231_v43 = vrot.slane %v6734_v6, %v5258_v63  ;;  %v2238_v0 = vrot.slane %v2224_v60, %v5258_v63  ;;  %v6761_v54 = vmul.f32 %v3838_v24, %v6563_v23 }
 0x225   : > { %v3068_v14 = vadd.f32 %v3067_v19, %v3066_v32  ;;  %v3698_v3 = vmul.f32 0.25, %v3054_v36  ;;  %v3699_v10 = vmul.f32 0.25, %v3061_v62  ;;  %v3502_v38 = vadd.f32 %v3501_v9, %v3500_v52 }
 0x226   : > { %v3516_v48 = vadd.f32 %v3515_v31, %v3514_v33  ;;  %v3761_v39 = vmul.f32 0.25, %v3495_v11  ;;  %v2239_v56 = vcombine.high %v2231_v43, %v2231_v43  ;;  %v2240_v45 = vcombine.high %v2238_v0, %v2238_v0 }
 0x227   : > { %v4035_v8 = vsel %vm3993_vm0, %v3698_v3, %v3697_v29  ;;  %v6763_v2 = vmul.f32 0.25, %v3068_v14  ;;  %v2985_v50 = vsel %vm2760_vm9, %v2231_v43, 0.0  ;;  %v3762_v6 = vmul.f32 0.25, %v3502_v38 }
 0x228   : > { %v4036_v34 = vsel %vm3995_vm1, %v3699_v10, %v4035_v8  ;;  %v3763_v47 = vmul.f32 0.25, %v3509_v61  ;;  %v2986_v4 = vrot.slane %v2985_v50, 4  ;;  %v2999_v35 = vsel %vm2760_vm9, %v2238_v0, 0.0 }
 0x229   : > { %v2992_v23 = vsel %vm2760_vm9, %v2239_v56, 0.0  ;;  %v3000_v24 = vrot.slane %v2999_v35, 4  ;;  %v3006_v15 = vsel %vm2760_vm9, %v2240_v45, 0.0  ;;  %v2033_v49 = vsel %vm1831_vm2, %v6737_v40, 0.0 }
 0x22a   : > { %v4091_v32 = vsel %vm3993_vm0, %v3762_v6, %v3761_v39  ;;  %v2987_v42 = vadd.f32 %v2986_v4, %v2985_v50  ;;  %v2993_v58 = vrot.slane %v2992_v23, 4  ;;  %v3007_v37 = vrot.slane %v3006_v15, 4 }
 0x22b   : > { %v6775_v41 = vmul.f32 0.25, %v3516_v48  ;;  %v3001_v36 = vadd.f32 %v3000_v24, %v2999_v35  ;;  %v2034_v62 = vadd.f32 %v2033_v49, %v6206_v57  ;;  %v1598_v19 = vadd.f32 %v6717_v44, %v6561_v7 }
 0x22c   : > { %v6781_v29 = vsel %vm3995_vm1, %v3763_v47, %v4091_v32  ;;  %v2988_v1 = vrot.slane %v2987_v42, 2  ;;  %v2994_v40 = vadd.f32 %v2993_v58, %v2992_v23  ;;  %v3008_v52 = vadd.f32 %v3007_v37, %v3006_v15 }
 0x22d   : > { %v3002_v46 = vrot.slane %v3001_v36, 2  ;;  %v2496_v33 = vcombine.high %v2034_v62, %v2034_v62  ;;  %v2503_v14 = vrot.slane %v2034_v62, %v5258_v63  ;;  %vm1662_vm14 = vcmp.gt.f32.partialorder %v1598_v19, 0.5  ;;  %1855 = vst.msk [vmem:[%s6320_s23 + $0xb8] sm:$0xff] %vm1831_vm2, %v1598_v19 }
 0x22e   : > { %v2989_v3 = vadd.f32 %v2988_v1, %v2987_v42  ;;  %v2995_v10 = vrot.slane %v2994_v40, 2  ;;  %v3009_v57 = vrot.slane %v3008_v52, 2  ;;  %v4700_v60 = vsel %vm1662_vm14, 1.0, %v7532_v17 }
 0x22f   : > { %v3003_v7 = vadd.f32 %v3002_v46, %v3001_v36  ;;  %v2510_v44 = vrot.slane %v2496_v33, %v5258_v63  ;;  %v2511_v11 = vcombine.high %v2503_v14, %v2503_v14  ;;  %v3433_v9 = vsel %vm2760_vm9, %v2503_v14, 0.0  ;;  %1919 = vst.msk [vmem:[%s6408_s28 + $0xb8] sm:$0xff] %vm1831_vm2, %v4700_v60 }
 0x230   : > { %v2990_v61 = vrot.slane %v2989_v3, 1  ;;  %v2996_v31 = vadd.f32 %v2995_v10, %v2994_v40  ;;  %v3010_v8 = vadd.f32 %v3009_v57, %v3008_v52  ;;  %v3434_v43 = vrot.slane %v3433_v9, 4 }
 0x231   : > { %v3004_v0 = vrot.slane %v3003_v7, 1  ;;  %v2512_v38 = vcombine.high %v2510_v44, %v2510_v44  ;;  %v3440_v48 = vsel %vm2760_vm9, %v2511_v11, 0.0  ;;  %v3447_v39 = vsel %vm2760_vm9, %v2510_v44, 0.0 }
 0x232   : > { %v2991_v56 = vadd.f32 %v2990_v61, %v2989_v3  ;;  %v2997_v45 = vrot.slane %v2996_v31, 1  ;;  %v3011_v50 = vrot.slane %v3010_v8, 1  ;;  %v3435_v6 = vadd.f32 %v3434_v43, %v3433_v9 }
 0x233   : > { %v3005_v47 = vadd.f32 %v3004_v0, %v3003_v7  ;;  %v3441_v4 = vrot.slane %v3440_v48, 4  ;;  %v3448_v35 = vrot.slane %v3447_v39, 4  ;;  %v3454_v23 = vsel %vm2760_vm9, %v2512_v38, 0.0 }
 0x234   : > { %v2998_v24 = vadd.f32 %v2997_v45, %v2996_v31  ;;  %v3012_v15 = vadd.f32 %v3011_v50, %v3010_v8  ;;  %v3436_v49 = vrot.slane %v3435_v6, 2  ;;  %v6796_v32 = vsel %vm3997_vm4, %v6763_v2, %v4036_v34  ;;  %v7689_v34 = vld [vmem:[#allocation41_spill] sm:$0xff] }
 0x235   : > { %v3689_v42 = vmul.f32 0.25, %v2991_v56  ;;  %v3442_v58 = vadd.f32 %v3441_v4, %v3440_v48  ;;  %v3449_v37 = vadd.f32 %v3448_v35, %v3447_v39  ;;  %v3455_v36 = vrot.slane %v3454_v23, 4  ;;  %v6813_v4 = vpop.f32.mrb[31].mxu0 }
 0x236   : > { %v3690_v62 = vmul.f32 0.25, %v2998_v24  ;;  %v3691_v19 = vmul.f32 0.25, %v3005_v47  ;;  %v3437_v1 = vadd.f32 %v3436_v49, %v3435_v6  ;;  %v1994_v40 = vsel %vm1831_vm2, %v4700_v60, 0.0 }
 0x237   : > { %v3443_v52 = vrot.slane %v3442_v58, 2  ;;  %v3450_v46 = vrot.slane %v3449_v37, 2  ;;  %v3456_v33 = vadd.f32 %v3455_v36, %v3454_v23  ;;  %v1995_v14 = vadd.f32 %v1994_v40, %v6241_v51 }
 0x238   : > { %v6800_v3 = vmul.f32 0.25, %v3012_v15  ;;  %v4028_v10 = vsel %vm3993_vm0, %v3690_v62, %v3689_v42  ;;  %v3438_v2 = vrot.slane %v3437_v1, 1  ;;  %v1220_v57 = vadd.f32 %v6218_v12, %v7689_v34  ;;  %v6825_v34 = vld [vmem:[%s5212_s24 + $0x68] sm:$0xff] }
 0x239   : > { %v3444_v7 = vadd.f32 %v3443_v52, %v3442_v58  ;;  %v3451_v44 = vadd.f32 %v3450_v46, %v3449_v37  ;;  %v3457_v11 = vrot.slane %v3456_v33, 2  ;;  %v1374_v9 = vmul.f32 0.2, %v6269_v28 }
 0x23a   : > { %v3439_v61 = vadd.f32 %v3438_v2, %v3437_v1  ;;  %v2275_v60 = vcombine.high %v1995_v14, %v1995_v14  ;;  %v2282_v31 = vrot.slane %v1995_v14, %v5258_v63  ;;  %v1502_v8 = vsub.f32 1.0, %v6332_v59  ;;  %v3798_v1 = vld [vmem:[%s5206_s20 + $0x68] sm:$0xff] }
 0x23b   : > { %v6809_v51 = vsel %vm3995_vm1, %v3691_v19, %v4028_v10  ;;  %v3445_v43 = vrot.slane %v3444_v7, 1  ;;  %v3452_v0 = vrot.slane %v3451_v44, 1  ;;  %v3458_v38 = vadd.f32 %v3457_v11, %v3456_v33 }
 0x23c   : > { %v3753_v48 = vmul.f32 0.25, %v3439_v61  ;;  %v2289_v39 = vrot.slane %v2275_v60, %v5258_v63  ;;  %v2290_v56 = vcombine.high %v2282_v31, %v2282_v31  ;;  %v3069_v45 = vsel %vm2760_vm9, %v2282_v31, 0.0  ;;  %v6835_v61 = vld [vmem:[%s5206_s20 + $0x60] sm:$0xff]  ;;  %v6838_v60 = vld [vmem:[%s5206_s20 + $0x38] sm:$0xff] }
 0x23d   : > { %v3446_v50 = vadd.f32 %v3445_v43, %v3444_v7  ;;  %v3453_v28 = vadd.f32 %v3452_v0, %v3451_v44  ;;  %v3459_v6 = vrot.slane %v3458_v38, 1  ;;  %v3070_v47 = vrot.slane %v3069_v45, 4 }
 0x23e   : > { %v2291_v59 = vcombine.high %v2289_v39, %v2289_v39  ;;  %v3076_v35 = vsel %vm2760_vm9, %v2290_v56, 0.0  ;;  %v3083_v23 = vsel %vm2760_vm9, %v2289_v39, 0.0  ;;  %v1566_v24 = vmul.f32 %v1502_v8, %v1374_v9  ;;  %v3789_v9 = vld [vmem:[%s5206_s20 + $0x20] sm:$0xff] }
 0x23f   : > { %v3460_v15 = vadd.f32 %v3459_v6, %v3458_v38  ;;  %v3754_v49 = vmul.f32 0.25, %v3446_v50  ;;  %v3755_v42 = vmul.f32 0.25, %v3453_v28  ;;  %v3071_v58 = vadd.f32 %v3070_v47, %v3069_v45  ;;  %v6849_v38 = vld [vmem:[%s5206_s20 + $0x78] sm:$0xff]  ;;  %v6863_v28 = vld [vmem:[%s5212_s24 + $0x20] sm:$0xff] }
 0x240   : > { %v3077_v37 = vrot.slane %v3076_v35, 4  ;;  %v3084_v36 = vrot.slane %v3083_v23, 4  ;;  %v3090_v62 = vsel %vm2760_vm9, %v2291_v59, 0.0  ;;  %v1630_v19 = vadd.f32 %v1566_v24, %v1220_v57  ;;  %v6866_v6 = vld [vmem:[%s5212_s24 + $0x60] sm:$0xff]  ;;  %v6869_v47 = vld [vmem:[%s5212_s24 + $0x38] sm:$0xff]  ;;  %v6884_v24 = vld [vmem:[%s5212_s24 + $0x30] sm:$0xff] }
 0x241   : > { %v4084_v40 = vsel %vm3993_vm0, %v3754_v49, %v3753_v48  ;;  %v3072_v52 = vrot.slane %v3071_v58, 2  ;;  %v3091_v46 = vrot.slane %v3090_v62, 4  ;;  %v6820_v33 = vmul.f32 0.2, %v3798_v1  ;;  %v6852_v48 = vld [vmem:[%s5206_s20 + $0x30] sm:$0xff]  ;;  %v7694_v1 = vld [vmem:[#allocation49_spill] sm:$0xff] }
 0x242   : > { %v6822_v14 = vmul.f32 0.25, %v3460_v15  ;;  %v3078_v10 = vadd.f32 %v3077_v37, %v3076_v35  ;;  %v3085_v2 = vadd.f32 %v3084_v36, %v3083_v23  ;;  %vm1694_vm15 = vcmp.gt.f32.partialorder %v1630_v19, 0.5  ;;  %1887 = vst.msk [vmem:[%s6320_s23 + $0x1b8] sm:$0xff] %vm1831_vm2, %v1630_v19  ;;  %v6881_v23 = vld [vmem:[%s5212_s24 + $0x78] sm:$0xff]  ;;  %v6886_v15 = vpop.f32.mrb[31].mxu1  ;;  %v6889_v49 = vld [vmem:[%s5206_s20 + $0x70] sm:$0xff] }
 0x243   : > { %v6830_v57 = vsel %vm3995_vm1, %v3755_v42, %v4084_v40  ;;  %v3073_v7 = vadd.f32 %v3072_v52, %v3071_v58  ;;  %v3092_v44 = vadd.f32 %v3091_v46, %v3090_v62  ;;  %v4732_v11 = vsel %vm1694_vm15, 1.0, %v7532_v17  ;;  %v7691_v62 = vld [vmem:[#allocation56_spill] sm:$0xff]  ;;  %v7692_v19 = vld [vmem:[#allocation47_spill] sm:$0xff]  ;;  %4194 = vst.msk [vmem:[%s6844_s13 + $0x10] sm:$0xff] %vm1831_vm2, %v6128_v21  ;;  %4195 = vst.msk [vmem:[%s6844_s13 + $0x18] sm:$0xff] %vm1831_vm2, %v6034_v16 }
 0x244   : > { %v3079_v31 = vrot.slane %v3078_v10, 2  ;;  %v3086_v8 = vrot.slane %v3085_v2, 2  ;;  %v2042_v43 = vsel %vm1831_vm2, %v4732_v11, 0.0  ;;  %v3846_v0 = vsub.f32 1.0, %v6825_v34  ;;  %1951 = vst.msk [vmem:[%s6408_s28 + $0x1b8] sm:$0xff] %vm1831_vm2, %v4732_v11  ;;  %4192 = vst.msk [vmem:[%s6844_s13] sm:$0xff] %vm1831_vm2, %v7691_v62 }
 0x245   : > { %v3074_v39 = vrot.slane %v3073_v7, 1  ;;  %v3093_v56 = vrot.slane %v3092_v44, 2  ;;  %v2043_v45 = vadd.f32 %v2042_v43, %v6254_v26  ;;  %v6860_v50 = vsel %vm3997_vm4, %v6775_v41, %v6781_v29  ;;  %v7690_v41 = vld [vmem:[#allocation42_spill] sm:$0xff]  ;;  %4193 = vst.msk [vmem:[%s6844_s13 + $0x8] sm:$0xff] %vm1831_vm2, %v7692_v19  ;;  %4201 = vst.msk [vmem:[%s6844_s13 + $0x48] sm:$0xff] %vm1831_vm2, %v7694_v1  ;;  %v6918_v46 = vld [vmem:[%s5212_s24 + $0x70] sm:$0xff] }
 0x246   : > { %v3080_v26 = vadd.f32 %v3079_v31, %v3078_v10  ;;  %v3087_v59 = vadd.f32 %v3086_v8, %v3085_v2  ;;  %v1084_v29 = vadd.f32 %v6218_v12, %v7690_v41  ;;  %v1340_v35 = vmul.f32 0.2, %v6272_v55  ;;  %v7693_v55 = vld [vmem:[#allocation3_spill] sm:$0xff]  ;;  %4202 = vst.msk [vmem:[%s6844_s13 + $0x50] sm:$0xff] %vm1831_vm2, %v6191_v22  ;;  %4203 = vst.msk [vmem:[%s6844_s13 + $0x58] sm:$0xff] %vm1831_vm2, %v6074_v13  ;;  %v7695_v11 = vld [vmem:[#allocation57_spill] sm:$0xff] }
 0x247   : > { %v3075_v42 = vadd.f32 %v3074_v39, %v3073_v7  ;;  %v3094_v58 = vadd.f32 %v3093_v56, %v3092_v44  ;;  %v2547_v37 = vcombine.high %v2043_v45, %v2043_v45  ;;  %v2554_v36 = vrot.slane %v2043_v45, %v5258_v63  ;;  %4200 = vst.msk [vmem:[%s6844_s13 + $0x40] sm:$0xff] %vm1831_vm2, %v7693_v55  ;;  %v7696_v22 = vld [vmem:[#allocation48_spill] sm:$0xff]  ;;  %v7697_v13 = vld [vmem:[#allocation71_spill] sm:$0xff]  ;;  %v7698_v31 = vld [vmem:[#allocation65_spill] sm:$0xff] }
 0x248   : > { %v3081_v21 = vrot.slane %v3080_v26, 1  ;;  %v3088_v16 = vrot.slane %v3087_v59, 1  ;;  %v1468_v40 = vsub.f32 1.0, %v6335_v27  ;;  %v3805_v52 = vmul.f32 0.2, %v3789_v9  ;;  %4208 = vst.msk [vmem:[%s6875_s11] sm:$0xff] %vm1831_vm2, %v7695_v11 }
 0x249   : > { %v3095_v10 = vrot.slane %v3094_v58, 1  ;;  %v3701_v2 = vmul.f32 0.25, %v3075_v42  ;;  %v2561_v7 = vrot.slane %v2547_v37, %v5258_v63  ;;  %v2562_v44 = vcombine.high %v2554_v36, %v2554_v36  ;;  %4209 = vst.msk [vmem:[%s6875_s11 + $0x8] sm:$0xff] %vm1831_vm2, %v7696_v22  ;;  %4210 = vst.msk [vmem:[%s6875_s11 + $0x10] sm:$0xff] %vm1831_vm2, %v7697_v13  ;;  %v7699_v27 = vld [vmem:[#allocation6_spill] sm:$0xff]  ;;  %v7700_v9 = vld [vmem:[#allocation51_spill] sm:$0xff] }
 0x24a   : > { %4211 = vst.msk [vmem:[%s6875_s11 + $0x18] sm:$0xff] %vm1831_vm2, %v7698_v31  ;;  %4216 = vst.msk [vmem:[%s6875_s11 + $0x40] sm:$0xff] %vm1831_vm2, %v7699_v27  ;;  %v7701_v8 = vld [vmem:[#allocation78_spill] sm:$0xff]  ;;  %v7702_v43 = vld [vmem:[#allocation67_spill] sm:$0xff]  ;;  %v3082_v39 = vadd.f32 %v3081_v21, %v3080_v26  ;;  %v3089_v56 = vadd.f32 %v3088_v16, %v3087_v59  ;;  %v3517_v45 = vsel %vm2760_vm9, %v2554_v36, 0.0  ;;  %v1532_v41 = vmul.f32 %v1468_v40, %v1340_v35 }
 0x24b   : > { %4217 = vst.msk [vmem:[%s6875_s11 + $0x48] sm:$0xff] %vm1831_vm2, %v7700_v9  ;;  %4218 = vst.msk [vmem:[%s6875_s11 + $0x50] sm:$0xff] %vm1831_vm2, %v7701_v8  ;;  %v3096_v42 = vadd.f32 %v3095_v10, %v3094_v58  ;;  %v4038_v37 = vsel %vm3999_vm7, %v3701_v2, %v6796_v32  ;;  %v2563_v62 = vcombine.high %v2561_v7, %v2561_v7  ;;  %v3518_v19 = vrot.slane %v3517_v45, 4 }
 0x24c   : > { %4219 = vst.msk [vmem:[%s6875_s11 + $0x58] sm:$0xff] %vm1831_vm2, %v7702_v43  ;;  %v3702_v55 = vmul.f32 0.25, %v3082_v39  ;;  %v3703_v1 = vmul.f32 0.25, %v3089_v56  ;;  %v3524_v11 = vsel %vm2760_vm9, %v2562_v44, 0.0  ;;  %v3531_v22 = vsel %vm2760_vm9, %v2561_v7, 0.0 }
 0x24d   : > { %v3704_v13 = vmul.f32 0.25, %v3096_v42  ;;  %v3519_v31 = vadd.f32 %v3518_v19, %v3517_v45  ;;  %v3525_v26 = vrot.slane %v3524_v11, 4  ;;  %v3532_v59 = vrot.slane %v3531_v22, 4 }
 0x24e   : > { %v4039_v36 = vsel %vm4001_vm8, %v3702_v55, %v4038_v37  ;;  %v3538_v35 = vsel %vm2760_vm9, %v2563_v62, 0.0  ;;  %v1596_v58 = vadd.f32 %v1532_v41, %v1084_v29  ;;  %v3837_v32 = vsub.f32 1.0, %v6863_v28  ;;  %v7703_v41 = vld [vmem:[#allocation80_spill] sm:$0xff]  ;;  %v7704_v55 = vld [vmem:[#allocation43_spill] sm:$0xff] }
 0x24f   : > { %v4040_v21 = vsel %vm4003_vm10, %v3703_v1, %v4039_v36  ;;  %v3520_v16 = vrot.slane %v3519_v31, 2  ;;  %v3526_v40 = vadd.f32 %v3525_v26, %v3524_v11  ;;  %v3533_v10 = vadd.f32 %v3532_v59, %v3531_v22  ;;  %v7705_v11 = vld [vmem:[#allocation93_spill] sm:$0xff] }
 0x250   : > { %v4041_v2 = vsel %vm4005_vm11, %v3704_v13, %v4040_v21  ;;  %v3539_v7 = vrot.slane %v3538_v35, 4  ;;  %v6958_v44 = vmul.f32 %v3846_v0, %v6820_v33  ;;  %vm1660_vm3 = vcmp.gt.f32.partialorder %v1596_v58, 0.5  ;;  %1853 = vst.msk [vmem:[%s6320_s23 + $0xa8] sm:$0xff] %vm1831_vm2, %v1596_v58 }
 0x251   : > { %v4133_v28 = vadd.f32 %v4041_v2, %v6761_v54  ;;  %v3521_v29 = vadd.f32 %v3520_v16, %v3519_v31  ;;  %v3527_v27 = vrot.slane %v3526_v40, 2  ;;  %v3534_v9 = vrot.slane %v3533_v10, 2 }
 0x252   : > { %v3540_v8 = vadd.f32 %v3539_v7, %v3538_v35  ;;  %v4698_v43 = vsel %vm1660_vm3, 1.0, %v7532_v17  ;;  %v6964_v39 = vmul.f32 %v3837_v32, %v3805_v52  ;;  %v6969_v33 = vsel %vm3997_vm4, %v6800_v3, %v6809_v51 }
 0x253   : > { %vm4149_vm5 = vcmp.gt.f32.partialorder %v4133_v28, 0.5  ;;  %v3522_v34 = vrot.slane %v3521_v29, 1  ;;  %v3528_v0 = vadd.f32 %v3527_v27, %v3526_v40  ;;  %v3535_v56 = vadd.f32 %v3534_v9, %v3533_v10  ;;  %1917 = vst.msk [vmem:[%s6408_s28 + $0xa8] sm:$0xff] %vm1831_vm2, %v4698_v43  ;;  %4197 = vst.msk [vmem:[%s6844_s13 + $0x28] sm:$0xff] %vm1831_vm2, %v4133_v28 }
 0x254   : > { %v4746_v54 = vsel %vm4149_vm5, 1.0, %v7532_v17  ;;  %v3541_v45 = vrot.slane %v3540_v8, 2  ;;  %v1988_v52 = vsel %vm1831_vm2, %v4698_v43, 0.0  ;;  %v1372_v42 = vmul.f32 0.2, %v7703_v41 }
 0x255   : > { %v3523_v37 = vadd.f32 %v3522_v34, %v3521_v29  ;;  %v3529_v62 = vrot.slane %v3528_v0, 1  ;;  %v3536_v19 = vrot.slane %v3535_v56, 1  ;;  %v1989_v3 = vadd.f32 %v1988_v52, %v6384_v25  ;;  %4213 = vst.msk [vmem:[%s6875_s11 + $0x28] sm:$0xff] %vm1831_vm2, %v4746_v54 }
 0x256   : > { %v3542_v51 = vadd.f32 %v3541_v45, %v3540_v8  ;;  %v1212_v1 = vadd.f32 %v6218_v12, %v7704_v55  ;;  %v1500_v22 = vsub.f32 1.0, %v7705_v11  ;;  %v3813_v13 = vmul.f32 0.2, %v6835_v61  ;;  %v7706_v55 = vld [vmem:[#allocation108_spill] sm:$0xff] }
 0x257   : > { %v3530_v31 = vadd.f32 %v3529_v62, %v3528_v0  ;;  %v3537_v26 = vadd.f32 %v3536_v19, %v3535_v56  ;;  %v3765_v59 = vmul.f32 0.25, %v3523_v37  ;;  %v2241_v36 = vcombine.high %v1989_v3, %v1989_v3 }
 0x258   : > { %v3543_v35 = vrot.slane %v3542_v51, 1  ;;  %v2248_v58 = vrot.slane %v1989_v3, %v5258_v63  ;;  %v1564_v32 = vmul.f32 %v1500_v22, %v1372_v42  ;;  %v3845_v25 = vsub.f32 1.0, %v6866_v6 }
 0x259   : > { %v3766_v21 = vmul.f32 0.25, %v3530_v31  ;;  %v3767_v16 = vmul.f32 0.25, %v3537_v26  ;;  %v4094_v12 = vsel %vm3999_vm7, %v3765_v59, %v6860_v50  ;;  %v2255_v40 = vrot.slane %v2241_v36, %v5258_v63 }
 0x25a   : > { %v3544_v10 = vadd.f32 %v3543_v35, %v3542_v51  ;;  %v2256_v61 = vcombine.high %v2248_v58, %v2248_v58  ;;  %v3013_v2 = vsel %vm2760_vm9, %v2248_v58, 0.0  ;;  %v1628_v7 = vadd.f32 %v1564_v32, %v1212_v1 }
 0x25b   : > { %v4095_v28 = vsel %vm4001_vm8, %v3766_v21, %v4094_v12  ;;  %v2257_v29 = vcombine.high %v2255_v40, %v2255_v40  ;;  %v3014_v27 = vrot.slane %v3013_v2, 4  ;;  %v3027_v9 = vsel %vm2760_vm9, %v2255_v40, 0.0 }
 0x25c   : > { %v3768_v6 = vmul.f32 0.25, %v3544_v10  ;;  %v4096_v8 = vsel %vm4003_vm10, %v3767_v16, %v4095_v28  ;;  %v3020_v43 = vsel %vm2760_vm9, %v2256_v61, 0.0  ;;  %v3028_v50 = vrot.slane %v3027_v9, 4  ;;  %1885 = vst.msk [vmem:[%s6320_s23 + $0x1a8] sm:$0xff] %vm1831_vm2, %v1628_v7 }
 0x25d   : > { %v3015_v34 = vadd.f32 %v3014_v27, %v3013_v2  ;;  %v3021_v0 = vrot.slane %v3020_v43, 4  ;;  %v3034_v56 = vsel %vm2760_vm9, %v2257_v29, 0.0  ;;  %vm1692_vm6 = vcmp.gt.f32.partialorder %v1628_v7, 0.5 }
 0x25e   : > { %v4097_v54 = vsel %vm4005_vm11, %v3768_v6, %v4096_v8  ;;  %v3029_v45 = vadd.f32 %v3028_v50, %v3027_v9  ;;  %v3035_v52 = vrot.slane %v3034_v56, 4  ;;  %v4730_v41 = vsel %vm1692_vm6, 1.0, %v7532_v17 }
 0x25f   : > { %v4141_v42 = vadd.f32 %v4097_v54, %v6958_v44  ;;  %v3016_v37 = vrot.slane %v3015_v34, 2  ;;  %v3022_v62 = vadd.f32 %v3021_v0, %v3020_v43  ;;  %v2036_v19 = vsel %vm1831_vm2, %v4730_v41, 0.0  ;;  %1949 = vst.msk [vmem:[%s6408_s28 + $0x1a8] sm:$0xff] %vm1831_vm2, %v4730_v41  ;;  %v7027_v54 = vld [vmem:[%s7420_s2] ss:$0 sm:$0xff] }
 0x260   : > { %v3030_v3 = vrot.slane %v3029_v45, 2  ;;  %v3036_v51 = vadd.f32 %v3035_v52, %v3034_v56  ;;  %v2037_v1 = vadd.f32 %v2036_v19, %v7706_v55  ;;  %v7005_v11 = vmul.f32 %v3845_v25, %v3813_v13  ;;  %v7707_v25 = vld [vmem:[#allocation81_spill] sm:$0xff] }
 0x261   : > { %vm4157_vm12 = vcmp.gt.f32.partialorder %v4141_v42, 0.5  ;;  %v3017_v22 = vadd.f32 %v3016_v37, %v3015_v34  ;;  %v3023_v31 = vrot.slane %v3022_v62, 2  ;;  %v7010_v44 = vsel %vm3997_vm4, %v6822_v14, %v6830_v57  ;;  %4205 = vst.msk [vmem:[%s6844_s13 + $0x68] sm:$0xff] %vm1831_vm2, %v4141_v42  ;;  %v7708_v57 = vld [vmem:[#allocation94_spill] sm:$0xff] }
 0x262   : > { %v4754_v26 = vsel %vm4157_vm12, 1.0, %v7532_v17  ;;  %v3031_v59 = vadd.f32 %v3030_v3, %v3029_v45  ;;  %v3037_v36 = vrot.slane %v3036_v51, 2  ;;  %v2513_v35 = vcombine.high %v2037_v1, %v2037_v1  ;;  %v7709_v45 = vld [vmem:[#allocation66_spill] sm:$0xff] }
 0x263   : > { %v3018_v58 = vrot.slane %v3017_v22, 1  ;;  %v3024_v32 = vadd.f32 %v3023_v31, %v3022_v62  ;;  %v2520_v13 = vrot.slane %v2037_v1, %v5258_v63  ;;  %v1345_v21 = vmul.f32 0.2, %v7707_v25  ;;  %4221 = vst.msk [vmem:[%s6875_s11 + $0x68] sm:$0xff] %vm1831_vm2, %v4754_v26  ;;  %v7710_v25 = vld [vmem:[#allocation82_spill] sm:$0xff] }
 0x264   : > { %v3032_v16 = vrot.slane %v3031_v59, 1  ;;  %v3038_v12 = vadd.f32 %v3037_v36, %v3036_v51  ;;  %v2527_v14 = vrot.slane %v2513_v35, %v5258_v63  ;;  %v1473_v40 = vsub.f32 1.0, %v7708_v57 }
 0x265   : > { %v3019_v10 = vadd.f32 %v3018_v58, %v3017_v22  ;;  %v3025_v61 = vrot.slane %v3024_v32, 1  ;;  %v2528_v2 = vcombine.high %v2520_v13, %v2520_v13  ;;  %v3461_v7 = vsel %vm2760_vm9, %v2520_v13, 0.0 }
 0x266   : > { %v3033_v28 = vadd.f32 %v3032_v16, %v3031_v59  ;;  %v3039_v29 = vrot.slane %v3038_v12, 1  ;;  %v2529_v27 = vcombine.high %v2527_v14, %v2527_v14  ;;  %v3462_v9 = vrot.slane %v3461_v7, 4 }
 0x267   : > { %v3026_v6 = vadd.f32 %v3025_v61, %v3024_v32  ;;  %v3693_v8 = vmul.f32 0.25, %v3019_v10  ;;  %v3468_v43 = vsel %vm2760_vm9, %v2528_v2, 0.0  ;;  %v3475_v50 = vsel %vm2760_vm9, %v2527_v14, 0.0  ;;  %v7712_v2 = vld [vmem:[#allocation95_spill] sm:$0xff] }
 0x268   : > { %v3040_v34 = vadd.f32 %v3039_v29, %v3038_v12  ;;  %v3463_v0 = vadd.f32 %v3462_v9, %v3461_v7  ;;  %v3469_v56 = vrot.slane %v3468_v43, 4  ;;  %v1105_v52 = vadd.f32 %v7027_v54, %v7709_v45 }
 0x269   : > { %v3694_v41 = vmul.f32 0.25, %v3026_v6  ;;  %v4031_v42 = vsel %vm3999_vm7, %v3693_v8, %v6969_v33  ;;  %v3476_v37 = vrot.slane %v3475_v50, 4  ;;  %v3482_v62 = vsel %vm2760_vm9, %v2529_v27, 0.0 }
 0x26a   : > { %v3695_v19 = vmul.f32 0.25, %v3033_v28  ;;  %v3464_v3 = vrot.slane %v3463_v0, 2  ;;  %v3470_v51 = vadd.f32 %v3469_v56, %v3468_v43  ;;  %v3483_v55 = vrot.slane %v3482_v62, 4 }
 0x26b   : > { %v3696_v1 = vmul.f32 0.25, %v3040_v34  ;;  %v4032_v22 = vsel %vm4001_vm8, %v3694_v41, %v4031_v42  ;;  %v3477_v31 = vadd.f32 %v3476_v37, %v3475_v50  ;;  %v1537_v26 = vmul.f32 %v1473_v40, %v1345_v21  ;;  %v7711_v21 = vld [vmem:[#allocation68_spill] sm:$0xff]  ;;  %v7714_v41 = vld [vmem:[#allocation83_spill] sm:$0xff] }
 0x26c   : > { %v4033_v59 = vsel %vm4003_vm10, %v3695_v19, %v4032_v22  ;;  %v3465_v36 = vadd.f32 %v3464_v3, %v3463_v0  ;;  %v3471_v35 = vrot.slane %v3470_v51, 2  ;;  %v3484_v58 = vadd.f32 %v3483_v55, %v3482_v62  ;;  %v7713_v0 = vld [vmem:[#allocation69_spill] sm:$0xff]  ;;  %v7715_v37 = vld [vmem:[#allocation96_spill] sm:$0xff]  ;;  %v7716_v55 = vld [vmem:[#allocation70_spill] sm:$0xff] }
 0x26d   : > { %v4034_v33 = vsel %vm4005_vm11, %v3696_v1, %v4033_v59  ;;  %v3478_v32 = vrot.slane %v3477_v31, 2  ;;  %v1601_v13 = vadd.f32 %v1537_v26, %v1105_v52  ;;  %v1377_v16 = vmul.f32 0.2, %v7710_v25  ;;  %v7717_v26 = vld [vmem:[#allocation84_spill] sm:$0xff] }
 0x26e   : > { %v4132_v12 = vadd.f32 %v4034_v33, %v6964_v39  ;;  %v3466_v14 = vrot.slane %v3465_v36, 1  ;;  %v3472_v57 = vadd.f32 %v3471_v35, %v3470_v51  ;;  %v3485_v10 = vrot.slane %v3484_v58, 2  ;;  %v7718_v33 = vld [vmem:[#allocation97_spill] sm:$0xff]  ;;  %v7719_v25 = vld [vmem:[#allocation72_spill] sm:$0xff] }
 0x26f   : > { %v3479_v61 = vadd.f32 %v3478_v32, %v3477_v31  ;;  %vm1665_vm13 = vcmp.gt.f32.partialorder %v1601_v13, 0.5  ;;  %v1233_v40 = vadd.f32 %v7027_v54, %v7711_v21  ;;  %v1505_v7 = vsub.f32 1.0, %v7712_v2  ;;  %1858 = vst.msk [vmem:[%s6320_s23 + $0xd0] sm:$0xff] %vm1831_vm2, %v1601_v13  ;;  %v7722_v2 = vld [vmem:[#allocation73_spill] sm:$0xff] }
 0x270   : > { %vm4148_vm14 = vcmp.gt.f32.partialorder %v4132_v12, 0.5  ;;  %v3467_v28 = vadd.f32 %v3466_v14, %v3465_v36  ;;  %v3473_v29 = vrot.slane %v3472_v57, 1  ;;  %v3486_v27 = vadd.f32 %v3485_v10, %v3484_v58  ;;  %4196 = vst.msk [vmem:[%s6844_s13 + $0x20] sm:$0xff] %vm1831_vm2, %v4132_v12 }
 0x271   : > { %v4745_v39 = vsel %vm4148_vm14, 1.0, %v7532_v17  ;;  %v3480_v9 = vrot.slane %v3479_v61, 1  ;;  %v7048_v6 = vsel %vm1665_vm13, 1.0, %v7532_v17  ;;  %v1569_v8 = vmul.f32 %v1505_v7, %v1377_v16 }
 0x272   : > { %v3474_v43 = vadd.f32 %v3473_v29, %v3472_v57  ;;  %v3487_v50 = vrot.slane %v3486_v27, 1  ;;  %v3757_v34 = vmul.f32 0.25, %v3467_v28  ;;  %v1097_v56 = vadd.f32 %v7027_v54, %v7713_v0  ;;  %1922 = vst.msk [vmem:[%s6408_s28 + $0xd0] sm:$0xff] %vm1831_vm2, %v7048_v6  ;;  %4212 = vst.msk [vmem:[%s6875_s11 + $0x20] sm:$0xff] %vm1831_vm2, %v4745_v39  ;;  %v7720_v57 = vld [vmem:[#allocation85_spill] sm:$0xff]  ;;  %v7723_v28 = vld [vmem:[#allocation86_spill] sm:$0xff] }
 0x273   : > { %v3481_v45 = vadd.f32 %v3480_v9, %v3479_v61  ;;  %v1633_v52 = vadd.f32 %v1569_v8, %v1233_v40  ;;  %v1343_v42 = vmul.f32 0.2, %v7714_v41  ;;  %v1471_v62 = vsub.f32 1.0, %v7715_v37  ;;  %v7721_v61 = vld [vmem:[#allocation98_spill] sm:$0xff]  ;;  %v7724_v8 = vld [vmem:[#allocation99_spill] sm:$0xff] }
 0x274   : > { %v3488_v19 = vadd.f32 %v3487_v50, %v3486_v27  ;;  %v3758_v3 = vmul.f32 0.25, %v3474_v43  ;;  %v4087_v51 = vsel %vm3999_vm7, %v3757_v34, %v7010_v44  ;;  %v1225_v1 = vadd.f32 %v7027_v54, %v7716_v55  ;;  %v7725_v50 = vld [vmem:[#allocation87_spill] sm:$0xff] }
 0x275   : > { %v3759_v22 = vmul.f32 0.25, %v3481_v45  ;;  %vm1697_vm15 = vcmp.gt.f32.partialorder %v1633_v52, 0.5  ;;  %v1535_v31 = vmul.f32 %v1471_v62, %v1343_v42  ;;  %v1375_v59 = vmul.f32 0.2, %v7717_v26  ;;  %1890 = vst.msk [vmem:[%s6320_s23 + $0x1d0] sm:$0xff] %vm1831_vm2, %v1633_v52  ;;  %v7726_v52 = vld [vmem:[#allocation74_spill] sm:$0xff] }
 0x276   : > { %v3760_v36 = vmul.f32 0.25, %v3488_v19  ;;  %v4088_v35 = vsel %vm4001_vm8, %v3758_v3, %v4087_v51  ;;  %v7068_v58 = vsel %vm1697_vm15, 1.0, %v7532_v17  ;;  %v1503_v32 = vsub.f32 1.0, %v7718_v33  ;;  %v7727_v42 = vld [vmem:[#allocation100_spill] sm:$0xff]  ;;  %v7729_v51 = vld [vmem:[#allocation75_spill] sm:$0xff] }
 0x277   : > { %v4089_v44 = vsel %vm4003_vm10, %v3759_v22, %v4088_v35  ;;  %v1599_v13 = vadd.f32 %v1535_v31, %v1097_v56  ;;  %v1108_v16 = vadd.f32 %v7027_v54, %v7719_v25  ;;  %1954 = vst.msk [vmem:[%s6408_s28 + $0x1d0] sm:$0xff] %vm1831_vm2, %v7068_v58  ;;  %v1346_v10 = vmul.f32 0.2, %v7720_v57  ;;  %v7728_v62 = vld [vmem:[#allocation88_spill] sm:$0xff] }
 0x278   : > { %v4090_v12 = vsel %vm4005_vm11, %v3760_v36, %v4089_v44  ;;  %v1567_v14 = vmul.f32 %v1503_v32, %v1375_v59  ;;  %v1474_v21 = vsub.f32 1.0, %v7721_v61  ;;  %v1236_v7 = vadd.f32 %v7027_v54, %v7722_v2  ;;  %v7731_v59 = vld [vmem:[#allocation89_spill] sm:$0xff]  ;;  %v7732_v33 = vld [vmem:[#allocation76_spill] sm:$0xff]  ;;  %v7733_v44 = vld [vmem:[#allocation102_spill] sm:$0xff] }
 0x279   : > { %v4140_v40 = vadd.f32 %v4090_v12, %v7005_v11  ;;  %vm1663_vm3 = vcmp.gt.f32.partialorder %v1599_v13, 0.5  ;;  %v1378_v29 = vmul.f32 0.2, %v7723_v28  ;;  %1856 = vst.msk [vmem:[%s6320_s23 + $0xc0] sm:$0xff] %vm1831_vm2, %v1599_v13  ;;  %v1506_v43 = vsub.f32 1.0, %v7724_v8  ;;  %v7734_v12 = vld [vmem:[#allocation90_spill] sm:$0xff] }
 0x27a   : > { %v7087_v27 = vsel %vm1663_vm3, 1.0, %v7532_v17  ;;  %v1631_v39 = vadd.f32 %v1567_v14, %v1225_v1  ;;  %v1538_v9 = vmul.f32 %v1474_v21, %v1346_v10  ;;  %v1344_v11 = vmul.f32 0.2, %v7725_v50  ;;  %v7730_v1 = vld [vmem:[#allocation101_spill] sm:$0xff] }
 0x27b   : > { %vm4156_vm5 = vcmp.gt.f32.partialorder %v4140_v40, 0.5  ;;  %1920 = vst.msk [vmem:[%s6408_s28 + $0xc0] sm:$0xff] %vm1831_vm2, %v7087_v27  ;;  %4204 = vst.msk [vmem:[%s6844_s13 + $0x60] sm:$0xff] %vm1831_vm2, %v4140_v40  ;;  %v1570_v56 = vmul.f32 %v1506_v43, %v1378_v29  ;;  %v1100_v41 = vadd.f32 %v7027_v54, %v7726_v52  ;;  %v1472_v37 = vsub.f32 1.0, %v7727_v42  ;;  %v7735_v61 = vld [vmem:[#allocation77_spill] sm:$0xff]  ;;  %v7736_v40 = vld [vmem:[#allocation103_spill] sm:$0xff] }
 0x27c   : > { %v4753_v34 = vsel %vm4156_vm5, 1.0, %v7532_v17  ;;  %vm1695_vm6 = vcmp.gt.f32.partialorder %v1631_v39, 0.5  ;;  %v1602_v0 = vadd.f32 %v1538_v9, %v1108_v16  ;;  %1888 = vst.msk [vmem:[%s6320_s23 + $0x1c0] sm:$0xff] %vm1831_vm2, %v1631_v39  ;;  %v1376_v19 = vmul.f32 0.2, %v7728_v62  ;;  %v7738_v29 = vld [vmem:[#allocation91_spill] sm:$0xff] }
 0x27d   : > { %v7100_v45 = vsel %vm1695_vm6, 1.0, %v7532_v17  ;;  %4220 = vst.msk [vmem:[%s6875_s11 + $0x60] sm:$0xff] %vm1831_vm2, %v4753_v34  ;;  %v1634_v3 = vadd.f32 %v1570_v56, %v1236_v7  ;;  %v1228_v55 = vadd.f32 %v7027_v54, %v7729_v51  ;;  %v1504_v22 = vsub.f32 1.0, %v7730_v1  ;;  %v7737_v7 = vld [vmem:[#allocation79_spill] sm:$0xff]  ;;  %v7739_v9 = vld [vmem:[#allocation104_spill] sm:$0xff] }
 0x27e   : > { %vm1666_vm12 = vcmp.gt.f32.partialorder %v1602_v0, 0.5  ;;  %1859 = vst.msk [vmem:[%s6320_s23 + $0xd8] sm:$0xff] %vm1831_vm2, %v1602_v0  ;;  %1952 = vst.msk [vmem:[%s6408_s28 + $0x1c0] sm:$0xff] %vm1831_vm2, %v7100_v45  ;;  %v1536_v26 = vmul.f32 %v1472_v37, %v1344_v11  ;;  %v1349_v36 = vmul.f32 0.2, %v7731_v59  ;;  %v1121_v32 = vadd.f32 %v7027_v54, %v7732_v33  ;;  %v7740_v37 = vld [vmem:[#allocation92_spill] sm:$0xff] }
 0x27f   : > { %v7117_v31 = vsel %vm1666_vm12, 1.0, %v7532_v17  ;;  %vm1698_vm13 = vcmp.gt.f32.partialorder %v1634_v3, 0.5  ;;  %v1568_v35 = vmul.f32 %v1504_v22, %v1376_v19  ;;  %v1477_v13 = vsub.f32 1.0, %v7733_v44  ;;  %1891 = vst.msk [vmem:[%s6320_s23 + $0x1d8] sm:$0xff] %vm1831_vm2, %v1634_v3  ;;  %v7741_v19 = vld [vmem:[#allocation109_spill] sm:$0xff]  ;;  %v7743_v22 = vld [vmem:[#allocation110_spill] sm:$0xff] }
 0x280   : > { %1923 = vst.msk [vmem:[%s6408_s28 + $0xd8] sm:$0xff] %vm1831_vm2, %v7117_v31  ;;  %v7129_v25 = vsel %vm1698_vm13, 1.0, %v7532_v17  ;;  %v1600_v16 = vadd.f32 %v1536_v26, %v1100_v41  ;;  %v1381_v14 = vmul.f32 0.2, %v7734_v12  ;;  %v1249_v21 = vadd.f32 %v7027_v54, %v7735_v61 }
 0x281   : > { %v1632_v57 = vadd.f32 %v1568_v35, %v1228_v55  ;;  %v1541_v10 = vmul.f32 %v1477_v13, %v1349_v36  ;;  %v1509_v2 = vsub.f32 1.0, %v7736_v40  ;;  %1955 = vst.msk [vmem:[%s6408_s28 + $0x1d8] sm:$0xff] %vm1831_vm2, %v7129_v25  ;;  %v1113_v28 = vadd.f32 %v7027_v54, %v7737_v7 }
 0x282   : > { %vm1664_vm14 = vcmp.gt.f32.partialorder %v1600_v16, 0.5  ;;  %v1347_v39 = vmul.f32 0.2, %v7738_v29  ;;  %v1475_v8 = vsub.f32 1.0, %v7739_v9  ;;  %1857 = vst.msk [vmem:[%s6320_s23 + $0xc8] sm:$0xff] %vm1831_vm2, %v1600_v16  ;;  %v2002_v34 = vsel %vm1831_vm2, %v7048_v6, 0.0 }
 0x283   : > { %v7145_v43 = vsel %vm1664_vm14, 1.0, %v7532_v17  ;;  %vm1696_vm15 = vcmp.gt.f32.partialorder %v1632_v57, 0.5  ;;  %v1605_v50 = vadd.f32 %v1541_v10, %v1121_v32  ;;  %v1573_v11 = vmul.f32 %v1509_v2, %v1381_v14  ;;  %1889 = vst.msk [vmem:[%s6320_s23 + $0x1c8] sm:$0xff] %vm1831_vm2, %v1632_v57 }
 0x284   : > { %v2050_v0 = vsel %vm1831_vm2, %v7068_v58, 0.0  ;;  %v7154_v56 = vsel %vm1696_vm15, 1.0, %v7532_v17  ;;  %v1539_v52 = vmul.f32 %v1475_v8, %v1347_v39  ;;  %1921 = vst.msk [vmem:[%s6408_s28 + $0xc8] sm:$0xff] %vm1831_vm2, %v7145_v43  ;;  %v1241_v42 = vadd.f32 %v7027_v54, %v6729_v18  ;;  %v7742_v18 = vld [vmem:[#allocation105_spill] sm:$0xff] }
 0x285   : > { %vm1669_vm3 = vcmp.gt.f32.partialorder %v1605_v50, 0.5  ;;  %v1637_v41 = vadd.f32 %v1573_v11, %v1249_v21  ;;  %v1379_v62 = vmul.f32 0.2, %v7740_v37  ;;  %1862 = vst.msk [vmem:[%s6320_s23 + $0xf0] sm:$0xff] %vm1831_vm2, %v1605_v50  ;;  %1953 = vst.msk [vmem:[%s6408_s28 + $0x1c8] sm:$0xff] %vm1831_vm2, %v7154_v56  ;;  %v1507_v3 = vsub.f32 1.0, %v7741_v19 }
 0x286   : > { %v4707_v6 = vsel %vm1669_vm3, 1.0, %v7532_v17  ;;  %v1603_v58 = vadd.f32 %v1539_v52, %v1113_v28  ;;  %v1124_v51 = vadd.f32 %v7027_v54, %v6750_v20  ;;  %v1350_v1 = vmul.f32 0.2, %v7742_v18 }
 0x287   : > { %v2003_v55 = vsel %vm1831_vm2, %v4707_v6, 0.0  ;;  %vm1701_vm5 = vcmp.gt.f32.partialorder %v1637_v41, 0.5  ;;  %v1478_v26 = vsub.f32 1.0, %v7743_v22  ;;  %1894 = vst.msk [vmem:[%s6320_s23 + $0x1f0] sm:$0xff] %vm1831_vm2, %v1637_v41  ;;  %1926 = vst.msk [vmem:[%s6408_s28 + $0xf0] sm:$0xff] %vm1831_vm2, %v4707_v6  ;;  %v1571_v35 = vmul.f32 %v1507_v3, %v1379_v62 }
 0x288   : > { %v2004_v59 = vadd.f32 %v2003_v55, %v2002_v34  ;;  %v4739_v36 = vsel %vm1701_vm5, 1.0, %v7532_v17  ;;  %vm1667_vm6 = vcmp.gt.f32.partialorder %v1603_v58, 0.5  ;;  %1860 = vst.msk [vmem:[%s6320_s23 + $0xe0] sm:$0xff] %vm1831_vm2, %v1603_v58  ;;  %v1996_v20 = vsel %vm1831_vm2, %v7087_v27, 0.0 }
 0x289   : > { %v2051_v33 = vsel %vm1831_vm2, %v4739_v36, 0.0  ;;  %v4705_v32 = vsel %vm1667_vm6, 1.0, %v7532_v17  ;;  %v1542_v44 = vmul.f32 %v1478_v26, %v1350_v1  ;;  %1958 = vst.msk [vmem:[%s6408_s28 + $0x1f0] sm:$0xff] %vm1831_vm2, %v4739_v36  ;;  %v7193_v27 = vadd.f32 %v1571_v35, %v1241_v42 }
 0x28a   : > { %v2326_v13 = vcombine.high %v2004_v59, %v2004_v59  ;;  %v2333_v16 = vrot.slane %v2004_v59, %v5258_v63  ;;  %v2052_v12 = vadd.f32 %v2051_v33, %v2050_v0  ;;  %v1997_v14 = vsel %vm1831_vm2, %v4705_v32, 0.0  ;;  %1924 = vst.msk [vmem:[%s6408_s28 + $0xe0] sm:$0xff] %vm1831_vm2, %v4705_v32 }
 0x28b   : > { %v7191_v57 = vadd.f32 %v1997_v14, %v1996_v20  ;;  %v7195_v10 = vadd.f32 %v1542_v44, %v1124_v51  ;;  %1892 = vst.msk [vmem:[%s6320_s23 + $0x1e0] sm:$0xff] %vm1831_vm2, %v7193_v27  ;;  %vm1699_vm12 = vcmp.gt.f32.partialorder %v7193_v27, 0.5 }
 0x28c   : > { %v2340_v61 = vrot.slane %v2326_v13, %v5258_v63  ;;  %v2341_v21 = vcombine.high %v2333_v16, %v2333_v16  ;;  %v3153_v40 = vsel %vm2760_vm9, %v2333_v16, 0.0  ;;  %v2598_v2 = vcombine.high %v2052_v12, %v2052_v12 }
 0x28d   : > { %v3154_v7 = vrot.slane %v3153_v40, 4  ;;  %v2605_v28 = vrot.slane %v2052_v12, %v5258_v63  ;;  %1863 = vst.msk [vmem:[%s6320_s23 + $0xf8] sm:$0xff] %vm1831_vm2, %v7195_v10  ;;  %vm1670_vm13 = vcmp.gt.f32.partialorder %v7195_v10, 0.5 }
 0x28e   : > { %v2342_v29 = vcombine.high %v2340_v61, %v2340_v61  ;;  %v3160_v39 = vsel %vm2760_vm9, %v2341_v21, 0.0  ;;  %v3167_v9 = vsel %vm2760_vm9, %v2340_v61, 0.0  ;;  %v2612_v8 = vrot.slane %v2598_v2, %v5258_v63 }
 0x28f   : > { %v3155_v50 = vadd.f32 %v3154_v7, %v3153_v40  ;;  %v3161_v11 = vrot.slane %v3160_v39, 4  ;;  %v3168_v34 = vrot.slane %v3167_v9, 4  ;;  %v2613_v0 = vcombine.high %v2605_v28, %v2605_v28 }
 0x290   : > { %v3174_v52 = vsel %vm2760_vm9, %v2342_v29, 0.0  ;;  %v2614_v41 = vcombine.high %v2612_v8, %v2612_v8  ;;  %v3601_v42 = vsel %vm2760_vm9, %v2605_v28, 0.0  ;;  %v3615_v37 = vsel %vm2760_vm9, %v2612_v8, 0.0 }
 0x291   : > { %v3156_v62 = vrot.slane %v3155_v50, 2  ;;  %v3162_v6 = vadd.f32 %v3161_v11, %v3160_v39  ;;  %v3169_v58 = vadd.f32 %v3168_v34, %v3167_v9  ;;  %v3175_v19 = vrot.slane %v3174_v52, 4 }
 0x292   : > { %v3602_v3 = vrot.slane %v3601_v42, 4  ;;  %v3608_v51 = vsel %vm2760_vm9, %v2613_v0, 0.0  ;;  %v3616_v55 = vrot.slane %v3615_v37, 4  ;;  %v3622_v18 = vsel %vm2760_vm9, %v2614_v41, 0.0 }
 0x293   : > { %v3157_v1 = vadd.f32 %v3156_v62, %v3155_v50  ;;  %v3163_v22 = vrot.slane %v3162_v6, 2  ;;  %v3170_v26 = vrot.slane %v3169_v58, 2  ;;  %v3176_v59 = vadd.f32 %v3175_v19, %v3174_v52 }
 0x294   : > { %v3603_v36 = vadd.f32 %v3602_v3, %v3601_v42  ;;  %v3609_v35 = vrot.slane %v3608_v51, 4  ;;  %v3617_v20 = vadd.f32 %v3616_v55, %v3615_v37  ;;  %v3623_v33 = vrot.slane %v3622_v18, 4 }
 0x295   : > { %v3158_v32 = vrot.slane %v3157_v1, 1  ;;  %v3164_v44 = vadd.f32 %v3163_v22, %v3162_v6  ;;  %v3171_v13 = vadd.f32 %v3170_v26, %v3169_v58  ;;  %v3177_v16 = vrot.slane %v3176_v59, 2 }
 0x296   : > { %v3604_v12 = vrot.slane %v3603_v36, 2  ;;  %v3610_v14 = vadd.f32 %v3609_v35, %v3608_v51  ;;  %v3618_v61 = vrot.slane %v3617_v20, 2  ;;  %v3624_v21 = vadd.f32 %v3623_v33, %v3622_v18 }
 0x297   : > { %v2292_v40 = vcombine.high %v7191_v57, %v7191_v57  ;;  %v3165_v2 = vrot.slane %v3164_v44, 1  ;;  %v2044_v29 = vsel %vm1831_vm2, %v7100_v45, 0.0  ;;  %v2005_v39 = vsel %vm1831_vm2, %v7117_v31, 0.0 }
 0x298   : > { %v3605_v7 = vadd.f32 %v3604_v12, %v3603_v36  ;;  %v3611_v28 = vrot.slane %v3610_v14, 2  ;;  %v3172_v9 = vrot.slane %v3171_v13, 1  ;;  %v2299_v8 = vrot.slane %v7191_v57, %v5258_v63 }
 0x299   : > { %v3159_v50 = vadd.f32 %v3158_v32, %v3157_v1  ;;  %v3178_v11 = vadd.f32 %v3177_v16, %v3176_v59  ;;  %v3619_v0 = vadd.f32 %v3618_v61, %v3617_v20  ;;  %v7224_v52 = vsel %vm1831_vm2, %v7129_v25, 0.0 }
 0x29a   : > { %v3612_v34 = vadd.f32 %v3611_v28, %v3610_v14  ;;  %v7228_v41 = vsel %vm1831_vm2, %v7145_v43, 0.0  ;;  %v3625_v45 = vrot.slane %v3624_v21, 2  ;;  %v2306_v42 = vrot.slane %v2292_v40, %v5258_v63 }
 0x29b   : > { %v7233_v31 = vsel %vm1831_vm2, %v7154_v56, 0.0  ;;  %v3166_v57 = vadd.f32 %v3165_v2, %v3164_v44  ;;  %v3606_v37 = vrot.slane %v3605_v7, 1  ;;  %v7236_v62 = vmul.f32 0.2, %v6838_v60 }
 0x29c   : > { %v3173_v6 = vadd.f32 %v3172_v9, %v3171_v13  ;;  %v2307_v58 = vcombine.high %v2299_v8, %v2299_v8  ;;  %v2308_v25 = vcombine.high %v2306_v42, %v2306_v42  ;;  %v3840_v19 = vsub.f32 1.0, %v6869_v47 }
 0x29d   : > { %v3179_v3 = vrot.slane %v3178_v11, 1  ;;  %v3713_v43 = vmul.f32 0.25, %v3159_v50  ;;  %v3613_v51 = vrot.slane %v3612_v34, 1  ;;  %v3620_v55 = vrot.slane %v3619_v0, 1 }
 0x29e   : > { %v3626_v18 = vadd.f32 %v3625_v45, %v3624_v21  ;;  %v3097_v1 = vsel %vm2760_vm9, %v2299_v8, 0.0  ;;  %v3104_v56 = vsel %vm2760_vm9, %v2307_v58, 0.0  ;;  %v3111_v22 = vsel %vm2760_vm9, %v2306_v42, 0.0 }
 0x29f   : > { %v3714_v26 = vmul.f32 0.25, %v3166_v57  ;;  %v3607_v59 = vadd.f32 %v3606_v37, %v3605_v7  ;;  %v3098_v60 = vrot.slane %v3097_v1, 4  ;;  %v3105_v36 = vrot.slane %v3104_v56, 4 }
 0x2a0   : > { %v3112_v35 = vrot.slane %v3111_v22, 4  ;;  %v3118_v20 = vsel %vm2760_vm9, %v2308_v25, 0.0  ;;  %v3614_v33 = vadd.f32 %v3613_v51, %v3612_v34  ;;  %v3627_v16 = vrot.slane %v3626_v18, 1 }
 0x2a1   : > { %v3099_v32 = vadd.f32 %v3098_v60, %v3097_v1  ;;  %v3106_v44 = vadd.f32 %v3105_v36, %v3104_v56  ;;  %v3119_v13 = vrot.slane %v3118_v20, 4  ;;  %v4737_v14 = vsel %vm1699_vm12, 1.0, %v7532_v17 }
 0x2a2   : > { %v3113_v12 = vadd.f32 %v3112_v35, %v3111_v22  ;;  %v4708_v61 = vsel %vm1670_vm13, 1.0, %v7532_v17  ;;  %v2045_v7 = vsel %vm1831_vm2, %v4737_v14, 0.0  ;;  %1956 = vst.msk [vmem:[%s6408_s28 + $0x1e0] sm:$0xff] %vm1831_vm2, %v4737_v14  ;;  %v3180_v27 = vadd.f32 %v3179_v3, %v3178_v11 }
 0x2a3   : > { %v3100_v21 = vrot.slane %v3099_v32, 2  ;;  %v3107_v40 = vrot.slane %v3106_v44, 2  ;;  %v3120_v2 = vadd.f32 %v3119_v13, %v3118_v20  ;;  %1927 = vst.msk [vmem:[%s6408_s28 + $0xf8] sm:$0xff] %vm1831_vm2, %v4708_v61  ;;  %v3621_v10 = vadd.f32 %v3620_v55, %v3619_v0 }
 0x2a4   : > { %v2046_v28 = vadd.f32 %v2045_v7, %v2044_v29  ;;  %v2006_v9 = vsel %vm1831_vm2, %v4708_v61, 0.0  ;;  %v3778_v8 = vmul.f32 0.25, %v3614_v33  ;;  %v3114_v34 = vrot.slane %v3113_v12, 2 }
 0x2a5   : > { %v3108_v50 = vadd.f32 %v3107_v40, %v3106_v44  ;;  %v2007_v45 = vadd.f32 %v2006_v9, %v2005_v39  ;;  %v3715_v42 = vmul.f32 0.25, %v3173_v6  ;;  %v3121_v57 = vrot.slane %v3120_v2, 2 }
 0x2a6   : > { %v2564_v37 = vcombine.high %v2046_v28, %v2046_v28  ;;  %v2571_v58 = vrot.slane %v2046_v28, %v5258_v63  ;;  %v4049_v25 = vsel %vm3993_vm0, %v3714_v26, %v3713_v43  ;;  %v3628_v51 = vadd.f32 %v3627_v16, %v3626_v18 }
 0x2a7   : > { %v3777_v1 = vmul.f32 0.25, %v3607_v59  ;;  %v3101_v56 = vadd.f32 %v3100_v21, %v3099_v32  ;;  %v3779_v22 = vmul.f32 0.25, %v3621_v10  ;;  %v3109_v55 = vrot.slane %v3108_v50, 1 }
 0x2a8   : > { %v2578_v11 = vrot.slane %v2564_v37, %v5258_v63  ;;  %v2579_v29 = vcombine.high %v2571_v58, %v2571_v58  ;;  %v3545_v0 = vsel %vm2760_vm9, %v2571_v58, 0.0  ;;  %v3115_v39 = vadd.f32 %v3114_v34, %v3113_v12 }
 0x2a9   : > { %v4105_v3 = vsel %vm3993_vm0, %v3778_v8, %v3777_v1  ;;  %v3546_v6 = vrot.slane %v3545_v0, 4  ;;  %v3122_v60 = vadd.f32 %v3121_v57, %v3120_v2  ;;  %v3716_v18 = vmul.f32 0.25, %v3180_v27 }
 0x2aa   : > { %v2580_v36 = vcombine.high %v2578_v11, %v2578_v11  ;;  %v3552_v35 = vsel %vm2760_vm9, %v2579_v29, 0.0  ;;  %v3559_v43 = vsel %vm2760_vm9, %v2578_v11, 0.0  ;;  %v3102_v26 = vrot.slane %v3101_v56, 1 }
 0x2ab   : > { %v3547_v59 = vadd.f32 %v3546_v6, %v3545_v0  ;;  %v2343_v20 = vcombine.high %v2007_v45, %v2007_v45  ;;  %v4050_v33 = vsel %vm3995_vm1, %v3715_v42, %v4049_v25  ;;  %v3553_v32 = vrot.slane %v3552_v35, 4 }
 0x2ac   : > { %v3560_v44 = vrot.slane %v3559_v43, 4  ;;  %v3566_v13 = vsel %vm2760_vm9, %v2580_v36, 0.0  ;;  %v7262_v16 = vmul.f32 0.25, %v3628_v51  ;;  %v7265_v12 = vsel %vm3995_vm1, %v3779_v22, %v4105_v3 }
 0x2ad   : > { %v3116_v14 = vrot.slane %v3115_v39, 1  ;;  %v3567_v61 = vrot.slane %v3566_v13, 4  ;;  %v3110_v21 = vadd.f32 %v3109_v55, %v3108_v50  ;;  %v3123_v40 = vrot.slane %v3122_v60, 1 }
 0x2ae   : > { %v2350_v2 = vrot.slane %v2007_v45, %v5258_v63  ;;  %v7271_v7 = vmul.f32 %v3840_v19, %v7236_v62  ;;  %v3103_v27 = vadd.f32 %v3102_v26, %v3101_v56  ;;  %v3548_v10 = vrot.slane %v3547_v59, 2 }
 0x2af   : > { %v2357_v28 = vrot.slane %v2343_v20, %v5258_v63  ;;  %v7275_v9 = vsel %vm3997_vm4, %v3716_v18, %v4050_v33  ;;  %v3554_v8 = vadd.f32 %v3553_v32, %v3552_v35  ;;  %v3561_v34 = vadd.f32 %v3560_v44, %v3559_v43  ;;  %v7744_v33 = vld [vmem:[#allocation106_spill] sm:$0xff] }
 0x2b0   : > { %v2358_v42 = vcombine.high %v2350_v2, %v2350_v2  ;;  %v3181_v50 = vsel %vm2760_vm9, %v2350_v2, 0.0  ;;  %v3117_v57 = vadd.f32 %v3116_v14, %v3115_v39  ;;  %v3568_v37 = vadd.f32 %v3567_v61, %v3566_v13 }
 0x2b1   : > { %v2359_v45 = vcombine.high %v2357_v28, %v2357_v28  ;;  %v3182_v58 = vrot.slane %v3181_v50, 4  ;;  %v3124_v25 = vadd.f32 %v3123_v40, %v3122_v60  ;;  %v3706_v47 = vmul.f32 0.25, %v3110_v21 }
 0x2b2   : > { %v3188_v62 = vsel %vm2760_vm9, %v2358_v42, 0.0  ;;  %v3195_v19 = vsel %vm2760_vm9, %v2357_v28, 0.0  ;;  %v3705_v51 = vmul.f32 0.25, %v3103_v27  ;;  %v3549_v1 = vadd.f32 %v3548_v10, %v3547_v59  ;;  %v7745_v27 = vld [vmem:[#allocation111_spill] sm:$0xff] }
 0x2b3   : > { %v3183_v56 = vadd.f32 %v3182_v58, %v3181_v50  ;;  %v3189_v22 = vrot.slane %v3188_v62, 4  ;;  %v3555_v11 = vrot.slane %v3554_v8, 2  ;;  %v3562_v29 = vrot.slane %v3561_v34, 2 }
 0x2b4   : > { %v3196_v0 = vrot.slane %v3195_v19, 4  ;;  %v3202_v3 = vsel %vm2760_vm9, %v2359_v45, 0.0  ;;  %v3707_v55 = vmul.f32 0.25, %v3117_v57  ;;  %v3569_v39 = vrot.slane %v3568_v37, 2 }
 0x2b5   : > { %v3184_v6 = vrot.slane %v3183_v56, 2  ;;  %v3190_v36 = vadd.f32 %v3189_v22, %v3188_v62  ;;  %v4042_v60 = vsel %vm3993_vm0, %v3706_v47, %v3705_v51  ;;  %v3203_v43 = vrot.slane %v3202_v3, 4 }
 0x2b6   : > { %v3197_v35 = vadd.f32 %v3196_v0, %v3195_v19  ;;  %v1252_v18 = vadd.f32 %v7027_v54, %v6767_v30  ;;  %v3550_v26 = vrot.slane %v3549_v1, 1  ;;  %v1382_v32 = vmul.f32 0.2, %v7744_v33  ;;  %v7746_v0 = vld [vmem:[#allocation107_spill] sm:$0xff] }
 0x2b7   : > { %v3185_v59 = vadd.f32 %v3184_v6, %v3183_v56  ;;  %v3191_v20 = vrot.slane %v3190_v36, 2  ;;  %v3556_v44 = vadd.f32 %v3555_v11, %v3554_v8  ;;  %v3563_v13 = vadd.f32 %v3562_v29, %v3561_v34 }
 0x2b8   : > { %v3198_v14 = vrot.slane %v3197_v35, 2  ;;  %v3204_v61 = vadd.f32 %v3203_v43, %v3202_v3  ;;  %v3570_v21 = vadd.f32 %v3569_v39, %v3568_v37  ;;  %v1510_v10 = vsub.f32 1.0, %v7745_v27 }
 0x2b9   : > { %v3186_v40 = vrot.slane %v3185_v59, 1  ;;  %v3192_v2 = vadd.f32 %v3191_v20, %v3190_v36  ;;  %v7286_v28 = vmul.f32 0.25, %v3124_v25  ;;  %v7289_v42 = vsel %vm3995_vm1, %v3707_v55, %v4042_v60 }
 0x2ba   : > { %v3199_v30 = vadd.f32 %v3198_v14, %v3197_v35  ;;  %v3205_v50 = vrot.slane %v3204_v61, 2  ;;  %v3551_v57 = vadd.f32 %v3550_v26, %v3549_v1  ;;  %v1574_v47 = vmul.f32 %v1510_v10, %v1382_v32  ;;  %v7747_v14 = vld [vmem:[#allocation112_spill] sm:$0xff] }
 0x2bb   : > { %v3187_v45 = vadd.f32 %v3186_v40, %v3185_v59  ;;  %v3193_v58 = vrot.slane %v3192_v2, 1  ;;  %v3557_v8 = vrot.slane %v3556_v44, 1  ;;  %v3564_v34 = vrot.slane %v3563_v13, 1 }
 0x2bc   : > { %v3200_v62 = vrot.slane %v3199_v30, 1  ;;  %v3206_v37 = vadd.f32 %v3205_v50, %v3204_v61  ;;  %v3571_v19 = vrot.slane %v3570_v21, 1  ;;  %v1638_v22 = vadd.f32 %v1574_v47, %v1252_v18 }
 0x2bd   : > { %v3194_v51 = vadd.f32 %v3193_v58, %v3192_v2  ;;  %v3717_v56 = vmul.f32 0.25, %v3187_v45  ;;  %v1116_v29 = vadd.f32 %v7027_v54, %v6813_v4  ;;  %v1348_v1 = vmul.f32 0.2, %v7746_v0 }
 0x2be   : > { %v3201_v25 = vadd.f32 %v3200_v62, %v3199_v30  ;;  %v3207_v11 = vrot.slane %v3206_v37, 1  ;;  %vm1702_vm14 = vcmp.gt.f32.partialorder %v1638_v22, 0.5  ;;  %v1476_v39 = vsub.f32 1.0, %v6416_v5  ;;  %1895 = vst.msk [vmem:[%s6320_s23 + $0x1f8] sm:$0xff] %vm1831_vm2, %v1638_v22 }
 0x2bf   : > { %v3718_v3 = vmul.f32 0.25, %v3194_v51  ;;  %v4052_v55 = vsel %vm3999_vm7, %v3717_v56, %v7275_v9  ;;  %v7299_v6 = vmul.f32 0.25, %v3551_v57  ;;  %v4740_v35 = vsel %vm1702_vm14, 1.0, %v7532_v17 }
 0x2c0   : > { %v3208_v36 = vadd.f32 %v3207_v11, %v3206_v37  ;;  %v3719_v60 = vmul.f32 0.25, %v3201_v25  ;;  %v3558_v43 = vadd.f32 %v3557_v8, %v3556_v44  ;;  %v2054_v18 = vsel %vm1831_vm2, %v4740_v35, 0.0  ;;  %1959 = vst.msk [vmem:[%s6408_s28 + $0x1f8] sm:$0xff] %vm1831_vm2, %v4740_v35 }
 0x2c1   : > { %v4053_v4 = vsel %vm4001_vm8, %v3718_v3, %v4052_v55  ;;  %v1540_v26 = vmul.f32 %v1476_v39, %v1348_v1  ;;  %v7306_v9 = vadd.f32 %v3564_v34, %v3563_v13  ;;  %v2055_v20 = vadd.f32 %v2054_v18, %v7224_v52 }
 0x2c2   : > { %v3720_v5 = vmul.f32 0.25, %v3208_v36  ;;  %v4054_v59 = vsel %vm4003_vm10, %v3719_v60, %v4053_v4  ;;  %v7310_v33 = vadd.f32 %v3571_v19, %v3570_v21  ;;  %v3816_v32 = vmul.f32 0.2, %v6849_v38 }
 0x2c3   : > { %v1604_v44 = vadd.f32 %v1540_v26, %v1116_v29  ;;  %v1380_v61 = vmul.f32 0.2, %v7747_v14  ;;  %v2615_v2 = vcombine.high %v2055_v20, %v2055_v20  ;;  %v2622_v13 = vrot.slane %v2055_v20, %v5258_v63 }
 0x2c4   : > { %v4055_v40 = vsel %vm4005_vm11, %v3720_v5, %v4054_v59  ;;  %v1508_v27 = vsub.f32 1.0, %v6566_v53  ;;  %v3848_v52 = vsub.f32 1.0, %v6881_v23  ;;  %v1244_v38 = vadd.f32 %v7027_v54, %v6886_v15 }
 0x2c5   : > { %v4135_v10 = vadd.f32 %v4055_v40, %v7271_v7  ;;  %vm1668_vm15 = vcmp.gt.f32.partialorder %v1604_v44, 0.5  ;;  %1861 = vst.msk [vmem:[%s6320_s23 + $0xe8] sm:$0xff] %vm1831_vm2, %v1604_v44  ;;  %v2629_v21 = vrot.slane %v2615_v2, %v5258_v63  ;;  %v2630_v30 = vcombine.high %v2622_v13, %v2622_v13 }
 0x2c6   : > { %v3629_v50 = vsel %vm2760_vm9, %v2622_v13, 0.0  ;;  %v4706_v57 = vsel %vm1668_vm15, 1.0, %v7532_v17  ;;  %v1572_v45 = vmul.f32 %v1508_v27, %v1380_v61  ;;  %v7337_v37 = vmul.f32 0.25, %v3558_v43 }
 0x2c7   : > { %vm4151_vm3 = vcmp.gt.f32.partialorder %v4135_v10, 0.5  ;;  %v3630_v53 = vrot.slane %v3629_v50, 4  ;;  %v2000_v7 = vsel %vm1831_vm2, %v4706_v57, 0.0  ;;  %1925 = vst.msk [vmem:[%s6408_s28 + $0xe8] sm:$0xff] %vm1831_vm2, %v4706_v57  ;;  %4199 = vst.msk [vmem:[%s6844_s13 + $0x38] sm:$0xff] %vm1831_vm2, %v4135_v10  ;;  %v2631_v15 = vcombine.high %v2629_v21, %v2629_v21 }
 0x2c8   : > { %v4748_v23 = vsel %vm4151_vm3, 1.0, %v7532_v17  ;;  %v3636_v54 = vsel %vm2760_vm9, %v2630_v30, 0.0  ;;  %v3643_v58 = vsel %vm2760_vm9, %v2629_v21, 0.0  ;;  %v2001_v62 = vadd.f32 %v2000_v7, %v7228_v41 }
 0x2c9   : > { %v3631_v47 = vadd.f32 %v3630_v53, %v3629_v50  ;;  %v3637_v8 = vrot.slane %v3636_v54, 4  ;;  %v3644_v34 = vrot.slane %v3643_v58, 4  ;;  %4215 = vst.msk [vmem:[%s6875_s11 + $0x38] sm:$0xff] %vm1831_vm2, %v4748_v23  ;;  %v3650_v19 = vsel %vm2760_vm9, %v2631_v15, 0.0 }
 0x2ca   : > { %v4107_v51 = vsel %vm3997_vm4, %v7262_v16, %v7265_v12  ;;  %v1636_v56 = vadd.f32 %v1572_v45, %v1244_v38  ;;  %v3651_v29 = vrot.slane %v3650_v19, 4  ;;  %v3864_v0 = vmul.f32 %v3848_v52, %v3816_v32 }
 0x2cb   : > { %v3632_v22 = vrot.slane %v3631_v47, 2  ;;  %v3638_v25 = vadd.f32 %v3637_v8, %v3636_v54  ;;  %v3645_v11 = vadd.f32 %v3644_v34, %v3643_v58  ;;  %v2309_v1 = vcombine.high %v2001_v62, %v2001_v62 }
 0x2cc   : > { %v2316_v41 = vrot.slane %v2001_v62, %v5258_v63  ;;  %vm1700_vm5 = vcmp.gt.f32.partialorder %v1636_v56, 0.5  ;;  %1893 = vst.msk [vmem:[%s6320_s23 + $0x1e8] sm:$0xff] %vm1831_vm2, %v1636_v56  ;;  %v3652_v36 = vadd.f32 %v3651_v29, %v3650_v19  ;;  %v3807_v56 = vmul.f32 0.2, %v6852_v48 }
 0x2cd   : > { %v3633_v3 = vadd.f32 %v3632_v22, %v3631_v47  ;;  %v3639_v55 = vrot.slane %v3638_v25, 2  ;;  %v3646_v39 = vrot.slane %v3645_v11, 2  ;;  %v2323_v60 = vrot.slane %v2309_v1, %v5258_v63 }
 0x2ce   : > { %v2324_v16 = vcombine.high %v2316_v41, %v2316_v41  ;;  %v3125_v12 = vsel %vm2760_vm9, %v2316_v41, 0.0  ;;  %v4738_v35 = vsel %vm1700_vm5, 1.0, %v7532_v17  ;;  %v3653_v26 = vrot.slane %v3652_v36, 2 }
 0x2cf   : > { %v3634_v43 = vrot.slane %v3633_v3, 1  ;;  %v3640_v4 = vadd.f32 %v3639_v55, %v3638_v25  ;;  %v3647_v18 = vadd.f32 %v3646_v39, %v3645_v11  ;;  %1957 = vst.msk [vmem:[%s6408_s28 + $0x1e8] sm:$0xff] %vm1831_vm2, %v4738_v35  ;;  %v2325_v5 = vcombine.high %v2323_v60, %v2323_v60 }
 0x2d0   : > { %v3126_v59 = vrot.slane %v3125_v12, 4  ;;  %v3132_v20 = vsel %vm2760_vm9, %v2324_v16, 0.0  ;;  %v3139_v32 = vsel %vm2760_vm9, %v2323_v60, 0.0  ;;  %v3654_v40 = vadd.f32 %v3653_v26, %v3652_v36 }
 0x2d1   : > { %v3635_v44 = vadd.f32 %v3634_v43, %v3633_v3  ;;  %v3641_v14 = vrot.slane %v3640_v4, 1  ;;  %v3648_v61 = vrot.slane %v3647_v18, 1  ;;  %v3133_v13 = vrot.slane %v3132_v20, 4 }
 0x2d2   : > { %v3127_v2 = vadd.f32 %v3126_v59, %v3125_v12  ;;  %v3140_v27 = vrot.slane %v3139_v32, 4  ;;  %v3146_v10 = vsel %vm2760_vm9, %v2325_v5, 0.0  ;;  %v3655_v21 = vrot.slane %v3654_v40, 1 }
 0x2d3   : > { %v3642_v52 = vadd.f32 %v3641_v14, %v3640_v4  ;;  %v3649_v38 = vadd.f32 %v3648_v61, %v3647_v18  ;;  %v3781_v30 = vmul.f32 0.25, %v3635_v44  ;;  %v3134_v57 = vadd.f32 %v3133_v13, %v3132_v20 }
 0x2d4   : > { %v3128_v50 = vrot.slane %v3127_v2, 2  ;;  %v3141_v53 = vadd.f32 %v3140_v27, %v3139_v32  ;;  %v3147_v7 = vrot.slane %v3146_v10, 4  ;;  %v3656_v45 = vadd.f32 %v3655_v21, %v3654_v40 }
 0x2d5   : > { %v3782_v23 = vmul.f32 0.25, %v3642_v52  ;;  %v3783_v15 = vmul.f32 0.25, %v3649_v38  ;;  %v4108_v54 = vsel %vm3999_vm7, %v3781_v30, %v4107_v51  ;;  %v3135_v47 = vrot.slane %v3134_v57, 2 }
 0x2d6   : > { %v3129_v58 = vadd.f32 %v3128_v50, %v3127_v2  ;;  %v3142_v8 = vrot.slane %v3141_v53, 2  ;;  %v3148_v34 = vadd.f32 %v3147_v7, %v3146_v10  ;;  %v3784_v62 = vmul.f32 0.25, %v3656_v45 }
 0x2d7   : > { %v4109_v19 = vsel %vm4001_vm8, %v3782_v23, %v4108_v54  ;;  %v2048_v22 = vsel %vm1831_vm2, %v4738_v35, 0.0  ;;  %v3136_v29 = vadd.f32 %v3135_v47, %v3134_v57  ;;  %v3839_v3 = vsub.f32 1.0, %v6884_v24 }
 0x2d8   : > { %v4110_v25 = vsel %vm4003_vm10, %v3783_v15, %v4109_v19  ;;  %v3130_v11 = vrot.slane %v3129_v58, 1  ;;  %v3143_v1 = vadd.f32 %v3142_v8, %v3141_v53  ;;  %v3149_v51 = vrot.slane %v3148_v34, 2 }
 0x2d9   : > { %v4111_v41 = vsel %vm4005_vm11, %v3784_v62, %v4110_v25  ;;  %v2049_v55 = vadd.f32 %v2048_v22, %v7233_v31  ;;  %v3137_v60 = vrot.slane %v3136_v29, 1  ;;  %v4044_v12 = vsel %vm3997_vm4, %v7286_v28, %v7289_v42 }
 0x2da   : > { %v4143_v39 = vadd.f32 %v4111_v41, %v3864_v0  ;;  %v3131_v36 = vadd.f32 %v3130_v11, %v3129_v58  ;;  %v3144_v16 = vrot.slane %v3143_v1, 1  ;;  %v3150_v48 = vadd.f32 %v3149_v51, %v3148_v34 }
 0x2db   : > { %v2581_v35 = vcombine.high %v2049_v55, %v2049_v55  ;;  %v2588_v43 = vrot.slane %v2049_v55, %v5258_v63  ;;  %v3138_v4 = vadd.f32 %v3137_v60, %v3136_v29  ;;  %v3855_v40 = vmul.f32 %v3839_v3, %v3807_v56 }
 0x2dc   : > { %vm4159_vm6 = vcmp.gt.f32.partialorder %v4143_v39, 0.5  ;;  %v3145_v18 = vadd.f32 %v3144_v16, %v3143_v1  ;;  %v3709_v26 = vmul.f32 0.25, %v3131_v36  ;;  %4207 = vst.msk [vmem:[%s6844_s13 + $0x78] sm:$0xff] %vm1831_vm2, %v4143_v39  ;;  %v3151_v31 = vrot.slane %v3150_v48, 1 }
 0x2dd   : > { %v4756_v24 = vsel %vm4159_vm6, 1.0, %v7532_v17  ;;  %v2595_v0 = vrot.slane %v2581_v35, %v5258_v63  ;;  %v2596_v5 = vcombine.high %v2588_v43, %v2588_v43  ;;  %v3710_v59 = vmul.f32 0.25, %v3138_v4 }
 0x2de   : > { %v3711_v20 = vmul.f32 0.25, %v3145_v18  ;;  %v4045_v28 = vsel %vm3999_vm7, %v3709_v26, %v4044_v12  ;;  %v3573_v42 = vsel %vm2760_vm9, %v2588_v43, 0.0  ;;  %4223 = vst.msk [vmem:[%s6875_s11 + $0x78] sm:$0xff] %vm1831_vm2, %v4756_v24  ;;  %v3152_v32 = vadd.f32 %v3151_v31, %v3150_v48 }
 0x2df   : > { %v2597_v44 = vcombine.high %v2595_v0, %v2595_v0  ;;  %v3574_v14 = vrot.slane %v3573_v42, 4  ;;  %v3580_v61 = vsel %vm2760_vm9, %v2596_v5, 0.0  ;;  %v4046_v2 = vsel %vm4001_vm8, %v3710_v59, %v4045_v28 }
 0x2e0   : > { %v3581_v13 = vrot.slane %v3580_v61, 4  ;;  %v3587_v63 = vsel %vm2760_vm9, %v2595_v0, 0.0  ;;  %v3712_v27 = vmul.f32 0.25, %v3152_v32  ;;  %v4047_v10 = vsel %vm4003_vm10, %v3711_v20, %v4046_v2 }
 0x2e1   : > { %v3575_v52 = vadd.f32 %v3574_v14, %v3573_v42  ;;  %v3588_v38 = vrot.slane %v3587_v63, 4  ;;  %v3771_v21 = vmul.f32 0.25, %v7306_v9  ;;  %v4098_v30 = vsel %vm3993_vm0, %v7337_v37, %v7299_v6 }
 0x2e2   : > { %v3582_v50 = vadd.f32 %v3581_v13, %v3580_v61  ;;  %v3594_v57 = vsel %vm2760_vm9, %v2597_v44, 0.0  ;;  %v4048_v53 = vsel %vm4005_vm11, %v3712_v27, %v4047_v10  ;;  %v3772_v9 = vmul.f32 0.25, %v7310_v33 }
 0x2e3   : > { %v3576_v7 = vrot.slane %v3575_v52, 2  ;;  %v3589_v45 = vadd.f32 %v3588_v38, %v3587_v63  ;;  %v3595_v23 = vrot.slane %v3594_v57, 4  ;;  %v4134_v15 = vadd.f32 %v4048_v53, %v3855_v40 }
 0x2e4   : > { %v3583_v54 = vrot.slane %v3582_v50, 2  ;;  %v4099_v34 = vsel %vm3995_vm1, %v3771_v21, %v4098_v30  ;;  %v3815_v33 = vmul.f32 0.2, %v6889_v49  ;;  %v3847_v41 = vsub.f32 1.0, %v6918_v46 }
 0x2e5   : > { %v3577_v58 = vadd.f32 %v3576_v7, %v3575_v52  ;;  %v3590_v47 = vrot.slane %v3589_v45, 2  ;;  %v3596_v8 = vadd.f32 %v3595_v23, %v3594_v57  ;;  %vm4150_vm0 = vcmp.gt.f32.partialorder %v4134_v15, 0.5  ;;  %4198 = vst.msk [vmem:[%s6844_s13 + $0x30] sm:$0xff] %vm1831_vm2, %v4134_v15 }
 0x2e6   : > { %v3584_v6 = vadd.f32 %v3583_v54, %v3582_v50  ;;  %v4747_v37 = vsel %vm4150_vm0, 1.0, %v7532_v17  ;;  %v4100_v51 = vsel %vm3997_vm4, %v3772_v9, %v4099_v34  ;;  %v3863_v12 = vmul.f32 %v3847_v41, %v3815_v33 }
 0x2e7   : > { %v3578_v62 = vrot.slane %v3577_v58, 1  ;;  %v3591_v19 = vadd.f32 %v3590_v47, %v3589_v45  ;;  %v3597_v56 = vrot.slane %v3596_v8, 2  ;;  %4214 = vst.msk [vmem:[%s6875_s11 + $0x30] sm:$0xff] %vm1831_vm2, %v4747_v37 }
 0x2e8   : > { %v3585_v22 = vrot.slane %v3584_v6, 1 }
 0x2e9   : > { %v3579_v25 = vadd.f32 %v3578_v62, %v3577_v58  ;;  %v3592_v11 = vrot.slane %v3591_v19, 1  ;;  %v3598_v29 = vadd.f32 %v3597_v56, %v3596_v8 }
 0x2ea   : > { %v3586_v1 = vadd.f32 %v3585_v22, %v3584_v6 }
 0x2eb   : > { %v3593_v3 = vadd.f32 %v3592_v11, %v3591_v19  ;;  %v3599_v55 = vrot.slane %v3598_v29, 1  ;;  %v3773_v39 = vmul.f32 0.25, %v3579_v25 }
 0x2ec   : > { %v3774_v36 = vmul.f32 0.25, %v3586_v1 }
 0x2ed   : > { %v3600_v60 = vadd.f32 %v3599_v55, %v3598_v29  ;;  %v3775_v16 = vmul.f32 0.25, %v3593_v3  ;;  %v4101_v48 = vsel %vm3999_vm7, %v3773_v39, %v4100_v51 }
 0x2ee   : > { %v4102_v35 = vsel %vm4001_vm8, %v3774_v36, %v4101_v48 }
 0x2ef   : > { %v3776_v43 = vmul.f32 0.25, %v3600_v60  ;;  %v4103_v49 = vsel %vm4003_vm10, %v3775_v16, %v4102_v35 }
 0x2f1   : > { %v4104_v46 = vsel %vm4005_vm11, %v3776_v43, %v4103_v49 }
 0x2f2   : > { %v4142_v4 = vadd.f32 %v4104_v46, %v3863_v12 }
 0x2f4   : > { %vm4158_vm9 = vcmp.gt.f32.partialorder %v4142_v4, 0.5  ;;  %4206 = vst.msk [vmem:[%s6844_s13 + $0x70] sm:$0xff] %vm1831_vm2, %v4142_v4 }
 0x2f5   : > { %v4755_v18 = vsel %vm4158_vm9, 1.0, %v7532_v17 }
 0x2f6   : > { %4222 = vst.msk [vmem:[%s6875_s11 + $0x70] sm:$0xff] %vm1831_vm2, %v4755_v18 }
 0x2f7 PF: > { %s21_s17 = sadd.s32 1, %s4987_s17   ;;  %s7748_s13 = smov %s4979_s15 }
 0x2f8   : > { %p18_p8 = scmp.ge.s32.totalorder %s21_s17, 6   ;;  %s7749_s14 = smov %s4983_s16 }
 0x2f9   : > { %s7750_s15 = smov %s7753_s18  ;;  %s7751_s16 = smov %s7757_s19 }
 0x2fa   :  { %20 = sbr.rel (!%p18_p8) target bundleno = 3 (0x3), region = 127 }

// kernel: closed_call.79
= control target key start
LH: loop header
LB: loop body
LE: loop exit
PB: predicated region body
PF: predicated region fallthrough
CT: control target
= control target key end

     0   :  { %s4515_s13 = smov 0   ;;  %s4517_s14 = smov 0   ;;  %s5927_s0 = inlined_call_operand.vmem [shape: bf16[2,18,16,192], index: 0, kind: input, shape index: {}]   ;;  %s5928_s1 = inlined_call_operand.vmem [shape: bf16[3,192,128], index: 1, kind: input, shape index: {}]   ;;  %s5929_s2 = inlined_call_operand.vmem [shape: f32[1,128], index: 2, kind: input, shape index: {}]   ;;  %s5930_s3 = inlined_call_operand.vmem [shape: f32[2,16,16,128], index: 3, kind: input, shape index: {}, may-alias: {3,7}]   ;;  %s5931_s4 = inlined_call_operand.vmem [shape: f32[2,16,16,128], index: 4, kind: input, shape index: {}, may-alias: {4,8}]   ;;  %s5932_s5 = inlined_call_operand.vmem [shape: f32[2,8,8,128], index: 5, kind: input, shape index: {}, may-alias: {5,9}]   ;;  %s5933_s6 = inlined_call_operand.vmem [shape: f32[2,8,8,128], index: 6, kind: input, shape index: {}, may-alias: {6,10}]   ;;  %s5934_s7 = inlined_call_operand.vmem [shape: f32[2,16,16,128], index: 7, kind: output, shape index: {0}, may-alias: {3,7}]   ;;  %s5935_s8 = inlined_call_operand.vmem [shape: f32[2,16,16,128], index: 8, kind: output, shape index: {1}, may-alias: {4,8}]   ;;  %s5936_s9 = inlined_call_operand.vmem [shape: f32[2,8,8,128], index: 9, kind: output, shape index: {2}, may-alias: {5,9}]   ;;  %s5937_s10 = inlined_call_operand.vmem [shape: f32[2,8,8,128], index: 10, kind: output, shape index: {3}, may-alias: {6,10}]  }
   0x1   :  { %s4519_s15 = smov 0  }
   0x2 LB: > { %s33_s16 = sadd.s32 1, %s4451_s14  ;;  %p3928_p0 = scmp.ge.s32.totalorder %s4455_s15, 1  ;;  %s4455_s15 = sphi %s4519_s15, %s21_s15   ;;  %s4451_s14 = sphi %s4517_s14, %s6039_s14   ;;  %s4447_s13 = sphi %s4515_s13, %s6038_s13  }
   0x3   : > { %p35_p1 = scmp.ge.s32.totalorder %s33_s16, 2  ;;  %p409_p2 = scmp.lt.s32.totalorder %s4455_s15, 3 }
   0x5   : > { %s6041_s16 = smov (%p35_p1, %s33_s16), 0  ;;  %p410_p3 = pnand %p3928_p0, %p409_p2 }
   0x7   : > { %413 = sbr.rel (%p410_p3) target bundleno = 599 (0x257), region = 48 }
   0xe   : > { %v4341_v0 = vld [vmem:[%s5928_s1 + $0x60] sm:$0xff]   ;;  %v4457_v1 = vmov 0   ;;  %p518_p4 = scmp.lt.s32.totalorder %s4447_s13, 1  ;;  %v4342_v2 = vld [vmem:[%s5928_s1 + $0x68] sm:$0xff]   ;;  %v4343_v3 = vld [vmem:[%s5928_s1 + $0x70] sm:$0xff]   ;;  %vm945_vm0 = vcmask 523264  }
   0xf   : > { %994 = vmatprep.subr.bf16.mxu0 %v4457_v1  ;;  %4289 = vmatprep.subr.bf16.mxu1 %v4457_v1  ;;  %v4344_v4 = vld [vmem:[%s5928_s1 + $0x78] sm:$0xff]   ;;  %v4345_v6 = vld [vmem:[%s5928_s1 + $0x80] sm:$0xff]   ;;  %v4346_v8 = vld [vmem:[%s5928_s1 + $0x88] sm:$0xff]   ;;  %vm2857_vm3 = vcmask 1041408   ;;  %vm3474_vm6 = vcmask 1041409   ;;  %vm3476_vm7 = vcmask 1042434  }
  0x10   : > { %995 = vmatpush1.bf16.msra.mxu0 %v4341_v0  ;;  %4301 = vmatpush1.bf16.msra.mxu1 %v4341_v0  ;;  %s6043_s13 = smov (!%p518_p4, %s4447_s13), 1  ;;  %v4347_v9 = vld [vmem:[%s5928_s1 + $0x90] sm:$0xff]   ;;  %v4348_v10 = vld [vmem:[%s5928_s1 + $0x98] sm:$0xff]   ;;  %v4349_v11 = vld [vmem:[%s5928_s1 + $0xa0] sm:$0xff]   ;;  %vm3478_vm8 = vcmask 1043459   ;;  %vm3480_vm9 = vcmask 1044484  }
  0x11   : > { %996 = vmatprep.subr.bf16.mxu0 %v4457_v1  ;;  %4290 = vmatprep.subr.bf16.mxu1 %v4457_v1  ;;  %s4313_s23 = smul.u32 288, %s6043_s13  ;;  %v4350_v12 = vld [vmem:[%s5928_s1 + $0xa8] sm:$0xff]   ;;  %v4351_v13 = vld [vmem:[%s5928_s1 + $0xb0] sm:$0xff]   ;;  %v4352_v14 = vld [vmem:[%s5928_s1 + $0xb8] sm:$0xff]   ;;  %vm3482_vm10 = vcmask 1045509   ;;  %vm3484_vm11 = vcmask 1046534  }
  0x12   : > { %v4359_v17 = vld [vmem:[%s5928_s1] sm:$0xff]   ;;  %v4365_v21 = vld [vmem:[%s5928_s1 + $0x8] sm:$0xff]   ;;  %v4369_v25 = vld [vmem:[%s5928_s1 + $0x10] sm:$0xff]   ;;  %vm3486_vm12 = vcmask 1047559  }
  0x13   : > { %s4557_s28 = scalar_lea.vmem %s5927_s0, %s4313_s23  ;;  %v4360_v18 = vld [vmem:[%s5928_s1 + $0xc0] sm:$0xff]   ;;  %v4368_v22 = vld [vmem:[%s5928_s1 + $0xc8] sm:$0xff]   ;;  %v4370_v26 = vld [vmem:[%s5928_s1 + $0xd0] sm:$0xff]   ;;  %s4988_s23 = sshll.u32 %s6043_s13, 6 }
  0x14   : > { %997 = vmatpush1.bf16.msra.mxu0 %v4342_v2  ;;  %4302 = vmatpush1.bf16.msra.mxu1 %v4342_v2  ;;  %v4562_v5 = vld [vmem:[%s4557_s28 + $0x14] ss:$8 sps:$4 sm:$0xff]   ;;  %v4612_v15 = vld [vmem:[%s4557_s28 + $0x10] ss:$8 sps:$4 sm:$0xff]   ;;  %v4626_v19 = vld [vmem:[%s4557_s28 + $0x24] ss:$8 sps:$4 sm:$0xff]   ;;  %s5000_s25 = scalar_lea.vmem %s5932_s5, %s4988_s23  ;;  %s5007_s29 = scalar_lea.vmem %s5933_s6, %s4988_s23 }
  0x15   : > { %998 = vmatprep.subr.bf16.mxu0 %v4457_v1  ;;  %4291 = vmatprep.subr.bf16.mxu1 %v4457_v1  ;;  %v4568_v7 = vld [vmem:[%s4557_s28 + $0x94] ss:$8 sps:$4 sm:$0xff]   ;;  %v4615_v16 = vld [vmem:[%s4557_s28 + $0x90] ss:$8 sps:$4 sm:$0xff]   ;;  %v4629_v20 = vld [vmem:[%s4557_s28 + $0xa4] ss:$8 sps:$4 sm:$0xff]   ;;  %s5406_s27 = scalar_lea.vmem %s5937_s10, %s4988_s23 }
  0x16   : > { %4046 = vmatprep.mubr.msk.bf16.mxu0 %vm945_vm0, %v4562_v5  ;;  %4054 = vmatprep.mubr.msk.bf16.mxu1 %vm945_vm0, %v4568_v7  ;;  %v4643_v23 = vld [vmem:[%s4557_s28 + $0x20] ss:$8 sps:$4 sm:$0xff]   ;;  %v4658_v27 = vld [vmem:[%s4557_s28 + $0x34] ss:$8 sps:$4 sm:$0xff]   ;;  %v4680_v31 = vld [vmem:[%s4557_s28 + $0x30] ss:$8 sps:$4 sm:$0xff]  }
  0x17   : > { %v4648_v24 = vld [vmem:[%s4557_s28 + $0xa0] ss:$8 sps:$4 sm:$0xff]   ;;  %v4663_v28 = vld [vmem:[%s4557_s28 + $0xb4] ss:$8 sps:$4 sm:$0xff]   ;;  %v4683_v32 = vld [vmem:[%s4557_s28 + $0xb0] ss:$8 sps:$4 sm:$0xff]  }
  0x18   : > { %999 = vmatpush1.bf16.msra.mxu0 %v4343_v3  ;;  %4303 = vmatpush1.bf16.msra.mxu1 %v4343_v3  ;;  %v4377_v29 = vld [vmem:[%s5928_s1 + $0x18] sm:$0xff]   ;;  %v4686_v33 = vld [vmem:[%s4557_s28 + $0x44] ss:$8 sps:$4 sm:$0xff]   ;;  %v4714_v39 = vld [vmem:[%s4557_s28 + $0x40] ss:$8 sps:$4 sm:$0xff]  }
  0x19   : > { %1000 = vmatprep.subr.bf16.mxu0 %v4457_v1  ;;  %4292 = vmatprep.subr.bf16.mxu1 %v4457_v1  ;;  %v4378_v30 = vld [vmem:[%s5928_s1 + $0xd8] sm:$0xff]   ;;  %v4689_v34 = vld [vmem:[%s4557_s28 + $0xc4] ss:$8 sps:$4 sm:$0xff]   ;;  %v4717_v40 = vld [vmem:[%s4557_s28 + $0xc0] ss:$8 sps:$4 sm:$0xff]  }
  0x1a   : > { %v4383_v35 = vld [vmem:[%s5928_s1 + $0x20] sm:$0xff]   ;;  %v4387_v37 = vld [vmem:[%s5928_s1 + $0x28] sm:$0xff]   ;;  %v4720_v41 = vld [vmem:[%s4557_s28 + $0x54] ss:$8 sps:$4 sm:$0xff]  }
  0x1b   : > { %v4386_v36 = vld [vmem:[%s5928_s1 + $0xe0] sm:$0xff]   ;;  %v4388_v38 = vld [vmem:[%s5928_s1 + $0xe8] sm:$0xff]   ;;  %v4723_v42 = vld [vmem:[%s4557_s28 + $0xd4] ss:$8 sps:$4 sm:$0xff]  }
  0x1c   : > { %1001 = vmatpush1.bf16.msra.mxu0 %v4344_v4  ;;  %4304 = vmatpush1.bf16.msra.mxu1 %v4344_v4  ;;  %v4395_v43 = vld [vmem:[%s5928_s1 + $0x30] sm:$0xff]   ;;  %v4401_v45 = vld [vmem:[%s5928_s1 + $0x38] sm:$0xff]   ;;  %v4754_v49 = vld [vmem:[%s4557_s28 + $0x64] ss:$8 sps:$4 sm:$0xff]  }
  0x1d   : > { %1002 = vmatprep.subr.bf16.mxu0 %v4457_v1  ;;  %4293 = vmatprep.subr.bf16.mxu1 %v4457_v1  ;;  %v4396_v44 = vld [vmem:[%s5928_s1 + $0xf0] sm:$0xff]   ;;  %v4404_v46 = vld [vmem:[%s5928_s1 + $0xf8] sm:$0xff]   ;;  %v4757_v50 = vld [vmem:[%s4557_s28 + $0xe4] ss:$8 sps:$4 sm:$0xff]  }
  0x1e   : > { %v4748_v47 = vld [vmem:[%s4557_s28 + $0x50] ss:$8 sps:$4 sm:$0xff]   ;;  %v4405_v51 = vld [vmem:[%s5928_s1 + $0x40] sm:$0xff]   ;;  %v4413_v53 = vld [vmem:[%s5928_s1 + $0x48] sm:$0xff]  }
  0x1f   : > { %v4751_v48 = vld [vmem:[%s4557_s28 + $0xd0] ss:$8 sps:$4 sm:$0xff]   ;;  %v4406_v52 = vld [vmem:[%s5928_s1 + $0x100] sm:$0xff]   ;;  %v4414_v54 = vld [vmem:[%s5928_s1 + $0x108] sm:$0xff]  }
  0x20   : > { %1003 = vmatpush1.bf16.msra.mxu0 %v4345_v6  ;;  %4305 = vmatpush1.bf16.msra.mxu1 %v4345_v6  ;;  %v4402_v55 = vld [vmem:[%s4557_s28 + $0x60] ss:$8 sps:$4 sm:$0xff]   ;;  %v4407_v57 = vld [vmem:[%s4557_s28 + $0x74] ss:$8 sps:$4 sm:$0xff]   ;;  %v4411_v63 = vld [vmem:[%s4557_s28 + $0x70] ss:$8 sps:$4 sm:$0xff]  }
  0x21   : > { %1004 = vmatprep.subr.bf16.mxu0 %v4457_v1  ;;  %4294 = vmatprep.subr.bf16.mxu1 %v4457_v1  ;;  %v4783_v56 = vld [vmem:[%s4557_s28 + $0xe0] ss:$8 sps:$4 sm:$0xff]   ;;  %v4787_v58 = vld [vmem:[%s4557_s28 + $0xf4] ss:$8 sps:$4 sm:$0xff]   ;;  %v4811_v0 = vld [vmem:[%s4557_s28 + $0xf0] ss:$8 sps:$4 sm:$0xff]  }
  0x22   : > { %v4419_v59 = vld [vmem:[%s5928_s1 + $0x50] sm:$0xff]   ;;  %v4423_v61 = vld [vmem:[%s5928_s1 + $0x58] sm:$0xff]   ;;  %v4415_v2 = vld [vmem:[%s4557_s28 + $0x84] ss:$8 sps:$4 sm:$0xff]  }
  0x23   : > { %v4422_v60 = vld [vmem:[%s5928_s1 + $0x110] sm:$0xff]   ;;  %v4424_v62 = vld [vmem:[%s5928_s1 + $0x118] sm:$0xff]   ;;  %v4815_v3 = vld [vmem:[%s4557_s28 + $0x104] ss:$8 sps:$4 sm:$0xff]  }
  0x24   : > { %1005 = vmatpush1.bf16.msra.mxu0 %v4346_v8  ;;  %4306 = vmatpush1.bf16.msra.mxu1 %v4346_v8  ;;  %v4420_v4 = vld [vmem:[%s4557_s28 + $0x80] ss:$8 sps:$4 sm:$0xff]  }
  0x25   : > { %1006 = vmatprep.subr.bf16.mxu0 %v4457_v1  ;;  %4295 = vmatprep.subr.bf16.mxu1 %v4457_v1  ;;  %v4823_v6 = vld [vmem:[%s4557_s28 + $0x100] ss:$8 sps:$4 sm:$0xff]  }
  0x26   : > { %v4425_v8 = vld [vmem:[%s4557_s28] ss:$8 sps:$4 sm:$0xff]  }
  0x28   : > { %1007 = vmatpush1.bf16.msra.mxu0 %v4347_v9  ;;  %4307 = vmatpush1.bf16.msra.mxu1 %v4347_v9 }
  0x29   : > { %1008 = vmatprep.subr.bf16.mxu0 %v4457_v1  ;;  %4296 = vmatprep.subr.bf16.mxu1 %v4457_v1 }
  0x2c   : > { %1009 = vmatpush1.bf16.msra.mxu0 %v4348_v10  ;;  %4308 = vmatpush1.bf16.msra.mxu1 %v4348_v10 }
  0x2d   : > { %1010 = vmatprep.subr.bf16.mxu0 %v4457_v1  ;;  %4297 = vmatprep.subr.bf16.mxu1 %v4457_v1 }
  0x30   : > { %1011 = vmatpush1.bf16.msra.mxu0 %v4349_v11  ;;  %4309 = vmatpush1.bf16.msra.mxu1 %v4349_v11 }
  0x31   : > { %1012 = vmatprep.subr.bf16.mxu0 %v4457_v1  ;;  %4298 = vmatprep.subr.bf16.mxu1 %v4457_v1 }
  0x34   : > { %1013 = vmatpush1.bf16.msra.mxu0 %v4350_v12  ;;  %4310 = vmatpush1.bf16.msra.mxu1 %v4350_v12 }
  0x35   : > { %1014 = vmatprep.subr.bf16.mxu0 %v4457_v1  ;;  %4299 = vmatprep.subr.bf16.mxu1 %v4457_v1 }
  0x38   : > { %1015 = vmatpush1.bf16.msra.mxu0 %v4351_v13  ;;  %4311 = vmatpush1.bf16.msra.mxu1 %v4351_v13 }
  0x39   : > { %1016 = vmatprep.subr.bf16.mxu0 %v4457_v1  ;;  %4300 = vmatprep.subr.bf16.mxu1 %v4457_v1 }
  0x3c   : > { %1017 = vmatpush1.bf16.msra.mxu0 %v4352_v14  ;;  %4312 = vmatpush1.bf16.msra.mxu1 %v4352_v14 }
  0x3d   : > { %1419 = vmatprep.subr.bf16.mxu1 %v4457_v1  ;;  %1905 = vmatprep.subr.bf16.mxu0 %v4457_v1 }
  0x3f   : > { %1027 = vmatmul.mubr.bf16.vlgmr.msra.gmra.mrb[0].mxu0 %v4612_v15  ;;  %1091 = vmatmul.mubr.bf16.vlgmr.msra.gmra.mrb[0].mxu1 %v4615_v16 }
  0x40   : > { %1420 = vmatpush1.bf16.msra.mxu1 %v4359_v17  ;;  %1906 = vmatpush1.bf16.msra.mxu0 %v4360_v18 }
  0x41   : > { %1421 = vmatprep.subr.bf16.mxu1 %v4457_v1  ;;  %4047 = vmatprep.mubr.msk.bf16.mxu0 %vm945_vm0, %v4626_v19 }
  0x42   : > { %4055 = vmatprep.mubr.msk.bf16.mxu1 %vm945_vm0, %v4629_v20  ;;  %1907 = vmatprep.subr.bf16.mxu0 %v4457_v1 }
  0x44   : > { %1422 = vmatpush1.bf16.msra.mxu1 %v4365_v21  ;;  %1908 = vmatpush1.bf16.msra.mxu0 %v4368_v22 }
  0x45   : > { %1423 = vmatprep.subr.bf16.mxu1 %v4457_v1  ;;  %1909 = vmatprep.subr.bf16.mxu0 %v4457_v1 }
  0x47   : > { %1035 = vmatmul.mubr.bf16.gmra.mrb[4].mxu0 %v4643_v23  ;;  %1099 = vmatmul.mubr.bf16.gmra.mrb[4].mxu1 %v4648_v24 }
  0x48   : > { %1424 = vmatpush1.bf16.msra.mxu1 %v4369_v25  ;;  %1910 = vmatpush1.bf16.msra.mxu0 %v4370_v26 }
  0x49   : > { %4048 = vmatprep.mubr.msk.bf16.mxu0 %vm945_vm0, %v4658_v27  ;;  %4056 = vmatprep.mubr.msk.bf16.mxu1 %vm945_vm0, %v4663_v28 }
  0x4a   : > { %1425 = vmatprep.subr.bf16.mxu1 %v4457_v1  ;;  %1911 = vmatprep.subr.bf16.mxu0 %v4457_v1 }
  0x4c   : > { %1426 = vmatpush1.bf16.msra.mxu1 %v4377_v29  ;;  %1912 = vmatpush1.bf16.msra.mxu0 %v4378_v30 }
  0x4d   : > { %1427 = vmatprep.subr.bf16.mxu1 %v4457_v1  ;;  %1913 = vmatprep.subr.bf16.mxu0 %v4457_v1 }
  0x4f   : > { %1043 = vmatmul.mubr.bf16.gmra.mrb[8].mxu0 %v4680_v31  ;;  %1107 = vmatmul.mubr.bf16.gmra.mrb[8].mxu1 %v4683_v32 }
  0x50   : > { %4049 = vmatprep.mubr.msk.bf16.mxu0 %vm945_vm0, %v4686_v33  ;;  %4057 = vmatprep.mubr.msk.bf16.mxu1 %vm945_vm0, %v4689_v34 }
  0x51   : > { %1428 = vmatpush1.bf16.msra.mxu1 %v4383_v35  ;;  %1914 = vmatpush1.bf16.msra.mxu0 %v4386_v36 }
  0x52   : > { %1429 = vmatprep.subr.bf16.mxu1 %v4457_v1  ;;  %1915 = vmatprep.subr.bf16.mxu0 %v4457_v1 }
  0x55   : > { %1430 = vmatpush1.bf16.msra.mxu1 %v4387_v37  ;;  %1916 = vmatpush1.bf16.msra.mxu0 %v4388_v38 }
  0x56   : > { %1431 = vmatprep.subr.bf16.mxu1 %v4457_v1  ;;  %1917 = vmatprep.subr.bf16.mxu0 %v4457_v1 }
  0x57   : > { %1051 = vmatmul.mubr.bf16.gmra.mrb[12].mxu0 %v4714_v39  ;;  %1115 = vmatmul.mubr.bf16.gmra.mrb[12].mxu1 %v4717_v40 }
  0x58   : > { %4050 = vmatprep.mubr.msk.bf16.mxu0 %vm945_vm0, %v4720_v41  ;;  %4058 = vmatprep.mubr.msk.bf16.mxu1 %vm945_vm0, %v4723_v42 }
  0x59   : > { %1432 = vmatpush1.bf16.msra.mxu1 %v4395_v43  ;;  %1918 = vmatpush1.bf16.msra.mxu0 %v4396_v44 }
  0x5a   : > { %1433 = vmatprep.subr.bf16.mxu1 %v4457_v1  ;;  %1919 = vmatprep.subr.bf16.mxu0 %v4457_v1 }
  0x5d   : > { %1434 = vmatpush1.bf16.msra.mxu1 %v4401_v45  ;;  %1920 = vmatpush1.bf16.msra.mxu0 %v4404_v46 }
  0x5e   : > { %1435 = vmatprep.subr.bf16.mxu1 %v4457_v1  ;;  %1921 = vmatprep.subr.bf16.mxu0 %v4457_v1 }
  0x5f   : > { %1059 = vmatmul.mubr.bf16.gmra.mrb[16].mxu0 %v4748_v47  ;;  %1123 = vmatmul.mubr.bf16.gmra.mrb[16].mxu1 %v4751_v48 }
  0x60   : > { %4051 = vmatprep.mubr.msk.bf16.mxu0 %vm945_vm0, %v4754_v49  ;;  %4059 = vmatprep.mubr.msk.bf16.mxu1 %vm945_vm0, %v4757_v50 }
  0x61   : > { %1436 = vmatpush1.bf16.msra.mxu1 %v4405_v51  ;;  %1922 = vmatpush1.bf16.msra.mxu0 %v4406_v52 }
  0x62   : > { %1437 = vmatprep.subr.bf16.mxu1 %v4457_v1  ;;  %1923 = vmatprep.subr.bf16.mxu0 %v4457_v1 }
  0x65   : > { %1438 = vmatpush1.bf16.msra.mxu1 %v4413_v53  ;;  %1924 = vmatpush1.bf16.msra.mxu0 %v4414_v54 }
  0x66   : > { %1439 = vmatprep.subr.bf16.mxu1 %v4457_v1  ;;  %1925 = vmatprep.subr.bf16.mxu0 %v4457_v1 }
  0x67   : > { %1067 = vmatmul.mubr.bf16.gmra.mrb[20].mxu0 %v4402_v55  ;;  %1131 = vmatmul.mubr.bf16.gmra.mrb[20].mxu1 %v4783_v56 }
  0x68   : > { %4052 = vmatprep.mubr.msk.bf16.mxu0 %vm945_vm0, %v4407_v57  ;;  %4060 = vmatprep.mubr.msk.bf16.mxu1 %vm945_vm0, %v4787_v58 }
  0x69   : > { %1440 = vmatpush1.bf16.msra.mxu1 %v4419_v59  ;;  %1926 = vmatpush1.bf16.msra.mxu0 %v4422_v60 }
  0x6a   : > { %1441 = vmatprep.subr.bf16.mxu1 %v4457_v1  ;;  %1927 = vmatprep.subr.bf16.mxu0 %v4457_v1  ;;  %v4427_v1 = vld [vmem:[%s4557_s28 + $0x4] ss:$8 sps:$4 sm:$0xff]  }
  0x6d   : > { %1442 = vmatpush1.bf16.msra.mxu1 %v4423_v61  ;;  %1928 = vmatpush1.bf16.msra.mxu0 %v4424_v62 }
  0x6f   : > { %1075 = vmatmul.mubr.bf16.gmra.mrb[24].mxu0 %v4411_v63  ;;  %1139 = vmatmul.mubr.bf16.gmra.mrb[24].mxu1 %v4811_v0 }
  0x70   : > { %4053 = vmatprep.mubr.msk.bf16.mxu0 %vm945_vm0, %v4415_v2  ;;  %4061 = vmatprep.mubr.msk.bf16.mxu1 %vm945_vm0, %v4815_v3 }
  0x77   : > { %1083 = vmatmul.mubr.bf16.gmra.mrb[28].mxu0 %v4420_v4  ;;  %1147 = vmatmul.mubr.bf16.gmra.mrb[28].mxu1 %v4823_v6 }
  0x78   : > { %4106 = vmatprep.mubr.msk.bf16.mxu1 %vm945_vm0, %v4427_v1  ;;  %4222 = vmatprep.mubr.msk.bf16.mxu0 %vm945_vm0, %v4626_v19 }
  0x7f   : > { %1452 = vmatmul.mubr.bf16.vlgmr.msra.gmra.mrb[32].mxu1 %v4425_v8  ;;  %1938 = vmatmul.mubr.bf16.vlgmr.msra.gmra.mrb[32].mxu0 %v4643_v23 }
  0x80   : > { %4107 = vmatprep.mubr.msk.bf16.mxu1 %vm945_vm0, %v4562_v5  ;;  %4223 = vmatprep.mubr.msk.bf16.mxu0 %vm945_vm0, %v4658_v27  ;;  %v4428_v5 = vld [vmem:[%s4557_s28 + $0x114] ss:$8 sps:$4 sm:$0xff]  }
  0x87   : > { %1460 = vmatmul.mubr.bf16.gmra.mrb[36].mxu1 %v4612_v15  ;;  %1946 = vmatmul.mubr.bf16.gmra.mrb[36].mxu0 %v4680_v31 }
  0x88   : > { %4108 = vmatprep.mubr.msk.bf16.mxu1 %vm945_vm0, %v4626_v19  ;;  %4224 = vmatprep.mubr.msk.bf16.mxu0 %vm945_vm0, %v4686_v33 }
  0x8f   : > { %1468 = vmatmul.mubr.bf16.gmra.mrb[40].mxu1 %v4643_v23  ;;  %1954 = vmatmul.mubr.bf16.gmra.mrb[40].mxu0 %v4714_v39 }
  0x90   : > { %4109 = vmatprep.mubr.msk.bf16.mxu1 %vm945_vm0, %v4658_v27  ;;  %4225 = vmatprep.mubr.msk.bf16.mxu0 %vm945_vm0, %v4720_v41 }
  0x97   : > { %1476 = vmatmul.mubr.bf16.gmra.mrb[44].mxu1 %v4680_v31  ;;  %1962 = vmatmul.mubr.bf16.gmra.mrb[44].mxu0 %v4748_v47 }
  0x98   : > { %4110 = vmatprep.mubr.msk.bf16.mxu1 %vm945_vm0, %v4686_v33  ;;  %4226 = vmatprep.mubr.msk.bf16.mxu0 %vm945_vm0, %v4754_v49 }
  0x9f   : > { %1484 = vmatmul.mubr.bf16.gmra.mrb[48].mxu1 %v4714_v39  ;;  %1970 = vmatmul.mubr.bf16.gmra.mrb[48].mxu0 %v4402_v55 }
  0xa0   : > { %4111 = vmatprep.mubr.msk.bf16.mxu1 %vm945_vm0, %v4720_v41  ;;  %4227 = vmatprep.mubr.msk.bf16.mxu0 %vm945_vm0, %v4407_v57 }
  0xa7   : > { %1492 = vmatmul.mubr.bf16.gmra.mrb[52].mxu1 %v4748_v47  ;;  %1978 = vmatmul.mubr.bf16.gmra.mrb[52].mxu0 %v4411_v63 }
  0xa8   : > { %4112 = vmatprep.mubr.msk.bf16.mxu1 %vm945_vm0, %v4754_v49  ;;  %4228 = vmatprep.mubr.msk.bf16.mxu0 %vm945_vm0, %v4415_v2 }
  0xaf   : > { %1500 = vmatmul.mubr.bf16.gmra.mrb[56].mxu1 %v4402_v55  ;;  %1986 = vmatmul.mubr.bf16.gmra.mrb[56].mxu0 %v4420_v4 }
  0xb0   : > { %4113 = vmatprep.mubr.msk.bf16.mxu1 %vm945_vm0, %v4407_v57  ;;  %4229 = vmatprep.mubr.msk.bf16.mxu0 %vm945_vm0, %v4568_v7 }
  0xb7   : > { %1508 = vmatmul.mubr.bf16.gmra.mrb[60].mxu1 %v4411_v63  ;;  %1994 = vmatmul.mubr.bf16.gmra.mrb[60].mxu0 %v4615_v16 }
  0xb8   : > { %4114 = vmatprep.mubr.msk.bf16.mxu1 %vm945_vm0, %v4415_v2  ;;  %4230 = vmatprep.mubr.msk.bf16.mxu0 %vm945_vm0, %v4629_v20 }
  0xbf   : > { %1516 = vmatmul.mubr.bf16.gmra.mrb[64].mxu1 %v4420_v4  ;;  %2002 = vmatmul.mubr.bf16.gmra.mrb[64].mxu0 %v4648_v24 }
  0xc0   : > { %4115 = vmatprep.mubr.msk.bf16.mxu1 %vm945_vm0, %v4568_v7  ;;  %4231 = vmatprep.mubr.msk.bf16.mxu0 %vm945_vm0, %v4663_v28  ;;  %v4430_v7 = vld [vmem:[%s4557_s28 + $0x110] ss:$8 sps:$4 sm:$0xff]   ;;  %s4961_s28 = sshll.u32 %s6043_s13, 8  ;;  %s5382_s13 = scalar_lea.vmem %s5936_s9, %s4988_s23 }
  0xc1   : > { %s4971_s19 = scalar_lea.vmem %s5930_s3, %s4961_s28  ;;  %s4981_s22 = scalar_lea.vmem %s5931_s4, %s4961_s28 }
  0xc2   : > { %v2137_v2 = vld [vmem:[%s4971_s19] sm:$0xff]  ;;  %v2203_v1 = vld [vmem:[%s4981_s22 + $0x10] sm:$0xff]  ;;  %s5145_s18 = scalar_lea.vmem %s5934_s7, %s4961_s28  ;;  %s5215_s21 = scalar_lea.vmem %s5935_s8, %s4961_s28 }
  0xc3   : > { %v2201_v4 = vld [vmem:[%s4981_s22] sm:$0xff]  ;;  %v2169_v8 = vmul.f32 0.2, %v2137_v2  ;;  %v2144_v2 = vld [vmem:[%s4971_s19 + $0x38] sm:$0xff] }
  0xc7   : > { %1524 = vmatmul.mubr.bf16.gmra.mrb[68].mxu1 %v4615_v16  ;;  %2010 = vmatmul.mubr.bf16.gmra.mrb[68].mxu0 %v4683_v32 }
  0xc8   : > { %4116 = vmatprep.mubr.msk.bf16.mxu1 %vm945_vm0, %v4629_v20  ;;  %4232 = vmatprep.mubr.msk.bf16.mxu0 %vm945_vm0, %v4689_v34 }
  0xcf   : > { %1532 = vmatmul.mubr.bf16.gmra.mrb[72].mxu1 %v4648_v24  ;;  %2018 = vmatmul.mubr.bf16.gmra.mrb[72].mxu0 %v4717_v40 }
  0xd0   : > { %4117 = vmatprep.mubr.msk.bf16.mxu1 %vm945_vm0, %v4663_v28  ;;  %4233 = vmatprep.mubr.msk.bf16.mxu0 %vm945_vm0, %v4723_v42 }
  0xd7   : > { %1540 = vmatmul.mubr.bf16.gmra.mrb[76].mxu1 %v4683_v32  ;;  %2026 = vmatmul.mubr.bf16.gmra.mrb[76].mxu0 %v4751_v48 }
  0xd8   : > { %4118 = vmatprep.mubr.msk.bf16.mxu1 %vm945_vm0, %v4689_v34  ;;  %4234 = vmatprep.mubr.msk.bf16.mxu0 %vm945_vm0, %v4757_v50 }
  0xdf   : > { %1548 = vmatmul.mubr.bf16.gmra.mrb[80].mxu1 %v4717_v40  ;;  %2034 = vmatmul.mubr.bf16.gmra.mrb[80].mxu0 %v4783_v56 }
  0xe0   : > { %4119 = vmatprep.mubr.msk.bf16.mxu1 %vm945_vm0, %v4723_v42  ;;  %4235 = vmatprep.mubr.msk.bf16.mxu0 %vm945_vm0, %v4787_v58 }
  0xe7   : > { %1556 = vmatmul.mubr.bf16.gmra.mrb[84].mxu1 %v4751_v48  ;;  %2042 = vmatmul.mubr.bf16.gmra.mrb[84].mxu0 %v4811_v0 }
  0xe8   : > { %4120 = vmatprep.mubr.msk.bf16.mxu1 %vm945_vm0, %v4757_v50  ;;  %4236 = vmatprep.mubr.msk.bf16.mxu0 %vm945_vm0, %v4815_v3  ;;  %v2138_v3 = vld [vmem:[%s4971_s19 + $0x8] sm:$0xff] }
  0xef   : > { %1564 = vmatmul.mubr.bf16.gmra.mrb[88].mxu1 %v4783_v56  ;;  %2050 = vmatmul.mubr.bf16.gmra.mrb[88].mxu0 %v4823_v6  ;;  %v2202_v6 = vld [vmem:[%s4981_s22 + $0x8] sm:$0xff] }
  0xf0   : > { %4121 = vmatprep.mubr.msk.bf16.mxu1 %vm945_vm0, %v4787_v58  ;;  %4237 = vmatprep.mubr.msk.bf16.mxu0 %vm945_vm0, %v4428_v5  ;;  %v2170_v5 = vmul.f32 0.2, %v2138_v3 }
  0xf7   : > { %1572 = vmatmul.mubr.bf16.gmra.mrb[92].mxu1 %v4811_v0  ;;  %2058 = vmatmul.mubr.bf16.gmra.mrb[92].mxu0 %v4430_v7 }
 0x112   : > { %v4912_v9 = vpop.f32.mrb[0].mxu0  ;;  %v4914_v10 = vpop.f32.mrb[0].mxu1 }
 0x113   : > { %5940 = vst [vmem:[#allocation2_spill] sm:$0xff] %v4914_v10  ;;  %v1030_v11 = vpop.f32.mrb[1].mxu0  ;;  %v1094_v12 = vpop.f32.mrb[1].mxu1  ;;  %v5197_v10 = vld [vmem:[%s4971_s19 + $0xf8] sm:$0xff] }
 0x114   : > { %v4916_v13 = vpop.f32.mrb[2].mxu0  ;;  %v4918_v14 = vpop.f32.mrb[2].mxu1  ;;  %v2233_v12 = vsub.f32 1.0, %v2201_v4  ;;  %5973 = vst [vmem:[#allocation35_spill] sm:$0xff] %v5197_v10  ;;  %v5229_v10 = vld [vmem:[%s4981_s22 + $0xf0] sm:$0xff] }
 0x115   : > { %5941 = vst [vmem:[#allocation3_spill] sm:$0xff] %v4918_v14  ;;  %v1033_v15 = vpop.f32.mrb[3].mxu0  ;;  %v1097_v16 = vpop.f32.mrb[3].mxu1  ;;  %v5194_v14 = vld [vmem:[%s4971_s19 + $0xf0] sm:$0xff]  ;;  %5978 = vst [vmem:[#allocation39_spill] sm:$0xff] %v5229_v10 }
 0x116   : > { %v2234_v15 = vsub.f32 1.0, %v2202_v6  ;;  %v2139_v16 = vld [vmem:[%s4971_s19 + $0x10] sm:$0xff]  ;;  %v5022_v3 = vmul.f32 %v2233_v12, %v2169_v8  ;;  %v2146_v8 = vld [vmem:[%s4971_s19 + $0x48] sm:$0xff]  ;;  %5972 = vst [vmem:[#allocation34_spill] sm:$0xff] %v5194_v14 }
 0x118   : > { %v5024_v4 = vmul.f32 %v2234_v15, %v2170_v5 }
 0x11a   : > { %v4920_v17 = vpop.f32.mrb[4].mxu0  ;;  %v4922_v18 = vpop.f32.mrb[4].mxu1 }
 0x11b   : > { %5942 = vst [vmem:[#allocation4_spill] sm:$0xff] %v4922_v18  ;;  %v1038_v19 = vpop.f32.mrb[5].mxu0  ;;  %v1102_v20 = vpop.f32.mrb[5].mxu1  ;;  %v5191_v18 = vld [vmem:[%s4971_s19 + $0xe8] sm:$0xff] }
 0x11c   : > { %v4924_v21 = vpop.f32.mrb[6].mxu0  ;;  %v4926_v22 = vpop.f32.mrb[6].mxu1  ;;  %v4458_v19 = vmov 1983009808   ;;  %5971 = vst [vmem:[#allocation33_spill] sm:$0xff] %v5191_v18 }
 0x11d   : > { %5943 = vst [vmem:[#allocation5_spill] sm:$0xff] %v4926_v22  ;;  %v1041_v23 = vpop.f32.mrb[7].mxu0  ;;  %v1105_v24 = vpop.f32.mrb[7].mxu1  ;;  %v2523_v20 = vunpack.c.l.s4 %v4458_v19  ;;  %v5028_v19 = vld [vmem:[%s4981_s22 + $0x38] sm:$0xff]  ;;  %v5188_v22 = vld [vmem:[%s4981_s22 + $0xd0] sm:$0xff] }
 0x11e   : > { %v2525_v23 = vlaneseq  ;;  %v2140_v24 = vld [vmem:[%s4971_s19 + $0x18] sm:$0xff]  ;;  %5970 = vst [vmem:[#allocation32_spill] sm:$0xff] %v5188_v22  ;;  %v5209_v22 = vld [vmem:[%s4981_s22 + $0xe8] sm:$0xff] }
 0x11f   : > { %5976 = vst [vmem:[#allocation38_spill] sm:$0xff] %v5209_v22  ;;  %v5232_v22 = vld [vmem:[%s4981_s22 + $0xf8] sm:$0xff] }
 0x120   : > { %5979 = vst [vmem:[#allocation40_spill] sm:$0xff] %v5232_v22 }
 0x122   : > { %v4928_v25 = vpop.f32.mrb[8].mxu0  ;;  %v4930_v26 = vpop.f32.mrb[8].mxu1 }
 0x123   : > { %5944 = vst [vmem:[#allocation6_spill] sm:$0xff] %v4930_v26  ;;  %v1046_v27 = vpop.f32.mrb[9].mxu0  ;;  %v1110_v28 = vpop.f32.mrb[9].mxu1  ;;  %v5133_v26 = vld [vmem:[%s4971_s19 + $0xd0] sm:$0xff] }
 0x124   : > { %v4932_v29 = vpop.f32.mrb[10].mxu0  ;;  %v4934_v30 = vpop.f32.mrb[10].mxu1  ;;  %5963 = vst [vmem:[#allocation25_spill] sm:$0xff] %v5133_v26  ;;  %v5164_v26 = vld [vmem:[%s4981_s22 + $0x90] sm:$0xff] }
 0x125   : > { %5945 = vst [vmem:[#allocation7_spill] sm:$0xff] %v4934_v30  ;;  %v1049_v31 = vpop.f32.mrb[11].mxu0  ;;  %v1113_v32 = vpop.f32.mrb[11].mxu1 }
 0x126   : > { %v2171_v31 = vmul.f32 0.2, %v2139_v16  ;;  %v2235_v32 = vsub.f32 1.0, %v2203_v1  ;;  %v2207_v16 = vld [vmem:[%s4981_s22 + $0x30] sm:$0xff] }
 0x12a   : > { %v4936_v33 = vpop.f32.mrb[12].mxu0  ;;  %v4938_v34 = vpop.f32.mrb[12].mxu1 }
 0x12b   : > { %5946 = vst [vmem:[#allocation8_spill] sm:$0xff] %v4938_v34  ;;  %v1054_v35 = vpop.f32.mrb[13].mxu0  ;;  %v1118_v36 = vpop.f32.mrb[13].mxu1 }
 0x12c   : > { %v4940_v37 = vpop.f32.mrb[14].mxu0  ;;  %v4942_v38 = vpop.f32.mrb[14].mxu1  ;;  %v2204_v35 = vld [vmem:[%s4981_s22 + $0x18] sm:$0xff] }
 0x12d   : > { %5947 = vst [vmem:[#allocation9_spill] sm:$0xff] %v4942_v38  ;;  %v1057_v39 = vpop.f32.mrb[15].mxu0  ;;  %v1121_v40 = vpop.f32.mrb[15].mxu1 }
 0x12e   : > { %v2172_v40 = vmul.f32 0.2, %v2140_v24  ;;  %v2145_v24 = vld [vmem:[%s4971_s19 + $0x40] sm:$0xff] }
 0x132   : > { %v4944_v41 = vpop.f32.mrb[16].mxu0  ;;  %v4946_v42 = vpop.f32.mrb[16].mxu1 }
 0x133   : > { %5948 = vst [vmem:[#allocation10_spill] sm:$0xff] %v4946_v42  ;;  %v1062_v43 = vpop.f32.mrb[17].mxu0  ;;  %v1126_v44 = vpop.f32.mrb[17].mxu1  ;;  %v5126_v42 = vld [vmem:[%s4971_s19 + $0xc8] sm:$0xff] }
 0x134   : > { %v4948_v45 = vpop.f32.mrb[18].mxu0  ;;  %v4950_v46 = vpop.f32.mrb[18].mxu1  ;;  %v2141_v43 = vld [vmem:[%s4971_s19 + $0x20] sm:$0xff]  ;;  %5962 = vst [vmem:[#allocation24_spill] sm:$0xff] %v5126_v42  ;;  %v5185_v42 = vld [vmem:[%s4981_s22 + $0xc8] sm:$0xff] }
 0x135   : > { %5949 = vst [vmem:[#allocation11_spill] sm:$0xff] %v4950_v46  ;;  %v1065_v47 = vpop.f32.mrb[19].mxu0  ;;  %v1129_v48 = vpop.f32.mrb[19].mxu1  ;;  %v2205_v44 = vld [vmem:[%s4981_s22 + $0x20] sm:$0xff]  ;;  %v2173_v6 = vmul.f32 0.2, %v2141_v43 }
 0x136   : > { %v2237_v1 = vsub.f32 1.0, %v2205_v44  ;;  %v2176_v43 = vmul.f32 0.2, %v2144_v2  ;;  %v5040_v44 = vld [vmem:[%s4981_s22 + $0x48] sm:$0xff]  ;;  %v5123_v46 = vld [vmem:[%s4971_s19 + $0xc0] sm:$0xff]  ;;  %5969 = vst [vmem:[#allocation31_spill] sm:$0xff] %v5185_v42 }
 0x137   : > { %5961 = vst [vmem:[#allocation23_spill] sm:$0xff] %v5123_v46  ;;  %v5139_v46 = vld [vmem:[%s4971_s19 + $0xe0] sm:$0xff] }
 0x138   : > { %5965 = vst [vmem:[#allocation27_spill] sm:$0xff] %v5139_v46  ;;  %v5158_v46 = vld [vmem:[%s4981_s22 + $0x80] sm:$0xff] }
 0x139   : > { %v5206_v42 = vld [vmem:[%s4981_s22 + $0xe0] sm:$0xff] }
 0x13a   : > { %v4952_v49 = vpop.f32.mrb[20].mxu0  ;;  %v4954_v50 = vpop.f32.mrb[20].mxu1  ;;  %5975 = vst [vmem:[#allocation37_spill] sm:$0xff] %v5206_v42 }
 0x13b   : > { %5950 = vst [vmem:[#allocation12_spill] sm:$0xff] %v4954_v50  ;;  %v1070_v51 = vpop.f32.mrb[21].mxu0  ;;  %v1134_v52 = vpop.f32.mrb[21].mxu1  ;;  %v5102_v50 = vld [vmem:[%s4971_s19 + $0x88] sm:$0xff] }
 0x13c   : > { %v4956_v53 = vpop.f32.mrb[22].mxu0  ;;  %v4958_v54 = vpop.f32.mrb[22].mxu1  ;;  %v2236_v51 = vsub.f32 1.0, %v2204_v35  ;;  %v3370_v52 = vld [vmem:[%s5000_s25] sm:$0xff] }
 0x13d   : > { %5951 = vst [vmem:[#allocation13_spill] sm:$0xff] %v4958_v54  ;;  %v1073_v55 = vpop.f32.mrb[23].mxu0  ;;  %v1137_v56 = vpop.f32.mrb[23].mxu1  ;;  %v5034_v35 = vld [vmem:[%s4981_s22 + $0x40] sm:$0xff] }
 0x13e   : > { %v2142_v55 = vld [vmem:[%s4971_s19 + $0x28] sm:$0xff]  ;;  %v5037_v5 = vmul.f32 %v2236_v51, %v2172_v40  ;;  %v2240_v40 = vsub.f32 1.0, %v5028_v19  ;;  %v2177_v51 = vmul.f32 0.2, %v2145_v24  ;;  %v5063_v24 = vmul.f32 %v2237_v1, %v2173_v6 }
 0x13f   : > { %v2206_v56 = vld [vmem:[%s4981_s22 + $0x28] sm:$0xff] }
 0x140   : > { %v3371_v1 = vld [vmem:[%s5000_s25 + $0x8] sm:$0xff] }
 0x142   : > { %v4963_v57 = vpop.f32.mrb[24].mxu0  ;;  %v4965_v58 = vpop.f32.mrb[24].mxu1 }
 0x143   : > { %5952 = vst [vmem:[#allocation14_spill] sm:$0xff] %v4965_v58  ;;  %v1078_v59 = vpop.f32.mrb[25].mxu0  ;;  %v1142_v60 = vpop.f32.mrb[25].mxu1 }
 0x144   : > { %v4973_v61 = vpop.f32.mrb[26].mxu0  ;;  %v4975_v62 = vpop.f32.mrb[26].mxu1  ;;  %v2524_v59 = vunpack.c.0.s8 %v2523_v20  ;;  %v2526_v60 = vshrl.u32 %v2525_v23, 7  ;;  %v5031_v20 = vmul.f32 %v2235_v32, %v2171_v31  ;;  %v3378_v23 = vmul.f32 0.2, %v3370_v52 }
 0x145   : > { %5953 = vst [vmem:[#allocation15_spill] sm:$0xff] %v4973_v61  ;;  %5954 = vst [vmem:[#allocation16_spill] sm:$0xff] %v4975_v62  ;;  %v1081_v63 = vpop.f32.mrb[27].mxu0  ;;  %v1145_v0 = vpop.f32.mrb[27].mxu1  ;;  %v5047_v32 = vld [vmem:[%s5929_s2] ss:$0 sm:$0xff] }
 0x146   : > { %v3386_v63 = vld [vmem:[%s5007_s29] sm:$0xff]  ;;  %v2143_v0 = vld [vmem:[%s4971_s19 + $0x30] sm:$0xff]  ;;  %v5049_v52 = vsub.s32 %v2524_v59, %v2526_v60  ;;  %v2241_v62 = vsub.f32 1.0, %v5034_v35  ;;  %v5060_v59 = vmul.f32 0.2, %v2146_v8 }
 0x147   : > { %v3394_v12 = vsub.f32 1.0, %v3386_v63  ;;  %v2175_v15 = vmul.f32 0.2, %v2143_v0  ;;  %v5056_v63 = vld [vmem:[%s4981_s22 + $0x58] sm:$0xff]  ;;  %v5099_v60 = vld [vmem:[%s4971_s19 + $0x80] sm:$0xff] }
 0x14a   : > { %v4991_v7 = vpop.f32.mrb[28].mxu0  ;;  %v4993_v11 = vpop.f32.mrb[28].mxu1 }
 0x14b   : > { %5955 = vst [vmem:[#allocation17_spill] sm:$0xff] %v4991_v7  ;;  %5956 = vst [vmem:[#allocation18_spill] sm:$0xff] %v4993_v11  ;;  %v1086_v27 = vpop.f32.mrb[29].mxu0  ;;  %v1150_v28 = vpop.f32.mrb[29].mxu1 }
 0x14c   : > { %v5010_v36 = vpop.f32.mrb[30].mxu0  ;;  %v5012_v39 = vpop.f32.mrb[30].mxu1  ;;  %v2174_v27 = vmul.f32 0.2, %v2142_v55  ;;  %v2238_v28 = vsub.f32 1.0, %v2206_v56  ;;  %v2239_v55 = vsub.f32 1.0, %v2207_v16 }
 0x14d   : > { %5957 = vst [vmem:[#allocation19_spill] sm:$0xff] %v5010_v36  ;;  %5958 = vst [vmem:[#allocation20_spill] sm:$0xff] %v5012_v39  ;;  %v1089_v47 = vpop.f32.mrb[31].mxu0  ;;  %v1153_v48 = vpop.f32.mrb[31].mxu1  ;;  %v5053_v56 = vld [vmem:[%s4981_s22 + $0x50] sm:$0xff] }
 0x14e   : > { %v2147_v47 = vld [vmem:[%s4971_s19 + $0x50] sm:$0xff]  ;;  %v2148_v48 = vld [vmem:[%s4971_s19 + $0x58] sm:$0xff]  ;;  %v5065_v58 = vmul.f32 %v2238_v28, %v2174_v27  ;;  %v5078_v27 = vld [vmem:[%s5007_s29 + $0x8] sm:$0xff]  ;;  %v2243_v28 = vsub.f32 1.0, %v5053_v56 }
 0x14f   : > { %v5067_v54 = vmul.f32 0.2, %v2147_v47  ;;  %v2244_v47 = vsub.f32 1.0, %v5056_v63  ;;  %v5095_v56 = vld [vmem:[%s4981_s22 + $0x70] sm:$0xff]  ;;  %v2152_v63 = vld [vmem:[%s4971_s19 + $0x78] sm:$0xff]  ;;  %v5980_v22 = vsub.f32 1.0, %v5078_v27 }
 0x150   : > { %v2247_v7 = vsub.f32 1.0, %v5095_v56  ;;  %v2184_v56 = vmul.f32 0.2, %v2152_v63  ;;  %v2186_v27 = vmul.f32 0.2, %v5102_v50 }
 0x152   : > { %v1453_v39 = vpop.f32.mrb[32].mxu1  ;;  %v1939_v31 = vpop.f32.mrb[32].mxu0 }
 0x153   : > { %v1454_v0 = vadd.f32 %v1453_v39, %v4912_v9  ;;  %v1455_v2 = vpop.f32.mrb[33].mxu1  ;;  %v1941_v11 = vpop.f32.mrb[33].mxu0  ;;  %v5069_v9 = vmul.f32 0.2, %v2148_v48  ;;  %v5073_v39 = vld [vmem:[%s4981_s22 + $0x60] sm:$0xff]  ;;  %v2150_v48 = vld [vmem:[%s4971_s19 + $0x68] sm:$0xff] }
 0x154   : > { %v1456_v16 = vpop.f32.mrb[34].mxu1  ;;  %v1942_v19 = vpop.f32.mrb[34].mxu0  ;;  %v2149_v11 = vld [vmem:[%s4971_s19 + $0x60] sm:$0xff] }
 0x155   : > { %v2066_v35 = vadd.f32 %v1939_v31, %v1454_v0  ;;  %v1457_v8 = vadd.f32 %v1456_v16, %v4916_v13  ;;  %v1458_v2 = vpop.f32.mrb[35].mxu1  ;;  %v1944_v6 = vpop.f32.mrb[35].mxu0  ;;  %v5084_v31 = vld [vmem:[%s4981_s22 + $0x68] sm:$0xff]  ;;  %v5086_v13 = vmul.f32 %v3394_v12, %v3378_v23  ;;  %v5088_v0 = vmul.f32 %v2239_v55, %v2175_v15  ;;  %v5105_v23 = vld [vmem:[%s4971_s19 + $0x90] sm:$0xff]  ;;  %v5108_v12 = vld [vmem:[%s4971_s19 + $0x98] sm:$0xff] }
 0x156   : > { %v5090_v16 = vmul.f32 0.2, %v3371_v1  ;;  %v2151_v6 = vld [vmem:[%s4971_s19 + $0x70] sm:$0xff]  ;;  %v5111_v15 = vld [vmem:[%s4971_s19 + $0xa0] sm:$0xff]  ;;  %v5114_v55 = vld [vmem:[%s4971_s19 + $0xa8] sm:$0xff] }
 0x157   : > { %v5117_v1 = vld [vmem:[%s4971_s19 + $0xb0] sm:$0xff]  ;;  %v5120_v2 = vld [vmem:[%s4971_s19 + $0xb8] sm:$0xff]  ;;  %v2105_v38 = vadd.f32 %v5047_v32, %v2066_v35  ;;  %v2067_v34 = vadd.f32 %v1942_v19, %v1457_v8  ;;  %v5129_v30 = vmul.f32 0.2, %v2149_v11  ;;  %v5147_v19 = vmul.f32 %v2240_v40, %v2176_v43  ;;  %v5173_v40 = vld [vmem:[%s4981_s22 + $0xa8] sm:$0xff] }
 0x158   : > { %5959 = vst [vmem:[#allocation21_spill] sm:$0xff] %v5117_v1  ;;  %5960 = vst [vmem:[#allocation22_spill] sm:$0xff] %v5120_v2  ;;  %v5136_v2 = vld [vmem:[%s4971_s19 + $0xd8] sm:$0xff]  ;;  %v5149_v11 = vmul.f32 %v2241_v62, %v2177_v51  ;;  %v5151_v35 = vmul.f32 0.2, %v2150_v48  ;;  %v5170_v62 = vld [vmem:[%s4981_s22 + $0xa0] sm:$0xff] }
 0x159   : > { %5964 = vst [vmem:[#allocation26_spill] sm:$0xff] %v5136_v2  ;;  %v5155_v1 = vld [vmem:[%s4981_s22 + $0x78] sm:$0xff]  ;;  %v5161_v2 = vld [vmem:[%s4981_s22 + $0x88] sm:$0xff]  ;;  %v5176_v51 = vld [vmem:[%s4981_s22 + $0xb0] sm:$0xff]  ;;  %v2297_v36 = vadd.f32 %v5022_v3, %v2105_v38  ;;  %v5223_v3 = vmul.f32 %v2243_v28, %v5067_v54 }
 0x15a   : > { %v5167_v43 = vld [vmem:[%s4981_s22 + $0x98] sm:$0xff]  ;;  %5966 = vst [vmem:[#allocation28_spill] sm:$0xff] %v5176_v51  ;;  %v5182_v8 = vld [vmem:[%s4981_s22 + $0xc0] sm:$0xff]  ;;  %v2106_v51 = vadd.f32 %v5047_v32, %v2067_v34  ;;  %v1461_v14 = vpop.f32.mrb[36].mxu1  ;;  %v1947_v18 = vpop.f32.mrb[36].mxu0  ;;  %v5977_v34 = vsub.f32 1.0, %v5040_v44 }
 0x15b   : > { %v5179_v48 = vld [vmem:[%s4981_s22 + $0xb8] sm:$0xff]  ;;  %5968 = vst [vmem:[#allocation30_spill] sm:$0xff] %v5182_v8  ;;  %vm2329_vm1 = vcmp.gt.f32.partialorder %v2297_v36, 0.5  ;;  %v1463_v61 = vpop.f32.mrb[37].mxu1  ;;  %v1949_v44 = vpop.f32.mrb[37].mxu0  ;;  %v2248_v54 = vsub.f32 1.0, %v5155_v1  ;;  %2425 = vst [vmem:[%s5145_s18] sm:$0xff] %v2297_v36 }
 0x15c   : > { %5967 = vst [vmem:[#allocation29_spill] sm:$0xff] %v5179_v48  ;;  %v2183_v48 = vmul.f32 0.2, %v2151_v6  ;;  %v5203_v8 = vld [vmem:[%s4981_s22 + $0xd8] sm:$0xff]  ;;  %v5220_v38 = vmul.f32 %v5977_v34, %v5060_v59  ;;  %v5226_v6 = vmul.f32 %v2244_v47, %v5069_v9  ;;  %v2298_v42 = vadd.f32 %v5024_v4, %v2106_v51  ;;  %v3372_v59 = vld [vmem:[%s5000_s25 + $0x10] sm:$0xff]  ;;  %v1464_v47 = vpop.f32.mrb[38].mxu1 }
 0x15d   : > { %5974 = vst [vmem:[#allocation36_spill] sm:$0xff] %v5203_v8  ;;  %v1462_v8 = vadd.f32 %v1461_v14, %v4920_v17  ;;  %v3388_v34 = vld [vmem:[%s5007_s29 + $0x10] sm:$0xff]  ;;  %v5938_v9 = vmov 0.0   ;;  %v1950_v63 = vpop.f32.mrb[38].mxu0  ;;  %v5244_v4 = vmul.f32 %v5980_v22, %v5090_v16  ;;  %v3380_v14 = vmul.f32 0.2, %v3372_v59 }
 0x15e   : > { %v4239_v28 = vsel %vm2329_vm1, 1.0, %v5938_v9  ;;  %v3396_v17 = vsub.f32 1.0, %v3388_v34  ;;  %vm2330_vm2 = vcmp.gt.f32.partialorder %v2298_v42, 0.5  ;;  %v1465_v51 = vadd.f32 %v1464_v47, %v4924_v21  ;;  %v1466_v1 = vpop.f32.mrb[39].mxu1  ;;  %v1952_v44 = vpop.f32.mrb[39].mxu0  ;;  %2426 = vst [vmem:[%s5145_s18 + $0x8] sm:$0xff] %v2298_v42 }
 0x15f   : > { %v2068_v61 = vadd.f32 %v1947_v18, %v1462_v8  ;;  %v2185_v36 = vmul.f32 0.2, %v5099_v60  ;;  %2457 = vst [vmem:[%s5215_s21] sm:$0xff] %v4239_v28  ;;  %v4240_v10 = vsel %vm2330_vm2, 1.0, %v5938_v9  ;;  %v2249_v22 = vsub.f32 1.0, %v5158_v46 }
 0x160   : > { %v2250_v16 = vsub.f32 1.0, %v5161_v2  ;;  %v2069_v8 = vadd.f32 %v1950_v63, %v1465_v51  ;;  %v5981_v21 = vsub.f32 1.0, %v5073_v39  ;;  %v5982_v42 = vsub.f32 1.0, %v5084_v31  ;;  %2458 = vst [vmem:[%s5215_s21 + $0x8] sm:$0xff] %v4240_v10  ;;  %v3373_v63 = vld [vmem:[%s5000_s25 + $0x18] sm:$0xff] }
 0x161   : > { %v2107_v18 = vadd.f32 %v5047_v32, %v2068_v61  ;;  %v5266_v46 = vmul.f32 %v2247_v7, %v2183_v48  ;;  %v5268_v50 = vmul.f32 %v2248_v54, %v2184_v56  ;;  %v2187_v2 = vmul.f32 0.2, %v5105_v23  ;;  %v3389_v48 = vld [vmem:[%s5007_s29 + $0x18] sm:$0xff] }
 0x162   : > { %v5258_v60 = vmul.f32 %v5981_v21, %v5129_v30  ;;  %v5263_v59 = vmul.f32 %v5982_v42, %v5151_v35  ;;  %v2251_v34 = vsub.f32 1.0, %v5164_v26  ;;  %v2108_v39 = vadd.f32 %v5047_v32, %v2069_v8  ;;  %v1469_v35 = vpop.f32.mrb[40].mxu1  ;;  %v1955_v61 = vpop.f32.mrb[40].mxu0 }
 0x163   : > { %v2299_v47 = vadd.f32 %v5031_v20, %v2107_v18  ;;  %v5274_v30 = vmul.f32 %v3396_v17, %v3380_v14  ;;  %v2188_v31 = vmul.f32 0.2, %v5108_v12  ;;  %v3381_v7 = vmul.f32 0.2, %v3373_v63  ;;  %v1471_v14 = vpop.f32.mrb[41].mxu1  ;;  %v1957_v17 = vpop.f32.mrb[41].mxu0 }
 0x164   : > { %v5279_v56 = vmul.f32 %v2249_v22, %v2185_v36  ;;  %v5281_v54 = vmul.f32 %v2250_v16, %v2186_v27  ;;  %v2252_v26 = vsub.f32 1.0, %v5167_v43  ;;  %v2300_v20 = vadd.f32 %v5037_v5, %v2108_v39  ;;  %v1472_v1 = vpop.f32.mrb[42].mxu1  ;;  %v1958_v44 = vpop.f32.mrb[42].mxu0 }
 0x165   : > { %vm2331_vm4 = vcmp.gt.f32.partialorder %v2299_v47, 0.5  ;;  %v1470_v23 = vadd.f32 %v1469_v35, %v4928_v25  ;;  %v3397_v12 = vsub.f32 1.0, %v3389_v48  ;;  %2427 = vst [vmem:[%s5145_s18 + $0x10] sm:$0xff] %v2299_v47  ;;  %v5288_v36 = vmul.f32 %v2251_v34, %v2187_v2  ;;  %v1474_v16 = vpop.f32.mrb[43].mxu1  ;;  %v1960_v18 = vpop.f32.mrb[43].mxu0 }
 0x166   : > { %v4241_v51 = vsel %vm2331_vm4, 1.0, %v5938_v9  ;;  %v2189_v22 = vmul.f32 0.2, %v5111_v15  ;;  %v2253_v43 = vsub.f32 1.0, %v5170_v62  ;;  %vm2332_vm5 = vcmp.gt.f32.partialorder %v2300_v20, 0.5  ;;  %2428 = vst [vmem:[%s5145_s18 + $0x18] sm:$0xff] %v2300_v20 }
 0x167   : > { %5983 = vst [vmem:[#allocation41_spill] sm:$0xff] %v5288_v36  ;;  %v2489_v27 = vadd.f32 %v4241_v51, %v4239_v28  ;;  %v2070_v25 = vadd.f32 %v1955_v61, %v1470_v23  ;;  %v1473_v5 = vadd.f32 %v1472_v1, %v4932_v29  ;;  %2459 = vst [vmem:[%s5215_s21 + $0x10] sm:$0xff] %v4241_v51  ;;  %v4242_v8 = vsel %vm2332_vm5, 1.0, %v5938_v9 }
 0x168   : > { %v5296_v21 = vmul.f32 %v2252_v26, %v2188_v31  ;;  %v2190_v42 = vmul.f32 0.2, %v5114_v55  ;;  %v2254_v15 = vsub.f32 1.0, %v5173_v40  ;;  %v2490_v28 = vadd.f32 %v4242_v8, %v4240_v10  ;;  %2460 = vst [vmem:[%s5215_s21 + $0x18] sm:$0xff] %v4242_v8 }
 0x169   : > { %v2521_v2 = vcombine.high %v2489_v27, %v2489_v27  ;;  %v2528_v62 = vrot.slane %v2489_v27, %v5049_v52  ;;  %v2109_v34 = vadd.f32 %v5047_v32, %v2070_v25  ;;  %v2071_v29 = vadd.f32 %v1958_v44, %v1473_v5 }
 0x16a   : > { %5984 = vst [vmem:[#allocation42_spill] sm:$0xff] %v5296_v21  ;;  %v5303_v47 = vmul.f32 %v3397_v12, %v3381_v7  ;;  %v5305_v39 = vmul.f32 %v2253_v43, %v2189_v22  ;;  %v5307_v63 = vmul.f32 %v2254_v15, %v2190_v42  ;;  %v2538_v40 = vcombine.high %v2490_v28, %v2490_v28  ;;  %v5318_v26 = vpop.f32.mrb[44].mxu1  ;;  %v5320_v20 = vpop.f32.mrb[44].mxu0 }
 0x16b   : > { %v2535_v31 = vrot.slane %v2521_v2, %v5049_v52  ;;  %v2536_v35 = vcombine.high %v2528_v62, %v2528_v62  ;;  %v2858_v55 = vsel %vm2857_vm3, %v2528_v62, 0.0  ;;  %v2545_v48 = vrot.slane %v2490_v28, %v5049_v52  ;;  %v1479_v51 = vpop.f32.mrb[45].mxu1  ;;  %v1965_v1 = vpop.f32.mrb[45].mxu0 }
 0x16c   : > { %5985 = vst [vmem:[#allocation43_spill] sm:$0xff] %v5303_v47  ;;  %5986 = vst [vmem:[#allocation44_spill] sm:$0xff] %v5305_v39  ;;  %v2859_v61 = vrot.slane %v2858_v55, 4  ;;  %v5313_v10 = vadd.f32 %v5063_v24, %v2109_v34  ;;  %v5316_v7 = vadd.f32 %v5047_v32, %v2071_v29  ;;  %v2552_v12 = vrot.slane %v2538_v40, %v5049_v52  ;;  %v5325_v27 = vpop.f32.mrb[46].mxu1  ;;  %v5327_v25 = vpop.f32.mrb[46].mxu0 }
 0x16d   : > { %5987 = vst [vmem:[#allocation45_spill] sm:$0xff] %v5307_v63  ;;  %v2537_v23 = vcombine.high %v2535_v31, %v2535_v31  ;;  %v2865_v14 = vsel %vm2857_vm3, %v2536_v35, 0.0  ;;  %v2872_v17 = vsel %vm2857_vm3, %v2535_v31, 0.0  ;;  %v2553_v43 = vcombine.high %v2545_v48, %v2545_v48  ;;  %v1482_v42 = vpop.f32.mrb[47].mxu1  ;;  %v1968_v15 = vpop.f32.mrb[47].mxu0 }
 0x16e   : > { %v2860_v44 = vadd.f32 %v2859_v61, %v2858_v55  ;;  %v2866_v24 = vrot.slane %v2865_v14, 4  ;;  %v2873_v22 = vrot.slane %v2872_v17, 4  ;;  %2429 = vst [vmem:[%s5145_s18 + $0x20] sm:$0xff] %v5313_v10  ;;  %v2554_v16 = vcombine.high %v2552_v12, %v2552_v12 }
 0x16f   : > { %v2879_v5 = vsel %vm2857_vm3, %v2537_v23, 0.0  ;;  %v2886_v18 = vsel %vm2857_vm3, %v2545_v48, 0.0  ;;  %v2900_v8 = vsel %vm2857_vm3, %v2552_v12, 0.0  ;;  %v2893_v31 = vsel %vm2857_vm3, %v2553_v43, 0.0 }
 0x170   : > { %v2861_v2 = vrot.slane %v2860_v44, 2  ;;  %v2867_v62 = vadd.f32 %v2866_v24, %v2865_v14  ;;  %v2874_v28 = vadd.f32 %v2873_v22, %v2872_v17  ;;  %v2880_v34 = vrot.slane %v2879_v5, 4 }
 0x171   : > { %v2887_v29 = vrot.slane %v2886_v18, 4  ;;  %v2901_v35 = vrot.slane %v2900_v8, 4  ;;  %v2907_v55 = vsel %vm2857_vm3, %v2554_v16, 0.0  ;;  %v2894_v12 = vrot.slane %v2893_v31, 4 }
 0x172   : > { %v2862_v40 = vadd.f32 %v2861_v2, %v2860_v44  ;;  %v2868_v61 = vrot.slane %v2867_v62, 2  ;;  %v2875_v23 = vrot.slane %v2874_v28, 2  ;;  %v2881_v51 = vadd.f32 %v2880_v34, %v2879_v5  ;;  %v5336_v15 = vpop.f32.mrb[48].mxu1  ;;  %v5338_v43 = vpop.f32.mrb[48].mxu0 }
 0x173   : > { %v2888_v48 = vadd.f32 %v2887_v29, %v2886_v18  ;;  %v2902_v1 = vadd.f32 %v2901_v35, %v2900_v8  ;;  %v2908_v42 = vrot.slane %v2907_v55, 4  ;;  %v2895_v44 = vadd.f32 %v2894_v12, %v2893_v31  ;;  %v1487_v5 = vpop.f32.mrb[49].mxu1  ;;  %v1973_v34 = vpop.f32.mrb[49].mxu0 }
 0x174   : > { %v2863_v14 = vrot.slane %v2862_v40, 1  ;;  %v2869_v17 = vadd.f32 %v2868_v61, %v2867_v62  ;;  %v2876_v24 = vadd.f32 %v2875_v23, %v2874_v28  ;;  %v2882_v22 = vrot.slane %v2881_v51, 2  ;;  %v1488_v63 = vpop.f32.mrb[50].mxu1  ;;  %v5340_v62 = vpop.f32.mrb[50].mxu0 }
 0x175   : > { %v2889_v16 = vrot.slane %v2888_v48, 2  ;;  %v2903_v2 = vrot.slane %v2902_v1, 2  ;;  %v2909_v9 = vadd.f32 %v2908_v42, %v2907_v55  ;;  %v2896_v61 = vrot.slane %v2895_v44, 2  ;;  %v1490_v47 = vpop.f32.mrb[51].mxu1  ;;  %v1976_v21 = vpop.f32.mrb[51].mxu0 }
 0x176   : > { %v2864_v18 = vadd.f32 %v2863_v14, %v2862_v40  ;;  %v2870_v29 = vrot.slane %v2869_v17, 1  ;;  %v2877_v8 = vrot.slane %v2876_v24, 1  ;;  %v2883_v35 = vadd.f32 %v2882_v22, %v2881_v51 }
 0x177   : > { %v2890_v28 = vadd.f32 %v2889_v16, %v2888_v48  ;;  %v2904_v23 = vadd.f32 %v2903_v2, %v2902_v1  ;;  %v2910_v39 = vrot.slane %v2909_v9, 2  ;;  %v2897_v14 = vadd.f32 %v2896_v61, %v2895_v44 }
 0x178   : > { %v2871_v31 = vadd.f32 %v2870_v29, %v2869_v17  ;;  %v2878_v12 = vadd.f32 %v2877_v8, %v2876_v24  ;;  %v2884_v55 = vrot.slane %v2883_v35, 1  ;;  %v3306_v42 = vmul.f32 0.25, %v2864_v18 }
 0x179   : > { %v2891_v40 = vrot.slane %v2890_v28, 1  ;;  %v2905_v5 = vrot.slane %v2904_v23, 1  ;;  %v2911_v51 = vadd.f32 %v2910_v39, %v2909_v9  ;;  %vm2333_vm13 = vcmp.gt.f32.partialorder %v5313_v10, 0.5 }
 0x17a   : > { %v2885_v22 = vadd.f32 %v2884_v55, %v2883_v35  ;;  %v3307_v34 = vmul.f32 0.25, %v2871_v31  ;;  %v3308_v36 = vmul.f32 0.25, %v2878_v12  ;;  %v2898_v1 = vrot.slane %v2897_v14, 1  ;;  %v1493_v9 = vpop.f32.mrb[52].mxu1  ;;  %v1979_v39 = vpop.f32.mrb[52].mxu0 }
 0x17b   : > { %v2892_v48 = vadd.f32 %v2891_v40, %v2890_v28  ;;  %v2906_v16 = vadd.f32 %v2905_v5, %v2904_v23  ;;  %v2912_v47 = vrot.slane %v2911_v51, 1  ;;  %v5988_v24 = vmov 0.0   ;;  %v1495_v35 = vpop.f32.mrb[53].mxu1  ;;  %v1981_v28 = vpop.f32.mrb[53].mxu0 }
 0x17c   : > { %v3309_v21 = vmul.f32 0.25, %v2885_v22  ;;  %v3475_v17 = vsel %vm3474_vm6, %v3307_v34, %v3306_v42  ;;  %v5345_v2 = vsel %vm2333_vm13, 1.0, %v5988_v24  ;;  %v2302_v44 = vadd.f32 %v5065_v58, %v5316_v7  ;;  %v1496_v7 = vpop.f32.mrb[54].mxu1  ;;  %v1982_v31 = vpop.f32.mrb[54].mxu0  ;;  %v3374_v22 = vld [vmem:[%s5000_s25 + $0x20] sm:$0xff]  ;;  %v5413_v35 = vld [vmem:[%s5007_s29 + $0x28] sm:$0xff] }
 0x17d   : > { %v3477_v18 = vsel %vm3476_vm7, %v3308_v36, %v3475_v17  ;;  %v2899_v10 = vadd.f32 %v2898_v1, %v2897_v14  ;;  %v2913_v29 = vadd.f32 %v2912_v47, %v2911_v51  ;;  %v3310_v8 = vmul.f32 0.25, %v2892_v48  ;;  %2461 = vst [vmem:[%s5215_s21 + $0x20] sm:$0xff] %v5345_v2  ;;  %v1498_v40 = vpop.f32.mrb[55].mxu1  ;;  %v1984_v14 = vpop.f32.mrb[55].mxu0  ;;  %v5390_v47 = vld [vmem:[%s5000_s25 + $0x30] sm:$0xff] }
 0x17e   : > { %v3312_v61 = vmul.f32 0.25, %v2906_v16  ;;  %v3479_v23 = vsel %vm3478_vm8, %v3309_v21, %v3477_v18  ;;  %vm2334_vm14 = vcmp.gt.f32.partialorder %v2302_v44, 0.5  ;;  %v1478_v58 = vadd.f32 %v5318_v26, %v4936_v33  ;;  %2430 = vst [vmem:[%s5145_s18 + $0x28] sm:$0xff] %v2302_v44  ;;  %v5387_v16 = vld [vmem:[%s5000_s25 + $0x28] sm:$0xff]  ;;  %v5416_v28 = vld [vmem:[%s5007_s29 + $0x30] sm:$0xff] }
 0x17f   : > { %v3311_v36 = vmul.f32 0.25, %v2899_v10  ;;  %v3313_v12 = vmul.f32 0.25, %v2913_v29  ;;  %v3481_v55 = vsel %vm3480_vm9, %v3310_v8, %v3479_v23  ;;  %v5358_v42 = vsel %vm2334_vm14, 1.0, %v5988_v24 }
 0x180   : > { %v2072_v5 = vadd.f32 %v5320_v20, %v1478_v58  ;;  %v1481_v51 = vadd.f32 %v5325_v27, %v4940_v37  ;;  %v1486_v33 = vadd.f32 %v5336_v15, %v4944_v41  ;;  %v1489_v26 = vadd.f32 %v1488_v63, %v4948_v45  ;;  %2462 = vst [vmem:[%s5215_s21 + $0x28] sm:$0xff] %v5358_v42 }
 0x181   : > { %v3483_v34 = vsel %vm3482_vm10, %v3311_v36, %v3481_v55  ;;  %v1494_v48 = vadd.f32 %v1493_v9, %v4952_v49  ;;  %v1497_v20 = vadd.f32 %v1496_v7, %v4956_v53  ;;  %v5372_v1 = vmul.f32 0.2, %v3374_v22  ;;  %v5991_v22 = vld [vmem:[#allocation15_spill] sm:$0xff] }
 0x182   : > { %v3485_v37 = vsel %vm3484_vm11, %v3312_v61, %v3483_v34  ;;  %v2111_v41 = vadd.f32 %v5047_v32, %v2072_v5  ;;  %v2073_v45 = vadd.f32 %v5327_v25, %v1481_v51  ;;  %v2074_v63 = vadd.f32 %v5338_v43, %v1486_v33  ;;  %v5393_v25 = vld [vmem:[%s5000_s25 + $0x38] sm:$0xff]  ;;  %v1987_v9 = vpop.f32.mrb[56].mxu0 }
 0x183   : > { %v3487_v49 = vsel %vm3486_vm12, %v3313_v12, %v3485_v37  ;;  %v2075_v53 = vadd.f32 %v5340_v62, %v1489_v26  ;;  %v2076_v27 = vadd.f32 %v1979_v39, %v1494_v48  ;;  %v2077_v15 = vadd.f32 %v1982_v31, %v1497_v20  ;;  %5989 = vst [vmem:[#allocation46_spill] sm:$0xff] %v5393_v25  ;;  %v1501_v62 = vpop.f32.mrb[56].mxu1  ;;  %v5400_v39 = vld [vmem:[%s5007_s29 + $0x20] sm:$0xff]  ;;  %v1989_v8 = vpop.f32.mrb[57].mxu0  ;;  %v5419_v61 = vld [vmem:[%s5007_s29 + $0x38] sm:$0xff] }
 0x184   : > { %v3545_v43 = vadd.f32 %v3487_v49, %v5086_v13  ;;  %v2303_v21 = vadd.f32 %v5088_v0, %v2111_v41  ;;  %v2112_v17 = vadd.f32 %v5047_v32, %v2073_v45  ;;  %v2113_v44 = vadd.f32 %v5047_v32, %v2074_v63  ;;  %v1503_v29 = vpop.f32.mrb[57].mxu1  ;;  %5990 = vst [vmem:[#allocation47_spill] sm:$0xff] %v5419_v61  ;;  %v5423_v31 = vpop.f32.mrb[58].mxu0 }
 0x185   : > { %v2114_v18 = vadd.f32 %v5047_v32, %v2075_v53  ;;  %v2115_v13 = vadd.f32 %v5047_v32, %v2076_v27  ;;  %v2116_v0 = vadd.f32 %v5047_v32, %v2077_v15  ;;  %v1502_v10 = vadd.f32 %v1501_v62, %v4963_v57  ;;  %v1504_v7 = vpop.f32.mrb[58].mxu1 }
 0x186   : > { %vm3553_vm15 = vcmp.gt.f32.partialorder %v3545_v43, 0.5  ;;  %vm2335_vm0 = vcmp.gt.f32.partialorder %v2303_v21, 0.5  ;;  %v2304_v23 = vadd.f32 %v5147_v19, %v2112_v17  ;;  %v2305_v58 = vadd.f32 %v5149_v11, %v2113_v44  ;;  %2431 = vst [vmem:[%s5145_s18 + $0x30] sm:$0xff] %v2303_v21  ;;  %3577 = vst [vmem:[%s5382_s13] sm:$0xff] %v3545_v43  ;;  %v1506_v55 = vpop.f32.mrb[59].mxu1  ;;  %v1992_v11 = vpop.f32.mrb[59].mxu0 }
 0x187   : > { %v4271_v57 = vsel %vm3553_vm15, 1.0, %v5988_v24  ;;  %v4245_v36 = vsel %vm2335_vm0, 1.0, %v5988_v24  ;;  %v2306_v12 = vadd.f32 %v5220_v38, %v2114_v18  ;;  %v2307_v19 = vadd.f32 %v5223_v3, %v2115_v13 }
 0x188   : > { %v2491_v40 = vadd.f32 %v4245_v36, %v5345_v2  ;;  %vm2336_vm1 = vcmp.gt.f32.partialorder %v2304_v23, 0.5  ;;  %vm2337_vm2 = vcmp.gt.f32.partialorder %v2305_v58, 0.5  ;;  %v2308_v14 = vadd.f32 %v5226_v6, %v2116_v0  ;;  %2432 = vst [vmem:[%s5145_s18 + $0x38] sm:$0xff] %v2304_v23  ;;  %2433 = vst [vmem:[%s5145_s18 + $0x40] sm:$0xff] %v2305_v58 }
 0x189   : > { %2463 = vst [vmem:[%s5215_s21 + $0x30] sm:$0xff] %v4245_v36  ;;  %3585 = vst [vmem:[%s5406_s27] sm:$0xff] %v4271_v57  ;;  %v4246_v38 = vsel %vm2336_vm1, 1.0, %v5988_v24  ;;  %v4247_v3 = vsel %vm2337_vm2, 1.0, %v5988_v24  ;;  %vm2338_vm4 = vcmp.gt.f32.partialorder %v2306_v12, 0.5  ;;  %vm2339_vm5 = vcmp.gt.f32.partialorder %v2307_v19, 0.5 }
 0x18a   : > { %2434 = vst [vmem:[%s5145_s18 + $0x48] sm:$0xff] %v2306_v12  ;;  %2435 = vst [vmem:[%s5145_s18 + $0x50] sm:$0xff] %v2307_v19  ;;  %v2555_v2 = vcombine.high %v2491_v40, %v2491_v40  ;;  %v2562_v5 = vrot.slane %v2491_v40, %v5049_v52  ;;  %v2492_v6 = vadd.f32 %v4246_v38, %v5358_v42  ;;  %v5444_v51 = vsel %vm2338_vm4, 1.0, %v5988_v24  ;;  %v5459_v41 = vpop.f32.mrb[60].mxu1  ;;  %v5461_v45 = vpop.f32.mrb[60].mxu0 }
 0x18b   : > { %2436 = vst [vmem:[%s5145_s18 + $0x58] sm:$0xff] %v2308_v14  ;;  %2464 = vst [vmem:[%s5215_s21 + $0x38] sm:$0xff] %v4246_v38  ;;  %v4249_v33 = vsel %vm2339_vm5, 1.0, %v5988_v24  ;;  %vm2340_vm13 = vcmp.gt.f32.partialorder %v2308_v14, 0.5  ;;  %v5450_v26 = vadd.f32 %v1987_v9, %v1502_v10  ;;  %v5453_v34 = vadd.f32 %v1504_v7, %v5991_v22  ;;  %v1511_v15 = vpop.f32.mrb[61].mxu1  ;;  %v1997_v43 = vpop.f32.mrb[61].mxu0 }
 0x18c   : > { %2465 = vst [vmem:[%s5215_s21 + $0x40] sm:$0xff] %v4247_v3  ;;  %2466 = vst [vmem:[%s5215_s21 + $0x48] sm:$0xff] %v5444_v51  ;;  %v2569_v48 = vrot.slane %v2555_v2, %v5049_v52  ;;  %v2570_v42 = vcombine.high %v2562_v5, %v2562_v5  ;;  %v2914_v20 = vsel %vm2857_vm3, %v2562_v5, 0.0  ;;  %v2572_v37 = vcombine.high %v2492_v6, %v2492_v6  ;;  %v5473_v9 = vpop.f32.mrb[62].mxu1  ;;  %v5475_v18 = vpop.f32.mrb[62].mxu0 }
 0x18d   : > { %2467 = vst [vmem:[%s5215_s21 + $0x50] sm:$0xff] %v4249_v33  ;;  %v2915_v63 = vrot.slane %v2914_v20, 4  ;;  %v2579_v49 = vrot.slane %v2492_v6, %v5049_v52  ;;  %v5465_v53 = vadd.f32 %v4249_v33, %v4247_v3  ;;  %v5468_v27 = vsel %vm2340_vm13, 1.0, %v5988_v24  ;;  %v1514_v8 = vpop.f32.mrb[63].mxu1  ;;  %v2000_v23 = vpop.f32.mrb[63].mxu0 }
 0x18e   : > { %v2571_v21 = vcombine.high %v2569_v48, %v2569_v48  ;;  %v2921_v17 = vsel %vm2857_vm3, %v2570_v42, 0.0  ;;  %v2928_v44 = vsel %vm2857_vm3, %v2569_v48, 0.0  ;;  %v2586_v62 = vrot.slane %v2572_v37, %v5049_v52  ;;  %2468 = vst [vmem:[%s5215_s21 + $0x58] sm:$0xff] %v5468_v27 }
 0x18f   : > { %v2916_v13 = vadd.f32 %v2915_v63, %v2914_v20  ;;  %v2922_v0 = vrot.slane %v2921_v17, 4  ;;  %v2929_v10 = vrot.slane %v2928_v44, 4  ;;  %v2587_v29 = vcombine.high %v2579_v49, %v2579_v49 }
 0x190   : > { %v2935_v58 = vsel %vm2857_vm3, %v2571_v21, 0.0  ;;  %v2588_v7 = vcombine.high %v2586_v62, %v2586_v62  ;;  %v2942_v57 = vsel %vm2857_vm3, %v2579_v49, 0.0  ;;  %v2956_v36 = vsel %vm2857_vm3, %v2586_v62, 0.0 }
 0x191   : > { %v2917_v12 = vrot.slane %v2916_v13, 2  ;;  %v2923_v19 = vadd.f32 %v2922_v0, %v2921_v17  ;;  %v2930_v55 = vadd.f32 %v2929_v10, %v2928_v44  ;;  %v2936_v11 = vrot.slane %v2935_v58, 4 }
 0x192   : > { %v2943_v40 = vrot.slane %v2942_v57, 4  ;;  %v2949_v14 = vsel %vm2857_vm3, %v2587_v29, 0.0  ;;  %v2957_v38 = vrot.slane %v2956_v36, 4  ;;  %v2963_v3 = vsel %vm2857_vm3, %v2588_v7, 0.0  ;;  %v5484_v37 = vpop.f32.mrb[64].mxu1  ;;  %v5486_v63 = vpop.f32.mrb[64].mxu0 }
 0x193   : > { %v2918_v2 = vadd.f32 %v2917_v12, %v2916_v13  ;;  %v2924_v5 = vrot.slane %v2923_v19, 2  ;;  %v2931_v6 = vrot.slane %v2930_v55, 2  ;;  %v2937_v33 = vadd.f32 %v2936_v11, %v2935_v58  ;;  %v1519_v17 = vpop.f32.mrb[65].mxu1  ;;  %v2005_v44 = vpop.f32.mrb[65].mxu0 }
 0x194   : > { %v2944_v22 = vadd.f32 %v2943_v40, %v2942_v57  ;;  %v2950_v48 = vrot.slane %v2949_v14, 4  ;;  %v2958_v42 = vadd.f32 %v2957_v38, %v2956_v36  ;;  %v2964_v20 = vrot.slane %v2963_v3, 4  ;;  %v5488_v29 = vpop.f32.mrb[66].mxu1  ;;  %v5490_v8 = vpop.f32.mrb[66].mxu0 }
 0x195   : > { %v2919_v49 = vrot.slane %v2918_v2, 1  ;;  %v2925_v15 = vadd.f32 %v2924_v5, %v2923_v19  ;;  %v2932_v43 = vadd.f32 %v2931_v6, %v2930_v55  ;;  %v2938_v21 = vrot.slane %v2937_v33, 2  ;;  %v1522_v36 = vpop.f32.mrb[67].mxu1  ;;  %v2008_v12 = vpop.f32.mrb[67].mxu0 }
 0x196   : > { %v2945_v62 = vrot.slane %v2944_v22, 2  ;;  %v2951_v0 = vadd.f32 %v2950_v48, %v2949_v14  ;;  %v2959_v13 = vrot.slane %v2958_v42, 2  ;;  %v2965_v10 = vadd.f32 %v2964_v20, %v2963_v3 }
 0x197   : > { %v2920_v23 = vadd.f32 %v2919_v49, %v2918_v2  ;;  %v2926_v58 = vrot.slane %v2925_v15, 1  ;;  %v2933_v7 = vrot.slane %v2932_v43, 1  ;;  %v2939_v57 = vadd.f32 %v2938_v21, %v2937_v33 }
 0x198   : > { %v2946_v11 = vadd.f32 %v2945_v62, %v2944_v22  ;;  %v2952_v19 = vrot.slane %v2951_v0, 2  ;;  %v2960_v55 = vadd.f32 %v2959_v13, %v2958_v42  ;;  %v2966_v40 = vrot.slane %v2965_v10, 2 }
 0x199   : > { %v2927_v38 = vadd.f32 %v2926_v58, %v2925_v15  ;;  %v2934_v5 = vadd.f32 %v2933_v7, %v2932_v43  ;;  %v2940_v6 = vrot.slane %v2939_v57, 1  ;;  %v3314_v14 = vmul.f32 0.25, %v2920_v23 }
 0x19a   : > { %v2947_v48 = vrot.slane %v2946_v11, 1  ;;  %v2953_v3 = vadd.f32 %v2952_v19, %v2951_v0  ;;  %v2961_v20 = vrot.slane %v2960_v55, 1  ;;  %v2967_v17 = vadd.f32 %v2966_v40, %v2965_v10  ;;  %v5494_v42 = vpop.f32.mrb[68].mxu1  ;;  %v5496_v15 = vpop.f32.mrb[68].mxu0 }
 0x19b   : > { %v2941_v44 = vadd.f32 %v2940_v6, %v2939_v57  ;;  %v3315_v61 = vmul.f32 0.25, %v2927_v38  ;;  %v3316_v2 = vmul.f32 0.25, %v2934_v5  ;;  %v2589_v33 = vcombine.high %v5465_v53, %v5465_v53  ;;  %v1527_v23 = vpop.f32.mrb[69].mxu1  ;;  %v2013_v58 = vpop.f32.mrb[69].mxu0 }
 0x19c   : > { %v2948_v49 = vadd.f32 %v2947_v48, %v2946_v11  ;;  %v2954_v21 = vrot.slane %v2953_v3, 1  ;;  %v2962_v22 = vadd.f32 %v2961_v20, %v2960_v55  ;;  %v2968_v62 = vrot.slane %v2967_v17, 1  ;;  %v5503_v11 = vpop.f32.mrb[70].mxu1  ;;  %v5505_v19 = vpop.f32.mrb[70].mxu0 }
 0x19d   : > { %v3317_v43 = vmul.f32 0.25, %v2941_v44  ;;  %v3488_v13 = vsel %vm3474_vm6, %v3315_v61, %v3314_v14  ;;  %v2596_v0 = vrot.slane %v5465_v53, %v5049_v52  ;;  %v2603_v10 = vrot.slane %v2589_v33, %v5049_v52  ;;  %v1530_v5 = vpop.f32.mrb[71].mxu1  ;;  %v2016_v53 = vpop.f32.mrb[71].mxu0 }
 0x19e   : > { %v3489_v7 = vsel %vm3476_vm7, %v3316_v2, %v3488_v13  ;;  %v2955_v57 = vadd.f32 %v2954_v21, %v2953_v3  ;;  %v2969_v36 = vadd.f32 %v2968_v62, %v2967_v17  ;;  %v3318_v12 = vmul.f32 0.25, %v2948_v49 }
 0x19f   : > { %v3320_v55 = vmul.f32 0.25, %v2962_v22  ;;  %v3490_v40 = vsel %vm3478_vm8, %v3317_v43, %v3489_v7  ;;  %v2604_v61 = vcombine.high %v2596_v0, %v2596_v0  ;;  %v2605_v38 = vcombine.high %v2603_v10, %v2603_v10 }
 0x1a0   : > { %v3319_v6 = vmul.f32 0.25, %v2955_v57  ;;  %v3321_v14 = vmul.f32 0.25, %v2969_v36  ;;  %v3491_v48 = vsel %vm3480_vm9, %v3318_v12, %v3490_v40  ;;  %v2970_v20 = vsel %vm2857_vm3, %v2596_v0, 0.0 }
 0x1a1   : > { %v2971_v3 = vrot.slane %v2970_v20, 4  ;;  %v2977_v17 = vsel %vm2857_vm3, %v2604_v61, 0.0  ;;  %v2984_v44 = vsel %vm2857_vm3, %v2603_v10, 0.0  ;;  %v2991_v2 = vsel %vm2857_vm3, %v2605_v38, 0.0 }
 0x1a2   : > { %v3492_v33 = vsel %vm3482_vm10, %v3319_v6, %v3491_v48  ;;  %v2978_v49 = vrot.slane %v2977_v17, 4  ;;  %v2985_v21 = vrot.slane %v2984_v44, 4  ;;  %v2992_v22 = vrot.slane %v2991_v2, 4  ;;  %v5520_v57 = vpop.f32.mrb[72].mxu1  ;;  %v5522_v36 = vpop.f32.mrb[72].mxu0 }
 0x1a3   : > { %v3493_v62 = vsel %vm3484_vm11, %v3320_v55, %v3492_v33  ;;  %v2972_v43 = vadd.f32 %v2971_v3, %v2970_v20  ;;  %v2494_v13 = vadd.f32 %v5468_v27, %v5444_v51  ;;  %v2117_v0 = vadd.f32 %v5047_v32, %v5450_v26  ;;  %v1535_v51 = vpop.f32.mrb[73].mxu1  ;;  %v2021_v27 = vpop.f32.mrb[73].mxu0 }
 0x1a4   : > { %v3494_v23 = vsel %vm3486_vm12, %v3321_v14, %v3493_v62  ;;  %v2979_v58 = vadd.f32 %v2978_v49, %v2977_v17  ;;  %v2986_v10 = vadd.f32 %v2985_v21, %v2984_v44  ;;  %v2993_v7 = vadd.f32 %v2992_v22, %v2991_v2  ;;  %v5527_v53 = vpop.f32.mrb[74].mxu1  ;;  %v5529_v6 = vpop.f32.mrb[74].mxu0 }
 0x1a5   : > { %v3546_v12 = vadd.f32 %v3494_v23, %v5244_v4  ;;  %v2973_v40 = vrot.slane %v2972_v43, 2  ;;  %v2606_v55 = vcombine.high %v2494_v13, %v2494_v13  ;;  %v2613_v61 = vrot.slane %v2494_v13, %v5049_v52  ;;  %v1538_v20 = vpop.f32.mrb[75].mxu1  ;;  %v2024_v3 = vpop.f32.mrb[75].mxu0 }
 0x1a6   : > { %v2980_v38 = vrot.slane %v2979_v58, 2  ;;  %v2987_v32 = vrot.slane %v2986_v10, 2  ;;  %v2994_v26 = vrot.slane %v2993_v7, 2  ;;  %v2309_v5 = vadd.f32 %v5258_v60, %v2117_v0 }
 0x1a7   : > { %vm3554_vm14 = vcmp.gt.f32.partialorder %v3546_v12, 0.5  ;;  %v2974_v4 = vadd.f32 %v2973_v40, %v2972_v43  ;;  %v2620_v14 = vrot.slane %v2606_v55, %v5049_v52  ;;  %v2621_v48 = vcombine.high %v2613_v61, %v2613_v61  ;;  %3578 = vst [vmem:[%s5382_s13 + $0x8] sm:$0xff] %v3546_v12 }
 0x1a8   : > { %v4272_v17 = vsel %vm3554_vm14, 1.0, %v5988_v24  ;;  %v2981_v44 = vadd.f32 %v2980_v38, %v2979_v58  ;;  %v2988_v2 = vadd.f32 %v2987_v32, %v2986_v10  ;;  %v2995_v33 = vadd.f32 %v2994_v26, %v2993_v7  ;;  %2437 = vst [vmem:[%s5145_s18 + $0x60] sm:$0xff] %v2309_v5 }
 0x1a9   : > { %v2975_v60 = vrot.slane %v2974_v4, 1  ;;  %v2622_v49 = vcombine.high %v2620_v14, %v2620_v14  ;;  %v2998_v21 = vsel %vm2857_vm3, %v2613_v61, 0.0  ;;  %v3005_v22 = vsel %vm2857_vm3, %v2621_v48, 0.0  ;;  %3586 = vst [vmem:[%s5406_s27 + $0x8] sm:$0xff] %v4272_v17 }
 0x1aa   : > { %v2982_v62 = vrot.slane %v2981_v44, 1  ;;  %v2989_v43 = vrot.slane %v2988_v2, 1  ;;  %v2996_v13 = vrot.slane %v2995_v33, 1  ;;  %v2999_v0 = vrot.slane %v2998_v21, 4  ;;  %v5540_v27 = vpop.f32.mrb[76].mxu1  ;;  %v5542_v61 = vpop.f32.mrb[76].mxu0 }
 0x1ab   : > { %v2976_v23 = vadd.f32 %v2975_v60, %v2974_v4  ;;  %v3006_v40 = vrot.slane %v3005_v22, 4  ;;  %v3012_v12 = vsel %vm2857_vm3, %v2620_v14, 0.0  ;;  %v3019_v58 = vsel %vm2857_vm3, %v2622_v49, 0.0  ;;  %v1543_v20 = vpop.f32.mrb[77].mxu1  ;;  %v2029_v3 = vpop.f32.mrb[77].mxu0 }
 0x1ac   : > { %v2983_v10 = vadd.f32 %v2982_v62, %v2981_v44  ;;  %v2990_v7 = vadd.f32 %v2989_v43, %v2988_v2  ;;  %v2997_v55 = vadd.f32 %v2996_v13, %v2995_v33  ;;  %v3000_v51 = vadd.f32 %v2999_v0, %v2998_v21  ;;  %v5544_v25 = vpop.f32.mrb[78].mxu1  ;;  %v5546_v44 = vpop.f32.mrb[78].mxu0 }
 0x1ad   : > { %v3322_v38 = vmul.f32 0.25, %v2976_v23  ;;  %v3007_v32 = vadd.f32 %v3006_v40, %v3005_v22  ;;  %v3013_v26 = vrot.slane %v3012_v12, 4  ;;  %v3020_v48 = vrot.slane %v3019_v58, 4  ;;  %v1546_v21 = vpop.f32.mrb[79].mxu1  ;;  %v2032_v62 = vpop.f32.mrb[79].mxu0 }
 0x1ae   : > { %v3323_v4 = vmul.f32 0.25, %v2983_v10  ;;  %v3324_v17 = vmul.f32 0.25, %v2990_v7  ;;  %v3325_v60 = vmul.f32 0.25, %v2997_v55  ;;  %v3001_v14 = vrot.slane %v3000_v51, 2 }
 0x1af   : > { %v3008_v2 = vrot.slane %v3007_v32, 2  ;;  %v3014_v33 = vadd.f32 %v3013_v26, %v3012_v12  ;;  %v3021_v49 = vadd.f32 %v3020_v48, %v3019_v58  ;;  %vm2341_vm15 = vcmp.gt.f32.partialorder %v2309_v5, 0.5  ;;  %v5558_v5 = vld [vmem:[%s5929_s2] ss:$0 sm:$0xff] }
 0x1b0   : > { %v3495_v22 = vsel %vm3474_vm6, %v3323_v4, %v3322_v38  ;;  %v3002_v43 = vadd.f32 %v3001_v14, %v3000_v51  ;;  %v4251_v13 = vsel %vm2341_vm15, 1.0, %v5988_v24  ;;  %v2079_v0 = vadd.f32 %v5423_v31, %v5453_v34  ;;  %v5992_v51 = vld [vmem:[#allocation17_spill] sm:$0xff] }
 0x1b1   : > { %v3496_v23 = vsel %vm3476_vm7, %v3324_v17, %v3495_v22  ;;  %v3009_v40 = vadd.f32 %v3008_v2, %v3007_v32  ;;  %v3015_v10 = vrot.slane %v3014_v33, 2  ;;  %v3022_v7 = vrot.slane %v3021_v49, 2  ;;  %2469 = vst [vmem:[%s5215_s21 + $0x60] sm:$0xff] %v4251_v13  ;;  %v5993_v32 = vld [vmem:[#allocation19_spill] sm:$0xff]  ;;  %v5994_v17 = vld [vmem:[#allocation2_spill] sm:$0xff] }
 0x1b2   : > { %v3003_v55 = vrot.slane %v3002_v43, 1  ;;  %v3497_v12 = vsel %vm3478_vm8, %v3325_v60, %v3496_v23  ;;  %v2118_v58 = vadd.f32 %v5558_v5, %v2079_v0  ;;  %v1510_v38 = vadd.f32 %v5459_v41, %v5992_v51  ;;  %v5569_v14 = vpop.f32.mrb[80].mxu1  ;;  %v5571_v2 = vpop.f32.mrb[80].mxu0 }
 0x1b3   : > { %v3010_v31 = vrot.slane %v3009_v40, 1  ;;  %v3016_v34 = vadd.f32 %v3015_v10, %v3014_v33  ;;  %v3023_v26 = vadd.f32 %v3022_v7, %v3021_v49  ;;  %v1513_v48 = vadd.f32 %v5473_v9, %v5993_v32  ;;  %v1551_v62 = vpop.f32.mrb[81].mxu1  ;;  %v2037_v9 = vpop.f32.mrb[81].mxu0 }
 0x1b4   : > { %v3004_v20 = vadd.f32 %v3003_v55, %v3002_v43  ;;  %v2310_v3 = vadd.f32 %v5263_v59, %v2118_v58  ;;  %v2080_v4 = vadd.f32 %v5461_v45, %v1510_v38  ;;  %v1518_v60 = vadd.f32 %v5484_v37, %v5994_v17  ;;  %v5576_v43 = vpop.f32.mrb[82].mxu1  ;;  %v5578_v37 = vpop.f32.mrb[82].mxu0 }
 0x1b5   : > { %v3011_v41 = vadd.f32 %v3010_v31, %v3009_v40  ;;  %v3017_v21 = vrot.slane %v3016_v34, 1  ;;  %v3024_v33 = vrot.slane %v3023_v26, 1  ;;  %v2081_v49 = vadd.f32 %v5475_v18, %v1513_v48  ;;  %v1554_v18 = vpop.f32.mrb[83].mxu1  ;;  %v2040_v7 = vpop.f32.mrb[83].mxu0 }
 0x1b6   : > { %v3326_v22 = vmul.f32 0.25, %v3004_v20  ;;  %vm2342_vm0 = vcmp.gt.f32.partialorder %v2310_v3, 0.5  ;;  %v2119_v59 = vadd.f32 %v5558_v5, %v2080_v4  ;;  %v2082_v45 = vadd.f32 %v5486_v63, %v1518_v60  ;;  %2438 = vst [vmem:[%s5145_s18 + $0x68] sm:$0xff] %v2310_v3  ;;  %v5997_v60 = vld [vmem:[#allocation5_spill] sm:$0xff] }
 0x1b7   : > { %v3018_v0 = vadd.f32 %v3017_v21, %v3016_v34  ;;  %v3025_v23 = vadd.f32 %v3024_v33, %v3023_v26  ;;  %v3327_v40 = vmul.f32 0.25, %v3011_v41  ;;  %v4252_v10 = vsel %vm2342_vm0, 1.0, %v5988_v24  ;;  %v5995_v26 = vld [vmem:[#allocation3_spill] sm:$0xff] }
 0x1b8   : > { %v3498_v55 = vsel %vm3480_vm9, %v3326_v22, %v3497_v12  ;;  %v2311_v58 = vadd.f32 %v5266_v46, %v2119_v59  ;;  %v2120_v51 = vadd.f32 %v5558_v5, %v2081_v49  ;;  %v2121_v63 = vadd.f32 %v5558_v5, %v2082_v45  ;;  %2470 = vst [vmem:[%s5215_s21 + $0x68] sm:$0xff] %v4252_v10  ;;  %v5996_v12 = vld [vmem:[#allocation4_spill] sm:$0xff] }
 0x1b9   : > { %v3328_v38 = vmul.f32 0.25, %v3018_v0  ;;  %v3329_v31 = vmul.f32 0.25, %v3025_v23  ;;  %v3499_v34 = vsel %vm3482_vm10, %v3327_v40, %v3498_v55  ;;  %v1521_v32 = vadd.f32 %v5488_v29, %v5995_v26 }
 0x1ba   : > { %vm2343_vm1 = vcmp.gt.f32.partialorder %v2311_v58, 0.5  ;;  %v2312_v48 = vadd.f32 %v5268_v50, %v2120_v51  ;;  %v2313_v46 = vadd.f32 %v5279_v56, %v2121_v63  ;;  %v1526_v20 = vadd.f32 %v5494_v42, %v5996_v12  ;;  %2439 = vst [vmem:[%s5145_s18 + $0x70] sm:$0xff] %v2311_v58  ;;  %v5601_v50 = vpop.f32.mrb[84].mxu1  ;;  %v5603_v56 = vpop.f32.mrb[84].mxu0 }
 0x1bb   : > { %v3500_v3 = vsel %vm3484_vm11, %v3328_v38, %v3499_v34  ;;  %v4253_v4 = vsel %vm2343_vm1, 1.0, %v5988_v24  ;;  %v2083_v17 = vadd.f32 %v5490_v8, %v1521_v32  ;;  %v1529_v29 = vadd.f32 %v5503_v11, %v5997_v60  ;;  %v1559_v33 = vpop.f32.mrb[85].mxu1  ;;  %v2045_v49 = vpop.f32.mrb[85].mxu0 }
 0x1bc   : > { %v3501_v41 = vsel %vm3486_vm12, %v3329_v31, %v3500_v3  ;;  %v2495_v21 = vadd.f32 %v4253_v4, %v4251_v13  ;;  %vm2344_vm2 = vcmp.gt.f32.partialorder %v2312_v48, 0.5  ;;  %vm2345_vm4 = vcmp.gt.f32.partialorder %v2313_v46, 0.5  ;;  %2440 = vst [vmem:[%s5145_s18 + $0x78] sm:$0xff] %v2312_v48  ;;  %2441 = vst [vmem:[%s5145_s18 + $0x80] sm:$0xff] %v2313_v46  ;;  %v5616_v45 = vpop.f32.mrb[86].mxu1  ;;  %v5618_v0 = vpop.f32.mrb[86].mxu0 }
 0x1bd   : > { %2471 = vst [vmem:[%s5215_s21 + $0x70] sm:$0xff] %v4253_v4  ;;  %v3547_v42 = vadd.f32 %v3501_v41, %v5274_v30  ;;  %v4254_v8 = vsel %vm2344_vm2, 1.0, %v5988_v24  ;;  %v5611_v11 = vsel %vm2345_vm4, 1.0, %v5988_v24  ;;  %v2122_v13 = vadd.f32 %v5558_v5, %v2083_v17  ;;  %v2048_v18 = vpop.f32.mrb[87].mxu0 }
 0x1be   : > { %v2623_v62 = vcombine.high %v2495_v21, %v2495_v21  ;;  %v2630_v9 = vrot.slane %v2495_v21, %v5049_v52  ;;  %v2496_v22 = vadd.f32 %v4254_v8, %v4252_v10  ;;  %v2084_v59 = vadd.f32 %v5496_v15, %v1526_v20  ;;  %2472 = vst [vmem:[%s5215_s21 + $0x78] sm:$0xff] %v4254_v8  ;;  %v1562_v10 = vpop.f32.mrb[87].mxu1 }
 0x1bf   : > { %2473 = vst [vmem:[%s5215_s21 + $0x80] sm:$0xff] %v5611_v11  ;;  %vm3555_vm5 = vcmp.gt.f32.partialorder %v3547_v42, 0.5  ;;  %v2314_v30 = vadd.f32 %v5281_v54, %v2122_v13  ;;  %v5625_v23 = vadd.f32 %v5505_v19, %v1529_v29  ;;  %3579 = vst [vmem:[%s5382_s13 + $0x10] sm:$0xff] %v3547_v42 }
 0x1c0   : > { %v4273_v15 = vsel %vm3555_vm5, 1.0, %v5988_v24  ;;  %v2637_v7 = vrot.slane %v2623_v62, %v5049_v52  ;;  %v2638_v55 = vcombine.high %v2630_v9, %v2630_v9  ;;  %v3026_v58 = vsel %vm2857_vm3, %v2630_v9, 0.0 }
 0x1c1   : > { %v3027_v51 = vrot.slane %v3026_v58, 4  ;;  %v2640_v63 = vcombine.high %v2496_v22, %v2496_v22  ;;  %v2647_v54 = vrot.slane %v2496_v22, %v5049_v52  ;;  %vm2346_vm13 = vcmp.gt.f32.partialorder %v2314_v30, 0.5  ;;  %2442 = vst [vmem:[%s5145_s18 + $0x88] sm:$0xff] %v2314_v30  ;;  %3587 = vst [vmem:[%s5406_s27 + $0x10] sm:$0xff] %v4273_v15 }
 0x1c2   : > { %v2639_v19 = vcombine.high %v2637_v7, %v2637_v7  ;;  %v3033_v38 = vsel %vm2857_vm3, %v2638_v55, 0.0  ;;  %v3040_v31 = vsel %vm2857_vm3, %v2637_v7, 0.0  ;;  %v5638_v34 = vsel %vm2346_vm13, 1.0, %v5988_v24  ;;  %v5646_v17 = vpop.f32.mrb[88].mxu1  ;;  %v5648_v60 = vpop.f32.mrb[88].mxu0 }
 0x1c3   : > { %v3028_v26 = vadd.f32 %v3027_v51, %v3026_v58  ;;  %v3034_v32 = vrot.slane %v3033_v38, 4  ;;  %v3041_v48 = vrot.slane %v3040_v31, 4  ;;  %v2654_v46 = vrot.slane %v2640_v63, %v5049_v52  ;;  %2474 = vst [vmem:[%s5215_s21 + $0x88] sm:$0xff] %v5638_v34  ;;  %v1567_v8 = vpop.f32.mrb[89].mxu1  ;;  %v2053_v13 = vpop.f32.mrb[89].mxu0 }
 0x1c4   : > { %v3047_v12 = vsel %vm2857_vm3, %v2639_v19, 0.0  ;;  %v2655_v20 = vcombine.high %v2647_v54, %v2647_v54  ;;  %v3054_v3 = vsel %vm2857_vm3, %v2647_v54, 0.0  ;;  %v2123_v4 = vadd.f32 %v5558_v5, %v2084_v59  ;;  %v5652_v22 = vpop.f32.mrb[90].mxu1  ;;  %v5654_v30 = vpop.f32.mrb[90].mxu0 }
 0x1c5   : > { %v3029_v29 = vrot.slane %v3028_v26, 2  ;;  %v3035_v41 = vadd.f32 %v3034_v32, %v3033_v38  ;;  %v3042_v21 = vadd.f32 %v3041_v48, %v3040_v31  ;;  %v3048_v42 = vrot.slane %v3047_v12, 4  ;;  %v1570_v7 = vpop.f32.mrb[91].mxu1  ;;  %v2056_v55 = vpop.f32.mrb[91].mxu0 }
 0x1c6   : > { %v2656_v33 = vcombine.high %v2654_v46, %v2654_v46  ;;  %v3055_v49 = vrot.slane %v3054_v3, 4  ;;  %v3061_v62 = vsel %vm2857_vm3, %v2655_v20, 0.0  ;;  %v3068_v9 = vsel %vm2857_vm3, %v2654_v46, 0.0 }
 0x1c7   : > { %v3030_v59 = vadd.f32 %v3029_v29, %v3028_v26  ;;  %v3036_v10 = vrot.slane %v3035_v41, 2  ;;  %v3043_v18 = vrot.slane %v3042_v21, 2  ;;  %v3049_v15 = vadd.f32 %v3048_v42, %v3047_v12 }
 0x1c8   : > { %v3056_v58 = vadd.f32 %v3055_v49, %v3054_v3  ;;  %v3062_v51 = vrot.slane %v3061_v62, 4  ;;  %v3069_v63 = vrot.slane %v3068_v9, 4  ;;  %v3075_v54 = vsel %vm2857_vm3, %v2656_v33, 0.0 }
 0x1c9   : > { %v3031_v19 = vrot.slane %v3030_v59, 1  ;;  %v3037_v38 = vadd.f32 %v3036_v10, %v3035_v41  ;;  %v3044_v31 = vadd.f32 %v3043_v18, %v3042_v21  ;;  %v3050_v32 = vrot.slane %v3049_v15, 2 }
 0x1ca   : > { %v3057_v48 = vrot.slane %v3056_v58, 2  ;;  %v3063_v46 = vadd.f32 %v3062_v51, %v3061_v62  ;;  %v3070_v20 = vadd.f32 %v3069_v63, %v3068_v9  ;;  %v3076_v8 = vrot.slane %v3075_v54, 4  ;;  %v5657_v49 = vpop.f32.mrb[92].mxu1  ;;  %v5659_v55 = vpop.f32.mrb[92].mxu0 }
 0x1cb   : > { %v3032_v13 = vadd.f32 %v3031_v19, %v3030_v59  ;;  %v3038_v26 = vrot.slane %v3037_v38, 1  ;;  %v3045_v29 = vrot.slane %v3044_v31, 1  ;;  %v3051_v40 = vadd.f32 %v3050_v32, %v3049_v15  ;;  %v1575_v18 = vpop.f32.mrb[93].mxu1  ;;  %v2061_v62 = vpop.f32.mrb[93].mxu0 }
 0x1cc   : > { %v3058_v12 = vadd.f32 %v3057_v48, %v3056_v58  ;;  %v3064_v42 = vrot.slane %v3063_v46, 2  ;;  %v3071_v7 = vrot.slane %v3070_v20, 2  ;;  %v3077_v3 = vadd.f32 %v3076_v8, %v3075_v54  ;;  %v5661_v19 = vpop.f32.mrb[94].mxu1  ;;  %v5663_v15 = vpop.f32.mrb[94].mxu0  ;;  %v5998_v48 = vld [vmem:[#allocation41_spill] sm:$0xff] }
 0x1cd   : > { %v3039_v33 = vadd.f32 %v3038_v26, %v3037_v38  ;;  %v3046_v41 = vadd.f32 %v3045_v29, %v3044_v31  ;;  %v3052_v21 = vrot.slane %v3051_v40, 1  ;;  %v3330_v10 = vmul.f32 0.25, %v3032_v13  ;;  %v1578_v38 = vpop.f32.mrb[95].mxu1  ;;  %v2064_v31 = vpop.f32.mrb[95].mxu0 }
 0x1ce   : > { %v3059_v9 = vrot.slane %v3058_v12, 1  ;;  %v3065_v51 = vadd.f32 %v3064_v42, %v3063_v46  ;;  %v3072_v59 = vadd.f32 %v3071_v7, %v3070_v20  ;;  %v3078_v63 = vrot.slane %v3077_v3, 2 }
 0x1cf   : > { %v3053_v58 = vadd.f32 %v3052_v21, %v3051_v40  ;;  %v3331_v54 = vmul.f32 0.25, %v3039_v33  ;;  %v3332_v32 = vmul.f32 0.25, %v3046_v41  ;;  %v2315_v8 = vadd.f32 %v5998_v48, %v2123_v4  ;;  %v5999_v41 = vld [vmem:[#allocation42_spill] sm:$0xff] }
 0x1d0   : > { %v3060_v26 = vadd.f32 %v3059_v9, %v3058_v12  ;;  %v3066_v13 = vrot.slane %v3065_v51, 1  ;;  %v3073_v29 = vrot.slane %v3072_v59, 1  ;;  %v3079_v18 = vadd.f32 %v3078_v63, %v3077_v3 }
 0x1d1   : > { %v3333_v62 = vmul.f32 0.25, %v3053_v58  ;;  %v3502_v46 = vsel %vm3474_vm6, %v3331_v54, %v3330_v10  ;;  %vm2347_vm14 = vcmp.gt.f32.partialorder %v2315_v8, 0.5  ;;  %v2124_v20 = vadd.f32 %v5558_v5, %v5625_v23  ;;  %2443 = vst [vmem:[%s5145_s18 + $0x90] sm:$0xff] %v2315_v8  ;;  %v6001_v54 = vld [vmem:[#allocation6_spill] sm:$0xff] }
 0x1d2   : > { %v3503_v40 = vsel %vm3476_vm7, %v3332_v32, %v3502_v46  ;;  %v3067_v42 = vadd.f32 %v3066_v13, %v3065_v51  ;;  %v3074_v4 = vadd.f32 %v3073_v29, %v3072_v59  ;;  %v3080_v7 = vrot.slane %v3079_v18, 1  ;;  %v6003_v46 = vld [vmem:[#allocation43_spill] sm:$0xff] }
 0x1d3   : > { %v3334_v33 = vmul.f32 0.25, %v3060_v26  ;;  %v3504_v12 = vsel %vm3478_vm8, %v3333_v62, %v3503_v40  ;;  %v4257_v3 = vsel %vm2347_vm14, 1.0, %v5988_v24  ;;  %v2316_v21 = vadd.f32 %v5999_v41, %v2124_v20 }
 0x1d4   : > { %v3081_v10 = vadd.f32 %v3080_v7, %v3079_v18  ;;  %v3335_v9 = vmul.f32 0.25, %v3067_v42  ;;  %v3336_v63 = vmul.f32 0.25, %v3074_v4  ;;  %v2497_v58 = vadd.f32 %v4257_v3, %v5611_v11  ;;  %2475 = vst [vmem:[%s5215_s21 + $0x90] sm:$0xff] %v4257_v3 }
 0x1d5   : > { %v3505_v23 = vsel %vm3480_vm9, %v3334_v33, %v3504_v12  ;;  %vm2348_vm15 = vcmp.gt.f32.partialorder %v2316_v21, 0.5  ;;  %v6000_v51 = vsub.f32 1.0, %v5400_v39  ;;  %v1534_v32 = vadd.f32 %v5520_v57, %v6001_v54  ;;  %2444 = vst [vmem:[%s5145_s18 + $0x98] sm:$0xff] %v2316_v21  ;;  %v6002_v39 = vld [vmem:[#allocation7_spill] sm:$0xff] }
 0x1d6   : > { %v3337_v48 = vmul.f32 0.25, %v3081_v10  ;;  %v3506_v8 = vsel %vm3482_vm10, %v3335_v9, %v3505_v23  ;;  %v2657_v38 = vcombine.high %v2497_v58, %v2497_v58  ;;  %v2664_v11 = vrot.slane %v2497_v58, %v5049_v52 }
 0x1d7   : > { %v5680_v59 = vmul.f32 %v6000_v51, %v5372_v1  ;;  %v3507_v31 = vsel %vm3484_vm11, %v3336_v63, %v3506_v8  ;;  %v4258_v26 = vsel %vm2348_vm15, 1.0, %v5988_v24  ;;  %v2086_v13 = vadd.f32 %v5522_v36, %v1534_v32 }
 0x1d8   : > { %v1537_v1 = vadd.f32 %v5527_v53, %v6002_v39  ;;  %v3508_v29 = vsel %vm3486_vm12, %v3337_v48, %v3507_v31  ;;  %v2671_v57 = vrot.slane %v2657_v38, %v5049_v52  ;;  %v2672_v18 = vcombine.high %v2664_v11, %v2664_v11  ;;  %2476 = vst [vmem:[%s5215_s21 + $0x98] sm:$0xff] %v4258_v26  ;;  %v6004_v48 = vld [vmem:[#allocation44_spill] sm:$0xff] }
 0x1d9   : > { %v3082_v62 = vsel %vm2857_vm3, %v2664_v11, 0.0  ;;  %v3548_v20 = vadd.f32 %v3508_v29, %v6003_v46  ;;  %v2498_v42 = vadd.f32 %v4258_v26, %v5638_v34  ;;  %v2125_v4 = vadd.f32 %v5558_v5, %v2086_v13 }
 0x1da   : > { %v3083_v40 = vrot.slane %v3082_v62, 4  ;;  %v2673_v36 = vcombine.high %v2671_v57, %v2671_v57  ;;  %v3089_v7 = vsel %vm2857_vm3, %v2672_v18, 0.0  ;;  %v3096_v53 = vsel %vm2857_vm3, %v2671_v57, 0.0 }
 0x1db   : > { %v5702_v33 = vadd.f32 %v5529_v6, %v1537_v1  ;;  %vm3556_vm0 = vcmp.gt.f32.partialorder %v3548_v20, 0.5  ;;  %v3090_v3 = vrot.slane %v3089_v7, 4  ;;  %v3097_v41 = vrot.slane %v3096_v53, 4  ;;  %3580 = vst [vmem:[%s5382_s13 + $0x18] sm:$0xff] %v3548_v20 }
 0x1dc   : > { %v3084_v12 = vadd.f32 %v3083_v40, %v3082_v62  ;;  %v4274_v21 = vsel %vm3556_vm0, 1.0, %v5988_v24  ;;  %v3103_v34 = vsel %vm2857_vm3, %v2673_v36, 0.0  ;;  %v2674_v10 = vcombine.high %v2498_v42, %v2498_v42 }
 0x1dd   : > { %v2681_v9 = vrot.slane %v2498_v42, %v5049_v52  ;;  %v3091_v58 = vadd.f32 %v3090_v3, %v3089_v7  ;;  %v3098_v23 = vadd.f32 %v3097_v41, %v3096_v53  ;;  %v3104_v51 = vrot.slane %v3103_v34, 4  ;;  %3588 = vst [vmem:[%s5406_s27 + $0x18] sm:$0xff] %v4274_v21 }
 0x1de   : > { %v3085_v63 = vrot.slane %v3084_v12, 2  ;;  %v2688_v6 = vrot.slane %v2674_v10, %v5049_v52  ;;  %v2317_v8 = vadd.f32 %v6004_v48, %v2125_v4 }
 0x1df   : > { %v2689_v54 = vcombine.high %v2681_v9, %v2681_v9  ;;  %v3110_v32 = vsel %vm2857_vm3, %v2681_v9, 0.0  ;;  %v3092_v11 = vrot.slane %v3091_v58, 2  ;;  %v3099_v31 = vrot.slane %v3098_v23, 2 }
 0x1e0   : > { %v3086_v38 = vadd.f32 %v3085_v63, %v3084_v12  ;;  %v3105_v26 = vadd.f32 %v3104_v51, %v3103_v34  ;;  %v2690_v13 = vcombine.high %v2688_v6, %v2688_v6  ;;  %v3111_v39 = vrot.slane %v3110_v32, 4  ;;  %2445 = vst [vmem:[%s5145_s18 + $0xa0] sm:$0xff] %v2317_v8 }
 0x1e1   : > { %v3117_v1 = vsel %vm2857_vm3, %v2689_v54, 0.0  ;;  %v3124_v29 = vsel %vm2857_vm3, %v2688_v6, 0.0  ;;  %v3093_v18 = vadd.f32 %v3092_v11, %v3091_v58  ;;  %v3100_v62 = vadd.f32 %v3099_v31, %v3098_v23 }
 0x1e2   : > { %v3087_v57 = vrot.slane %v3086_v38, 1  ;;  %v3106_v46 = vrot.slane %v3105_v26, 2  ;;  %v3112_v20 = vadd.f32 %v3111_v39, %v3110_v32  ;;  %v3118_v40 = vrot.slane %v3117_v1, 4 }
 0x1e3   : > { %v3125_v42 = vrot.slane %v3124_v29, 4  ;;  %v3131_v4 = vsel %vm2857_vm3, %v2690_v13, 0.0  ;;  %v3094_v7 = vrot.slane %v3093_v18, 1  ;;  %v3101_v53 = vrot.slane %v3100_v62, 1 }
 0x1e4   : > { %v3088_v36 = vadd.f32 %v3087_v57, %v3086_v38  ;;  %v3107_v12 = vadd.f32 %v3106_v46, %v3105_v26  ;;  %v3113_v3 = vrot.slane %v3112_v20, 2  ;;  %v3119_v41 = vadd.f32 %v3118_v40, %v3117_v1 }
 0x1e5   : > { %v3126_v21 = vadd.f32 %v3125_v42, %v3124_v29  ;;  %v3132_v34 = vrot.slane %v3131_v4, 4  ;;  %v3095_v10 = vadd.f32 %v3094_v7, %v3093_v18  ;;  %v3102_v9 = vadd.f32 %v3101_v53, %v3100_v62  ;;  %v6005_v42 = vld [vmem:[#allocation45_spill] sm:$0xff] }
 0x1e6   : > { %v3108_v63 = vrot.slane %v3107_v12, 1  ;;  %v3338_v51 = vmul.f32 0.25, %v3088_v36  ;;  %v3114_v58 = vadd.f32 %v3113_v3, %v3112_v20  ;;  %v3120_v23 = vrot.slane %v3119_v41, 2  ;;  %v6006_v36 = vld [vmem:[#allocation8_spill] sm:$0xff] }
 0x1e7   : > { %v3127_v6 = vrot.slane %v3126_v21, 2  ;;  %v3133_v54 = vadd.f32 %v3132_v34, %v3131_v4  ;;  %v3339_v48 = vmul.f32 0.25, %v3095_v10  ;;  %v3340_v11 = vmul.f32 0.25, %v3102_v9  ;;  %v6008_v10 = vld [vmem:[#allocation28_spill] sm:$0xff] }
 0x1e8   : > { %v3109_v32 = vadd.f32 %v3108_v63, %v3107_v12  ;;  %vm2349_vm1 = vcmp.gt.f32.partialorder %v2317_v8, 0.5  ;;  %v3115_v38 = vrot.slane %v3114_v58, 1  ;;  %v3121_v31 = vadd.f32 %v3120_v23, %v3119_v41 }
 0x1e9   : > { %v3128_v26 = vadd.f32 %v3127_v6, %v3126_v21  ;;  %v3134_v13 = vrot.slane %v3133_v54, 2  ;;  %v3509_v1 = vsel %vm3474_vm6, %v3339_v48, %v3338_v51  ;;  %v4259_v29 = vsel %vm2349_vm1, 1.0, %v5988_v24 }
 0x1ea   : > { %v3341_v39 = vmul.f32 0.25, %v3109_v32  ;;  %v2126_v57 = vadd.f32 %v5558_v5, %v5702_v33  ;;  %v3510_v18 = vsel %vm3476_vm7, %v3340_v11, %v3509_v1  ;;  %v3116_v62 = vadd.f32 %v3115_v38, %v3114_v58  ;;  %2477 = vst [vmem:[%s5215_s21 + $0xa0] sm:$0xff] %v4259_v29  ;;  %v6007_v33 = vld [vmem:[#allocation21_spill] sm:$0xff] }
 0x1eb   : > { %v3122_v46 = vrot.slane %v3121_v31, 1  ;;  %v3129_v20 = vrot.slane %v3128_v26, 1  ;;  %v3135_v8 = vadd.f32 %v3134_v13, %v3133_v54  ;;  %v1542_v7 = vadd.f32 %v5540_v27, %v6006_v36  ;;  %v6009_v32 = vld [vmem:[#allocation9_spill] sm:$0xff] }
 0x1ec   : > { %v3511_v40 = vsel %vm3478_vm8, %v3341_v39, %v3510_v18  ;;  %v2318_v4 = vadd.f32 %v6005_v42, %v2126_v57  ;;  %v3342_v3 = vmul.f32 0.25, %v3116_v62  ;;  %v2191_v41 = vmul.f32 0.2, %v6007_v33  ;;  %v6015_v33 = vld [vmem:[#allocation11_spill] sm:$0xff] }
 0x1ed   : > { %v3123_v53 = vadd.f32 %v3122_v46, %v3121_v31  ;;  %v3130_v12 = vadd.f32 %v3129_v20, %v3128_v26  ;;  %v3136_v21 = vrot.slane %v3135_v8, 1  ;;  %v2088_v34 = vadd.f32 %v5542_v61, %v1542_v7  ;;  %v6010_v61 = vld [vmem:[#allocation22_spill] sm:$0xff]  ;;  %v6011_v31 = vld [vmem:[#allocation29_spill] sm:$0xff] }
 0x1ee   : > { %vm2350_vm2 = vcmp.gt.f32.partialorder %v2318_v4, 0.5  ;;  %v2255_v9 = vsub.f32 1.0, %v6008_v10  ;;  %2446 = vst [vmem:[%s5145_s18 + $0xa8] sm:$0xff] %v2318_v4  ;;  %v3512_v58 = vsel %vm3480_vm9, %v3342_v3, %v3511_v40  ;;  %v1545_v48 = vadd.f32 %v5544_v25, %v6009_v32  ;;  %v6012_v25 = vld [vmem:[#allocation10_spill] sm:$0xff]  ;;  %v6017_v10 = vld [vmem:[#allocation31_spill] sm:$0xff] }
 0x1ef   : > { %v3343_v63 = vmul.f32 0.25, %v3123_v53  ;;  %v3344_v51 = vmul.f32 0.25, %v3130_v12  ;;  %v4260_v23 = vsel %vm2350_vm2, 1.0, %v5988_v24  ;;  %v3137_v27 = vadd.f32 %v3136_v21, %v3135_v8  ;;  %v6013_v8 = vld [vmem:[#allocation23_spill] sm:$0xff]  ;;  %v6014_v4 = vld [vmem:[#allocation30_spill] sm:$0xff] }
 0x1f0   : > { %v2127_v6 = vadd.f32 %v5558_v5, %v2088_v34  ;;  %v2287_v54 = vmul.f32 %v2255_v9, %v2191_v41  ;;  %2478 = vst [vmem:[%s5215_s21 + $0xa8] sm:$0xff] %v4260_v23  ;;  %v2192_v38 = vmul.f32 0.2, %v6010_v61  ;;  %v2256_v26 = vsub.f32 1.0, %v6011_v31  ;;  %v6016_v34 = vld [vmem:[#allocation24_spill] sm:$0xff] }
 0x1f1   : > { %v3513_v11 = vsel %vm3482_vm10, %v3343_v63, %v3512_v58  ;;  %v3383_v13 = vmul.f32 0.2, %v5387_v16  ;;  %v3345_v39 = vmul.f32 0.25, %v3137_v27  ;;  %v2089_v18 = vadd.f32 %v5546_v44, %v1545_v48 }
 0x1f2   : > { %v3514_v1 = vsel %vm3484_vm11, %v3344_v51, %v3513_v11  ;;  %v2319_v57 = vadd.f32 %v2287_v54, %v2127_v6  ;;  %v2288_v62 = vmul.f32 %v2256_v26, %v2192_v38  ;;  %v3399_v46 = vsub.f32 1.0, %v5413_v35  ;;  %v6018_v38 = vld [vmem:[#allocation12_spill] sm:$0xff] }
 0x1f3   : > { %v1550_v20 = vadd.f32 %v5569_v14, %v6012_v25  ;;  %v2193_v40 = vmul.f32 0.2, %v6013_v8  ;;  %v3515_v42 = vsel %vm3486_vm12, %v3345_v39, %v3514_v1  ;;  %v2128_v16 = vadd.f32 %v5558_v5, %v2089_v18 }
 0x1f4   : > { %vm2351_vm4 = vcmp.gt.f32.partialorder %v2319_v57, 0.5  ;;  %v2257_v36 = vsub.f32 1.0, %v6014_v4  ;;  %2447 = vst [vmem:[%s5145_s18 + $0xb0] sm:$0xff] %v2319_v57  ;;  %v3549_v44 = vadd.f32 %v3515_v42, %v5680_v59  ;;  %v5752_v35 = vmul.f32 %v3399_v46, %v3383_v13 }
 0x1f5   : > { %v4261_v7 = vsel %vm2351_vm4, 1.0, %v5988_v24  ;;  %v2090_v14 = vadd.f32 %v5571_v2, %v1550_v20  ;;  %v2320_v12 = vadd.f32 %v2288_v62, %v2128_v16  ;;  %v1553_v41 = vadd.f32 %v5576_v43, %v6015_v33 }
 0x1f6   : > { %v2499_v53 = vadd.f32 %v4261_v7, %v4259_v29  ;;  %v2289_v3 = vmul.f32 %v2257_v36, %v2193_v40  ;;  %2479 = vst [vmem:[%s5215_s21 + $0xb0] sm:$0xff] %v4261_v7  ;;  %vm3557_vm5 = vcmp.gt.f32.partialorder %v3549_v44, 0.5  ;;  %v2194_v59 = vmul.f32 0.2, %v6016_v34  ;;  %3581 = vst [vmem:[%s5382_s13 + $0x20] sm:$0xff] %v3549_v44 }
 0x1f7   : > { %v2129_v21 = vadd.f32 %v5558_v5, %v2090_v14  ;;  %v2258_v9 = vsub.f32 1.0, %v6017_v10  ;;  %v4275_v63 = vsel %vm3557_vm5, 1.0, %v5988_v24  ;;  %vm2352_vm13 = vcmp.gt.f32.partialorder %v2320_v12, 0.5  ;;  %2448 = vst [vmem:[%s5145_s18 + $0xb8] sm:$0xff] %v2320_v12 }
 0x1f8   : > { %v2691_v2 = vcombine.high %v2499_v53, %v2499_v53  ;;  %v2698_v29 = vrot.slane %v2499_v53, %v5049_v52  ;;  %v4262_v43 = vsel %vm2352_vm13, 1.0, %v5988_v24  ;;  %v2091_v58 = vadd.f32 %v5578_v37, %v1553_v41  ;;  %3589 = vst [vmem:[%s5406_s27 + $0x20] sm:$0xff] %v4275_v63 }
 0x1f9   : > { %v2321_v51 = vadd.f32 %v2289_v3, %v2129_v21  ;;  %v2290_v27 = vmul.f32 %v2258_v9, %v2194_v59  ;;  %v2500_v48 = vadd.f32 %v4262_v43, %v4260_v23  ;;  %2480 = vst [vmem:[%s5215_s21 + $0xb8] sm:$0xff] %v4262_v43  ;;  %v5774_v31 = vadd.f32 %v5601_v50, %v6018_v38 }
 0x1fa   : > { %v2705_v6 = vrot.slane %v2691_v2, %v5049_v52  ;;  %v2706_v54 = vcombine.high %v2698_v29, %v2698_v29  ;;  %v3138_v32 = vsel %vm2857_vm3, %v2698_v29, 0.0  ;;  %v2130_v61 = vadd.f32 %v5558_v5, %v2091_v58 }
 0x1fb   : > { %v3139_v11 = vrot.slane %v3138_v32, 4  ;;  %vm2353_vm14 = vcmp.gt.f32.partialorder %v2321_v51, 0.5  ;;  %2449 = vst [vmem:[%s5145_s18 + $0xc0] sm:$0xff] %v2321_v51  ;;  %v2708_v39 = vcombine.high %v2500_v48, %v2500_v48  ;;  %v2715_v18 = vrot.slane %v2500_v48, %v5049_v52 }
 0x1fc   : > { %v2707_v26 = vcombine.high %v2705_v6, %v2705_v6  ;;  %v3145_v37 = vsel %vm2857_vm3, %v2706_v54, 0.0  ;;  %v3152_v13 = vsel %vm2857_vm3, %v2705_v6, 0.0  ;;  %v5783_v50 = vsel %vm2353_vm14, 1.0, %v5988_v24 }
 0x1fd   : > { %v3140_v1 = vadd.f32 %v3139_v11, %v3138_v32  ;;  %v3146_v57 = vrot.slane %v3145_v37, 4  ;;  %v3153_v23 = vrot.slane %v3152_v13, 4  ;;  %v2722_v46 = vrot.slane %v2708_v39, %v5049_v52  ;;  %2481 = vst [vmem:[%s5215_s21 + $0xc0] sm:$0xff] %v5783_v50 }
 0x1fe   : > { %v3159_v62 = vsel %vm2857_vm3, %v2707_v26, 0.0  ;;  %v2322_v25 = vadd.f32 %v2290_v27, %v2130_v61  ;;  %v2723_v16 = vcombine.high %v2715_v18, %v2715_v18  ;;  %v3166_v36 = vsel %vm2857_vm3, %v2715_v18, 0.0 }
 0x1ff   : > { %v3141_v20 = vrot.slane %v3140_v1, 2  ;;  %v3147_v8 = vadd.f32 %v3146_v57, %v3145_v37  ;;  %v3154_v40 = vadd.f32 %v3153_v23, %v3152_v13  ;;  %v3160_v42 = vrot.slane %v3159_v62, 4 }
 0x200   : > { %v2724_v4 = vcombine.high %v2722_v46, %v2722_v46  ;;  %v3180_v44 = vsel %vm2857_vm3, %v2722_v46, 0.0  ;;  %2450 = vst [vmem:[%s5145_s18 + $0xc8] sm:$0xff] %v2322_v25  ;;  %v3167_v3 = vrot.slane %v3166_v36, 4  ;;  %v3173_v33 = vsel %vm2857_vm3, %v2723_v16, 0.0 }
 0x201   : > { %v3142_v7 = vadd.f32 %v3141_v20, %v3140_v1  ;;  %v3148_v14 = vrot.slane %v3147_v8, 2  ;;  %v3155_v53 = vrot.slane %v3154_v40, 2  ;;  %v3161_v12 = vadd.f32 %v3160_v42, %v3159_v62 }
 0x202   : > { %v3181_v41 = vrot.slane %v3180_v44, 4  ;;  %v3187_v21 = vsel %vm2857_vm3, %v2724_v4, 0.0  ;;  %v3168_v63 = vadd.f32 %v3167_v3, %v3166_v36  ;;  %v3174_v2 = vrot.slane %v3173_v33, 4 }
 0x203   : > { %v3143_v34 = vrot.slane %v3142_v7, 1  ;;  %v3149_v59 = vadd.f32 %v3148_v14, %v3147_v8  ;;  %v3156_v10 = vadd.f32 %v3155_v53, %v3154_v40  ;;  %v3162_v9 = vrot.slane %v3161_v12, 2 }
 0x204   : > { %v3182_v29 = vadd.f32 %v3181_v41, %v3180_v44  ;;  %v3188_v43 = vrot.slane %v3187_v21, 4  ;;  %v3169_v54 = vrot.slane %v3168_v63, 2  ;;  %v3175_v32 = vadd.f32 %v3174_v2, %v3173_v33  ;;  %v6019_v33 = vld [vmem:[#allocation25_spill] sm:$0xff]  ;;  %v6022_v2 = vld [vmem:[#allocation26_spill] sm:$0xff] }
 0x205   : > { %v3144_v51 = vadd.f32 %v3143_v34, %v3142_v7  ;;  %v3150_v58 = vrot.slane %v3149_v59, 1  ;;  %v3157_v27 = vrot.slane %v3156_v10, 1  ;;  %v3163_v6 = vadd.f32 %v3162_v9, %v3161_v12 }
 0x206   : > { %v3183_v48 = vrot.slane %v3182_v29, 2  ;;  %v3189_v11 = vadd.f32 %v3188_v43, %v3187_v21  ;;  %v3170_v13 = vadd.f32 %v3169_v54, %v3168_v63  ;;  %v3176_v39 = vrot.slane %v3175_v32, 2  ;;  %v6023_v43 = vld [vmem:[#allocation36_spill] sm:$0xff] }
 0x207   : > { %v3151_v61 = vadd.f32 %v3150_v58, %v3149_v59  ;;  %v3158_v38 = vadd.f32 %v3157_v27, %v3156_v10  ;;  %v3164_v26 = vrot.slane %v3163_v6, 1  ;;  %v3346_v37 = vmul.f32 0.25, %v3144_v51  ;;  %v6020_v10 = vld [vmem:[#allocation32_spill] sm:$0xff] }
 0x208   : > { %v3184_v1 = vadd.f32 %v3183_v48, %v3182_v29  ;;  %v3190_v57 = vrot.slane %v3189_v11, 2  ;;  %vm2354_vm15 = vcmp.gt.f32.partialorder %v2322_v25, 0.5  ;;  %v3171_v46 = vrot.slane %v3170_v13, 1 }
 0x209   : > { %v3165_v23 = vadd.f32 %v3164_v26, %v3163_v6  ;;  %v3347_v18 = vmul.f32 0.25, %v3151_v61  ;;  %v3348_v62 = vmul.f32 0.25, %v3158_v38  ;;  %v3177_v20 = vadd.f32 %v3176_v39, %v3175_v32  ;;  %v6024_v26 = vld [vmem:[#allocation14_spill] sm:$0xff] }
 0x20a   : > { %v3185_v8 = vrot.slane %v3184_v1, 1  ;;  %v3191_v40 = vadd.f32 %v3190_v57, %v3189_v11  ;;  %v4264_v4 = vsel %vm2354_vm15, 1.0, %v5988_v24  ;;  %v2092_v36 = vadd.f32 %v5603_v56, %v5774_v31  ;;  %v6021_v56 = vld [vmem:[#allocation13_spill] sm:$0xff] }
 0x20b   : > { %v3349_v42 = vmul.f32 0.25, %v3165_v23  ;;  %v3516_v16 = vsel %vm3474_vm6, %v3347_v18, %v3346_v37  ;;  %v3172_v7 = vadd.f32 %v3171_v46, %v3170_v13  ;;  %v3178_v14 = vrot.slane %v3177_v20, 1  ;;  %2482 = vst [vmem:[%s5215_s21 + $0xc8] sm:$0xff] %v4264_v4  ;;  %v6025_v13 = vld [vmem:[#allocation27_spill] sm:$0xff]  ;;  %v6026_v23 = vld [vmem:[#allocation37_spill] sm:$0xff] }
 0x20c   : > { %v3517_v44 = vsel %vm3476_vm7, %v3348_v62, %v3516_v16  ;;  %v3186_v53 = vadd.f32 %v3185_v8, %v3184_v1  ;;  %v3192_v12 = vrot.slane %v3191_v40, 1  ;;  %v2131_v3 = vadd.f32 %v5558_v5, %v2092_v36  ;;  %v6027_v62 = vld [vmem:[#allocation16_spill] sm:$0xff] }
 0x20d   : > { %v3518_v25 = vsel %vm3478_vm8, %v3349_v42, %v3517_v44  ;;  %v2195_v41 = vmul.f32 0.2, %v6019_v33  ;;  %v3179_v21 = vadd.f32 %v3178_v14, %v3177_v20  ;;  %v3350_v34 = vmul.f32 0.25, %v3172_v7  ;;  %v6028_v44 = vld [vmem:[#allocation33_spill] sm:$0xff] }
 0x20e   : > { %v3352_v59 = vmul.f32 0.25, %v3186_v53  ;;  %v2259_v9 = vsub.f32 1.0, %v6020_v10  ;;  %v3193_v63 = vadd.f32 %v3192_v12, %v3191_v40  ;;  %v1561_v31 = vadd.f32 %v5616_v45, %v6021_v56 }
 0x20f   : > { %v2196_v29 = vmul.f32 0.2, %v6022_v2  ;;  %v2260_v51 = vsub.f32 1.0, %v6023_v43  ;;  %v3351_v58 = vmul.f32 0.25, %v3179_v21  ;;  %v3519_v27 = vsel %vm3480_vm9, %v3350_v34, %v3518_v25 }
 0x210   : > { %v2291_v6 = vmul.f32 %v2259_v9, %v2195_v41  ;;  %v3384_v54 = vmul.f32 0.2, %v5390_v47  ;;  %v3353_v32 = vmul.f32 0.25, %v3193_v63  ;;  %v2093_v48 = vadd.f32 %v5618_v0, %v1561_v31 }
 0x211   : > { %v2292_v11 = vmul.f32 %v2260_v51, %v2196_v29  ;;  %v3400_v61 = vsub.f32 1.0, %v5416_v28  ;;  %v3520_v38 = vsel %vm3482_vm10, %v3351_v58, %v3519_v27  ;;  %v1566_v37 = vadd.f32 %v5646_v17, %v6024_v26 }
 0x212   : > { %v2323_v45 = vadd.f32 %v2291_v6, %v2131_v3  ;;  %v2197_v39 = vmul.f32 0.2, %v6025_v13  ;;  %v3521_v1 = vsel %vm3484_vm11, %v3352_v59, %v3520_v38  ;;  %v2132_v57 = vadd.f32 %v5558_v5, %v2093_v48 }
 0x213   : > { %v5816_v47 = vmul.f32 %v3400_v61, %v3384_v54  ;;  %v2261_v0 = vsub.f32 1.0, %v6026_v23  ;;  %v3522_v18 = vsel %vm3486_vm12, %v3353_v32, %v3521_v1  ;;  %v2094_v28 = vadd.f32 %v5648_v60, %v1566_v37 }
 0x214   : > { %vm2355_vm0 = vcmp.gt.f32.partialorder %v2323_v45, 0.5  ;;  %v1569_v17 = vadd.f32 %v5652_v22, %v6027_v62  ;;  %2451 = vst [vmem:[%s5145_s18 + $0xd0] sm:$0xff] %v2323_v45  ;;  %v3550_v46 = vadd.f32 %v3522_v18, %v5752_v35  ;;  %v2324_v8 = vadd.f32 %v2292_v11, %v2132_v57  ;;  %v6029_v22 = vld [vmem:[#allocation38_spill] sm:$0xff] }
 0x215   : > { %v4265_v20 = vsel %vm2355_vm0, 1.0, %v5988_v24  ;;  %v2293_v40 = vmul.f32 %v2261_v0, %v2197_v39  ;;  %v2133_v16 = vadd.f32 %v5558_v5, %v2094_v28  ;;  %v2198_v60 = vmul.f32 0.2, %v6028_v44  ;;  %v6030_v35 = vld [vmem:[#allocation18_spill] sm:$0xff] }
 0x216   : > { %v2501_v42 = vadd.f32 %v4265_v20, %v5783_v50  ;;  %v2095_v36 = vadd.f32 %v5654_v30, %v1569_v17  ;;  %2483 = vst [vmem:[%s5215_s21 + $0xd0] sm:$0xff] %v4265_v20  ;;  %vm3558_vm1 = vcmp.gt.f32.partialorder %v3550_v46, 0.5  ;;  %vm2356_vm2 = vcmp.gt.f32.partialorder %v2324_v8, 0.5  ;;  %2452 = vst [vmem:[%s5145_s18 + $0xd8] sm:$0xff] %v2324_v8 }
 0x217   : > { %v2262_v7 = vsub.f32 1.0, %v6029_v22  ;;  %v1574_v14 = vadd.f32 %v5657_v49, %v6030_v35  ;;  %3582 = vst [vmem:[%s5382_s13 + $0x28] sm:$0xff] %v3550_v46  ;;  %v4276_v50 = vsel %vm3558_vm1, 1.0, %v5988_v24  ;;  %v4266_v30 = vsel %vm2356_vm2, 1.0, %v5988_v24 }
 0x218   : > { %v2725_v53 = vcombine.high %v2501_v42, %v2501_v42  ;;  %v2732_v12 = vrot.slane %v2501_v42, %v5049_v52  ;;  %v2502_v25 = vadd.f32 %v4266_v30, %v4264_v4  ;;  %v2325_v3 = vadd.f32 %v2293_v40, %v2133_v16  ;;  %2484 = vst [vmem:[%s5215_s21 + $0xd8] sm:$0xff] %v4266_v30 }
 0x219   : > { %v2134_v33 = vadd.f32 %v5558_v5, %v2095_v36  ;;  %v2294_v41 = vmul.f32 %v2262_v7, %v2198_v60  ;;  %3590 = vst [vmem:[%s5406_s27 + $0x28] sm:$0xff] %v4276_v50  ;;  %v5845_v59 = vadd.f32 %v5659_v55, %v1574_v14 }
 0x21a   : > { %v2739_v21 = vrot.slane %v2725_v53, %v5049_v52  ;;  %v2740_v49 = vcombine.high %v2732_v12, %v2732_v12  ;;  %v3194_v34 = vsel %vm2857_vm3, %v2732_v12, 0.0  ;;  %v2742_v9 = vcombine.high %v2502_v25, %v2502_v25  ;;  %2453 = vst [vmem:[%s5145_s18 + $0xe0] sm:$0xff] %v2325_v3 }
 0x21b   : > { %v3195_v10 = vrot.slane %v3194_v34, 4  ;;  %v2749_v63 = vrot.slane %v2502_v25, %v5049_v52  ;;  %vm2357_vm4 = vcmp.gt.f32.partialorder %v2325_v3, 0.5  ;;  %v2326_v6 = vadd.f32 %v2294_v41, %v2134_v33 }
 0x21c   : > { %v2741_v4 = vcombine.high %v2739_v21, %v2739_v21  ;;  %v3201_v5 = vsel %vm2857_vm3, %v2740_v49, 0.0  ;;  %v3208_v56 = vsel %vm2857_vm3, %v2739_v21, 0.0  ;;  %v5852_v31 = vsel %vm2357_vm4, 1.0, %v5988_v24 }
 0x21d   : > { %v3196_v2 = vadd.f32 %v3195_v10, %v3194_v34  ;;  %v3202_v29 = vrot.slane %v3201_v5, 4  ;;  %v3209_v43 = vrot.slane %v3208_v56, 4  ;;  %v2756_v55 = vrot.slane %v2742_v9, %v5049_v52  ;;  %2485 = vst [vmem:[%s5215_s21 + $0xe0] sm:$0xff] %v5852_v31  ;;  %2454 = vst [vmem:[%s5145_s18 + $0xe8] sm:$0xff] %v2326_v6 }
 0x21e   : > { %v3215_v51 = vsel %vm2857_vm3, %v2741_v4, 0.0  ;;  %v2757_v58 = vcombine.high %v2749_v63, %v2749_v63  ;;  %v3222_v27 = vsel %vm2857_vm3, %v2749_v63, 0.0  ;;  %vm2358_vm5 = vcmp.gt.f32.partialorder %v2326_v6, 0.5 }
 0x21f   : > { %v3197_v54 = vrot.slane %v3196_v2, 2  ;;  %v3203_v32 = vadd.f32 %v3202_v29, %v3201_v5  ;;  %v3210_v48 = vadd.f32 %v3209_v43, %v3208_v56  ;;  %v3216_v11 = vrot.slane %v3215_v51, 4  ;;  %v4432_v29 = vld [vmem:[%s5929_s2] ss:$0 sm:$0xff] }
 0x220   : > { %v2758_v61 = vcombine.high %v2756_v55, %v2756_v55  ;;  %v3223_v38 = vrot.slane %v3222_v27, 4  ;;  %v3229_v45 = vsel %vm2857_vm3, %v2757_v58, 0.0  ;;  %v3236_v26 = vsel %vm2857_vm3, %v2756_v55, 0.0 }
 0x221   : > { %v3198_v37 = vadd.f32 %v3197_v54, %v3196_v2  ;;  %v3204_v13 = vrot.slane %v3203_v32, 2  ;;  %v3211_v39 = vrot.slane %v3210_v48, 2  ;;  %v3217_v1 = vadd.f32 %v3216_v11, %v3215_v51  ;;  %v6032_v11 = vld [vmem:[#allocation39_spill] sm:$0xff] }
 0x222   : > { %v3224_v57 = vadd.f32 %v3223_v38, %v3222_v27  ;;  %v3230_v23 = vrot.slane %v3229_v45, 4  ;;  %v3237_v0 = vrot.slane %v3236_v26, 4  ;;  %v3243_v18 = vsel %vm2857_vm3, %v2758_v61, 0.0 }
 0x223   : > { %v3199_v28 = vrot.slane %v3198_v37, 1  ;;  %v3205_v62 = vadd.f32 %v3204_v13, %v3203_v32  ;;  %v3212_v17 = vadd.f32 %v3211_v39, %v3210_v48  ;;  %v3218_v46 = vrot.slane %v3217_v1, 2  ;;  %v6031_v32 = vld [vmem:[#allocation34_spill] sm:$0xff] }
 0x224   : > { %v3225_v20 = vrot.slane %v3224_v57, 2  ;;  %v3231_v8 = vadd.f32 %v3230_v23, %v3229_v45  ;;  %v3238_v40 = vadd.f32 %v3237_v0, %v3236_v26  ;;  %v3244_v42 = vrot.slane %v3243_v18, 4  ;;  %v6035_v23 = vld [vmem:[#allocation40_spill] sm:$0xff] }
 0x225   : > { %v3200_v16 = vadd.f32 %v3199_v28, %v3198_v37  ;;  %v3206_v36 = vrot.slane %v3205_v62, 1  ;;  %v3213_v44 = vrot.slane %v3212_v17, 1  ;;  %v3219_v60 = vadd.f32 %v3218_v46, %v3217_v1  ;;  %v6033_v37 = vld [vmem:[#allocation20_spill] sm:$0xff]  ;;  %v6034_v1 = vld [vmem:[#allocation35_spill] sm:$0xff] }
 0x226   : > { %v3226_v22 = vadd.f32 %v3225_v20, %v3224_v57  ;;  %v3232_v7 = vrot.slane %v3231_v8, 2  ;;  %v3239_v35 = vrot.slane %v3238_v40, 2  ;;  %v3245_v14 = vadd.f32 %v3244_v42, %v3243_v18 }
 0x227   : > { %v3207_v50 = vadd.f32 %v3206_v36, %v3205_v62  ;;  %v3214_v53 = vadd.f32 %v3213_v44, %v3212_v17  ;;  %v3220_v12 = vrot.slane %v3219_v60, 1  ;;  %v3354_v30 = vmul.f32 0.25, %v3200_v16 }
 0x228   : > { %v3227_v25 = vrot.slane %v3226_v22, 1  ;;  %v3233_v3 = vadd.f32 %v3232_v7, %v3231_v8  ;;  %v3240_v33 = vadd.f32 %v3239_v35, %v3238_v40  ;;  %v3246_v41 = vrot.slane %v3245_v14, 2 }
 0x229   : > { %v3221_v21 = vadd.f32 %v3220_v12, %v3219_v60  ;;  %v3355_v49 = vmul.f32 0.25, %v3207_v50  ;;  %v3356_v34 = vmul.f32 0.25, %v3214_v53  ;;  %v4268_v2 = vsel %vm2358_vm5, 1.0, %v5988_v24 }
 0x22a   : > { %v3228_v10 = vadd.f32 %v3227_v25, %v3226_v22  ;;  %v3234_v9 = vrot.slane %v3233_v3, 1  ;;  %v3241_v63 = vrot.slane %v3240_v33, 1  ;;  %v3247_v4 = vadd.f32 %v3246_v41, %v3245_v14  ;;  %2486 = vst [vmem:[%s5215_s21 + $0xe8] sm:$0xff] %v4268_v2 }
 0x22b   : > { %v3357_v5 = vmul.f32 0.25, %v3221_v21  ;;  %v3523_v56 = vsel %vm3474_vm6, %v3355_v49, %v3354_v30  ;;  %v2135_v43 = vadd.f32 %v4432_v29, %v5845_v59  ;;  %v2199_v48 = vmul.f32 0.2, %v6031_v32 }
 0x22c   : > { %v3524_v55 = vsel %vm3476_vm7, %v3356_v34, %v3523_v56  ;;  %v3235_v51 = vadd.f32 %v3234_v9, %v3233_v3  ;;  %v3242_v58 = vadd.f32 %v3241_v63, %v3240_v33  ;;  %v3248_v27 = vrot.slane %v3247_v4, 1 }
 0x22d   : > { %v3358_v6 = vmul.f32 0.25, %v3228_v10  ;;  %v3525_v54 = vsel %vm3478_vm8, %v3357_v5, %v3524_v55  ;;  %v2263_v61 = vsub.f32 1.0, %v6032_v11  ;;  %v1577_v59 = vadd.f32 %v5661_v19, %v6033_v37 }
 0x22e   : > { %v3249_v38 = vadd.f32 %v3248_v27, %v3247_v4  ;;  %v3359_v45 = vmul.f32 0.25, %v3235_v51  ;;  %v3360_v26 = vmul.f32 0.25, %v3242_v58  ;;  %v2200_v57 = vmul.f32 0.2, %v6034_v1 }
 0x22f   : > { %v3526_v13 = vsel %vm3480_vm9, %v3358_v6, %v3525_v54  ;;  %v2295_v39 = vmul.f32 %v2263_v61, %v2199_v48  ;;  %v2264_v0 = vsub.f32 1.0, %v6035_v23  ;;  %v2097_v62 = vadd.f32 %v5663_v15, %v1577_v59 }
 0x230   : > { %v3361_v18 = vmul.f32 0.25, %v3249_v38  ;;  %v3527_v28 = vsel %vm3482_vm10, %v3359_v45, %v3526_v13 }
 0x231   : > { %v3528_v17 = vsel %vm3484_vm11, %v3360_v26, %v3527_v28  ;;  %v2327_v46 = vadd.f32 %v2295_v39, %v2135_v43  ;;  %v2296_v20 = vmul.f32 %v2264_v0, %v2200_v57  ;;  %v2136_v8 = vadd.f32 %v4432_v29, %v2097_v62 }
 0x232   : > { %v3529_v19 = vsel %vm3486_vm12, %v3361_v18, %v3528_v17 }
 0x233   : > { %v3551_v40 = vadd.f32 %v3529_v19, %v5816_v47  ;;  %vm2359_vm13 = vcmp.gt.f32.partialorder %v2327_v46, 0.5  ;;  %2455 = vst [vmem:[%s5145_s18 + $0xf0] sm:$0xff] %v2327_v46  ;;  %v2328_v16 = vadd.f32 %v2296_v20, %v2136_v8 }
 0x234   : > { %v4269_v42 = vsel %vm2359_vm13, 1.0, %v5988_v24 }
 0x235   : > { %vm3559_vm14 = vcmp.gt.f32.partialorder %v3551_v40, 0.5  ;;  %v2503_v15 = vadd.f32 %v4269_v42, %v5852_v31  ;;  %2487 = vst [vmem:[%s5215_s21 + $0xf0] sm:$0xff] %v4269_v42  ;;  %3583 = vst [vmem:[%s5382_s13 + $0x30] sm:$0xff] %v3551_v40  ;;  %vm2360_vm15 = vcmp.gt.f32.partialorder %v2328_v16, 0.5 }
 0x236   : > { %v4277_v36 = vsel %vm3559_vm14, 1.0, %v5988_v24  ;;  %2456 = vst [vmem:[%s5145_s18 + $0xf8] sm:$0xff] %v2328_v16  ;;  %v4270_v47 = vsel %vm2360_vm15, 1.0, %v5988_v24 }
 0x237   : > { %v2759_v44 = vcombine.high %v2503_v15, %v2503_v15  ;;  %v2766_v60 = vrot.slane %v2503_v15, %v5049_v52  ;;  %3591 = vst [vmem:[%s5406_s27 + $0x30] sm:$0xff] %v4277_v36  ;;  %2488 = vst [vmem:[%s5215_s21 + $0xf8] sm:$0xff] %v4270_v47  ;;  %v2504_v22 = vadd.f32 %v4270_v47, %v4268_v2 }
 0x239   : > { %v2773_v7 = vrot.slane %v2759_v44, %v5049_v52  ;;  %v2774_v35 = vcombine.high %v2766_v60, %v2766_v60  ;;  %v3250_v14 = vsel %vm2857_vm3, %v2766_v60, 0.0  ;;  %v2776_v50 = vcombine.high %v2504_v22, %v2504_v22 }
 0x23a   : > { %v3251_v31 = vrot.slane %v3250_v14, 4  ;;  %v2783_v53 = vrot.slane %v2504_v22, %v5049_v52 }
 0x23b   : > { %v2775_v12 = vcombine.high %v2773_v7, %v2773_v7  ;;  %v3257_v30 = vsel %vm2857_vm3, %v2774_v35, 0.0  ;;  %v3264_v25 = vsel %vm2857_vm3, %v2773_v7, 0.0  ;;  %v2790_v21 = vrot.slane %v2776_v50, %v5049_v52  ;;  %v6037_v50 = vld [vmem:[#allocation47_spill] sm:$0xff] }
 0x23c   : > { %v3252_v3 = vadd.f32 %v3251_v31, %v3250_v14  ;;  %v3258_v33 = vrot.slane %v3257_v30, 4  ;;  %v3265_v41 = vrot.slane %v3264_v25, 4  ;;  %v2791_v34 = vcombine.high %v2783_v53, %v2783_v53  ;;  %v6036_v14 = vld [vmem:[#allocation46_spill] sm:$0xff] }
 0x23d   : > { %v3271_v49 = vsel %vm2857_vm3, %v2775_v12, 0.0  ;;  %v3278_v10 = vsel %vm2857_vm3, %v2783_v53, 0.0  ;;  %v2792_v56 = vcombine.high %v2790_v21, %v2790_v21  ;;  %v3292_v43 = vsel %vm2857_vm3, %v2790_v21, 0.0 }
 0x23e   : > { %v3253_v9 = vrot.slane %v3252_v3, 2  ;;  %v3259_v63 = vadd.f32 %v3258_v33, %v3257_v30  ;;  %v3266_v4 = vadd.f32 %v3265_v41, %v3264_v25  ;;  %v3272_v5 = vrot.slane %v3271_v49, 4 }
 0x23f   : > { %v3279_v2 = vrot.slane %v3278_v10, 4  ;;  %v3285_v29 = vsel %vm2857_vm3, %v2791_v34, 0.0  ;;  %v3293_v54 = vrot.slane %v3292_v43, 4  ;;  %v3299_v32 = vsel %vm2857_vm3, %v2792_v56, 0.0 }
 0x240   : > { %v3254_v55 = vadd.f32 %v3253_v9, %v3252_v3  ;;  %v3260_v51 = vrot.slane %v3259_v63, 2  ;;  %v3267_v58 = vrot.slane %v3266_v4, 2  ;;  %v3273_v27 = vadd.f32 %v3272_v5, %v3271_v49 }
 0x241   : > { %v3280_v52 = vadd.f32 %v3279_v2, %v3278_v10  ;;  %v3286_v6 = vrot.slane %v3285_v29, 4  ;;  %v3294_v37 = vadd.f32 %v3293_v54, %v3292_v43  ;;  %v3300_v59 = vrot.slane %v3299_v32, 4 }
 0x242   : > { %v3255_v48 = vrot.slane %v3254_v55, 1  ;;  %v3261_v11 = vadd.f32 %v3260_v51, %v3259_v63  ;;  %v3268_v61 = vadd.f32 %v3267_v58, %v3266_v4  ;;  %v3274_v38 = vrot.slane %v3273_v27, 2 }
 0x243   : > { %v3281_v45 = vrot.slane %v3280_v52, 2  ;;  %v3287_v26 = vadd.f32 %v3286_v6, %v3285_v29  ;;  %v3295_v18 = vrot.slane %v3294_v37, 2  ;;  %v3301_v28 = vadd.f32 %v3300_v59, %v3299_v32 }
 0x244   : > { %v3256_v13 = vadd.f32 %v3255_v48, %v3254_v55  ;;  %v3262_v39 = vrot.slane %v3261_v11, 1  ;;  %v3269_v1 = vrot.slane %v3268_v61, 1  ;;  %v3275_v57 = vadd.f32 %v3274_v38, %v3273_v27 }
 0x245   : > { %v3282_v23 = vadd.f32 %v3281_v45, %v3280_v52  ;;  %v3288_v0 = vrot.slane %v3287_v26, 2  ;;  %v3296_v8 = vadd.f32 %v3295_v18, %v3294_v37  ;;  %v3302_v40 = vrot.slane %v3301_v28, 2 }
 0x246   : > { %v3263_v62 = vadd.f32 %v3262_v39, %v3261_v11  ;;  %v3270_v17 = vadd.f32 %v3269_v1, %v3268_v61  ;;  %v3276_v46 = vrot.slane %v3275_v57, 1  ;;  %v3362_v16 = vmul.f32 0.25, %v3256_v13 }
 0x247   : > { %v3283_v20 = vrot.slane %v3282_v23, 1  ;;  %v3289_v19 = vadd.f32 %v3288_v0, %v3287_v26  ;;  %v3297_v47 = vrot.slane %v3296_v8, 1  ;;  %v3303_v22 = vadd.f32 %v3302_v40, %v3301_v28 }
 0x248   : > { %v3277_v42 = vadd.f32 %v3276_v46, %v3275_v57  ;;  %v3363_v15 = vmul.f32 0.25, %v3263_v62  ;;  %v3364_v36 = vmul.f32 0.25, %v3270_v17  ;;  %v3385_v31 = vmul.f32 0.2, %v6036_v14 }
 0x249   : > { %v3284_v44 = vadd.f32 %v3283_v20, %v3282_v23  ;;  %v3290_v60 = vrot.slane %v3289_v19, 1  ;;  %v3401_v53 = vsub.f32 1.0, %v6037_v50  ;;  %v3298_v25 = vadd.f32 %v3297_v47, %v3296_v8 }
 0x24a   : > { %v3365_v7 = vmul.f32 0.25, %v3277_v42  ;;  %v3530_v35 = vsel %vm3474_vm6, %v3363_v15, %v3362_v16  ;;  %v3304_v3 = vrot.slane %v3303_v22, 1 }
 0x24b   : > { %v3531_v12 = vsel %vm3476_vm7, %v3364_v36, %v3530_v35  ;;  %v3291_v30 = vadd.f32 %v3290_v60, %v3289_v19  ;;  %v3366_v33 = vmul.f32 0.25, %v3284_v44  ;;  %v3368_v34 = vmul.f32 0.25, %v3298_v25 }
 0x24c   : > { %v3532_v41 = vsel %vm3478_vm8, %v3365_v7, %v3531_v12  ;;  %v3305_v21 = vadd.f32 %v3304_v3, %v3303_v22  ;;  %v3409_v10 = vmul.f32 %v3401_v53, %v3385_v31 }
 0x24d   : > { %v3367_v49 = vmul.f32 0.25, %v3291_v30  ;;  %v3533_v9 = vsel %vm3480_vm9, %v3366_v33, %v3532_v41 }
 0x24e   : > { %v3369_v63 = vmul.f32 0.25, %v3305_v21 }
 0x24f   : > { %v3534_v4 = vsel %vm3482_vm10, %v3367_v49, %v3533_v9 }
 0x250   : > { %v3535_v5 = vsel %vm3484_vm11, %v3368_v34, %v3534_v4 }
 0x251   : > { %v3536_v56 = vsel %vm3486_vm12, %v3369_v63, %v3535_v5 }
 0x252   : > { %v3552_v2 = vadd.f32 %v3536_v56, %v3409_v10 }
 0x254   : > { %vm3560_vm3 = vcmp.gt.f32.partialorder %v3552_v2, 0.5  ;;  %3584 = vst [vmem:[%s5382_s13 + $0x38] sm:$0xff] %v3552_v2 }
 0x255   : > { %v4278_v29 = vsel %vm3560_vm3, 1.0, %v5988_v24 }
 0x256   : > { %3592 = vst [vmem:[%s5406_s27 + $0x38] sm:$0xff] %v4278_v29 }
 0x257 PF: > { %s21_s15 = sadd.s32 1, %s4455_s15   ;;  %s6038_s13 = smov %s4451_s14 }
 0x258   : > { %p18_p5 = scmp.ge.s32.totalorder %s21_s15, 4   ;;  %s6039_s14 = smov %s6041_s16 }
 0x25a   :  { %20 = sbr.rel (!%p18_p5) target bundleno = 2 (0x2), region = 131 }

// kernel: closed_call.80
= control target key start
LH: loop header
LB: loop body
LE: loop exit
PB: predicated region body
PF: predicated region fallthrough
CT: control target
= control target key end

     0   :  { %s2601_s21 = smov 0   ;;  %s2603_s22 = smov 0   ;;  %s3046_s0 = inlined_call_operand.vmem [shape: bf16[2,10,8,384], index: 0, kind: input, shape index: {}]   ;;  %s3047_s1 = inlined_call_operand.vmem [shape: bf16[3,384,128], index: 1, kind: input, shape index: {}]   ;;  %s3048_s2 = inlined_call_operand.vmem [shape: f32[1,128], index: 2, kind: input, shape index: {}]   ;;  %s3049_s3 = inlined_call_operand.vmem [shape: f32[2,8,8,128], index: 3, kind: input, shape index: {}, may-alias: {3,5}]   ;;  %s3050_s4 = inlined_call_operand.vmem [shape: f32[2,8,8,128], index: 4, kind: input, shape index: {}, may-alias: {4,6}]   ;;  %s3051_s5 = inlined_call_operand.vmem [shape: f32[2,8,8,128], index: 5, kind: output, shape index: {0}, may-alias: {3,5}]   ;;  %s3052_s6 = inlined_call_operand.vmem [shape: f32[2,8,8,128], index: 6, kind: output, shape index: {1}, may-alias: {4,6}]  }
   0x1   :  { %s2605_s23 = smov 0  }
   0x2 LB: > { %s29_s24 = sadd.s32 1, %s2559_s22  ;;  %p1884_p0 = scmp.ge.s32.totalorder %s2563_s23, 1  ;;  %s2563_s23 = sphi %s2605_s23, %s17_s23   ;;  %s2559_s22 = sphi %s2603_s22, %s3054_s22   ;;  %s2555_s21 = sphi %s2601_s21, %s3053_s21  }
   0x3   : > { %p31_p1 = scmp.ge.s32.totalorder %s29_s24, 2  ;;  %p265_p2 = scmp.lt.s32.totalorder %s2563_s23, 3 }
   0x5   : > { %s3056_s24 = smov (%p31_p1, %s29_s24), 0  ;;  %p266_p3 = pnand %p1884_p0, %p265_p2 }
   0x6   : > { %v2439_v0 = vld [vmem:[%s3047_s1 + $0x100] sm:$0xff] (!%p266_p3)   ;;  %v2442_v3 = vld [vmem:[%s3047_s1 + $0x108] sm:$0xff] (!%p266_p3)   ;;  %v2445_v6 = vld [vmem:[%s3047_s1 + $0x110] sm:$0xff] (!%p266_p3)   ;;  %p326_p4 = scmp.lt.s32.totalorder (!%p266_p3), %s2555_s21, 1 }
   0x7   : > { %269 = sbr.rel (%p266_p3) target bundleno = 356 (0x164), region = 40  ;;  %v2440_v1 = vld [vmem:[%s3047_s1 + $0x140] sm:$0xff] (!%p266_p3)   ;;  %2145 = vmatprep.subr.bf16.mxu0 (!%p266_p3), %v2439_v0  ;;  %v2443_v4 = vld [vmem:[%s3047_s1 + $0x148] sm:$0xff] (!%p266_p3)   ;;  %v2446_v7 = vld [vmem:[%s3047_s1 + $0x150] sm:$0xff] (!%p266_p3)  }
   0x8   : > { %v2441_v2 = vld [vmem:[%s3047_s1 + $0xc0] sm:$0xff] (!%p266_p3)   ;;  %2301 = vmatprep.subr.bf16.mxu1 (!%p266_p3), %v2440_v1  ;;  %v2444_v5 = vld [vmem:[%s3047_s1 + $0xc8] sm:$0xff] (!%p266_p3)   ;;  %v2447_v8 = vld [vmem:[%s3047_s1 + $0xd0] sm:$0xff] (!%p266_p3)  }
   0x9   : > { %2146 = vmatpush3.bf16.msra.mxu0 (!%p266_p3), %v2441_v2  ;;  %2302 = vmatpush3.bf16.msra.mxu1 (!%p266_p3), %v2440_v1  ;;  %v2448_v9 = vld [vmem:[%s3047_s1 + $0x118] sm:$0xff] (!%p266_p3)   ;;  %v2451_v12 = vld [vmem:[%s3047_s1 + $0x120] sm:$0xff] (!%p266_p3)   ;;  %v2454_v15 = vld [vmem:[%s3047_s1 + $0x128] sm:$0xff] (!%p266_p3)  }
   0xa   : > { %2147 = vmatprep.subr.bf16.mxu0 (!%p266_p3), %v2442_v3  ;;  %2303 = vmatprep.subr.bf16.mxu1 (!%p266_p3), %v2443_v4  ;;  %v2449_v10 = vld [vmem:[%s3047_s1 + $0x158] sm:$0xff] (!%p266_p3)   ;;  %v2452_v13 = vld [vmem:[%s3047_s1 + $0x160] sm:$0xff] (!%p266_p3)   ;;  %v2455_v16 = vld [vmem:[%s3047_s1 + $0x168] sm:$0xff] (!%p266_p3)  }
   0xb   : > { %v2450_v11 = vld [vmem:[%s3047_s1 + $0xd8] sm:$0xff] (!%p266_p3)   ;;  %v2453_v14 = vld [vmem:[%s3047_s1 + $0xe0] sm:$0xff] (!%p266_p3)   ;;  %v2456_v17 = vld [vmem:[%s3047_s1 + $0xe8] sm:$0xff] (!%p266_p3)  }
   0xc   : > { %v2457_v18 = vld [vmem:[%s3047_s1 + $0x130] sm:$0xff] (!%p266_p3)   ;;  %v2460_v21 = vld [vmem:[%s3047_s1 + $0x138] sm:$0xff] (!%p266_p3)   ;;  %v2466_v28 = vld [vmem:[%s3047_s1 + $0x40] sm:$0xff] (!%p266_p3)  }
   0xd   : > { %2148 = vmatpush3.bf16.msra.mxu0 (!%p266_p3), %v2444_v5  ;;  %2304 = vmatpush3.bf16.msra.mxu1 (!%p266_p3), %v2443_v4  ;;  %v2458_v19 = vld [vmem:[%s3047_s1 + $0x170] sm:$0xff] (!%p266_p3)   ;;  %v2461_v22 = vld [vmem:[%s3047_s1 + $0x178] sm:$0xff] (!%p266_p3)   ;;  %v2467_v29 = vld [vmem:[%s3047_s1 + $0x80] sm:$0xff] (!%p266_p3)  }
   0xe   : > { %2149 = vmatprep.subr.bf16.mxu0 %v2445_v6  ;;  %2305 = vmatprep.subr.bf16.mxu1 %v2446_v7  ;;  %s3058_s21 = smov (!%p326_p4, %s2555_s21), 1  ;;  %v2459_v20 = vld [vmem:[%s3047_s1 + $0xf0] sm:$0xff]   ;;  %v2462_v27 = vld [vmem:[%s3047_s1 + $0xf8] sm:$0xff]   ;;  %v2469_v31 = vld [vmem:[%s3047_s1] sm:$0xff]  }
   0xf   : > { %s2413_s15 = smul.u32 120, %s3058_s21  ;;  %v2470_v33 = vld [vmem:[%s3047_s1 + $0x48] sm:$0xff]   ;;  %v2475_v39 = vld [vmem:[%s3047_s1 + $0x50] sm:$0xff]   ;;  %v2478_v45 = vld [vmem:[%s3047_s1 + $0x58] sm:$0xff]  }
  0x10   : > { %v2471_v34 = vld [vmem:[%s3047_s1 + $0x88] sm:$0xff]   ;;  %v2476_v40 = vld [vmem:[%s3047_s1 + $0x90] sm:$0xff]   ;;  %v2479_v46 = vld [vmem:[%s3047_s1 + $0x98] sm:$0xff]  }
  0x11   : > { %2150 = vmatpush3.bf16.msra.mxu0 %v2447_v8  ;;  %2306 = vmatpush3.bf16.msra.mxu1 %v2446_v7  ;;  %s2689_s28 = scalar_lea.vmem %s3046_s0, %s2413_s15  ;;  %v2472_v38 = vld [vmem:[%s3047_s1 + $0x8] sm:$0xff]   ;;  %v2477_v42 = vld [vmem:[%s3047_s1 + $0x10] sm:$0xff]   ;;  %v2480_v48 = vld [vmem:[%s3047_s1 + $0x18] sm:$0xff]  }
  0x12   : > { %2151 = vmatprep.subr.bf16.mxu0 %v2448_v9  ;;  %2307 = vmatprep.subr.bf16.mxu1 %v2449_v10  ;;  %v2701_v23 = vld [vmem:[%s2689_s28 + $0xc] sm:$0xff]  ;;  %v2704_v24 = vld [vmem:[%s2689_s28 + $0x18] sm:$0xff]  ;;  %v2465_v26 = vld [vmem:[%s2689_s28 + $0x14] ss:$12 sps:$4 sm:$0xff]  }
  0x13   : > { %v1959_v25 = vcombine.high %v2701_v23, %v2704_v24  ;;  %2317 = vmatprep.mubr.bf16.mxu1 %v2465_v26  ;;  %v2468_v30 = vld [vmem:[%s2689_s28 + $0x2c] ss:$12 sps:$4 sm:$0xff]   ;;  %v1958_v32 = vcombine.low %v2701_v23, %v2704_v24  ;;  %v2731_v35 = vld [vmem:[%s2689_s28 + $0x24] sm:$0xff]  ;;  %v2734_v36 = vld [vmem:[%s2689_s28 + $0x30] sm:$0xff] }
  0x14   : > { %v1962_v37 = vcombine.high %v2731_v35, %v2734_v36  ;;  %v1961_v41 = vcombine.low %v2731_v35, %v2734_v36  ;;  %v2753_v43 = vld [vmem:[%s2689_s28 + $0x3c] sm:$0xff]  ;;  %v2756_v44 = vld [vmem:[%s2689_s28 + $0x48] sm:$0xff]  ;;  %v2779_v52 = vld [vmem:[%s2689_s28 + $0x54] sm:$0xff] }
  0x15   : > { %2152 = vmatpush3.bf16.msra.mxu0 %v2450_v11  ;;  %2308 = vmatpush3.bf16.msra.mxu1 %v2449_v10  ;;  %v1965_v47 = vcombine.high %v2753_v43, %v2756_v44  ;;  %v2483_v49 = vld [vmem:[%s3047_s1 + $0x60] sm:$0xff]   ;;  %v1964_v54 = vcombine.low %v2753_v43, %v2756_v44  ;;  %v2486_v56 = vld [vmem:[%s3047_s1 + $0x68] sm:$0xff]   ;;  %v2492_v61 = vld [vmem:[%s3047_s1 + $0x70] sm:$0xff]  }
  0x16   : > { %2153 = vmatprep.subr.bf16.mxu0 %v2451_v12  ;;  %2309 = vmatprep.subr.bf16.mxu1 %v2452_v13  ;;  %v2484_v50 = vld [vmem:[%s3047_s1 + $0xa0] sm:$0xff]   ;;  %v2487_v57 = vld [vmem:[%s3047_s1 + $0xa8] sm:$0xff]   ;;  %v2493_v62 = vld [vmem:[%s3047_s1 + $0xb0] sm:$0xff]  }
  0x17   : > { %749 = vmatprep.mubr.bf16.mxu0 %v1959_v25  ;;  %v2485_v51 = vld [vmem:[%s3047_s1 + $0x20] sm:$0xff]   ;;  %v2494_v59 = vld [vmem:[%s2689_s28 + $0x5c] ss:$12 sps:$4 sm:$0xff]   ;;  %v2495_v63 = vld [vmem:[%s3047_s1 + $0x30] sm:$0xff]  }
  0x18   : > { %v2782_v53 = vld [vmem:[%s2689_s28 + $0x60] sm:$0xff]  ;;  %v2488_v60 = vld [vmem:[%s3047_s1 + $0x28] sm:$0xff]   ;;  %v2496_v3 = vld [vmem:[%s3047_s1 + $0x78] sm:$0xff]  }
  0x19   : > { %2154 = vmatpush3.bf16.msra.mxu0 %v2453_v14  ;;  %2310 = vmatpush3.bf16.msra.mxu1 %v2452_v13  ;;  %v2491_v55 = vld [vmem:[%s2689_s28 + $0x44] ss:$12 sps:$4 sm:$0xff]   ;;  %v1968_v58 = vcombine.high %v2779_v52, %v2782_v53  ;;  %v1967_v1 = vcombine.low %v2779_v52, %v2782_v53  ;;  %v2501_v2 = vld [vmem:[%s2689_s28 + $0x8] ss:$12 sps:$4 sm:$0xff]   ;;  %v2497_v4 = vld [vmem:[%s3047_s1 + $0xb8] sm:$0xff]   ;;  %v2841_v14 = vcombine.high %v2704_v24, %v2731_v35 }
  0x1a   : > { %2155 = vmatprep.subr.bf16.mxu0 %v2454_v15  ;;  %2311 = vmatprep.subr.bf16.mxu1 %v2455_v16  ;;  %v376_v0 = vld [vmem:[%s2689_s28] sm:$0xff]  ;;  %v2498_v6 = vld [vmem:[%s3047_s1 + $0x38] sm:$0xff]   ;;  %v2506_v12 = vld [vmem:[%s3047_s1 + $0x1c8] sm:$0xff]  }
  0x1b   : > { %v1995_v5 = vcombine.high %v376_v0, %v2701_v23  ;;  %v2502_v7 = vld [vmem:[%s3047_s1 + $0x1c0] sm:$0xff]   ;;  %v1994_v10 = vcombine.low %v376_v0, %v2701_v23  ;;  %v2507_v13 = vld [vmem:[%s3047_s1 + $0x208] sm:$0xff]   ;;  %v2001_v23 = vcombine.high %v2734_v36, %v2753_v43  ;;  %v2528_v26 = vld [vmem:[%s2689_s28 + $0x50] ss:$12 sps:$4 sm:$0xff]  }
  0x1c   : > { %v2503_v8 = vld [vmem:[%s3047_s1 + $0x200] sm:$0xff]   ;;  %v2508_v15 = vld [vmem:[%s3047_s1 + $0x188] sm:$0xff]  }
  0x1d   : > { %2156 = vmatpush3.bf16.msra.mxu0 %v2456_v17  ;;  %2312 = vmatpush3.bf16.msra.mxu1 %v2455_v16  ;;  %v2504_v9 = vld [vmem:[%s2689_s28 + $0x20] ss:$12 sps:$4 sm:$0xff]   ;;  %v2511_v16 = vld [vmem:[%s3047_s1 + $0x1d0] sm:$0xff]   ;;  %v2526_v25 = vld [vmem:[%s2689_s28 + $0x38] ss:$12 sps:$4 sm:$0xff]  }
  0x1e   : > { %2157 = vmatprep.subr.bf16.mxu0 %v2457_v18  ;;  %2313 = vmatprep.subr.bf16.mxu1 %v2458_v19  ;;  %v2505_v11 = vld [vmem:[%s3047_s1 + $0x180] sm:$0xff]   ;;  %v2512_v17 = vld [vmem:[%s3047_s1 + $0x210] sm:$0xff]   ;;  %v1997_v18 = vcombine.low %v2704_v24, %v2731_v35 }
  0x1f   : > { %v2519_v24 = vld [vmem:[%s3047_s1 + $0x1e0] sm:$0xff]   ;;  %v2529_v35 = vld [vmem:[%s3047_s1 + $0x1f0] sm:$0xff]  }
  0x21   : > { %2158 = vmatpush3.bf16.msra.mxu0 %v2459_v20  ;;  %2314 = vmatpush3.bf16.msra.mxu1 %v2458_v19  ;;  %v2513_v19 = vld [vmem:[%s3047_s1 + $0x190] sm:$0xff]   ;;  %v2514_v20 = vld [vmem:[%s3047_s1 + $0x1d8] sm:$0xff]  }
  0x22   : > { %2159 = vmatprep.subr.bf16.mxu0 %v2460_v21  ;;  %2315 = vmatprep.subr.bf16.mxu1 %v2461_v22  ;;  %v2515_v21 = vld [vmem:[%s3047_s1 + $0x218] sm:$0xff]  }
  0x25   : > { %2160 = vmatpush3.bf16.msra.mxu0 %v2462_v27  ;;  %2316 = vmatpush3.bf16.msra.mxu1 %v2461_v22  ;;  %v2516_v22 = vld [vmem:[%s3047_s1 + $0x198] sm:$0xff]   ;;  %v2520_v27 = vld [vmem:[%s3047_s1 + $0x220] sm:$0xff]  }
  0x26   : > { %2197 = vmatprep.subr.bf16.mxu0 %v2466_v28  ;;  %2325 = vmatprep.subr.bf16.mxu1 %v2467_v29  ;;  %v2000_v28 = vcombine.low %v2734_v36, %v2753_v43  ;;  %v2530_v36 = vld [vmem:[%s3047_s1 + $0x230] sm:$0xff]   ;;  %v2534_v43 = vld [vmem:[%s3047_s1 + $0x1b8] sm:$0xff]  }
  0x28   : > { %750 = vmatmul.mubr.bf16.vlgmr.msra.gmra.mrb[0].mxu0 %v1958_v32  ;;  %2318 = vmatmul.mubr.bf16.vlgmr.msra.gmra.mrb[0].mxu1 %v2468_v30  ;;  %v2522_v30 = vld [vmem:[%s3047_s1 + $0x1e8] sm:$0xff]  }
  0x29   : > { %2198 = vmatpush3.bf16.msra.mxu0 %v2469_v31  ;;  %2326 = vmatpush3.bf16.msra.mxu1 %v2467_v29  ;;  %v2521_v29 = vld [vmem:[%s3047_s1 + $0x1a0] sm:$0xff]   ;;  %v2523_v31 = vld [vmem:[%s3047_s1 + $0x228] sm:$0xff]  }
  0x2a   : > { %2199 = vmatprep.subr.bf16.mxu0 %v2470_v33  ;;  %2327 = vmatprep.subr.bf16.mxu1 %v2471_v34  ;;  %v2524_v32 = vld [vmem:[%s3047_s1 + $0x1a8] sm:$0xff]   ;;  %v2004_v33 = vcombine.high %v2756_v44, %v2779_v52 }
  0x2b   : > { %757 = vmatprep.mubr.bf16.mxu0 %v1962_v37  ;;  %2321 = vmatprep.mubr.bf16.mxu1 %v2491_v55  ;;  %v2003_v37 = vcombine.low %v2756_v44, %v2779_v52  ;;  %v2536_v44 = vld [vmem:[%s2689_s28 + $0x38] ss:$12 sps:$4 sm:$0xff]  }
  0x2d   : > { %2200 = vmatpush3.bf16.msra.mxu0 %v2472_v38  ;;  %2328 = vmatpush3.bf16.msra.mxu1 %v2471_v34  ;;  %v2535_v34 = vld [vmem:[%s2689_s28 + $0x20] ss:$12 sps:$4 sm:$0xff]  }
  0x2e   : > { %2201 = vmatprep.subr.bf16.mxu0 %v2475_v39  ;;  %2329 = vmatprep.subr.bf16.mxu1 %v2476_v40  ;;  %v2044_v38 = vld [vmem:[%s2689_s28 + $0x6c] sm:$0xff] }
  0x2f   : > { %v2531_v39 = vld [vmem:[%s3047_s1 + $0x1b0] sm:$0xff]  }
  0x30   : > { %758 = vmatmul.mubr.bf16.gmra.mrb[4].mxu0 %v1961_v41  ;;  %2322 = vmatmul.mubr.bf16.gmra.mrb[4].mxu1 %v2494_v59  ;;  %v2532_v41 = vld [vmem:[%s3047_s1 + $0x1f8] sm:$0xff]  }
  0x31   : > { %2202 = vmatpush3.bf16.msra.mxu0 %v2477_v42  ;;  %2330 = vmatpush3.bf16.msra.mxu1 %v2476_v40  ;;  %v2103_v40 = vcombine.low %v2782_v53, %v2044_v38  ;;  %v2533_v42 = vld [vmem:[%s3047_s1 + $0x238] sm:$0xff]  }
  0x32   : > { %2203 = vmatprep.subr.bf16.mxu0 %v2478_v45  ;;  %2331 = vmatprep.subr.bf16.mxu1 %v2479_v46  ;;  %v2537_v45 = vld [vmem:[%s2689_s28 + $0x50] ss:$12 sps:$4 sm:$0xff]  }
  0x33   : > { %765 = vmatprep.mubr.bf16.mxu0 %v1965_v47  ;;  %2341 = vmatprep.mubr.bf16.mxu1 %v2501_v2  ;;  %v2104_v47 = vcombine.high %v2782_v53, %v2044_v38 }
  0x35   : > { %2204 = vmatpush3.bf16.msra.mxu0 %v2480_v48  ;;  %2332 = vmatpush3.bf16.msra.mxu1 %v2479_v46  ;;  %v2538_v46 = vld [vmem:[%s2689_s28 + $0x68] ss:$12 sps:$4 sm:$0xff]   ;;  %s2930_s28 = sshll.u32 %s3058_s21, 6 }
  0x36   : > { %2205 = vmatprep.subr.bf16.mxu0 %v2483_v49  ;;  %2333 = vmatprep.subr.bf16.mxu1 %v2484_v50  ;;  %s2938_s16 = scalar_lea.vmem %s3049_s3, %s2930_s28  ;;  %s2944_s21 = scalar_lea.vmem %s3050_s4, %s2930_s28 }
  0x37   : > { %s2972_s27 = scalar_lea.vmem %s3051_s5, %s2930_s28  ;;  %s2990_s7 = scalar_lea.vmem %s3052_s6, %s2930_s28 }
  0x38   : > { %766 = vmatmul.mubr.bf16.gmra.mrb[8].mxu0 %v1964_v54 }
  0x39   : > { %2206 = vmatpush3.bf16.msra.mxu0 %v2485_v51  ;;  %2334 = vmatpush3.bf16.msra.mxu1 %v2484_v50 }
  0x3a   : > { %2207 = vmatprep.subr.bf16.mxu0 %v2486_v56  ;;  %2335 = vmatprep.subr.bf16.mxu1 %v2487_v57 }
  0x3b   : > { %773 = vmatprep.mubr.bf16.mxu0 %v1968_v58 }
  0x3d   : > { %2208 = vmatpush3.bf16.msra.mxu0 %v2488_v60  ;;  %2336 = vmatpush3.bf16.msra.mxu1 %v2487_v57 }
  0x3e   : > { %2209 = vmatprep.subr.bf16.mxu0 %v2492_v61  ;;  %2337 = vmatprep.subr.bf16.mxu1 %v2493_v62 }
  0x40   : > { %774 = vmatmul.mubr.bf16.gmra.mrb[12].mxu0 %v1967_v1 }
  0x41   : > { %2210 = vmatpush3.bf16.msra.mxu0 %v2495_v63  ;;  %2338 = vmatpush3.bf16.msra.mxu1 %v2493_v62 }
  0x42   : > { %2211 = vmatprep.subr.bf16.mxu0 %v2496_v3  ;;  %2339 = vmatprep.subr.bf16.mxu1 %v2497_v4 }
  0x43   : > { %1087 = vmatprep.mubr.bf16.mxu0 %v1995_v5 }
  0x45   : > { %2212 = vmatpush3.bf16.msra.mxu0 %v2498_v6  ;;  %2340 = vmatpush3.bf16.msra.mxu1 %v2497_v4 }
  0x46   : > { %2249 = vmatprep.subr.bf16.mxu0 %v2502_v7  ;;  %2349 = vmatprep.subr.bf16.mxu1 %v2503_v8 }
  0x48   : > { %1088 = vmatmul.mubr.bf16.vlgmr.msra.gmra.mrb[16].mxu0 %v1994_v10  ;;  %2342 = vmatmul.mubr.bf16.vlgmr.msra.gmra.mrb[0].mxu1 %v2504_v9 }
  0x49   : > { %2250 = vmatpush3.bf16.msra.mxu0 %v2505_v11  ;;  %2350 = vmatpush3.bf16.msra.mxu1 %v2503_v8 }
  0x4a   : > { %2251 = vmatprep.subr.bf16.mxu0 %v2506_v12  ;;  %2351 = vmatprep.subr.bf16.mxu1 %v2507_v13 }
  0x4b   : > { %1095 = vmatprep.mubr.bf16.mxu0 %v2841_v14  ;;  %2345 = vmatprep.mubr.bf16.mxu1 %v2526_v25 }
  0x4d   : > { %2252 = vmatpush3.bf16.msra.mxu0 %v2508_v15  ;;  %2352 = vmatpush3.bf16.msra.mxu1 %v2507_v13 }
  0x4e   : > { %2253 = vmatprep.subr.bf16.mxu0 %v2511_v16  ;;  %2353 = vmatprep.subr.bf16.mxu1 %v2512_v17 }
  0x50   : > { %1096 = vmatmul.mubr.bf16.gmra.mrb[20].mxu0 %v1997_v18  ;;  %2346 = vmatmul.mubr.bf16.gmra.mrb[4].mxu1 %v2528_v26 }
  0x51   : > { %2254 = vmatpush3.bf16.msra.mxu0 %v2513_v19  ;;  %2354 = vmatpush3.bf16.msra.mxu1 %v2512_v17 }
  0x52   : > { %2255 = vmatprep.subr.bf16.mxu0 %v2514_v20  ;;  %2355 = vmatprep.subr.bf16.mxu1 %v2515_v21 }
  0x53   : > { %1103 = vmatprep.mubr.bf16.mxu0 %v2001_v23  ;;  %2365 = vmatprep.mubr.bf16.mxu1 %v2535_v34 }
  0x55   : > { %2256 = vmatpush3.bf16.msra.mxu0 %v2516_v22  ;;  %2356 = vmatpush3.bf16.msra.mxu1 %v2515_v21 }
  0x56   : > { %2257 = vmatprep.subr.bf16.mxu0 %v2519_v24  ;;  %2357 = vmatprep.subr.bf16.mxu1 %v2520_v27 }
  0x58   : > { %1104 = vmatmul.mubr.bf16.gmra.mrb[24].mxu0 %v2000_v28 }
  0x59   : > { %2258 = vmatpush3.bf16.msra.mxu0 %v2521_v29  ;;  %2358 = vmatpush3.bf16.msra.mxu1 %v2520_v27 }
  0x5a   : > { %2259 = vmatprep.subr.bf16.mxu0 %v2522_v30  ;;  %2359 = vmatprep.subr.bf16.mxu1 %v2523_v31 }
  0x5b   : > { %1111 = vmatprep.mubr.bf16.mxu0 %v2004_v33 }
  0x5d   : > { %2260 = vmatpush3.bf16.msra.mxu0 %v2524_v32  ;;  %2360 = vmatpush3.bf16.msra.mxu1 %v2523_v31 }
  0x5e   : > { %2261 = vmatprep.subr.bf16.mxu0 %v2529_v35  ;;  %2361 = vmatprep.subr.bf16.mxu1 %v2530_v36 }
  0x60   : > { %1112 = vmatmul.mubr.bf16.gmra.mrb[28].mxu0 %v2003_v37 }
  0x61   : > { %2262 = vmatpush3.bf16.msra.mxu0 %v2531_v39  ;;  %2362 = vmatpush3.bf16.msra.mxu1 %v2530_v36 }
  0x62   : > { %2263 = vmatprep.subr.bf16.mxu0 %v2532_v41  ;;  %2363 = vmatprep.subr.bf16.mxu1 %v2533_v42  ;;  %v1631_v41 = vld [vmem:[%s2944_s21] sm:$0xff] }
  0x63   : > { %1494 = vmatprep.mubr.bf16.mxu0 %v2841_v14 }
  0x65   : > { %2264 = vmatpush3.bf16.msra.mxu0 %v2534_v43  ;;  %2364 = vmatpush3.bf16.msra.mxu1 %v2533_v42 }
  0x68   : > { %1495 = vmatmul.mubr.bf16.vlgmr.msra.gmra.mrb[32].mxu0 %v1997_v18  ;;  %2366 = vmatmul.mubr.bf16.vlgmr.msra.gmra.mrb[0].mxu1 %v2536_v44 }
  0x69   : > { %1502 = vmatprep.mubr.bf16.mxu0 %v2001_v23  ;;  %2369 = vmatprep.mubr.bf16.mxu1 %v2537_v45 }
  0x70   : > { %1503 = vmatmul.mubr.bf16.gmra.mrb[36].mxu0 %v2000_v28  ;;  %2370 = vmatmul.mubr.bf16.gmra.mrb[4].mxu1 %v2538_v46  ;;  %v1616_v46 = vld [vmem:[%s2938_s16 + $0x8] sm:$0xff] }
  0x71   : > { %1510 = vmatprep.mubr.bf16.mxu0 %v2004_v33 }
  0x78   : > { %1511 = vmatmul.mubr.bf16.gmra.mrb[40].mxu0 %v2003_v37 }
  0x79   : > { %1518 = vmatprep.mubr.bf16.mxu0 %v2104_v47  ;;  %v1632_v47 = vld [vmem:[%s2944_s21 + $0x8] sm:$0xff] }
  0x80   : > { %1519 = vmatmul.mubr.bf16.gmra.mrb[44].mxu0 %v2103_v40  ;;  %v1615_v40 = vld [vmem:[%s2938_s16] sm:$0xff] }
  0xfb   : > { %v2161_v48 = vpop.f32.mrb[0].mxu0 }
  0xfc   : > { %v2162_v49 = vpop.f32.mrb[1].mxu0 }
  0xfd   : > { %v2163_v50 = vadd.f32 %v2162_v49, %v2161_v48  ;;  %v2164_v51 = vpop.f32.mrb[2].mxu0  ;;  %v1623_v49 = vmul.f32 0.2, %v1615_v40 }
  0xfe   : > { %v2165_v52 = vpop.f32.mrb[3].mxu0 }
  0xff   : > { %v2166_v54 = vadd.f32 %v2165_v52, %v2164_v51 }
 0x103   : > { %v2167_v55 = vpop.f32.mrb[4].mxu0 }
 0x104   : > { %v2168_v56 = vpop.f32.mrb[5].mxu0 }
 0x105   : > { %v2169_v57 = vadd.f32 %v2168_v56, %v2167_v55  ;;  %v2170_v58 = vpop.f32.mrb[6].mxu0 }
 0x106   : > { %v2171_v59 = vpop.f32.mrb[7].mxu0 }
 0x107   : > { %v2172_v60 = vadd.f32 %v2171_v59, %v2170_v58  ;;  %v1624_v58 = vmul.f32 0.2, %v1616_v46  ;;  %v1640_v59 = vsub.f32 1.0, %v1632_v47 }
 0x10b   : > { %v2173_v61 = vpop.f32.mrb[8].mxu0 }
 0x10c   : > { %v2174_v62 = vpop.f32.mrb[9].mxu0 }
 0x10d   : > { %v2175_v63 = vadd.f32 %v2174_v62, %v2173_v61  ;;  %v2176_v0 = vpop.f32.mrb[10].mxu0 }
 0x10e   : > { %v2177_v53 = vpop.f32.mrb[11].mxu0 }
 0x10f   : > { %v2178_v1 = vadd.f32 %v2177_v53, %v2176_v0  ;;  %v1633_v0 = vld [vmem:[%s2944_s21 + $0x10] sm:$0xff] }
 0x110   : > { %v1617_v53 = vld [vmem:[%s2938_s16 + $0x10] sm:$0xff] }
 0x113   : > { %v2179_v2 = vpop.f32.mrb[12].mxu0 }
 0x114   : > { %v2180_v3 = vpop.f32.mrb[13].mxu0 }
 0x115   : > { %v2181_v4 = vadd.f32 %v2180_v3, %v2179_v2  ;;  %v2182_v5 = vpop.f32.mrb[14].mxu0 }
 0x116   : > { %v2183_v6 = vpop.f32.mrb[15].mxu0 }
 0x117   : > { %v2184_v7 = vadd.f32 %v2183_v6, %v2182_v5 }
 0x11b   : > { %v2213_v8 = vpop.f32.mrb[16].mxu0 }
 0x11c   : > { %v2214_v9 = vpop.f32.mrb[17].mxu0 }
 0x11d   : > { %v2215_v10 = vadd.f32 %v2214_v9, %v2213_v8  ;;  %v2216_v11 = vpop.f32.mrb[18].mxu0  ;;  %v1620_v8 = vld [vmem:[%s2938_s16 + $0x28] sm:$0xff]  ;;  %v2966_v9 = vld [vmem:[%s2938_s16 + $0x30] sm:$0xff] }
 0x11e   : > { %v2217_v12 = vpop.f32.mrb[19].mxu0 }
 0x11f   : > { %v2376_v13 = vadd.f32 %v2215_v10, %v2163_v50  ;;  %v2218_v14 = vadd.f32 %v2217_v12, %v2216_v11  ;;  %v1639_v50 = vsub.f32 1.0, %v1631_v41  ;;  %v1634_v10 = vld [vmem:[%s2944_s21 + $0x18] sm:$0xff]  ;;  %v1625_v12 = vmul.f32 0.2, %v1617_v53 }
 0x121   : > { %v2382_v15 = vadd.f32 %v2218_v14, %v2166_v54  ;;  %v1647_v62 = vmul.f32 %v1639_v50, %v1623_v49  ;;  %v2976_v14 = vld [vmem:[%s2938_s16 + $0x38] sm:$0xff] }
 0x123   : > { %v2219_v16 = vpop.f32.mrb[20].mxu0 }
 0x124   : > { %v2220_v17 = vpop.f32.mrb[21].mxu0 }
 0x125   : > { %v2221_v18 = vadd.f32 %v2220_v17, %v2219_v16  ;;  %v2222_v19 = vpop.f32.mrb[22].mxu0  ;;  %v1635_v17 = vld [vmem:[%s2944_s21 + $0x20] sm:$0xff] }
 0x126   : > { %v2223_v20 = vpop.f32.mrb[23].mxu0 }
 0x127   : > { %v2921_v21 = vadd.f32 %v2221_v18, %v2169_v57  ;;  %v2224_v22 = vadd.f32 %v2223_v20, %v2222_v19  ;;  %v1636_v18 = vld [vmem:[%s2944_s21 + $0x28] sm:$0xff]  ;;  %v2982_v19 = vld [vmem:[%s2944_s21 + $0x30] sm:$0xff] }
 0x129   : > { %v2923_v23 = vadd.f32 %v2224_v22, %v2172_v60  ;;  %v2955_v60 = vld [vmem:[%s3048_s2] ss:$0 sm:$0xff]  ;;  %v1641_v22 = vsub.f32 1.0, %v1633_v0 }
 0x12b   : > { %v2225_v24 = vpop.f32.mrb[24].mxu0  ;;  %v1649_v41 = vmul.f32 %v1641_v22, %v1625_v12 }
 0x12c   : > { %v2226_v25 = vpop.f32.mrb[25].mxu0 }
 0x12d   : > { %v2227_v26 = vadd.f32 %v2226_v25, %v2225_v24  ;;  %v2228_v27 = vpop.f32.mrb[26].mxu0 }
 0x12e   : > { %v2229_v28 = vpop.f32.mrb[27].mxu0 }
 0x12f   : > { %v2925_v29 = vadd.f32 %v2227_v26, %v2175_v63  ;;  %v2230_v30 = vadd.f32 %v2229_v28, %v2228_v27  ;;  %v2993_v26 = vld [vmem:[%s2944_s21 + $0x38] sm:$0xff] }
 0x131   : > { %v2927_v31 = vadd.f32 %v2230_v30, %v2178_v1  ;;  %v1618_v1 = vld [vmem:[%s2938_s16 + $0x18] sm:$0xff]  ;;  %v1642_v30 = vsub.f32 1.0, %v1634_v10 }
 0x132   : > { %v1626_v28 = vmul.f32 0.2, %v1618_v1 }
 0x133   : > { %v2231_v32 = vpop.f32.mrb[28].mxu0 }
 0x134   : > { %v2232_v33 = vpop.f32.mrb[29].mxu0  ;;  %v1650_v47 = vmul.f32 %v1642_v30, %v1626_v28 }
 0x135   : > { %v2233_v34 = vadd.f32 %v2232_v33, %v2231_v32  ;;  %v2234_v35 = vpop.f32.mrb[30].mxu0 }
 0x136   : > { %v2235_v36 = vpop.f32.mrb[31].mxu0 }
 0x137   : > { %v2932_v37 = vadd.f32 %v2233_v34, %v2181_v4  ;;  %v2236_v38 = vadd.f32 %v2235_v36, %v2234_v35  ;;  %v1648_v4 = vmul.f32 %v1640_v59, %v1624_v58  ;;  %v2565_v36 = vmov 0.0  }
 0x139   : > { %v2946_v39 = vadd.f32 %v2236_v38, %v2184_v7  ;;  %v1619_v7 = vld [vmem:[%s2938_s16 + $0x20] sm:$0xff] }
 0x13a   : > { %v1627_v49 = vmul.f32 0.2, %v1619_v7 }
 0x13b   : > { %v2265_v42 = vpop.f32.mrb[32].mxu0  ;;  %v2367_v43 = vpop.f32.mrb[0].mxu1 }
 0x13c   : > { %v2266_v44 = vpop.f32.mrb[33].mxu0  ;;  %v1561_v45 = vpop.f32.mrb[1].mxu1 }
 0x13d   : > { %v2267_v48 = vadd.f32 %v2266_v44, %v2265_v42  ;;  %v2268_v51 = vpop.f32.mrb[34].mxu0  ;;  %v2368_v52 = vpop.f32.mrb[2].mxu1 }
 0x13e   : > { %v2269_v54 = vpop.f32.mrb[35].mxu0  ;;  %v1564_v55 = vpop.f32.mrb[3].mxu1 }
 0x13f   : > { %v2377_v56 = vadd.f32 %v2376_v13, %v2267_v48  ;;  %v2270_v57 = vadd.f32 %v2269_v54, %v2268_v51  ;;  %v1643_v54 = vsub.f32 1.0, %v1635_v17 }
 0x141   : > { %v2378_v61 = vadd.f32 %v2377_v56, %v1561_v45  ;;  %v2383_v63 = vadd.f32 %v2382_v15, %v2270_v57  ;;  %v1628_v56 = vmul.f32 0.2, %v1620_v8  ;;  %v1644_v57 = vsub.f32 1.0, %v1636_v18 }
 0x143   : > { %v1607_v2 = vadd.f32 %v2378_v61, %v2955_v60  ;;  %v2384_v3 = vadd.f32 %v2383_v63, %v1564_v55  ;;  %v2271_v5 = vpop.f32.mrb[36].mxu0  ;;  %v2961_v6 = vpop.f32.mrb[4].mxu1  ;;  %v1651_v63 = vmul.f32 %v1643_v54, %v1627_v49 }
 0x144   : > { %v2272_v11 = vpop.f32.mrb[37].mxu0  ;;  %v1577_v13 = vpop.f32.mrb[5].mxu1 }
 0x145   : > { %v1655_v15 = vadd.f32 %v1647_v62, %v1607_v2  ;;  %v1608_v16 = vadd.f32 %v2384_v3, %v2955_v60  ;;  %v2273_v20 = vadd.f32 %v2272_v11, %v2271_v5  ;;  %v2274_v24 = vpop.f32.mrb[38].mxu0  ;;  %v2984_v25 = vpop.f32.mrb[6].mxu1  ;;  %v1652_v3 = vmul.f32 %v1644_v57, %v1628_v56 }
 0x146   : > { %v2275_v27 = vpop.f32.mrb[39].mxu0  ;;  %v1580_v32 = vpop.f32.mrb[7].mxu1  ;;  %v1629_v5 = vmul.f32 0.2, %v2966_v9 }
 0x147   : > { %vm1663_vm0 = vcmp.gt.f32.partialorder %v1655_v15, 0.5  ;;  %v1656_v33 = vadd.f32 %v1648_v4, %v1608_v16  ;;  %v2374_v34 = vadd.f32 %v2921_v21, %v2273_v20  ;;  %v2276_v35 = vadd.f32 %v2275_v27, %v2274_v24  ;;  %1687 = vst [vmem:[%s2972_s27] sm:$0xff] %v1655_v15 }
 0x148   : > { %v2131_v38 = vsel %vm1663_vm0, 1.0, %v2565_v36  ;;  %v1646_v15 = vsub.f32 1.0, %v2993_v26 }
 0x149   : > { %vm1664_vm1 = vcmp.gt.f32.partialorder %v1656_v33, 0.5  ;;  %1695 = vst [vmem:[%s2990_s7] sm:$0xff] %v2131_v38  ;;  %v2375_v40 = vadd.f32 %v2374_v34, %v2367_v43  ;;  %v2380_v42 = vadd.f32 %v2923_v23, %v2276_v35  ;;  %1688 = vst [vmem:[%s2972_s27 + $0x8] sm:$0xff] %v1656_v33 }
 0x14a   : > { %v2132_v44 = vsel %vm1664_vm1, 1.0, %v2565_v36 }
 0x14b   : > { %1696 = vst [vmem:[%s2990_s7 + $0x8] sm:$0xff] %v2132_v44  ;;  %v1609_v45 = vadd.f32 %v2375_v40, %v2955_v60  ;;  %v2381_v46 = vadd.f32 %v2380_v42, %v2368_v52  ;;  %v2277_v21 = vpop.f32.mrb[40].mxu0 }
 0x14c   : > { %v2278_v48 = vpop.f32.mrb[41].mxu0 }
 0x14d   : > { %v1657_v50 = vadd.f32 %v1649_v41, %v1609_v45  ;;  %v1610_v51 = vadd.f32 %v2381_v46, %v2955_v60  ;;  %v2279_v43 = vadd.f32 %v2278_v48, %v2277_v21  ;;  %v2280_v23 = vpop.f32.mrb[42].mxu0 }
 0x14e   : > { %v2281_v55 = vpop.f32.mrb[43].mxu0 }
 0x14f   : > { %vm1665_vm2 = vcmp.gt.f32.partialorder %v1657_v50, 0.5  ;;  %v1658_v58 = vadd.f32 %v1650_v47, %v1610_v51  ;;  %v2389_v52 = vadd.f32 %v2925_v29, %v2279_v43  ;;  %v2282_v59 = vadd.f32 %v2281_v55, %v2280_v23  ;;  %1689 = vst [vmem:[%s2972_s27 + $0x10] sm:$0xff] %v1657_v50 }
 0x150   : > { %v2133_v61 = vsel %vm1665_vm2, 1.0, %v2565_v36 }
 0x151   : > { %1697 = vst [vmem:[%s2990_s7 + $0x10] sm:$0xff] %v2133_v61  ;;  %vm1666_vm3 = vcmp.gt.f32.partialorder %v1658_v58, 0.5  ;;  %v2390_v62 = vadd.f32 %v2389_v52, %v1577_v13  ;;  %v2395_v0 = vadd.f32 %v2927_v31, %v2282_v59  ;;  %1690 = vst [vmem:[%s2972_s27 + $0x18] sm:$0xff] %v1658_v58  ;;  %v1645_v31 = vsub.f32 1.0, %v2982_v19 }
 0x152   : > { %v2134_v53 = vsel %vm1666_vm3, 1.0, %v2565_v36  ;;  %v1630_v13 = vmul.f32 0.2, %v2976_v14 }
 0x153   : > { %1698 = vst [vmem:[%s2990_s7 + $0x18] sm:$0xff] %v2134_v53  ;;  %v1611_v1 = vadd.f32 %v2390_v62, %v2955_v60  ;;  %v2396_v2 = vadd.f32 %v2395_v0, %v1580_v32  ;;  %v2283_v29 = vpop.f32.mrb[44].mxu0  ;;  %v1653_v20 = vmul.f32 %v1645_v31, %v1629_v5 }
 0x154   : > { %v2284_v4 = vpop.f32.mrb[45].mxu0  ;;  %v1654_v26 = vmul.f32 %v1646_v15, %v1630_v13 }
 0x155   : > { %v1659_v7 = vadd.f32 %v1651_v63, %v1611_v1  ;;  %v1612_v8 = vadd.f32 %v2396_v2, %v2955_v60  ;;  %v2285_v10 = vadd.f32 %v2284_v4, %v2283_v29  ;;  %v2286_v11 = vpop.f32.mrb[46].mxu0 }
 0x156   : > { %v2287_v12 = vpop.f32.mrb[47].mxu0 }
 0x157   : > { %vm1667_vm4 = vcmp.gt.f32.partialorder %v1659_v7, 0.5  ;;  %v1660_v16 = vadd.f32 %v1652_v3, %v1612_v8  ;;  %v2386_v17 = vadd.f32 %v2932_v37, %v2285_v10  ;;  %v2288_v18 = vadd.f32 %v2287_v12, %v2286_v11  ;;  %1691 = vst [vmem:[%s2972_s27 + $0x20] sm:$0xff] %v1659_v7 }
 0x158   : > { %v2135_v9 = vsel %vm1667_vm4, 1.0, %v2565_v36 }
 0x159   : > { %1699 = vst [vmem:[%s2990_s7 + $0x20] sm:$0xff] %v2135_v9  ;;  %vm1668_vm5 = vcmp.gt.f32.partialorder %v1660_v16, 0.5  ;;  %v2387_v19 = vadd.f32 %v2386_v17, %v2961_v6  ;;  %v2392_v14 = vadd.f32 %v2946_v39, %v2288_v18  ;;  %1692 = vst [vmem:[%s2972_s27 + $0x28] sm:$0xff] %v1660_v16 }
 0x15a   : > { %v2136_v22 = vsel %vm1668_vm5, 1.0, %v2565_v36 }
 0x15b   : > { %1700 = vst [vmem:[%s2990_s7 + $0x28] sm:$0xff] %v2136_v22  ;;  %v1613_v37 = vadd.f32 %v2387_v19, %v2955_v60  ;;  %v2393_v24 = vadd.f32 %v2392_v14, %v2984_v25 }
 0x15d   : > { %v1661_v27 = vadd.f32 %v1653_v20, %v1613_v37  ;;  %v1614_v28 = vadd.f32 %v2393_v24, %v2955_v60 }
 0x15f   : > { %vm1669_vm6 = vcmp.gt.f32.partialorder %v1661_v27, 0.5  ;;  %v1662_v30 = vadd.f32 %v1654_v26, %v1614_v28  ;;  %1693 = vst [vmem:[%s2972_s27 + $0x30] sm:$0xff] %v1661_v27 }
 0x160   : > { %v2137_v6 = vsel %vm1669_vm6, 1.0, %v2565_v36 }
 0x161   : > { %1701 = vst [vmem:[%s2990_s7 + $0x30] sm:$0xff] %v2137_v6  ;;  %vm1670_vm7 = vcmp.gt.f32.partialorder %v1662_v30, 0.5  ;;  %1694 = vst [vmem:[%s2972_s27 + $0x38] sm:$0xff] %v1662_v30 }
 0x162   : > { %v2138_v39 = vsel %vm1670_vm7, 1.0, %v2565_v36 }
 0x163   : > { %1702 = vst [vmem:[%s2990_s7 + $0x38] sm:$0xff] %v2138_v39 }
 0x164 PF: > { %s17_s23 = sadd.s32 1, %s2563_s23   ;;  %s3053_s21 = smov %s2559_s22 }
 0x165   : > { %p14_p5 = scmp.ge.s32.totalorder %s17_s23, 4   ;;  %s3054_s22 = smov %s3056_s24 }
 0x167   :  { %16 = sbr.rel (!%p14_p5) target bundleno = 2 (0x2), region = 93 }

// kernel: closed_call.82
= control target key start
LH: loop header
LB: loop body
LE: loop exit
PB: predicated region body
PF: predicated region fallthrough
CT: control target
= control target key end

     0   :  { %s3301_s13 = smov 0   ;;  %s3303_s14 = smov 0   ;;  %s3876_s0 = inlined_call_operand.vmem [shape: bf16[2,10,8,384], index: 0, kind: input, shape index: {}]   ;;  %s3877_s1 = inlined_call_operand.vmem [shape: bf16[3,384,128], index: 1, kind: input, shape index: {}]   ;;  %s3878_s2 = inlined_call_operand.vmem [shape: f32[1,128], index: 2, kind: input, shape index: {}]   ;;  %s3879_s3 = inlined_call_operand.vmem [shape: f32[2,8,8,128], index: 3, kind: input, shape index: {}, may-alias: {3,7}]   ;;  %s3880_s4 = inlined_call_operand.vmem [shape: f32[2,8,8,128], index: 4, kind: input, shape index: {}, may-alias: {4,8}]   ;;  %s3881_s5 = inlined_call_operand.vmem [shape: f32[2,4,4,128], index: 5, kind: input, shape index: {}, may-alias: {5,9}]   ;;  %s3882_s6 = inlined_call_operand.vmem [shape: f32[2,4,4,128], index: 6, kind: input, shape index: {}, may-alias: {6,10}]   ;;  %s3883_s7 = inlined_call_operand.vmem [shape: f32[2,8,8,128], index: 7, kind: output, shape index: {0}, may-alias: {3,7}]   ;;  %s3884_s8 = inlined_call_operand.vmem [shape: f32[2,8,8,128], index: 8, kind: output, shape index: {1}, may-alias: {4,8}]   ;;  %s3885_s9 = inlined_call_operand.vmem [shape: f32[2,4,4,128], index: 9, kind: output, shape index: {2}, may-alias: {5,9}]   ;;  %s3886_s10 = inlined_call_operand.vmem [shape: f32[2,4,4,128], index: 10, kind: output, shape index: {3}, may-alias: {6,10}]  }
   0x1   :  { %s3305_s15 = smov 0  }
   0x2 LB: > { %s33_s16 = sadd.s32 1, %s3238_s14  ;;  %p2546_p0 = scmp.ge.s32.totalorder %s3242_s15, 1  ;;  %s3242_s15 = sphi %s3305_s15, %s21_s15   ;;  %s3238_s14 = sphi %s3303_s14, %s3888_s14   ;;  %s3234_s13 = sphi %s3301_s13, %s3887_s13  }
   0x3   : > { %p35_p1 = scmp.ge.s32.totalorder %s33_s16, 2  ;;  %p407_p2 = scmp.lt.s32.totalorder %s3242_s15, 3 }
   0x5   : > { %s3890_s16 = smov (%p35_p1, %s33_s16), 0  ;;  %p408_p3 = pnand %p2546_p0, %p407_p2 }
   0x6   : > { %v3118_v0 = vld [vmem:[%s3877_s1 + $0x100] sm:$0xff] (!%p408_p3)   ;;  %v3121_v3 = vld [vmem:[%s3877_s1 + $0x108] sm:$0xff] (!%p408_p3)   ;;  %v3124_v6 = vld [vmem:[%s3877_s1 + $0x110] sm:$0xff] (!%p408_p3)   ;;  %p512_p4 = scmp.lt.s32.totalorder (!%p408_p3), %s3234_s13, 1  ;;  %vm2021_vm2 = vcmask (!%p408_p3), 1041408   ;;  %vm2186_vm5 = vcmask (!%p408_p3), 1041409  }
   0x7   : > { %411 = sbr.rel (%p408_p3) target bundleno = 402 (0x192), region = 48  ;;  %v3119_v1 = vld [vmem:[%s3877_s1 + $0x140] sm:$0xff] (!%p408_p3)   ;;  %2823 = vmatprep.subr.bf16.mxu0 (!%p408_p3), %v3118_v0  ;;  %v3122_v4 = vld [vmem:[%s3877_s1 + $0x148] sm:$0xff] (!%p408_p3)   ;;  %v3125_v7 = vld [vmem:[%s3877_s1 + $0x150] sm:$0xff] (!%p408_p3)   ;;  %vm2188_vm6 = vcmask (!%p408_p3), 1042434   ;;  %vm2190_vm7 = vcmask (!%p408_p3), 1043459  }
   0x8   : > { %v3120_v2 = vld [vmem:[%s3877_s1 + $0xc0] sm:$0xff] (!%p408_p3)   ;;  %2979 = vmatprep.subr.bf16.mxu1 (!%p408_p3), %v3119_v1  ;;  %v3123_v5 = vld [vmem:[%s3877_s1 + $0xc8] sm:$0xff] (!%p408_p3)   ;;  %v3126_v8 = vld [vmem:[%s3877_s1 + $0xd0] sm:$0xff] (!%p408_p3)  }
   0x9   : > { %2824 = vmatpush3.bf16.msra.mxu0 (!%p408_p3), %v3120_v2  ;;  %2980 = vmatpush3.bf16.msra.mxu1 (!%p408_p3), %v3119_v1  ;;  %v3127_v9 = vld [vmem:[%s3877_s1 + $0x118] sm:$0xff] (!%p408_p3)   ;;  %v3130_v12 = vld [vmem:[%s3877_s1 + $0x120] sm:$0xff] (!%p408_p3)   ;;  %v3133_v15 = vld [vmem:[%s3877_s1 + $0x128] sm:$0xff] (!%p408_p3)  }
   0xa   : > { %2825 = vmatprep.subr.bf16.mxu0 (!%p408_p3), %v3121_v3  ;;  %2981 = vmatprep.subr.bf16.mxu1 (!%p408_p3), %v3122_v4  ;;  %v3128_v10 = vld [vmem:[%s3877_s1 + $0x158] sm:$0xff] (!%p408_p3)   ;;  %v3131_v13 = vld [vmem:[%s3877_s1 + $0x160] sm:$0xff] (!%p408_p3)   ;;  %v3134_v16 = vld [vmem:[%s3877_s1 + $0x168] sm:$0xff] (!%p408_p3)  }
   0xb   : > { %v3129_v11 = vld [vmem:[%s3877_s1 + $0xd8] sm:$0xff] (!%p408_p3)   ;;  %v3132_v14 = vld [vmem:[%s3877_s1 + $0xe0] sm:$0xff] (!%p408_p3)   ;;  %v3135_v17 = vld [vmem:[%s3877_s1 + $0xe8] sm:$0xff] (!%p408_p3)  }
   0xc   : > { %v3136_v18 = vld [vmem:[%s3877_s1 + $0x130] sm:$0xff] (!%p408_p3)   ;;  %v3139_v21 = vld [vmem:[%s3877_s1 + $0x138] sm:$0xff] (!%p408_p3)   ;;  %v3145_v28 = vld [vmem:[%s3877_s1 + $0x40] sm:$0xff] (!%p408_p3)  }
   0xd   : > { %2826 = vmatpush3.bf16.msra.mxu0 (!%p408_p3), %v3123_v5  ;;  %2982 = vmatpush3.bf16.msra.mxu1 (!%p408_p3), %v3122_v4  ;;  %v3137_v19 = vld [vmem:[%s3877_s1 + $0x170] sm:$0xff] (!%p408_p3)   ;;  %v3140_v22 = vld [vmem:[%s3877_s1 + $0x178] sm:$0xff] (!%p408_p3)   ;;  %v3146_v29 = vld [vmem:[%s3877_s1 + $0x80] sm:$0xff] (!%p408_p3)  }
   0xe   : > { %2827 = vmatprep.subr.bf16.mxu0 %v3124_v6  ;;  %2983 = vmatprep.subr.bf16.mxu1 %v3125_v7  ;;  %s3892_s13 = smov (!%p512_p4, %s3234_s13), 1  ;;  %v3138_v20 = vld [vmem:[%s3877_s1 + $0xf0] sm:$0xff]   ;;  %v3141_v27 = vld [vmem:[%s3877_s1 + $0xf8] sm:$0xff]   ;;  %v3148_v31 = vld [vmem:[%s3877_s1] sm:$0xff]  }
   0xf   : > { %s3091_s19 = smul.u32 120, %s3892_s13  ;;  %v3149_v33 = vld [vmem:[%s3877_s1 + $0x48] sm:$0xff]   ;;  %v3154_v39 = vld [vmem:[%s3877_s1 + $0x50] sm:$0xff]   ;;  %v3157_v45 = vld [vmem:[%s3877_s1 + $0x58] sm:$0xff]   ;;  %s3657_s18 = sshll.u32 %s3892_s13, 4 }
  0x10   : > { %v3150_v34 = vld [vmem:[%s3877_s1 + $0x88] sm:$0xff]   ;;  %v3155_v40 = vld [vmem:[%s3877_s1 + $0x90] sm:$0xff]   ;;  %v3158_v46 = vld [vmem:[%s3877_s1 + $0x98] sm:$0xff]   ;;  %s3671_s22 = scalar_lea.vmem %s3881_s5, %s3657_s18  ;;  %s3680_s25 = scalar_lea.vmem %s3882_s6, %s3657_s18 }
  0x11   : > { %2828 = vmatpush3.bf16.msra.mxu0 %v3126_v8  ;;  %2984 = vmatpush3.bf16.msra.mxu1 %v3125_v7  ;;  %s3389_s28 = scalar_lea.vmem %s3876_s0, %s3091_s19  ;;  %v3151_v38 = vld [vmem:[%s3877_s1 + $0x8] sm:$0xff]   ;;  %v3156_v42 = vld [vmem:[%s3877_s1 + $0x10] sm:$0xff]   ;;  %v3159_v48 = vld [vmem:[%s3877_s1 + $0x18] sm:$0xff]   ;;  %s3786_s19 = scalar_lea.vmem %s3885_s9, %s3657_s18 }
  0x12   : > { %2829 = vmatprep.subr.bf16.mxu0 %v3127_v9  ;;  %2985 = vmatprep.subr.bf16.mxu1 %v3128_v10  ;;  %v3401_v23 = vld [vmem:[%s3389_s28 + $0xc] sm:$0xff]  ;;  %v3404_v24 = vld [vmem:[%s3389_s28 + $0x18] sm:$0xff]  ;;  %v3144_v26 = vld [vmem:[%s3389_s28 + $0x14] ss:$12 sps:$4 sm:$0xff]   ;;  %s3802_s21 = scalar_lea.vmem %s3886_s10, %s3657_s18 }
  0x13   : > { %v2629_v25 = vcombine.high %v3401_v23, %v3404_v24  ;;  %2995 = vmatprep.mubr.bf16.mxu1 %v3144_v26  ;;  %v3147_v30 = vld [vmem:[%s3389_s28 + $0x2c] ss:$12 sps:$4 sm:$0xff]   ;;  %v2628_v32 = vcombine.low %v3401_v23, %v3404_v24  ;;  %v3431_v35 = vld [vmem:[%s3389_s28 + $0x24] sm:$0xff]  ;;  %v3434_v36 = vld [vmem:[%s3389_s28 + $0x30] sm:$0xff] }
  0x14   : > { %v2632_v37 = vcombine.high %v3431_v35, %v3434_v36  ;;  %v2631_v41 = vcombine.low %v3431_v35, %v3434_v36  ;;  %v3453_v43 = vld [vmem:[%s3389_s28 + $0x3c] sm:$0xff]  ;;  %v3456_v44 = vld [vmem:[%s3389_s28 + $0x48] sm:$0xff]  ;;  %v3479_v52 = vld [vmem:[%s3389_s28 + $0x54] sm:$0xff] }
  0x15   : > { %2830 = vmatpush3.bf16.msra.mxu0 %v3129_v11  ;;  %2986 = vmatpush3.bf16.msra.mxu1 %v3128_v10  ;;  %v2635_v47 = vcombine.high %v3453_v43, %v3456_v44  ;;  %v3162_v49 = vld [vmem:[%s3877_s1 + $0x60] sm:$0xff]   ;;  %v2634_v54 = vcombine.low %v3453_v43, %v3456_v44  ;;  %v3165_v56 = vld [vmem:[%s3877_s1 + $0x68] sm:$0xff]   ;;  %v3171_v61 = vld [vmem:[%s3877_s1 + $0x70] sm:$0xff]  }
  0x16   : > { %2831 = vmatprep.subr.bf16.mxu0 %v3130_v12  ;;  %2987 = vmatprep.subr.bf16.mxu1 %v3131_v13  ;;  %v3163_v50 = vld [vmem:[%s3877_s1 + $0xa0] sm:$0xff]   ;;  %v3166_v57 = vld [vmem:[%s3877_s1 + $0xa8] sm:$0xff]   ;;  %v3172_v62 = vld [vmem:[%s3877_s1 + $0xb0] sm:$0xff]  }
  0x17   : > { %975 = vmatprep.mubr.bf16.mxu0 %v2629_v25  ;;  %v3164_v51 = vld [vmem:[%s3877_s1 + $0x20] sm:$0xff]   ;;  %v3173_v59 = vld [vmem:[%s3389_s28 + $0x5c] ss:$12 sps:$4 sm:$0xff]   ;;  %v3174_v63 = vld [vmem:[%s3877_s1 + $0x30] sm:$0xff]  }
  0x18   : > { %v3482_v53 = vld [vmem:[%s3389_s28 + $0x60] sm:$0xff]  ;;  %v3167_v60 = vld [vmem:[%s3877_s1 + $0x28] sm:$0xff]   ;;  %v3175_v3 = vld [vmem:[%s3877_s1 + $0x78] sm:$0xff]  }
  0x19   : > { %2832 = vmatpush3.bf16.msra.mxu0 %v3132_v14  ;;  %2988 = vmatpush3.bf16.msra.mxu1 %v3131_v13  ;;  %v3170_v55 = vld [vmem:[%s3389_s28 + $0x44] ss:$12 sps:$4 sm:$0xff]   ;;  %v2638_v58 = vcombine.high %v3479_v52, %v3482_v53  ;;  %v2637_v1 = vcombine.low %v3479_v52, %v3482_v53  ;;  %v3180_v2 = vld [vmem:[%s3389_s28 + $0x8] ss:$12 sps:$4 sm:$0xff]   ;;  %v3176_v4 = vld [vmem:[%s3877_s1 + $0xb8] sm:$0xff]   ;;  %v3541_v14 = vcombine.high %v3404_v24, %v3431_v35 }
  0x1a   : > { %2833 = vmatprep.subr.bf16.mxu0 %v3133_v15  ;;  %2989 = vmatprep.subr.bf16.mxu1 %v3134_v16  ;;  %v602_v0 = vld [vmem:[%s3389_s28] sm:$0xff]  ;;  %v3177_v6 = vld [vmem:[%s3877_s1 + $0x38] sm:$0xff]   ;;  %v3185_v12 = vld [vmem:[%s3877_s1 + $0x1c8] sm:$0xff]  }
  0x1b   : > { %v2665_v5 = vcombine.high %v602_v0, %v3401_v23  ;;  %v3181_v7 = vld [vmem:[%s3877_s1 + $0x1c0] sm:$0xff]   ;;  %v2664_v10 = vcombine.low %v602_v0, %v3401_v23  ;;  %v3186_v13 = vld [vmem:[%s3877_s1 + $0x208] sm:$0xff]   ;;  %v2671_v23 = vcombine.high %v3434_v36, %v3453_v43  ;;  %v3207_v26 = vld [vmem:[%s3389_s28 + $0x50] ss:$12 sps:$4 sm:$0xff]  }
  0x1c   : > { %v3182_v8 = vld [vmem:[%s3877_s1 + $0x200] sm:$0xff]   ;;  %v3187_v15 = vld [vmem:[%s3877_s1 + $0x188] sm:$0xff]  }
  0x1d   : > { %2834 = vmatpush3.bf16.msra.mxu0 %v3135_v17  ;;  %2990 = vmatpush3.bf16.msra.mxu1 %v3134_v16  ;;  %v3183_v9 = vld [vmem:[%s3389_s28 + $0x20] ss:$12 sps:$4 sm:$0xff]   ;;  %v3190_v16 = vld [vmem:[%s3877_s1 + $0x1d0] sm:$0xff]   ;;  %v3205_v25 = vld [vmem:[%s3389_s28 + $0x38] ss:$12 sps:$4 sm:$0xff]  }
  0x1e   : > { %2835 = vmatprep.subr.bf16.mxu0 %v3136_v18  ;;  %2991 = vmatprep.subr.bf16.mxu1 %v3137_v19  ;;  %v3184_v11 = vld [vmem:[%s3877_s1 + $0x180] sm:$0xff]   ;;  %v3191_v17 = vld [vmem:[%s3877_s1 + $0x210] sm:$0xff]   ;;  %v2667_v18 = vcombine.low %v3404_v24, %v3431_v35 }
  0x1f   : > { %v3198_v24 = vld [vmem:[%s3877_s1 + $0x1e0] sm:$0xff]   ;;  %v3208_v35 = vld [vmem:[%s3877_s1 + $0x1f0] sm:$0xff]  }
  0x21   : > { %2836 = vmatpush3.bf16.msra.mxu0 %v3138_v20  ;;  %2992 = vmatpush3.bf16.msra.mxu1 %v3137_v19  ;;  %v3192_v19 = vld [vmem:[%s3877_s1 + $0x190] sm:$0xff]   ;;  %v3193_v20 = vld [vmem:[%s3877_s1 + $0x1d8] sm:$0xff]  }
  0x22   : > { %2837 = vmatprep.subr.bf16.mxu0 %v3139_v21  ;;  %2993 = vmatprep.subr.bf16.mxu1 %v3140_v22  ;;  %v3194_v21 = vld [vmem:[%s3877_s1 + $0x218] sm:$0xff]  }
  0x25   : > { %2838 = vmatpush3.bf16.msra.mxu0 %v3141_v27  ;;  %2994 = vmatpush3.bf16.msra.mxu1 %v3140_v22  ;;  %v3195_v22 = vld [vmem:[%s3877_s1 + $0x198] sm:$0xff]   ;;  %v3199_v27 = vld [vmem:[%s3877_s1 + $0x220] sm:$0xff]  }
  0x26   : > { %2875 = vmatprep.subr.bf16.mxu0 %v3145_v28  ;;  %3003 = vmatprep.subr.bf16.mxu1 %v3146_v29  ;;  %v2670_v28 = vcombine.low %v3434_v36, %v3453_v43  ;;  %v3209_v36 = vld [vmem:[%s3877_s1 + $0x230] sm:$0xff]   ;;  %v3213_v43 = vld [vmem:[%s3877_s1 + $0x1b8] sm:$0xff]  }
  0x28   : > { %976 = vmatmul.mubr.bf16.vlgmr.msra.gmra.mrb[0].mxu0 %v2628_v32  ;;  %2996 = vmatmul.mubr.bf16.vlgmr.msra.gmra.mrb[0].mxu1 %v3147_v30  ;;  %v3201_v30 = vld [vmem:[%s3877_s1 + $0x1e8] sm:$0xff]  }
  0x29   : > { %2876 = vmatpush3.bf16.msra.mxu0 %v3148_v31  ;;  %3004 = vmatpush3.bf16.msra.mxu1 %v3146_v29  ;;  %v3200_v29 = vld [vmem:[%s3877_s1 + $0x1a0] sm:$0xff]   ;;  %v3202_v31 = vld [vmem:[%s3877_s1 + $0x228] sm:$0xff]  }
  0x2a   : > { %2877 = vmatprep.subr.bf16.mxu0 %v3149_v33  ;;  %3005 = vmatprep.subr.bf16.mxu1 %v3150_v34  ;;  %v3203_v32 = vld [vmem:[%s3877_s1 + $0x1a8] sm:$0xff]   ;;  %v2674_v33 = vcombine.high %v3456_v44, %v3479_v52 }
  0x2b   : > { %983 = vmatprep.mubr.bf16.mxu0 %v2632_v37  ;;  %2999 = vmatprep.mubr.bf16.mxu1 %v3170_v55  ;;  %v2673_v37 = vcombine.low %v3456_v44, %v3479_v52  ;;  %v3215_v44 = vld [vmem:[%s3389_s28 + $0x38] ss:$12 sps:$4 sm:$0xff]  }
  0x2d   : > { %2878 = vmatpush3.bf16.msra.mxu0 %v3151_v38  ;;  %3006 = vmatpush3.bf16.msra.mxu1 %v3150_v34  ;;  %v3214_v34 = vld [vmem:[%s3389_s28 + $0x20] ss:$12 sps:$4 sm:$0xff]  }
  0x2e   : > { %2879 = vmatprep.subr.bf16.mxu0 %v3154_v39  ;;  %3007 = vmatprep.subr.bf16.mxu1 %v3155_v40  ;;  %v2714_v38 = vld [vmem:[%s3389_s28 + $0x6c] sm:$0xff] }
  0x2f   : > { %v3210_v39 = vld [vmem:[%s3877_s1 + $0x1b0] sm:$0xff]  }
  0x30   : > { %984 = vmatmul.mubr.bf16.gmra.mrb[4].mxu0 %v2631_v41  ;;  %3000 = vmatmul.mubr.bf16.gmra.mrb[4].mxu1 %v3173_v59  ;;  %v3211_v41 = vld [vmem:[%s3877_s1 + $0x1f8] sm:$0xff]  }
  0x31   : > { %2880 = vmatpush3.bf16.msra.mxu0 %v3156_v42  ;;  %3008 = vmatpush3.bf16.msra.mxu1 %v3155_v40  ;;  %v2773_v40 = vcombine.low %v3482_v53, %v2714_v38  ;;  %v3212_v42 = vld [vmem:[%s3877_s1 + $0x238] sm:$0xff]  }
  0x32   : > { %2881 = vmatprep.subr.bf16.mxu0 %v3157_v45  ;;  %3009 = vmatprep.subr.bf16.mxu1 %v3158_v46  ;;  %v3216_v45 = vld [vmem:[%s3389_s28 + $0x50] ss:$12 sps:$4 sm:$0xff]  }
  0x33   : > { %991 = vmatprep.mubr.bf16.mxu0 %v2635_v47  ;;  %3019 = vmatprep.mubr.bf16.mxu1 %v3180_v2  ;;  %v2774_v47 = vcombine.high %v3482_v53, %v2714_v38 }
  0x35   : > { %2882 = vmatpush3.bf16.msra.mxu0 %v3159_v48  ;;  %3010 = vmatpush3.bf16.msra.mxu1 %v3158_v46  ;;  %v3217_v46 = vld [vmem:[%s3389_s28 + $0x68] ss:$12 sps:$4 sm:$0xff]   ;;  %s3630_s28 = sshll.u32 %s3892_s13, 6 }
  0x36   : > { %2883 = vmatprep.subr.bf16.mxu0 %v3162_v49  ;;  %3011 = vmatprep.subr.bf16.mxu1 %v3163_v50  ;;  %s3636_s30 = scalar_lea.vmem %s3879_s3, %s3630_s28  ;;  %s3642_s17 = scalar_lea.vmem %s3880_s4, %s3630_s28 }
  0x37   : > { %s3695_s29 = scalar_lea.vmem %s3883_s7, %s3630_s28 }
  0x38   : > { %992 = vmatmul.mubr.bf16.gmra.mrb[8].mxu0 %v2634_v54 }
  0x39   : > { %2884 = vmatpush3.bf16.msra.mxu0 %v3164_v51  ;;  %3012 = vmatpush3.bf16.msra.mxu1 %v3163_v50 }
  0x3a   : > { %2885 = vmatprep.subr.bf16.mxu0 %v3165_v56  ;;  %3013 = vmatprep.subr.bf16.mxu1 %v3166_v57 }
  0x3b   : > { %999 = vmatprep.mubr.bf16.mxu0 %v2638_v58 }
  0x3d   : > { %2886 = vmatpush3.bf16.msra.mxu0 %v3167_v60  ;;  %3014 = vmatpush3.bf16.msra.mxu1 %v3166_v57 }
  0x3e   : > { %2887 = vmatprep.subr.bf16.mxu0 %v3171_v61  ;;  %3015 = vmatprep.subr.bf16.mxu1 %v3172_v62 }
  0x40   : > { %1000 = vmatmul.mubr.bf16.gmra.mrb[12].mxu0 %v2637_v1 }
  0x41   : > { %2888 = vmatpush3.bf16.msra.mxu0 %v3174_v63  ;;  %3016 = vmatpush3.bf16.msra.mxu1 %v3172_v62 }
  0x42   : > { %2889 = vmatprep.subr.bf16.mxu0 %v3175_v3  ;;  %3017 = vmatprep.subr.bf16.mxu1 %v3176_v4 }
  0x43   : > { %1313 = vmatprep.mubr.bf16.mxu0 %v2665_v5 }
  0x45   : > { %2890 = vmatpush3.bf16.msra.mxu0 %v3177_v6  ;;  %3018 = vmatpush3.bf16.msra.mxu1 %v3176_v4 }
  0x46   : > { %2927 = vmatprep.subr.bf16.mxu0 %v3181_v7  ;;  %3027 = vmatprep.subr.bf16.mxu1 %v3182_v8 }
  0x48   : > { %1314 = vmatmul.mubr.bf16.vlgmr.msra.gmra.mrb[16].mxu0 %v2664_v10  ;;  %3020 = vmatmul.mubr.bf16.vlgmr.msra.gmra.mrb[0].mxu1 %v3183_v9 }
  0x49   : > { %2928 = vmatpush3.bf16.msra.mxu0 %v3184_v11  ;;  %3028 = vmatpush3.bf16.msra.mxu1 %v3182_v8 }
  0x4a   : > { %2929 = vmatprep.subr.bf16.mxu0 %v3185_v12  ;;  %3029 = vmatprep.subr.bf16.mxu1 %v3186_v13 }
  0x4b   : > { %1321 = vmatprep.mubr.bf16.mxu0 %v3541_v14  ;;  %3023 = vmatprep.mubr.bf16.mxu1 %v3205_v25 }
  0x4d   : > { %2930 = vmatpush3.bf16.msra.mxu0 %v3187_v15  ;;  %3030 = vmatpush3.bf16.msra.mxu1 %v3186_v13 }
  0x4e   : > { %2931 = vmatprep.subr.bf16.mxu0 %v3190_v16  ;;  %3031 = vmatprep.subr.bf16.mxu1 %v3191_v17 }
  0x50   : > { %1322 = vmatmul.mubr.bf16.gmra.mrb[20].mxu0 %v2667_v18  ;;  %3024 = vmatmul.mubr.bf16.gmra.mrb[4].mxu1 %v3207_v26 }
  0x51   : > { %2932 = vmatpush3.bf16.msra.mxu0 %v3192_v19  ;;  %3032 = vmatpush3.bf16.msra.mxu1 %v3191_v17 }
  0x52   : > { %2933 = vmatprep.subr.bf16.mxu0 %v3193_v20  ;;  %3033 = vmatprep.subr.bf16.mxu1 %v3194_v21 }
  0x53   : > { %1329 = vmatprep.mubr.bf16.mxu0 %v2671_v23  ;;  %3043 = vmatprep.mubr.bf16.mxu1 %v3214_v34 }
  0x55   : > { %2934 = vmatpush3.bf16.msra.mxu0 %v3195_v22  ;;  %3034 = vmatpush3.bf16.msra.mxu1 %v3194_v21 }
  0x56   : > { %2935 = vmatprep.subr.bf16.mxu0 %v3198_v24  ;;  %3035 = vmatprep.subr.bf16.mxu1 %v3199_v27 }
  0x58   : > { %1330 = vmatmul.mubr.bf16.gmra.mrb[24].mxu0 %v2670_v28 }
  0x59   : > { %2936 = vmatpush3.bf16.msra.mxu0 %v3200_v29  ;;  %3036 = vmatpush3.bf16.msra.mxu1 %v3199_v27 }
  0x5a   : > { %2937 = vmatprep.subr.bf16.mxu0 %v3201_v30  ;;  %3037 = vmatprep.subr.bf16.mxu1 %v3202_v31 }
  0x5b   : > { %1337 = vmatprep.mubr.bf16.mxu0 %v2674_v33 }
  0x5d   : > { %2938 = vmatpush3.bf16.msra.mxu0 %v3203_v32  ;;  %3038 = vmatpush3.bf16.msra.mxu1 %v3202_v31 }
  0x5e   : > { %2939 = vmatprep.subr.bf16.mxu0 %v3208_v35  ;;  %3039 = vmatprep.subr.bf16.mxu1 %v3209_v36 }
  0x60   : > { %1338 = vmatmul.mubr.bf16.gmra.mrb[28].mxu0 %v2673_v37 }
  0x61   : > { %2940 = vmatpush3.bf16.msra.mxu0 %v3210_v39  ;;  %3040 = vmatpush3.bf16.msra.mxu1 %v3209_v36  ;;  %v1841_v39 = vld [vmem:[%s3636_s30] sm:$0xff] }
  0x62   : > { %2941 = vmatprep.subr.bf16.mxu0 %v3211_v41  ;;  %3041 = vmatprep.subr.bf16.mxu1 %v3212_v42  ;;  %v1857_v41 = vld [vmem:[%s3642_s17] sm:$0xff] }
  0x63   : > { %1720 = vmatprep.mubr.bf16.mxu0 %v3541_v14 }
  0x65   : > { %2942 = vmatpush3.bf16.msra.mxu0 %v3213_v43  ;;  %3042 = vmatpush3.bf16.msra.mxu1 %v3212_v42 }
  0x68   : > { %1721 = vmatmul.mubr.bf16.vlgmr.msra.gmra.mrb[32].mxu0 %v2667_v18  ;;  %3044 = vmatmul.mubr.bf16.vlgmr.msra.gmra.mrb[0].mxu1 %v3215_v44  ;;  %v1849_v44 = vmul.f32 0.2, %v1841_v39 }
  0x69   : > { %1728 = vmatprep.mubr.bf16.mxu0 %v2671_v23  ;;  %3047 = vmatprep.mubr.bf16.mxu1 %v3216_v45 }
  0x70   : > { %1729 = vmatmul.mubr.bf16.gmra.mrb[36].mxu0 %v2670_v28  ;;  %3048 = vmatmul.mubr.bf16.gmra.mrb[4].mxu1 %v3217_v46 }
  0x71   : > { %1736 = vmatprep.mubr.bf16.mxu0 %v2674_v33 }
  0x78   : > { %1737 = vmatmul.mubr.bf16.gmra.mrb[40].mxu0 %v2673_v37 }
  0x79   : > { %1744 = vmatprep.mubr.bf16.mxu0 %v2774_v47  ;;  %v1865_v47 = vsub.f32 1.0, %v1857_v41 }
  0x80   : > { %1745 = vmatmul.mubr.bf16.gmra.mrb[44].mxu0 %v2773_v40 }
  0xfb   : > { %v2839_v48 = vpop.f32.mrb[0].mxu0 }
  0xfc   : > { %v2840_v49 = vpop.f32.mrb[1].mxu0 }
  0xfd   : > { %v2841_v50 = vadd.f32 %v2840_v49, %v2839_v48  ;;  %v2842_v51 = vpop.f32.mrb[2].mxu0  ;;  %v1842_v48 = vld [vmem:[%s3636_s30 + $0x8] sm:$0xff] }
  0xfe   : > { %v2843_v52 = vpop.f32.mrb[3].mxu0  ;;  %v1858_v49 = vld [vmem:[%s3642_s17 + $0x8] sm:$0xff] }
  0xff   : > { %v2844_v54 = vadd.f32 %v2843_v52, %v2842_v51 }
 0x103   : > { %v2845_v55 = vpop.f32.mrb[4].mxu0 }
 0x104   : > { %v2846_v56 = vpop.f32.mrb[5].mxu0 }
 0x105   : > { %v2847_v57 = vadd.f32 %v2846_v56, %v2845_v55  ;;  %v2848_v58 = vpop.f32.mrb[6].mxu0 }
 0x106   : > { %v2849_v59 = vpop.f32.mrb[7].mxu0 }
 0x107   : > { %v2850_v60 = vadd.f32 %v2849_v59, %v2848_v58 }
 0x10b   : > { %v2851_v61 = vpop.f32.mrb[8].mxu0 }
 0x10c   : > { %v2852_v62 = vpop.f32.mrb[9].mxu0 }
 0x10d   : > { %v2853_v63 = vadd.f32 %v2852_v62, %v2851_v61  ;;  %v2854_v0 = vpop.f32.mrb[10].mxu0  ;;  %v1850_v61 = vmul.f32 0.2, %v1842_v48  ;;  %v3660_v62 = vld [vmem:[%s3642_s17 + $0x10] sm:$0xff] }
 0x10e   : > { %v2855_v53 = vpop.f32.mrb[11].mxu0 }
 0x10f   : > { %v2856_v1 = vadd.f32 %v2855_v53, %v2854_v0  ;;  %v3665_v0 = vld [vmem:[%s3878_s2] ss:$0 sm:$0xff]  ;;  %v1873_v53 = vmul.f32 %v1865_v47, %v1849_v44 }
 0x113   : > { %v2857_v2 = vpop.f32.mrb[12].mxu0 }
 0x114   : > { %v2858_v3 = vpop.f32.mrb[13].mxu0 }
 0x115   : > { %v2859_v4 = vadd.f32 %v2858_v3, %v2857_v2  ;;  %v2860_v5 = vpop.f32.mrb[14].mxu0  ;;  %v1860_v3 = vld [vmem:[%s3642_s17 + $0x18] sm:$0xff] }
 0x116   : > { %v2861_v6 = vpop.f32.mrb[15].mxu0 }
 0x117   : > { %v2862_v7 = vadd.f32 %v2861_v6, %v2860_v5  ;;  %v1843_v5 = vld [vmem:[%s3636_s30 + $0x10] sm:$0xff]  ;;  %v1844_v6 = vld [vmem:[%s3636_s30 + $0x18] sm:$0xff] }
 0x11b   : > { %v2891_v8 = vpop.f32.mrb[16].mxu0 }
 0x11c   : > { %v2892_v9 = vpop.f32.mrb[17].mxu0 }
 0x11d   : > { %v2893_v10 = vadd.f32 %v2892_v9, %v2891_v8  ;;  %v2894_v11 = vpop.f32.mrb[18].mxu0  ;;  %v1851_v8 = vmul.f32 0.2, %v1843_v5  ;;  %v1867_v9 = vsub.f32 1.0, %v3660_v62 }
 0x11e   : > { %v2895_v12 = vpop.f32.mrb[19].mxu0 }
 0x11f   : > { %v3054_v13 = vadd.f32 %v2893_v10, %v2841_v50  ;;  %v2896_v14 = vadd.f32 %v2895_v12, %v2894_v11  ;;  %v1852_v10 = vmul.f32 0.2, %v1844_v6  ;;  %v1845_v11 = vld [vmem:[%s3636_s30 + $0x20] sm:$0xff] }
 0x121   : > { %v3060_v15 = vadd.f32 %v2896_v14, %v2844_v54  ;;  %v1941_v54 = vlaneseq  ;;  %v1861_v14 = vld [vmem:[%s3642_s17 + $0x20] sm:$0xff] }
 0x122   : > { %v1869_v47 = vsub.f32 1.0, %v1861_v14 }
 0x123   : > { %v2897_v16 = vpop.f32.mrb[20].mxu0 }
 0x124   : > { %v2898_v17 = vpop.f32.mrb[21].mxu0 }
 0x125   : > { %v2899_v18 = vadd.f32 %v2898_v17, %v2897_v16  ;;  %v2900_v19 = vpop.f32.mrb[22].mxu0  ;;  %v2150_v17 = vld [vmem:[%s3671_s22] sm:$0xf] }
 0x126   : > { %v2901_v20 = vpop.f32.mrb[23].mxu0  ;;  %v2154_v44 = vmul.f32 0.2, %v2150_v17 }
 0x127   : > { %v3621_v21 = vadd.f32 %v2899_v18, %v2847_v57  ;;  %v2902_v22 = vadd.f32 %v2901_v20, %v2900_v19  ;;  %v3244_v57 = vmov 1983009808   ;;  %v1868_v20 = vsub.f32 1.0, %v1860_v3 }
 0x128   : > { %v1939_v58 = vunpack.c.l.s4 %v3244_v57 }
 0x129   : > { %v3623_v23 = vadd.f32 %v2902_v22, %v2850_v60  ;;  %v1846_v22 = vld [vmem:[%s3636_s30 + $0x28] sm:$0xff]  ;;  %v1876_v62 = vmul.f32 %v1868_v20, %v1852_v10 }
 0x12a   : > { %v1854_v41 = vmul.f32 0.2, %v1846_v22 }
 0x12b   : > { %v2903_v24 = vpop.f32.mrb[24].mxu0 }
 0x12c   : > { %v2904_v25 = vpop.f32.mrb[25].mxu0 }
 0x12d   : > { %v2905_v26 = vadd.f32 %v2904_v25, %v2903_v24  ;;  %v2906_v27 = vpop.f32.mrb[26].mxu0  ;;  %v1863_v24 = vld [vmem:[%s3642_s17 + $0x30] sm:$0xff]  ;;  %v3699_v25 = vld [vmem:[%s3642_s17 + $0x38] sm:$0xff] }
 0x12e   : > { %v2907_v28 = vpop.f32.mrb[27].mxu0 }
 0x12f   : > { %v3625_v29 = vadd.f32 %v2905_v26, %v2853_v63  ;;  %v2908_v30 = vadd.f32 %v2907_v28, %v2906_v27  ;;  %v1866_v63 = vsub.f32 1.0, %v1858_v49  ;;  %v1853_v28 = vmul.f32 0.2, %v1845_v11 }
 0x131   : > { %v3627_v31 = vadd.f32 %v2908_v30, %v2856_v1  ;;  %v1874_v16 = vmul.f32 %v1866_v63, %v1850_v61  ;;  %v1847_v30 = vld [vmem:[%s3636_s30 + $0x30] sm:$0xff]  ;;  %v1877_v6 = vmul.f32 %v1869_v47, %v1853_v28 }
 0x132   : > { %v1855_v57 = vmul.f32 0.2, %v1847_v30 }
 0x133   : > { %v2909_v32 = vpop.f32.mrb[28].mxu0 }
 0x134   : > { %v2910_v33 = vpop.f32.mrb[29].mxu0 }
 0x135   : > { %v2911_v34 = vadd.f32 %v2910_v33, %v2909_v32  ;;  %v2912_v35 = vpop.f32.mrb[30].mxu0  ;;  %v1848_v32 = vld [vmem:[%s3636_s30 + $0x38] sm:$0xff] }
 0x136   : > { %v2913_v36 = vpop.f32.mrb[31].mxu0  ;;  %v1856_v63 = vmul.f32 0.2, %v1848_v32 }
 0x137   : > { %v3644_v37 = vadd.f32 %v2911_v34, %v2859_v4  ;;  %v2914_v38 = vadd.f32 %v2913_v36, %v2912_v35  ;;  %v1942_v4 = vshrl.u32 %v1941_v54, 7  ;;  %v2158_v35 = vld [vmem:[%s3680_s25] sm:$0xf]  ;;  %v3245_v54 = vmov 0.0  }
 0x139   : > { %v3647_v40 = vadd.f32 %v2914_v38, %v2862_v7  ;;  %v1940_v7 = vunpack.c.0.s8 %v1939_v58  ;;  %v1871_v58 = vsub.f32 1.0, %v1863_v24 }
 0x13b   : > { %v2943_v42 = vpop.f32.mrb[32].mxu0  ;;  %v3650_v43 = vpop.f32.mrb[0].mxu1 }
 0x13c   : > { %v2944_v45 = vpop.f32.mrb[33].mxu0  ;;  %v1787_v46 = vpop.f32.mrb[1].mxu1 }
 0x13d   : > { %v2945_v50 = vadd.f32 %v2944_v45, %v2943_v42  ;;  %v2946_v51 = vpop.f32.mrb[34].mxu0  ;;  %v3654_v52 = vpop.f32.mrb[2].mxu1  ;;  %v3715_v42 = vsub.s32 %v1940_v7, %v1942_v4 }
 0x13e   : > { %v2947_v55 = vpop.f32.mrb[35].mxu0  ;;  %v1790_v56 = vpop.f32.mrb[3].mxu1 }
 0x13f   : > { %v3055_v59 = vadd.f32 %v3054_v13, %v2945_v50  ;;  %v2948_v60 = vadd.f32 %v2947_v55, %v2946_v51 }
 0x141   : > { %v3056_v1 = vadd.f32 %v3055_v59, %v1787_v46  ;;  %v3061_v2 = vadd.f32 %v3060_v15, %v2948_v60  ;;  %v1862_v15 = vld [vmem:[%s3642_s17 + $0x28] sm:$0xff]  ;;  %s3713_s17 = scalar_lea.vmem %s3884_s8, %s3630_s28  ;;  %v1875_v60 = vmul.f32 %v1867_v9, %v1851_v8  ;;  %v3738_v8 = vmul.f32 %v1871_v58, %v1855_v57 }
 0x142   : > { %v1870_v48 = vsub.f32 1.0, %v1862_v15 }
 0x143   : > { %v1833_v12 = vadd.f32 %v3056_v1, %v3665_v0  ;;  %v3062_v13 = vadd.f32 %v3061_v2, %v1790_v56  ;;  %v2949_v18 = vpop.f32.mrb[36].mxu0  ;;  %v3688_v19 = vpop.f32.mrb[4].mxu1  ;;  %v2162_v56 = vsub.f32 1.0, %v2158_v35  ;;  %v3730_v2 = vld [vmem:[%s3680_s25 + $0x4] sm:$0xf] }
 0x144   : > { %v2950_v26 = vpop.f32.mrb[37].mxu0  ;;  %v3701_v27 = vpop.f32.mrb[5].mxu1  ;;  %v3736_v7 = vmul.f32 %v1870_v48, %v1854_v41 }
 0x145   : > { %v1881_v33 = vadd.f32 %v1873_v53, %v1833_v12  ;;  %v1834_v34 = vadd.f32 %v3062_v13, %v3665_v0  ;;  %v2951_v36 = vadd.f32 %v2950_v26, %v2949_v18  ;;  %v2952_v38 = vpop.f32.mrb[38].mxu0  ;;  %v3707_v39 = vpop.f32.mrb[6].mxu1  ;;  %v1872_v53 = vsub.f32 1.0, %v3699_v25  ;;  %v2151_v13 = vld [vmem:[%s3671_s22 + $0x4] sm:$0xf] }
 0x146   : > { %v2953_v45 = vpop.f32.mrb[39].mxu0  ;;  %v3717_v46 = vpop.f32.mrb[7].mxu1  ;;  %v3734_v5 = vmul.f32 %v2162_v56, %v2154_v44  ;;  %v3743_v15 = vmul.f32 0.2, %v2151_v13 }
 0x147   : > { %vm1889_vm0 = vcmp.gt.f32.partialorder %v1881_v33, 0.5  ;;  %v1882_v49 = vadd.f32 %v1874_v16, %v1834_v34  ;;  %v3052_v50 = vadd.f32 %v3621_v21, %v2951_v36  ;;  %v2954_v51 = vadd.f32 %v2953_v45, %v2952_v38  ;;  %1913 = vst [vmem:[%s3695_s29] sm:$0xff] %v1881_v33 }
 0x148   : > { %v2801_v55 = vsel %vm1889_vm0, 1.0, %v3245_v54  ;;  %v3746_v18 = vmul.f32 %v1872_v53, %v1856_v63 }
 0x149   : > { %vm1890_vm1 = vcmp.gt.f32.partialorder %v1882_v49, 0.5  ;;  %1921 = vst [vmem:[%s3713_s17] sm:$0xff] %v2801_v55  ;;  %v3053_v59 = vadd.f32 %v3052_v50, %v3650_v43  ;;  %v3058_v61 = vadd.f32 %v3623_v23, %v2954_v51  ;;  %1914 = vst [vmem:[%s3695_s29 + $0x8] sm:$0xff] %v1882_v49 }
 0x14a   : > { %v2802_v21 = vsel %vm1890_vm1, 1.0, %v3245_v54 }
 0x14b   : > { %1922 = vst [vmem:[%s3713_s17 + $0x8] sm:$0xff] %v2802_v21  ;;  %v1929_v1 = vadd.f32 %v2802_v21, %v2801_v55  ;;  %v1835_v3 = vadd.f32 %v3053_v59, %v3665_v0  ;;  %v3059_v43 = vadd.f32 %v3058_v61, %v3654_v52  ;;  %v2955_v4 = vpop.f32.mrb[40].mxu0  ;;  %v2163_v52 = vsub.f32 1.0, %v3730_v2 }
 0x14c   : > { %v2956_v23 = vpop.f32.mrb[41].mxu0 }
 0x14d   : > { %v1937_v9 = vcombine.high %v1929_v1, %v1929_v1  ;;  %v1944_v10 = vrot.slane %v1929_v1, %v3715_v42  ;;  %v1883_v11 = vadd.f32 %v1875_v60, %v1835_v3  ;;  %v1836_v12 = vadd.f32 %v3059_v43, %v3665_v0  ;;  %v2958_v14 = vpop.f32.mrb[42].mxu0 }
 0x14e   : > { %v2957_v16 = vadd.f32 %v2956_v23, %v2955_v4  ;;  %v2959_v17 = vpop.f32.mrb[43].mxu0 }
 0x14f   : > { %v1951_v20 = vrot.slane %v1937_v9, %v3715_v42  ;;  %v1952_v22 = vcombine.high %v1944_v10, %v1944_v10  ;;  %v2022_v24 = vsel %vm2021_vm2, %v1944_v10, 0.0  ;;  %vm1891_vm3 = vcmp.gt.f32.partialorder %v1883_v11, 0.5  ;;  %1915 = vst [vmem:[%s3695_s29 + $0x10] sm:$0xff] %v1883_v11 }
 0x150   : > { %v2023_v25 = vrot.slane %v2022_v24, 4  ;;  %v2803_v26 = vsel %vm1891_vm3, 1.0, %v3245_v54  ;;  %v1884_v28 = vadd.f32 %v1876_v62, %v1836_v12  ;;  %v3067_v30 = vadd.f32 %v3625_v29, %v2957_v16 }
 0x151   : > { %v1953_v32 = vcombine.high %v1951_v20, %v1951_v20  ;;  %v2029_v33 = vsel %vm2021_vm2, %v1952_v22, 0.0  ;;  %v2036_v34 = vsel %vm2021_vm2, %v1951_v20, 0.0  ;;  %1923 = vst [vmem:[%s3713_s17 + $0x10] sm:$0xff] %v2803_v26  ;;  %v2960_v35 = vadd.f32 %v2959_v17, %v2958_v14 }
 0x152   : > { %v2024_v36 = vadd.f32 %v2023_v25, %v2022_v24  ;;  %v2030_v38 = vrot.slane %v2029_v33, 4  ;;  %v2037_v41 = vrot.slane %v2036_v34, 4  ;;  %vm1892_vm4 = vcmp.gt.f32.partialorder %v1884_v28, 0.5  ;;  %1916 = vst [vmem:[%s3695_s29 + $0x18] sm:$0xff] %v1884_v28 }
 0x153   : > { %v2043_v44 = vsel %vm2021_vm2, %v1953_v32, 0.0  ;;  %v2804_v45 = vsel %vm1892_vm4, 1.0, %v3245_v54  ;;  %v3068_v47 = vadd.f32 %v3067_v30, %v3701_v27  ;;  %v3073_v29 = vadd.f32 %v3627_v31, %v2960_v35  ;;  %v2961_v48 = vpop.f32.mrb[44].mxu0 }
 0x154   : > { %v2025_v49 = vrot.slane %v2024_v36, 2  ;;  %v2031_v50 = vadd.f32 %v2030_v38, %v2029_v33  ;;  %v2038_v51 = vadd.f32 %v2037_v41, %v2036_v34  ;;  %v2044_v55 = vrot.slane %v2043_v44, 4  ;;  %1924 = vst [vmem:[%s3713_s17 + $0x18] sm:$0xff] %v2804_v45  ;;  %v2962_v56 = vpop.f32.mrb[45].mxu0 }
 0x155   : > { %v1930_v57 = vadd.f32 %v2804_v45, %v2803_v26  ;;  %v1837_v58 = vadd.f32 %v3068_v47, %v3665_v0  ;;  %v3074_v59 = vadd.f32 %v3073_v29, %v3717_v46  ;;  %v2963_v60 = vadd.f32 %v2962_v56, %v2961_v48  ;;  %v3764_v61 = vpop.f32.mrb[46].mxu0 }
 0x156   : > { %v2026_v21 = vadd.f32 %v2025_v49, %v2024_v36  ;;  %v2032_v27 = vrot.slane %v2031_v50, 2  ;;  %v2039_v62 = vrot.slane %v2038_v51, 2  ;;  %v2045_v31 = vadd.f32 %v2044_v55, %v2043_v44  ;;  %v3766_v63 = vpop.f32.mrb[47].mxu0 }
 0x157   : > { %v1954_v53 = vcombine.high %v1930_v57, %v1930_v57  ;;  %v1961_v1 = vrot.slane %v1930_v57, %v3715_v42  ;;  %v1885_v3 = vadd.f32 %v1877_v6, %v1837_v58  ;;  %v1838_v43 = vadd.f32 %v3074_v59, %v3665_v0 }
 0x158   : > { %v2027_v4 = vrot.slane %v2026_v21, 1  ;;  %v2033_v46 = vadd.f32 %v2032_v27, %v2031_v50  ;;  %v2040_v23 = vadd.f32 %v2039_v62, %v2038_v51  ;;  %v2046_v9 = vrot.slane %v2045_v31, 2  ;;  %v3790_v62 = vld [vmem:[%s3671_s22 + $0x8] sm:$0xf] }
 0x159   : > { %v1968_v10 = vrot.slane %v1954_v53, %v3715_v42  ;;  %v1969_v11 = vcombine.high %v1961_v1, %v1961_v1  ;;  %v2050_v12 = vsel %vm2021_vm2, %v1961_v1, 0.0  ;;  %vm1893_vm8 = vcmp.gt.f32.partialorder %v1885_v3, 0.5  ;;  %1917 = vst [vmem:[%s3695_s29 + $0x20] sm:$0xff] %v1885_v3 }
 0x15a   : > { %v2028_v13 = vadd.f32 %v2027_v4, %v2026_v21  ;;  %v2034_v14 = vrot.slane %v2033_v46, 1  ;;  %v2041_v16 = vrot.slane %v2040_v23, 1  ;;  %v2047_v17 = vadd.f32 %v2046_v9, %v2045_v31  ;;  %v3795_v31 = vld [vmem:[%s3671_s22 + $0xc] sm:$0xf]  ;;  %v3805_v4 = vld [vmem:[%s3680_s25 + $0x8] sm:$0xf] }
 0x15b   : > { %v1970_v20 = vcombine.high %v1968_v10, %v1968_v10  ;;  %v2051_v22 = vrot.slane %v2050_v12, 4  ;;  %v2057_v6 = vsel %vm2021_vm2, %v1969_v11, 0.0  ;;  %v2064_v24 = vsel %vm2021_vm2, %v1968_v10, 0.0 }
 0x15c   : > { %v2035_v25 = vadd.f32 %v2034_v14, %v2033_v46  ;;  %v2042_v26 = vadd.f32 %v2041_v16, %v2040_v23  ;;  %v2048_v28 = vrot.slane %v2047_v17, 1  ;;  %v2134_v30 = vmul.f32 0.25, %v2028_v13  ;;  %v3808_v46 = vld [vmem:[%s3680_s25 + $0xc] sm:$0xf] }
 0x15d   : > { %v2052_v32 = vadd.f32 %v2051_v22, %v2050_v12  ;;  %v2058_v33 = vrot.slane %v2057_v6, 4  ;;  %v2065_v34 = vrot.slane %v2064_v24, 4  ;;  %v2071_v35 = vsel %vm2021_vm2, %v1970_v20, 0.0 }
 0x15e   : > { %v2049_v36 = vadd.f32 %v2048_v28, %v2047_v17  ;;  %v2135_v38 = vmul.f32 0.25, %v2035_v25  ;;  %v2136_v41 = vmul.f32 0.25, %v2042_v26  ;;  %v2072_v44 = vrot.slane %v2071_v35, 4 }
 0x15f   : > { %v2053_v45 = vrot.slane %v2052_v32, 2  ;;  %v2059_v47 = vadd.f32 %v2058_v33, %v2057_v6  ;;  %v2066_v29 = vadd.f32 %v2065_v34, %v2064_v24  ;;  %v2805_v48 = vsel %vm1893_vm8, 1.0, %v3245_v54 }
 0x160   : > { %v2137_v49 = vmul.f32 0.25, %v2049_v36  ;;  %v2187_v50 = vsel %vm2186_vm5, %v2135_v38, %v2134_v30  ;;  %v2073_v51 = vadd.f32 %v2072_v44, %v2071_v35  ;;  %1925 = vst [vmem:[%s3713_s17 + $0x20] sm:$0xff] %v2805_v48  ;;  %v1886_v55 = vadd.f32 %v3736_v7, %v1838_v43 }
 0x161   : > { %v2189_v56 = vsel %vm2188_vm6, %v2136_v41, %v2187_v50  ;;  %v2054_v57 = vadd.f32 %v2053_v45, %v2052_v32  ;;  %v2060_v58 = vrot.slane %v2059_v47, 2  ;;  %v2067_v59 = vrot.slane %v2066_v29, 2 }
 0x162   : > { %v2191_v21 = vsel %vm2190_vm7, %v2137_v49, %v2189_v56  ;;  %v2074_v27 = vrot.slane %v2073_v51, 2  ;;  %vm1894_vm9 = vcmp.gt.f32.partialorder %v1886_v55, 0.5  ;;  %v3064_v7 = vadd.f32 %v3644_v37, %v2963_v60  ;;  %1918 = vst [vmem:[%s3695_s29 + $0x28] sm:$0xff] %v1886_v55 }
 0x163   : > { %v2205_v53 = vadd.f32 %v2191_v21, %v3734_v5  ;;  %v2055_v1 = vrot.slane %v2054_v57, 1  ;;  %v2061_v3 = vadd.f32 %v2060_v58, %v2059_v47  ;;  %v2068_v43 = vadd.f32 %v2067_v59, %v2066_v29 }
 0x164   : > { %v2075_v37 = vadd.f32 %v2074_v27, %v2073_v51  ;;  %v2806_v60 = vsel %vm1894_vm9, 1.0, %v3245_v54  ;;  %v3065_v23 = vadd.f32 %v3064_v7, %v3688_v19  ;;  %v2966_v5 = vadd.f32 %v3766_v63, %v3764_v61 }
 0x165   : > { %vm2209_vm10 = vcmp.gt.f32.partialorder %v2205_v53, 0.5  ;;  %v2056_v9 = vadd.f32 %v2055_v1, %v2054_v57  ;;  %v2062_v10 = vrot.slane %v2061_v3, 1  ;;  %v2069_v11 = vrot.slane %v2068_v43, 1  ;;  %1926 = vst [vmem:[%s3713_s17 + $0x28] sm:$0xff] %v2806_v60  ;;  %2221 = vst [vmem:[%s3786_s19] sm:$0xf] %v2205_v53 }
 0x166   : > { %v2809_v12 = vsel %vm2209_vm10, 1.0, %v3245_v54  ;;  %v2076_v13 = vrot.slane %v2075_v37, 1  ;;  %v1931_v14 = vadd.f32 %v2806_v60, %v2805_v48  ;;  %v1839_v16 = vadd.f32 %v3065_v23, %v3665_v0 }
 0x167   : > { %2225 = vst [vmem:[%s3802_s21] sm:$0xf] %v2809_v12  ;;  %v2063_v17 = vadd.f32 %v2062_v10, %v2061_v3  ;;  %v2070_v20 = vadd.f32 %v2069_v11, %v2068_v43  ;;  %v2167_v19 = vmul.f32 %v2163_v52, %v3743_v15  ;;  %v3070_v61 = vadd.f32 %v3647_v40, %v2966_v5 }
 0x168   : > { %v2077_v63 = vadd.f32 %v2076_v13, %v2075_v37  ;;  %v1971_v22 = vcombine.high %v1931_v14, %v1931_v14  ;;  %v1978_v6 = vrot.slane %v1931_v14, %v3715_v42  ;;  %v1887_v24 = vadd.f32 %v3738_v8, %v1839_v16 }
 0x169   : > { %v2138_v25 = vmul.f32 0.25, %v2056_v9  ;;  %v2139_v26 = vmul.f32 0.25, %v2063_v17  ;;  %v2140_v28 = vmul.f32 0.25, %v2070_v20  ;;  %v3071_v30 = vadd.f32 %v3070_v61, %v3707_v39 }
 0x16a   : > { %v2141_v32 = vmul.f32 0.25, %v2077_v63  ;;  %v1985_v33 = vrot.slane %v1971_v22, %v3715_v42  ;;  %v1986_v34 = vcombine.high %v1978_v6, %v1978_v6  ;;  %v2078_v2 = vsel %vm2021_vm2, %v1978_v6, 0.0  ;;  %1919 = vst [vmem:[%s3695_s29 + $0x30] sm:$0xff] %v1887_v24 }
 0x16b   : > { %v2192_v40 = vsel %vm2186_vm5, %v2139_v26, %v2138_v25  ;;  %v2079_v15 = vrot.slane %v2078_v2, 4  ;;  %vm1895_vm11 = vcmp.gt.f32.partialorder %v1887_v24, 0.5  ;;  %v1840_v52 = vadd.f32 %v3071_v30, %v3665_v0 }
 0x16c   : > { %v2193_v8 = vsel %vm2188_vm6, %v2140_v28, %v2192_v40  ;;  %v1987_v35 = vcombine.high %v1985_v33, %v1985_v33  ;;  %v2085_v36 = vsel %vm2021_vm2, %v1986_v34, 0.0  ;;  %v2092_v39 = vsel %vm2021_vm2, %v1985_v33, 0.0 }
 0x16d   : > { %v2194_v38 = vsel %vm2190_vm7, %v2141_v32, %v2193_v8  ;;  %v2080_v41 = vadd.f32 %v2079_v15, %v2078_v2  ;;  %v2086_v44 = vrot.slane %v2085_v36, 4  ;;  %v2093_v45 = vrot.slane %v2092_v39, 4 }
 0x16e   : > { %v2206_v47 = vadd.f32 %v2194_v38, %v2167_v19  ;;  %v2099_v29 = vsel %vm2021_vm2, %v1987_v35, 0.0  ;;  %v2807_v0 = vsel %vm1895_vm11, 1.0, %v3245_v54  ;;  %v1888_v48 = vadd.f32 %v3746_v18, %v1840_v52 }
 0x16f   : > { %v2081_v49 = vrot.slane %v2080_v41, 2  ;;  %v2087_v50 = vadd.f32 %v2086_v44, %v2085_v36  ;;  %v2094_v51 = vadd.f32 %v2093_v45, %v2092_v39  ;;  %v2100_v55 = vrot.slane %v2099_v29, 4  ;;  %1927 = vst [vmem:[%s3713_s17 + $0x30] sm:$0xff] %v2807_v0 }
 0x170   : > { %vm2210_vm12 = vcmp.gt.f32.partialorder %v2206_v47, 0.5  ;;  %vm1896_vm13 = vcmp.gt.f32.partialorder %v1888_v48, 0.5  ;;  %1920 = vst [vmem:[%s3695_s29 + $0x38] sm:$0xff] %v1888_v48  ;;  %2222 = vst [vmem:[%s3786_s19 + $0x4] sm:$0xf] %v2206_v47  ;;  %v2164_v10 = vsub.f32 1.0, %v3805_v4 }
 0x171   : > { %v2810_v56 = vsel %vm2210_vm12, 1.0, %v3245_v54  ;;  %v2082_v57 = vadd.f32 %v2081_v49, %v2080_v41  ;;  %v2088_v58 = vrot.slane %v2087_v50, 2  ;;  %v2095_v59 = vrot.slane %v2094_v51, 2 }
 0x172   : > { %2226 = vst [vmem:[%s3802_s21 + $0x4] sm:$0xf] %v2810_v56  ;;  %v2101_v21 = vadd.f32 %v2100_v55, %v2099_v29  ;;  %v2808_v27 = vsel %vm1896_vm13, 1.0, %v3245_v54  ;;  %v2156_v9 = vmul.f32 0.2, %v3790_v62 }
 0x173   : > { %v2083_v18 = vrot.slane %v2082_v57, 1  ;;  %v2089_v7 = vadd.f32 %v2088_v58, %v2087_v50  ;;  %v2096_v53 = vadd.f32 %v2095_v59, %v2094_v51  ;;  %1928 = vst [vmem:[%s3713_s17 + $0x38] sm:$0xff] %v2808_v27  ;;  %v1932_v1 = vadd.f32 %v2808_v27, %v2807_v0 }
 0x174   : > { %v2102_v3 = vrot.slane %v2101_v21, 2  ;;  %v2168_v25 = vmul.f32 %v2164_v10, %v2156_v9  ;;  %v2165_v58 = vsub.f32 1.0, %v3808_v46 }
 0x175   : > { %v2084_v43 = vadd.f32 %v2083_v18, %v2082_v57  ;;  %v2090_v37 = vrot.slane %v2089_v7, 1  ;;  %v2097_v60 = vrot.slane %v2096_v53, 1  ;;  %v1988_v23 = vcombine.high %v1932_v1, %v1932_v1 }
 0x176   : > { %v2103_v5 = vadd.f32 %v2102_v3, %v2101_v21  ;;  %v1995_v11 = vrot.slane %v1932_v1, %v3715_v42  ;;  %v2157_v57 = vmul.f32 0.2, %v3795_v31 }
 0x177   : > { %v2091_v12 = vadd.f32 %v2090_v37, %v2089_v7  ;;  %v2098_v13 = vadd.f32 %v2097_v60, %v2096_v53  ;;  %v2002_v14 = vrot.slane %v1988_v23, %v3715_v42  ;;  %v2142_v17 = vmul.f32 0.25, %v2084_v43 }
 0x178   : > { %v2104_v16 = vrot.slane %v2103_v5, 1  ;;  %v2003_v20 = vcombine.high %v1995_v11, %v1995_v11  ;;  %v2106_v19 = vsel %vm2021_vm2, %v1995_v11, 0.0  ;;  %v2169_v53 = vmul.f32 %v2165_v58, %v2157_v57 }
 0x179   : > { %v2143_v61 = vmul.f32 0.25, %v2091_v12  ;;  %v2144_v63 = vmul.f32 0.25, %v2098_v13  ;;  %v2004_v22 = vcombine.high %v2002_v14, %v2002_v14  ;;  %v2107_v6 = vrot.slane %v2106_v19, 4 }
 0x17a   : > { %v2105_v24 = vadd.f32 %v2104_v16, %v2103_v5  ;;  %v2113_v62 = vsel %vm2021_vm2, %v2003_v20, 0.0  ;;  %v2120_v4 = vsel %vm2021_vm2, %v2002_v14, 0.0 }
 0x17b   : > { %v2195_v26 = vsel %vm2186_vm5, %v2143_v61, %v2142_v17  ;;  %v2108_v28 = vadd.f32 %v2107_v6, %v2106_v19  ;;  %v2114_v30 = vrot.slane %v2113_v62, 4  ;;  %v2121_v42 = vrot.slane %v2120_v4, 4 }
 0x17c   : > { %v2145_v32 = vmul.f32 0.25, %v2105_v24  ;;  %v2196_v33 = vsel %vm2188_vm6, %v2144_v63, %v2195_v26  ;;  %v2127_v34 = vsel %vm2021_vm2, %v2004_v22, 0.0 }
 0x17d   : > { %v2109_v2 = vrot.slane %v2108_v28, 2  ;;  %v2115_v40 = vadd.f32 %v2114_v30, %v2113_v62  ;;  %v2122_v15 = vadd.f32 %v2121_v42, %v2120_v4  ;;  %v2128_v52 = vrot.slane %v2127_v34, 4 }
 0x17e   : > { %v2197_v8 = vsel %vm2190_vm7, %v2145_v32, %v2196_v33 }
 0x17f   : > { %v2207_v35 = vadd.f32 %v2197_v8, %v2168_v25  ;;  %v2110_v36 = vadd.f32 %v2109_v2, %v2108_v28  ;;  %v2116_v39 = vrot.slane %v2115_v40, 2  ;;  %v2123_v38 = vrot.slane %v2122_v15, 2 }
 0x180   : > { %v2129_v41 = vadd.f32 %v2128_v52, %v2127_v34 }
 0x181   : > { %vm2211_vm14 = vcmp.gt.f32.partialorder %v2207_v35, 0.5  ;;  %v2111_v44 = vrot.slane %v2110_v36, 1  ;;  %v2117_v45 = vadd.f32 %v2116_v39, %v2115_v40  ;;  %v2124_v47 = vadd.f32 %v2123_v38, %v2122_v15  ;;  %2223 = vst [vmem:[%s3786_s19 + $0x8] sm:$0xf] %v2207_v35 }
 0x182   : > { %v2811_v29 = vsel %vm2211_vm14, 1.0, %v3245_v54  ;;  %v2130_v0 = vrot.slane %v2129_v41, 2 }
 0x183   : > { %2227 = vst [vmem:[%s3802_s21 + $0x8] sm:$0xf] %v2811_v29  ;;  %v2112_v48 = vadd.f32 %v2111_v44, %v2110_v36  ;;  %v2118_v49 = vrot.slane %v2117_v45, 1  ;;  %v2125_v50 = vrot.slane %v2124_v47, 1 }
 0x184   : > { %v2131_v51 = vadd.f32 %v2130_v0, %v2129_v41 }
 0x185   : > { %v2119_v55 = vadd.f32 %v2118_v49, %v2117_v45  ;;  %v2126_v56 = vadd.f32 %v2125_v50, %v2124_v47  ;;  %v2146_v21 = vmul.f32 0.25, %v2112_v48 }
 0x186   : > { %v2132_v59 = vrot.slane %v2131_v51, 1 }
 0x187   : > { %v2147_v27 = vmul.f32 0.25, %v2119_v55  ;;  %v2148_v18 = vmul.f32 0.25, %v2126_v56 }
 0x188   : > { %v2133_v7 = vadd.f32 %v2132_v59, %v2131_v51 }
 0x189   : > { %v2198_v1 = vsel %vm2186_vm5, %v2147_v27, %v2146_v21 }
 0x18a   : > { %v2149_v3 = vmul.f32 0.25, %v2133_v7  ;;  %v2199_v43 = vsel %vm2188_vm6, %v2148_v18, %v2198_v1 }
 0x18c   : > { %v2200_v37 = vsel %vm2190_vm7, %v2149_v3, %v2199_v43 }
 0x18d   : > { %v2208_v60 = vadd.f32 %v2200_v37, %v2169_v53 }
 0x18f   : > { %vm2212_vm15 = vcmp.gt.f32.partialorder %v2208_v60, 0.5  ;;  %2224 = vst [vmem:[%s3786_s19 + $0xc] sm:$0xf] %v2208_v60 }
 0x190   : > { %v2812_v31 = vsel %vm2212_vm15, 1.0, %v3245_v54 }
 0x191   : > { %2228 = vst [vmem:[%s3802_s21 + $0xc] sm:$0xf] %v2812_v31 }
 0x192 PF: > { %s21_s15 = sadd.s32 1, %s3242_s15   ;;  %s3887_s13 = smov %s3238_s14 }
 0x193   : > { %p18_p5 = scmp.ge.s32.totalorder %s21_s15, 4   ;;  %s3888_s14 = smov %s3890_s16 }
 0x195   :  { %20 = sbr.rel (!%p18_p5) target bundleno = 2 (0x2), region = 131 }

// kernel: closed_call.83
= control target key start
LH: loop header
LB: loop body
LE: loop exit
PB: predicated region body
PF: predicated region fallthrough
CT: control target
= control target key end

     0   :  { %s2450_s13 = smov 0   ;;  %s2452_s14 = smov 0   ;;  %s2809_s0 = inlined_call_operand.vmem [shape: bf16[2,6,4,384], index: 0, kind: input, shape index: {}]   ;;  %s2810_s1 = inlined_call_operand.vmem [shape: bf16[3,384,128], index: 1, kind: input, shape index: {}]   ;;  %s2811_s2 = inlined_call_operand.vmem [shape: f32[1,128], index: 2, kind: input, shape index: {}]   ;;  %s2812_s3 = inlined_call_operand.vmem [shape: f32[2,4,4,128], index: 3, kind: input, shape index: {}, may-alias: {3,7}]   ;;  %s2813_s4 = inlined_call_operand.vmem [shape: f32[2,4,4,128], index: 4, kind: input, shape index: {}, may-alias: {4,8}]   ;;  %s2814_s5 = inlined_call_operand.vmem [shape: f32[2,1,1,128], index: 5, kind: input, shape index: {}, may-alias: {5,9}]   ;;  %s2815_s6 = inlined_call_operand.vmem [shape: f32[2,1,1,128], index: 6, kind: input, shape index: {}, may-alias: {6,10}]   ;;  %s2816_s7 = inlined_call_operand.vmem [shape: f32[2,4,4,128], index: 7, kind: output, shape index: {0}, may-alias: {3,7}]   ;;  %s2817_s8 = inlined_call_operand.vmem [shape: f32[2,4,4,128], index: 8, kind: output, shape index: {1}, may-alias: {4,8}]   ;;  %s2818_s9 = inlined_call_operand.vmem [shape: f32[2,1,1,128], index: 9, kind: output, shape index: {2}, may-alias: {5,9}]   ;;  %s2819_s10 = inlined_call_operand.vmem [shape: f32[2,1,1,128], index: 10, kind: output, shape index: {3}, may-alias: {6,10}]  }
   0x1   :  { %s2454_s15 = smov 0  }
   0x2 LB: > { %s33_s16 = sadd.s32 1, %s2386_s14  ;;  %p1899_p0 = scmp.ge.s32.totalorder %s2390_s15, 1  ;;  %s2390_s15 = sphi %s2454_s15, %s21_s15   ;;  %s2386_s14 = sphi %s2452_s14, %s2821_s14   ;;  %s2382_s13 = sphi %s2450_s13, %s2820_s13  }
   0x3   : > { %p35_p1 = scmp.ge.s32.totalorder %s33_s16, 2  ;;  %p399_p2 = scmp.lt.s32.totalorder %s2390_s15, 3 }
   0x5   : > { %s2823_s16 = smov (%p35_p1, %s33_s16), 0  ;;  %p400_p3 = pnand %p1899_p0, %p399_p2 }
   0x6   : > { %v2278_v0 = vld [vmem:[%s2810_s1 + $0x100] sm:$0xff] (!%p400_p3)   ;;  %v2392_v1 = vmov (!%p400_p3), 0.0   ;;  %v2281_v4 = vld [vmem:[%s2810_s1 + $0x108] sm:$0xff] (!%p400_p3)   ;;  %v2284_v7 = vld [vmem:[%s2810_s1 + $0x110] sm:$0xff] (!%p400_p3)   ;;  %vm2393_vm0 = vmmov (!%p400_p3), 0   ;;  %p492_p4 = scmp.lt.s32.totalorder (!%p400_p3), %s2382_s13, 1  ;;  %v686_v23 = vlaneseq (!%p400_p3) }
   0x7   : > { %403 = sbr.rel (%p400_p3) target bundleno = 357 (0x165), region = 48  ;;  %2190 = vmatprep.subr.bf16.mxu1 (!%p400_p3), %v2392_v1  ;;  %v2279_v2 = vld [vmem:[%s2810_s1 + $0xc0] sm:$0xff] (!%p400_p3)   ;;  %2097 = vmatprep.subr.bf16.mxu0 (!%p400_p3), %v2278_v0  ;;  %v2282_v5 = vld [vmem:[%s2810_s1 + $0xc8] sm:$0xff] (!%p400_p3)   ;;  %v2285_v8 = vld [vmem:[%s2810_s1 + $0xd0] sm:$0xff] (!%p400_p3)   ;;  %v2394_v28 = vmov (!%p400_p3), 1983009808  }
   0x8   : > { %v2280_v3 = vld [vmem:[%s2810_s1 + $0x140] sm:$0xff] (!%p400_p3)   ;;  %2098 = vmatpush3.bf16.msra.mxu0 (!%p400_p3), %v2279_v2  ;;  %v2283_v6 = vld [vmem:[%s2810_s1 + $0x148] sm:$0xff] (!%p400_p3)   ;;  %2206 = vmatprep.mubr.msk.bf16.mxu1 (!%p400_p3), %vm2393_vm0, %v2392_v1  ;;  %v2286_v9 = vld [vmem:[%s2810_s1 + $0x150] sm:$0xff] (!%p400_p3)   ;;  %v684_v29 = vunpack.c.l.s4 (!%p400_p3), %v2394_v28  ;;  %v687_v30 = vshrl.u32 (!%p400_p3), %v686_v23, 7  ;;  %vm1597_vm2 = vcmask (!%p400_p3), 1043456  }
   0x9   : > { %2191 = vmatpush3.bf16.msra.mxu1 (!%p400_p3), %v2280_v3  ;;  %2099 = vmatprep.subr.bf16.mxu0 (!%p400_p3), %v2281_v4  ;;  %v2287_v10 = vld [vmem:[%s2810_s1 + $0x118] sm:$0xff] (!%p400_p3)   ;;  %v2290_v13 = vld [vmem:[%s2810_s1 + $0x120] sm:$0xff] (!%p400_p3)   ;;  %v2293_v16 = vld [vmem:[%s2810_s1 + $0x128] sm:$0xff] (!%p400_p3)  }
   0xa   : > { %2192 = vmatprep.subr.bf16.mxu1 (!%p400_p3), %v2392_v1  ;;  %v2288_v11 = vld [vmem:[%s2810_s1 + $0xd8] sm:$0xff] (!%p400_p3)   ;;  %v2291_v14 = vld [vmem:[%s2810_s1 + $0xe0] sm:$0xff] (!%p400_p3)   ;;  %v2294_v17 = vld [vmem:[%s2810_s1 + $0xe8] sm:$0xff] (!%p400_p3)   ;;  %v685_v34 = vunpack.c.0.s8 (!%p400_p3), %v684_v29 }
   0xb   : > { %v2289_v12 = vld [vmem:[%s2810_s1 + $0x158] sm:$0xff] (!%p400_p3)   ;;  %v2292_v15 = vld [vmem:[%s2810_s1 + $0x160] sm:$0xff] (!%p400_p3)   ;;  %v2295_v18 = vld [vmem:[%s2810_s1 + $0x168] sm:$0xff] (!%p400_p3)  }
   0xc   : > { %2100 = vmatpush3.bf16.msra.mxu0 (!%p400_p3), %v2282_v5  ;;  %v2296_v19 = vld [vmem:[%s2810_s1 + $0x130] sm:$0xff] (!%p400_p3)   ;;  %v2299_v22 = vld [vmem:[%s2810_s1 + $0x138] sm:$0xff] (!%p400_p3)   ;;  %v2308_v31 = vld [vmem:[%s2810_s1 + $0x40] sm:$0xff] (!%p400_p3)   ;;  %v2569_v35 = vsub.s32 (!%p400_p3), %v685_v34, %v687_v30 }
   0xd   : > { %2193 = vmatpush3.bf16.msra.mxu1 (!%p400_p3), %v2283_v6  ;;  %2101 = vmatprep.subr.bf16.mxu0 (!%p400_p3), %v2284_v7  ;;  %v2297_v20 = vld [vmem:[%s2810_s1 + $0xf0] sm:$0xff] (!%p400_p3)   ;;  %v2300_v24 = vld [vmem:[%s2810_s1 + $0xf8] sm:$0xff] (!%p400_p3)   ;;  %v2310_v40 = vld [vmem:[%s2810_s1 + $0x80] sm:$0xff] (!%p400_p3)  }
   0xe   : > { %2194 = vmatprep.subr.bf16.mxu1 %v2392_v1  ;;  %s2825_s13 = smov (!%p492_p4, %s2382_s13), 1  ;;  %v2298_v21 = vld [vmem:[%s2810_s1 + $0x170] sm:$0xff]   ;;  %v2301_v25 = vld [vmem:[%s2810_s1 + $0x178] sm:$0xff]   ;;  %v2309_v44 = vld [vmem:[%s2810_s1] sm:$0xff]  }
   0xf   : > { %s2250_s21 = smul.u32 36, %s2825_s13  ;;  %v2311_v45 = vld [vmem:[%s2810_s1 + $0x48] sm:$0xff]   ;;  %v2314_v48 = vld [vmem:[%s2810_s1 + $0x50] sm:$0xff]   ;;  %v2317_v51 = vld [vmem:[%s2810_s1 + $0x58] sm:$0xff]   ;;  %s2753_s25 = sshll.u32 %s2825_s13, 4 }
  0x10   : > { %2102 = vmatpush3.bf16.msra.mxu0 %v2285_v8  ;;  %v2313_v46 = vld [vmem:[%s2810_s1 + $0x88] sm:$0xff]   ;;  %v2316_v49 = vld [vmem:[%s2810_s1 + $0x90] sm:$0xff]   ;;  %v2319_v52 = vld [vmem:[%s2810_s1 + $0x98] sm:$0xff]   ;;  %s505_s28 = scalar_lea.vmem %s2812_s3, %s2753_s25  ;;  %s515_s11 = scalar_lea.vmem %s2813_s4, %s2753_s25 }
  0x11   : > { %2195 = vmatpush3.bf16.msra.mxu1 %v2286_v9  ;;  %2103 = vmatprep.subr.bf16.mxu0 %v2287_v10  ;;  %s2552_s12 = scalar_lea.vmem %s2809_s0, %s2250_s21  ;;  %v2312_v47 = vld [vmem:[%s2810_s1 + $0x8] sm:$0xff]   ;;  %v2315_v50 = vld [vmem:[%s2810_s1 + $0x10] sm:$0xff]   ;;  %v2318_v53 = vld [vmem:[%s2810_s1 + $0x18] sm:$0xff]   ;;  %s537_s21 = scalar_lea.vmem %s2816_s7, %s2753_s25 }
  0x12   : > { %2196 = vmatprep.subr.bf16.mxu1 %v2392_v1  ;;  %v2304_v26 = vld [vmem:[%s2552_s12 + $0xa] ss:$6 sps:$4 sm:$0x33]   ;;  %v2307_v27 = vld [vmem:[%s2552_s12 + $0x16] ss:$6 sps:$4 sm:$0x33]   ;;  %s547_s23 = scalar_lea.vmem %s2817_s8, %s2753_s25  ;;  %s522_s26 = scalar_lea.vmem %s2814_s5, %s2825_s13 }
  0x13   : > { %v2302_v32 = vld [vmem:[%s2552_s12 + $0x6] ss:$6 sps:$4 sm:$0xff]   ;;  %v2305_v33 = vld [vmem:[%s2552_s12 + $0x12] ss:$6 sps:$4 sm:$0xff]   ;;  %v696_v38 = vrot.slane %v2304_v26, %v2569_v35  ;;  %v710_v39 = vrot.slane %v2307_v27, %v2569_v35  ;;  %s528_s29 = scalar_lea.vmem %s2815_s6, %s2825_s13  ;;  %s554_s17 = scalar_lea.vmem %s2818_s9, %s2825_s13 }
  0x14   : > { %2104 = vmatpush3.bf16.msra.mxu0 %v2288_v11  ;;  %v689_v36 = vrot.slane %v2302_v32, %v2569_v35  ;;  %v703_v37 = vrot.slane %v2305_v33, %v2569_v35  ;;  %v2320_v54 = vld [vmem:[%s2810_s1 + $0x60] sm:$0xff]   ;;  %v2323_v58 = vld [vmem:[%s2810_s1 + $0x68] sm:$0xff]   ;;  %v2337_v2 = vld [vmem:[%s2552_s12 + $0x10] ss:$6 sps:$4 sm:$0x33]   ;;  %s560_s20 = scalar_lea.vmem %s2819_s10, %s2825_s13 }
  0x15   : > { %2197 = vmatpush3.bf16.msra.mxu1 %v2289_v12  ;;  %2105 = vmatprep.subr.bf16.mxu0 %v2290_v13  ;;  %v713_v43 = vcombine.low %v696_v38, %v710_v39  ;;  %v2321_v55 = vld [vmem:[%s2810_s1 + $0x20] sm:$0xff]   ;;  %v2335_v59 = vld [vmem:[%s2552_s12 + $0xc] ss:$6 sps:$4 sm:$0xff]   ;;  %v2329_v7 = vld [vmem:[%s2810_s1 + $0x78] sm:$0xff]   ;;  %v978_v9 = vrot.slane %v2337_v2, %v2569_v35 }
  0x16   : > { %2198 = vmatprep.subr.bf16.mxu1 %v2392_v1  ;;  %v712_v41 = vcombine.high %v689_v36, %v703_v37  ;;  %v711_v42 = vcombine.low %v689_v36, %v703_v37  ;;  %v2322_v56 = vld [vmem:[%s2810_s1 + $0xa0] sm:$0xff]   ;;  %v2325_v60 = vld [vmem:[%s2810_s1 + $0xa8] sm:$0xff]   ;;  %v971_v62 = vrot.slane %v2335_v59, %v2569_v35  ;;  %v2326_v3 = vld [vmem:[%s2810_s1 + $0x70] sm:$0xff]  }
  0x17   : > { %v2332_v57 = vld [vmem:[%s2552_s12] ss:$6 sps:$4 sm:$0xff]   ;;  %v2334_v0 = vld [vmem:[%s2552_s12 + $0x4] ss:$6 sps:$4 sm:$0x33]   ;;  %v2328_v5 = vld [vmem:[%s2810_s1 + $0xb0] sm:$0xff]  }
  0x18   : > { %2106 = vmatpush3.bf16.msra.mxu0 %v2291_v14  ;;  %893 = vmatprep.mubr.bf16.mxu0 %v712_v41  ;;  %v957_v61 = vrot.slane %v2332_v57, %v2569_v35  ;;  %v2324_v63 = vld [vmem:[%s2810_s1 + $0x28] sm:$0xff]   ;;  %v2327_v6 = vld [vmem:[%s2810_s1 + $0x30] sm:$0xff]   ;;  %v964_v8 = vrot.slane %v2334_v0, %v2569_v35  ;;  %v2331_v10 = vld [vmem:[%s2810_s1 + $0xb8] sm:$0xff]  }
  0x19   : > { %2199 = vmatpush3.bf16.msra.mxu1 %v2292_v15  ;;  %2107 = vmatprep.subr.bf16.mxu0 %v2293_v16  ;;  %v2330_v11 = vld [vmem:[%s2810_s1 + $0x38] sm:$0xff]   ;;  %v2338_v12 = vld [vmem:[%s2810_s1 + $0x1c0] sm:$0xff]   ;;  %v2362_v26 = vld [vmem:[%s2552_s12 + $0xc] ss:$6 sps:$4 sm:$0xff]  }
  0x1a   : > { %2200 = vmatprep.subr.bf16.mxu1 %v2392_v1  ;;  %v980_v4 = vcombine.high %v957_v61, %v971_v62  ;;  %v981_v13 = vcombine.low %v964_v8, %v978_v9  ;;  %v979_v14 = vcombine.low %v957_v61, %v971_v62  ;;  %v2340_v15 = vld [vmem:[%s2810_s1 + $0x200] sm:$0xff]   ;;  %v2347_v23 = vld [vmem:[%s2810_s1 + $0x1d8] sm:$0xff]   ;;  %v2364_v28 = vld [vmem:[%s2552_s12 + $0x10] ss:$6 sps:$4 sm:$0x33]  }
  0x1b   : > { %v2339_v16 = vld [vmem:[%s2810_s1 + $0x180] sm:$0xff]   ;;  %v1289_v33 = vrot.slane %v2364_v28, %v2569_v35  ;;  %v2354_v41 = vld [vmem:[%s2810_s1 + $0x1a8] sm:$0xff]  }
  0x1c   : > { %2108 = vmatpush3.bf16.msra.mxu0 %v2294_v17  ;;  %v2341_v17 = vld [vmem:[%s2810_s1 + $0x1c8] sm:$0xff]   ;;  %v2365_v27 = vld [vmem:[%s2552_s12 + $0x18] ss:$6 sps:$4 sm:$0xff]   ;;  %v2367_v29 = vld [vmem:[%s2552_s12 + $0x1c] ss:$6 sps:$4 sm:$0x33]  }
  0x1d   : > { %2201 = vmatpush3.bf16.msra.mxu1 %v2295_v18  ;;  %2109 = vmatprep.subr.bf16.mxu0 %v2296_v19  ;;  %v2343_v18 = vld [vmem:[%s2810_s1 + $0x208] sm:$0xff]   ;;  %v2350_v30 = vld [vmem:[%s2810_s1 + $0x1e0] sm:$0xff]   ;;  %v1296_v32 = vrot.slane %v2365_v27, %v2569_v35  ;;  %v1303_v34 = vrot.slane %v2367_v29, %v2569_v35 }
  0x1e   : > { %2202 = vmatprep.subr.bf16.mxu1 %v2392_v1  ;;  %v2342_v19 = vld [vmem:[%s2810_s1 + $0x188] sm:$0xff]   ;;  %v2352_v36 = vld [vmem:[%s2810_s1 + $0x220] sm:$0xff]  }
  0x1f   : > { %v2351_v38 = vld [vmem:[%s2810_s1 + $0x1a0] sm:$0xff]   ;;  %v1306_v39 = vcombine.low %v1289_v33, %v1303_v34 }
  0x20   : > { %2110 = vmatpush3.bf16.msra.mxu0 %v2297_v20  ;;  %v2344_v20 = vld [vmem:[%s2810_s1 + $0x1d0] sm:$0xff]  }
  0x21   : > { %2203 = vmatpush3.bf16.msra.mxu1 %v2298_v21  ;;  %2111 = vmatprep.subr.bf16.mxu0 %v2299_v22  ;;  %v2345_v21 = vld [vmem:[%s2810_s1 + $0x190] sm:$0xff]  }
  0x22   : > { %2204 = vmatprep.subr.bf16.mxu1 %v2392_v1  ;;  %v2346_v22 = vld [vmem:[%s2810_s1 + $0x210] sm:$0xff]  }
  0x24   : > { %2112 = vmatpush3.bf16.msra.mxu0 %v2300_v24  ;;  %v2349_v24 = vld [vmem:[%s2810_s1 + $0x218] sm:$0xff]  }
  0x25   : > { %2205 = vmatpush3.bf16.msra.mxu1 %v2301_v25  ;;  %2128 = vmatprep.subr.bf16.mxu0 %v2308_v31  ;;  %v2348_v25 = vld [vmem:[%s2810_s1 + $0x198] sm:$0xff]   ;;  %v1282_v31 = vrot.slane %v2362_v26, %v2569_v35  ;;  %v2355_v35 = vld [vmem:[%s2810_s1 + $0x228] sm:$0xff]  }
  0x26   : > { %2210 = vmatprep.subr.bf16.mxu1 %v2392_v1 }
  0x27   : > { %894 = vmatmul.mubr.bf16.vlgmr.msra.gmra.mrb[0].mxu0 %v711_v42  ;;  %v1305_v37 = vcombine.high %v1282_v31, %v1296_v32  ;;  %v2356_v42 = vld [vmem:[%s2810_s1 + $0x1f0] sm:$0xff]  }
  0x28   : > { %2207 = vmatmul.mubr.bf16.vlgmr.msra.gmra.mrb[0].mxu1 %v713_v43  ;;  %2129 = vmatpush3.bf16.msra.mxu0 %v2309_v44  ;;  %v2358_v43 = vld [vmem:[%s2810_s1 + $0x230] sm:$0xff]  }
  0x29   : > { %2211 = vmatpush3.bf16.msra.mxu1 %v2310_v40  ;;  %2130 = vmatprep.subr.bf16.mxu0 %v2311_v45  ;;  %v2353_v40 = vld [vmem:[%s2810_s1 + $0x1e8] sm:$0xff]   ;;  %v2357_v44 = vld [vmem:[%s2810_s1 + $0x1b0] sm:$0xff]   ;;  %v2359_v45 = vld [vmem:[%s2810_s1 + $0x1f8] sm:$0xff]  }
  0x2a   : > { %2212 = vmatprep.subr.bf16.mxu1 %v2392_v1  ;;  %2226 = vmatprep.mubr.msk.bf16.mxu1 %vm2393_vm0, %v2392_v1 }
  0x2b   : > { %1161 = vmatprep.mubr.bf16.mxu0 %v980_v4 }
  0x2c   : > { %2131 = vmatpush3.bf16.msra.mxu0 %v2312_v47  ;;  %v2360_v47 = vld [vmem:[%s2810_s1 + $0x1b8] sm:$0xff]  }
  0x2d   : > { %2213 = vmatpush3.bf16.msra.mxu1 %v2313_v46  ;;  %2132 = vmatprep.subr.bf16.mxu0 %v2314_v48  ;;  %v2361_v46 = vld [vmem:[%s2810_s1 + $0x238] sm:$0xff]   ;;  %v1304_v48 = vcombine.low %v1282_v31, %v1296_v32  ;;  %v1556_v31 = vld [vmem:[%s505_s28 + $0xc] sm:$0xf] }
  0x2e   : > { %2214 = vmatprep.subr.bf16.mxu1 %v2392_v1  ;;  %v1564_v32 = vld [vmem:[%s515_s11 + $0xc] sm:$0xf] }
  0x30   : > { %2133 = vmatpush3.bf16.msra.mxu0 %v2315_v50 }
  0x31   : > { %2215 = vmatpush3.bf16.msra.mxu1 %v2316_v49  ;;  %2134 = vmatprep.subr.bf16.mxu0 %v2317_v51 }
  0x32   : > { %2216 = vmatprep.subr.bf16.mxu1 %v2392_v1 }
  0x34   : > { %2135 = vmatpush3.bf16.msra.mxu0 %v2318_v53 }
  0x35   : > { %2217 = vmatpush3.bf16.msra.mxu1 %v2319_v52  ;;  %2136 = vmatprep.subr.bf16.mxu0 %v2320_v54 }
  0x36   : > { %2218 = vmatprep.subr.bf16.mxu1 %v2392_v1 }
  0x38   : > { %2137 = vmatpush3.bf16.msra.mxu0 %v2321_v55 }
  0x39   : > { %2219 = vmatpush3.bf16.msra.mxu1 %v2322_v56  ;;  %2138 = vmatprep.subr.bf16.mxu0 %v2323_v58 }
  0x3a   : > { %2220 = vmatprep.subr.bf16.mxu1 %v2392_v1 }
  0x3c   : > { %2139 = vmatpush3.bf16.msra.mxu0 %v2324_v63 }
  0x3d   : > { %2221 = vmatpush3.bf16.msra.mxu1 %v2325_v60  ;;  %2140 = vmatprep.subr.bf16.mxu0 %v2326_v3 }
  0x3e   : > { %2222 = vmatprep.subr.bf16.mxu1 %v2392_v1 }
  0x40   : > { %2141 = vmatpush3.bf16.msra.mxu0 %v2327_v6 }
  0x41   : > { %2223 = vmatpush3.bf16.msra.mxu1 %v2328_v5  ;;  %2142 = vmatprep.subr.bf16.mxu0 %v2329_v7 }
  0x42   : > { %2224 = vmatprep.subr.bf16.mxu1 %v2392_v1 }
  0x44   : > { %2143 = vmatpush3.bf16.msra.mxu0 %v2330_v11 }
  0x45   : > { %2225 = vmatpush3.bf16.msra.mxu1 %v2331_v10  ;;  %2159 = vmatprep.subr.bf16.mxu0 %v2338_v12  ;;  %v1553_v12 = vld [vmem:[%s505_s28] sm:$0xf] }
  0x46   : > { %2230 = vmatprep.subr.bf16.mxu1 %v2392_v1 }
  0x47   : > { %1162 = vmatmul.mubr.bf16.vlgmr.msra.gmra.mrb[4].mxu0 %v979_v14 }
  0x48   : > { %2227 = vmatmul.mubr.bf16.vlgmr.msra.gmra.mrb[4].mxu1 %v981_v13  ;;  %2160 = vmatpush3.bf16.msra.mxu0 %v2339_v16  ;;  %v1561_v13 = vld [vmem:[%s515_s11] sm:$0xf]  ;;  %v1557_v16 = vmul.f32 0.2, %v1553_v12 }
  0x49   : > { %2231 = vmatpush3.bf16.msra.mxu1 %v2340_v15  ;;  %2161 = vmatprep.subr.bf16.mxu0 %v2341_v17  ;;  %v1554_v15 = vld [vmem:[%s505_s28 + $0x4] sm:$0xf] }
  0x4a   : > { %2232 = vmatprep.subr.bf16.mxu1 %v2392_v1  ;;  %2246 = vmatprep.mubr.msk.bf16.mxu1 %vm2393_vm0, %v2392_v1  ;;  %v1558_v26 = vmul.f32 0.2, %v1554_v15 }
  0x4b   : > { %1486 = vmatprep.mubr.bf16.mxu0 %v1305_v37 }
  0x4c   : > { %2162 = vmatpush3.bf16.msra.mxu0 %v2342_v19  ;;  %v1565_v19 = vsub.f32 1.0, %v1561_v13 }
  0x4d   : > { %2233 = vmatpush3.bf16.msra.mxu1 %v2343_v18  ;;  %2163 = vmatprep.subr.bf16.mxu0 %v2344_v20  ;;  %v1562_v18 = vld [vmem:[%s515_s11 + $0x4] sm:$0xf] }
  0x4e   : > { %2234 = vmatprep.subr.bf16.mxu1 %v2392_v1  ;;  %v1566_v29 = vsub.f32 1.0, %v1562_v18 }
  0x50   : > { %2164 = vmatpush3.bf16.msra.mxu0 %v2345_v21 }
  0x51   : > { %2235 = vmatpush3.bf16.msra.mxu1 %v2346_v22  ;;  %2165 = vmatprep.subr.bf16.mxu0 %v2347_v23  ;;  %v1555_v23 = vld [vmem:[%s505_s28 + $0x8] sm:$0xf] }
  0x52   : > { %2236 = vmatprep.subr.bf16.mxu1 %v2392_v1 }
  0x54   : > { %2166 = vmatpush3.bf16.msra.mxu0 %v2348_v25 }
  0x55   : > { %2237 = vmatpush3.bf16.msra.mxu1 %v2349_v24  ;;  %2167 = vmatprep.subr.bf16.mxu0 %v2350_v30  ;;  %v1563_v24 = vld [vmem:[%s515_s11 + $0x8] sm:$0xf] }
  0x56   : > { %2238 = vmatprep.subr.bf16.mxu1 %v2392_v1  ;;  %v1567_v37 = vsub.f32 1.0, %v1563_v24 }
  0x58   : > { %2168 = vmatpush3.bf16.msra.mxu0 %v2351_v38  ;;  %v2085_v38 = vld [vmem:[%s2811_s2] ss:$0 sm:$0xff] }
  0x59   : > { %2239 = vmatpush3.bf16.msra.mxu1 %v2352_v36  ;;  %2169 = vmatprep.subr.bf16.mxu0 %v2353_v40  ;;  %v1559_v36 = vmul.f32 0.2, %v1555_v23 }
  0x5a   : > { %2240 = vmatprep.subr.bf16.mxu1 %v2392_v1 }
  0x5c   : > { %2170 = vmatpush3.bf16.msra.mxu0 %v2354_v41  ;;  %v1560_v41 = vmul.f32 0.2, %v1556_v31 }
  0x5d   : > { %2241 = vmatpush3.bf16.msra.mxu1 %v2355_v35  ;;  %2171 = vmatprep.subr.bf16.mxu0 %v2356_v42  ;;  %v1568_v42 = vsub.f32 1.0, %v1564_v32 }
  0x5e   : > { %2242 = vmatprep.subr.bf16.mxu1 %v2392_v1 }
  0x60   : > { %2172 = vmatpush3.bf16.msra.mxu0 %v2357_v44  ;;  %v1570_v44 = vmul.f32 %v1566_v29, %v1558_v26 }
  0x61   : > { %2243 = vmatpush3.bf16.msra.mxu1 %v2358_v43  ;;  %2173 = vmatprep.subr.bf16.mxu0 %v2359_v45 }
  0x62   : > { %2244 = vmatprep.subr.bf16.mxu1 %v2392_v1 }
  0x64   : > { %2174 = vmatpush3.bf16.msra.mxu0 %v2360_v47 }
  0x65   : > { %2245 = vmatpush3.bf16.msra.mxu1 %v2361_v46  ;;  %v1571_v46 = vmul.f32 %v1567_v37, %v1559_v36 }
  0x67   : > { %1487 = vmatmul.mubr.bf16.vlgmr.msra.gmra.mrb[8].mxu0 %v1304_v48 }
  0x68   : > { %2247 = vmatmul.mubr.bf16.vlgmr.msra.gmra.mrb[8].mxu1 %v1306_v39  ;;  %v1569_v39 = vmul.f32 %v1565_v19, %v1557_v16 }
  0xfa   : > { %v2113_v50 = vpop.f32.mrb[0].mxu0 }
  0xfb   : > { %v936_v49 = vpop.f32.mrb[0].mxu1  ;;  %v2114_v52 = vpop.f32.mrb[1].mxu0 }
  0xfc   : > { %v2208_v51 = vpop.f32.mrb[1].mxu1  ;;  %v2115_v54 = vadd.f32 %v2114_v52, %v2113_v50  ;;  %v2116_v55 = vpop.f32.mrb[2].mxu0  ;;  %v1572_v50 = vmul.f32 %v1568_v42, %v1560_v41 }
  0xfd   : > { %v939_v53 = vpop.f32.mrb[2].mxu1  ;;  %v2117_v57 = vpop.f32.mrb[3].mxu0 }
  0xfe   : > { %v2209_v56 = vpop.f32.mrb[3].mxu1  ;;  %v937_v58 = vadd.f32 %v2115_v54, %v936_v49  ;;  %v2118_v59 = vadd.f32 %v2117_v57, %v2116_v55 }
 0x100   : > { %v940_v60 = vadd.f32 %v2118_v59, %v939_v53 }
 0x11a   : > { %v2144_v62 = vpop.f32.mrb[4].mxu0 }
 0x11b   : > { %v1204_v61 = vpop.f32.mrb[4].mxu1  ;;  %v2145_v0 = vpop.f32.mrb[5].mxu0 }
 0x11c   : > { %v2228_v63 = vpop.f32.mrb[5].mxu1  ;;  %v2146_v3 = vadd.f32 %v2145_v0, %v2144_v62  ;;  %v2147_v4 = vpop.f32.mrb[6].mxu0 }
 0x11d   : > { %v1207_v2 = vpop.f32.mrb[6].mxu1  ;;  %v2148_v6 = vpop.f32.mrb[7].mxu0 }
 0x11e   : > { %v2229_v5 = vpop.f32.mrb[7].mxu1  ;;  %v1164_v7 = vadd.f32 %v2146_v3, %v937_v58  ;;  %v2149_v8 = vadd.f32 %v2148_v6, %v2147_v4  ;;  %v1613_v6 = vld [vmem:[%s522_s26] sm:$0x1] }
 0x120   : > { %v1205_v9 = vadd.f32 %v1204_v61, %v1164_v7  ;;  %v1167_v10 = vadd.f32 %v2149_v8, %v940_v60  ;;  %v1615_v7 = vld [vmem:[%s528_s29] sm:$0x1] }
 0x122   : > { %v1208_v11 = vadd.f32 %v1207_v2, %v1167_v10  ;;  %v1614_v10 = vmul.f32 0.2, %v1613_v6 }
 0x13a   : > { %v2175_v17 = vpop.f32.mrb[8].mxu0 }
 0x13b   : > { %v1529_v14 = vpop.f32.mrb[8].mxu1  ;;  %v2176_v21 = vpop.f32.mrb[9].mxu0 }
 0x13c   : > { %v2248_v20 = vpop.f32.mrb[9].mxu1  ;;  %v2177_v25 = vadd.f32 %v2176_v21, %v2175_v17  ;;  %v2178_v27 = vpop.f32.mrb[10].mxu0 }
 0x13d   : > { %v1532_v22 = vpop.f32.mrb[10].mxu1  ;;  %v2179_v30 = vpop.f32.mrb[11].mxu0 }
 0x13e   : > { %v2249_v28 = vpop.f32.mrb[11].mxu1  ;;  %v1530_v33 = vadd.f32 %v2177_v25, %v1529_v14  ;;  %v2180_v34 = vadd.f32 %v2179_v30, %v2178_v27 }
 0x140   : > { %v1536_v40 = vadd.f32 %v1530_v33, %v1205_v9  ;;  %v1533_v35 = vadd.f32 %v2180_v34, %v1532_v22 }
 0x142   : > { %v1545_v43 = vadd.f32 %v2085_v38, %v1536_v40  ;;  %v1537_v45 = vadd.f32 %v1533_v35, %v1208_v11  ;;  %v1616_v11 = vsub.f32 1.0, %v1615_v7 }
 0x144   : > { %v1549_v47 = vcombine.high %v1545_v43, %v1545_v43  ;;  %v1573_v48 = vadd.f32 %v1569_v39, %v1545_v43  ;;  %v1546_v49 = vadd.f32 %v2085_v38, %v1537_v45  ;;  %v1617_v14 = vmul.f32 %v1616_v11, %v1614_v10 }
 0x146   : > { %v1574_v51 = vadd.f32 %v1570_v44, %v1549_v47  ;;  %vm1577_vm1 = vcmp.gt.f32.partialorder %v1573_v48, 0.5  ;;  %v1550_v52 = vcombine.high %v1546_v49, %v1546_v49  ;;  %v1575_v53 = vadd.f32 %v1571_v46, %v1546_v49  ;;  %1589 = vst [vmem:[%s537_s21] sm:$0xf] %v1573_v48 }
 0x147   : > { %v2086_v54 = vsel %vm1577_vm1, 1.0, %v2392_v1 }
 0x148   : > { %vm1578_vm3 = vcmp.gt.f32.partialorder %v1574_v51, 0.5  ;;  %v1576_v55 = vadd.f32 %v1572_v50, %v1550_v52  ;;  %vm1579_vm4 = vcmp.gt.f32.partialorder %v1575_v53, 0.5  ;;  %1590 = vst [vmem:[%s537_s21 + $0x4] sm:$0xf] %v1574_v51  ;;  %1591 = vst [vmem:[%s537_s21 + $0x8] sm:$0xf] %v1575_v53 }
 0x149   : > { %1593 = vst [vmem:[%s547_s23] sm:$0xf] %v2086_v54  ;;  %v2087_v56 = vsel %vm1578_vm3, 1.0, %v2392_v1  ;;  %v2088_v57 = vsel %vm1579_vm4, 1.0, %v2392_v1  ;;  %v1598_v58 = vsel %vm1597_vm2, %v2086_v54, 0.0 }
 0x14a   : > { %v1599_v59 = vsel %vm1597_vm2, %v2087_v56, 0.0  ;;  %vm1580_vm5 = vcmp.gt.f32.partialorder %v1576_v55, 0.5  ;;  %1592 = vst [vmem:[%s537_s21 + $0xc] sm:$0xf] %v1576_v55  ;;  %1594 = vst [vmem:[%s547_s23 + $0x4] sm:$0xf] %v2087_v56 }
 0x14b   : > { %1595 = vst [vmem:[%s547_s23 + $0x8] sm:$0xf] %v2088_v57  ;;  %v1600_v60 = vadd.f32 %v1599_v59, %v1598_v58  ;;  %v2089_v61 = vsel %vm1580_vm5, 1.0, %v2392_v1  ;;  %v1601_v62 = vsel %vm1597_vm2, %v2088_v57, 0.0 }
 0x14c   : > { %1596 = vst [vmem:[%s547_s23 + $0xc] sm:$0xf] %v2089_v61  ;;  %v1603_v0 = vsel %vm1597_vm2, %v2089_v61, 0.0 }
 0x14d   : > { %v1602_v63 = vadd.f32 %v1601_v62, %v1600_v60 }
 0x14f   : > { %v1604_v2 = vadd.f32 %v1603_v0, %v1602_v63 }
 0x151   : > { %v1605_v3 = vsel %vm1597_vm2, %v1604_v2, 0.0 }
 0x152   : > { %v1606_v4 = vrot.slane %v1605_v3, 4 }
 0x154   : > { %v1607_v5 = vadd.f32 %v1606_v4, %v1605_v3 }
 0x156   : > { %v1608_v8 = vrot.slane %v1607_v5, 2 }
 0x158   : > { %v1609_v9 = vadd.f32 %v1608_v8, %v1607_v5 }
 0x15a   : > { %v1610_v12 = vrot.slane %v1609_v9, 1 }
 0x15c   : > { %v1611_v13 = vadd.f32 %v1610_v12, %v1609_v9 }
 0x15e   : > { %v1612_v15 = vmul.f32 0.0625, %v1611_v13 }
 0x160   : > { %v1618_v16 = vadd.f32 %v1617_v14, %v1612_v15 }
 0x162   : > { %vm1619_vm6 = vcmp.gt.f32.partialorder %v1618_v16, 0.5  ;;  %1622 = vst [vmem:[%s554_s17] sm:$0x1] %v1618_v16 }
 0x163   : > { %v2090_v17 = vsel %vm1619_vm6, 1.0, %v2392_v1 }
 0x164   : > { %1623 = vst [vmem:[%s560_s20] sm:$0x1] %v2090_v17 }
 0x165 PF: > { %s21_s15 = sadd.s32 1, %s2390_s15   ;;  %s2820_s13 = smov %s2386_s14 }
 0x166   : > { %p18_p5 = scmp.ge.s32.totalorder %s21_s15, 4   ;;  %s2821_s14 = smov %s2823_s16 }
 0x168   :  { %20 = sbr.rel (!%p18_p5) target bundleno = 2 (0x2), region = 131 }

</bundles_post_ra>
